<compile_context>
chip_gen: v7x
topology: tpu7x:2x2x1
jax: 0.10.0
libtpu: 0.0.40
codegen_flags: <defaults>
</compile_context>

<pallas_src>
import functools

import jax
import jax.numpy as jnp
from jax.experimental import pallas as pl
from jax.experimental.pallas import tpu as pltpu

HID1, HID2, HID3 = 2048, 1024, 512
LANE = 128


def _round_up(x, m):
    return (x + m - 1) // m * m


def _vmem_limit_bytes():
    """Generation-aware VMEM budget (v7x only has 64 MiB per TensorCore)."""
    cap = 128 << 20
    try:
        info = pltpu.get_tpu_info()
        cap = int(getattr(info, "vmem_capacity_bytes", cap))
    except Exception:
        pass
    return int(min(cap * 3 // 4, 96 << 20))


def decoder_kernel(x_ref,
                   w1_ref, b1_ref,
                   w2_ref, b2_ref,
                   w3_ref, b3_ref,
                   w4_ref, b4_ref,
                   o_ref):
    """Fused 4x (matmul + bias) with tanh between layers.

    Weights (bf16) and biases (f32) are VMEM-resident; each layer is one MXU
    matmul on the current batch tile with an f32 accumulator. Bias add + tanh
    run in f32 on the VPU/EUP.
    """
    h = jnp.dot(x_ref[...].astype(jnp.bfloat16), w1_ref[...],
                preferred_element_type=jnp.float32)
    h = jnp.tanh(h + b1_ref[...])

    h = jnp.dot(h.astype(jnp.bfloat16), w2_ref[...],
                preferred_element_type=jnp.float32)
    h = jnp.tanh(h + b2_ref[...])

    h = jnp.dot(h.astype(jnp.bfloat16), w3_ref[...],
                preferred_element_type=jnp.float32)
    h = jnp.tanh(h + b3_ref[...])

    h = jnp.dot(h.astype(jnp.bfloat16), w4_ref[...],
                preferred_element_type=jnp.float32)
    o_ref[...] = (h + b4_ref[...]).astype(o_ref.dtype)


@functools.partial(jax.jit, static_argnames=("block_m",))
def decoder_forward(x, params, *, block_m=256):
    """params: dict with w1..w4 ([in, out], bf16) and b1..b4 ([1, out], f32)."""
    B, input_dim = x.shape
    output_dim = params["w4"].shape[1]
    out_pad = _round_up(max(output_dim, LANE), LANE)   # lane-dense output slab

    # Effective batch tile: multiple of 8 sublanes; a large batch is split into
    # >=2 grid steps so both TensorCores stay busy on v7x megacore.
    bm = max(8, min(block_m, _round_up(B, 8)))
    bm = (bm // 8) * 8
    if B >= 2 * LANE:
        bm = min(bm, _round_up((B + 1) // 2, 8))
    b_pad = _round_up(B, bm)

    if b_pad != B:
        x = jnp.pad(x, ((0, b_pad - B), (0, 0)))

    w4, b4 = params["w4"], params["b4"]
    if out_pad != output_dim:
        w4 = jnp.pad(w4, ((0, 0), (0, out_pad - output_dim)))
        b4 = jnp.pad(b4, ((0, 0), (0, out_pad - output_dim)))

    # Grid-invariant operands: constant index_map -> Pallas fetches the block
    # once and never re-DMAs it across grid steps (weights stay VMEM-resident).
    def resident(shape):
        return pl.BlockSpec(shape, lambda i: (0, 0))

    grid_spec = pltpu.PrefetchScalarGridSpec(
        num_scalar_prefetch=0,
        grid=(b_pad // bm,),
        in_specs=[
            pl.BlockSpec((bm, input_dim), lambda i: (i, 0)),      # x tile
            resident((input_dim, HID1)), resident((1, HID1)),     # layer 1
            resident((HID1, HID2)),      resident((1, HID2)),     # layer 2
            resident((HID2, HID3)),      resident((1, HID3)),     # layer 3
            resident((HID3, out_pad)),   resident((1, out_pad)),  # layer 4
        ],
        out_specs=pl.BlockSpec((bm, out_pad), lambda i: (i, 0)),
    )

    out = pl.pallas_call(
        decoder_kernel,
        out_shape=jax.ShapeDtypeStruct((b_pad, out_pad), jnp.float32),
        grid_spec=grid_spec,
        compiler_params=pltpu.CompilerParams(
            dimension_semantics=("parallel",),
            vmem_limit_bytes=_vmem_limit_bytes(),
        ),
    )(x,
      params["w1"], params["b1"],
      params["w2"], params["b2"],
      params["w3"], params["b3"],
      w4, b4)

    return out[:B, :output_dim]


def init_decoder_params(key, input_dim, output_dim):
    """Deterministic init mimicking nn.Linear default (uniform +-1/sqrt(fan_in)).

    Weights are stored transposed ([in, out]) and in bf16 so the kernel does
    x @ W + b on the MXU at native bf16 rate; biases stay f32.
    """
    dims = [(input_dim, HID1), (HID1, HID2), (HID2, HID3), (HID3, output_dim)]
    params = {}
    for idx, (fan_in, fan_out) in enumerate(dims, start=1):
        key, kw, kb = jax.random.split(key, 3)
        bound = 1.0 / jnp.sqrt(float(fan_in))
        w = jax.random.uniform(kw, (fan_in, fan_out), jnp.float32, -bound, bound)
        b = jax.random.uniform(kb, (1, fan_out), jnp.float32, -bound, bound)
        params[f"w{idx}"] = w.astype(jnp.bfloat16)
        params[f"b{idx}"] = b
    return params


def decoder_reference(x, params):
    """Pure-JAX reference following the same dtype path as the kernel."""
    def layer(h, w, b, act):
        y = jnp.dot(h.astype(jnp.bfloat16), w,
                    preferred_element_type=jnp.float32) + b
        return jnp.tanh(y) if act else y

    h = layer(x, params["w1"], params["b1"], True)
    h = layer(h, params["w2"], params["b2"], True)
    h = layer(h, params["w3"], params["b3"], True)
    return layer(h, params["w4"], params["b4"], False)


if __name__ == "__main__":
    key = jax.random.PRNGKey(0)

    batch, input_dim, output_dim = 8, 32, 16
    key, kx = jax.random.split(key)
    x = jax.random.normal(kx, (batch, input_dim), dtype=jnp.float32)

    params = init_decoder_params(key, input_dim, output_dim)

    out = decoder_forward(x, params)
    out = jax.block_until_ready(out)

    ref = decoder_reference(x, params)
    assert out.shape == (batch, output_dim)
    assert jnp.allclose(out, ref, atol=2e-2, rtol=2e-2), "mismatch vs reference"

    print("KERNEL_OK")
</pallas_src>

<mosaic_0001>
module attributes {stable_mosaic.version = 11 : i64} {
  func.func @decoder_kernel(%arg0: i32, %arg1: memref<8x32xf32, #tpu.memory_space<vmem>>, %arg2: memref<32x2048xbf16, #tpu.memory_space<vmem>>, %arg3: memref<1x2048xf32, #tpu.memory_space<vmem>>, %arg4: memref<2048x1024xbf16, #tpu.memory_space<vmem>>, %arg5: memref<1x1024xf32, #tpu.memory_space<vmem>>, %arg6: memref<1024x512xbf16, #tpu.memory_space<vmem>>, %arg7: memref<1x512xf32, #tpu.memory_space<vmem>>, %arg8: memref<512x128xbf16, #tpu.memory_space<vmem>>, %arg9: memref<1x128xf32, #tpu.memory_space<vmem>>, %arg10: memref<8x128xf32, #tpu.memory_space<vmem>>) attributes {dimension_semantics = [#tpu.dimension_semantics<parallel>], iteration_bounds = array<i64: 1>, scalar_prefetch = 0 : i64, scratch_operands = 0 : i64, tpu.core_type = #tpu.core_type<tc>, window_params = [{transform_indices = @transform_0, window_bounds = array<i64: 8, 32>}, {pipeline_mode = #tpu.pipeline_mode<synchronous>, transform_indices = @transform_1, window_bounds = array<i64: 32, 2048>}, {pipeline_mode = #tpu.pipeline_mode<synchronous>, transform_indices = @transform_2, window_bounds = array<i64: 1, 2048>}, {pipeline_mode = #tpu.pipeline_mode<synchronous>, transform_indices = @transform_3, window_bounds = array<i64: 2048, 1024>}, {pipeline_mode = #tpu.pipeline_mode<synchronous>, transform_indices = @transform_4, window_bounds = array<i64: 1, 1024>}, {pipeline_mode = #tpu.pipeline_mode<synchronous>, transform_indices = @transform_5, window_bounds = array<i64: 1024, 512>}, {pipeline_mode = #tpu.pipeline_mode<synchronous>, transform_indices = @transform_6, window_bounds = array<i64: 1, 512>}, {pipeline_mode = #tpu.pipeline_mode<synchronous>, transform_indices = @transform_7, window_bounds = array<i64: 512, 128>}, {pipeline_mode = #tpu.pipeline_mode<synchronous>, transform_indices = @transform_8, window_bounds = array<i64: 1, 128>}, {transform_indices = @transform_9, window_bounds = array<i64: 8, 128>}]} {
    %c0 = arith.constant 0 : index
    %c0_0 = arith.constant 0 : index
    %0 = vector.load %arg1[%c0, %c0_0] : memref<8x32xf32, #tpu.memory_space<vmem>>, vector<8x32xf32>
    %1 = arith.truncf %0 : vector<8x32xf32> to vector<8x32xbf16>
    %c0_1 = arith.constant 0 : index
    %c0_2 = arith.constant 0 : index
    %2 = vector.load %arg2[%c0_1, %c0_2] : memref<32x2048xbf16, #tpu.memory_space<vmem>>, vector<32x2048xbf16>
    %cst = arith.constant dense<0.000000e+00> : vector<8x2048xf32>
    %3 = tpu.matmul %1, %2, %cst {dimension_numbers = #tpu.dot_dimension_numbers<[1], [0], [0], [1], [0, 0, 1, 1], [], []>} : vector<8x32xbf16>, vector<32x2048xbf16>, vector<8x2048xf32> -> vector<8x2048xf32>
    %c0_3 = arith.constant 0 : index
    %c0_4 = arith.constant 0 : index
    %4 = vector.load %arg3[%c0_3, %c0_4] : memref<1x2048xf32, #tpu.memory_space<vmem>>, vector<1x2048xf32>
    %5 = vector.broadcast %4 : vector<1x2048xf32> to vector<8x2048xf32>
    %6 = arith.addf %3, %5 : vector<8x2048xf32>
    %7 = math.tanh %6 : vector<8x2048xf32>
    %8 = arith.truncf %7 : vector<8x2048xf32> to vector<8x2048xbf16>
    %c0_5 = arith.constant 0 : index
    %c0_6 = arith.constant 0 : index
    %9 = vector.load %arg4[%c0_5, %c0_6] : memref<2048x1024xbf16, #tpu.memory_space<vmem>>, vector<2048x1024xbf16>
    %cst_7 = arith.constant dense<0.000000e+00> : vector<8x1024xf32>
    %10 = tpu.matmul %8, %9, %cst_7 {dimension_numbers = #tpu.dot_dimension_numbers<[1], [0], [0], [1], [0, 0, 1, 1], [], []>} : vector<8x2048xbf16>, vector<2048x1024xbf16>, vector<8x1024xf32> -> vector<8x1024xf32>
    %c0_8 = arith.constant 0 : index
    %c0_9 = arith.constant 0 : index
    %11 = vector.load %arg5[%c0_8, %c0_9] : memref<1x1024xf32, #tpu.memory_space<vmem>>, vector<1x1024xf32>
    %12 = vector.broadcast %11 : vector<1x1024xf32> to vector<8x1024xf32>
    %13 = arith.addf %10, %12 : vector<8x1024xf32>
    %14 = math.tanh %13 : vector<8x1024xf32>
    %15 = arith.truncf %14 : vector<8x1024xf32> to vector<8x1024xbf16>
    %c0_10 = arith.constant 0 : index
    %c0_11 = arith.constant 0 : index
    %16 = vector.load %arg6[%c0_10, %c0_11] : memref<1024x512xbf16, #tpu.memory_space<vmem>>, vector<1024x512xbf16>
    %cst_12 = arith.constant dense<0.000000e+00> : vector<8x512xf32>
    %17 = tpu.matmul %15, %16, %cst_12 {dimension_numbers = #tpu.dot_dimension_numbers<[1], [0], [0], [1], [0, 0, 1, 1], [], []>} : vector<8x1024xbf16>, vector<1024x512xbf16>, vector<8x512xf32> -> vector<8x512xf32>
    %c0_13 = arith.constant 0 : index
    %c0_14 = arith.constant 0 : index
    %18 = vector.load %arg7[%c0_13, %c0_14] : memref<1x512xf32, #tpu.memory_space<vmem>>, vector<1x512xf32>
    %19 = vector.broadcast %18 : vector<1x512xf32> to vector<8x512xf32>
    %20 = arith.addf %17, %19 : vector<8x512xf32>
    %21 = math.tanh %20 : vector<8x512xf32>
    %22 = arith.truncf %21 : vector<8x512xf32> to vector<8x512xbf16>
    %c0_15 = arith.constant 0 : index
    %c0_16 = arith.constant 0 : index
    %23 = vector.load %arg8[%c0_15, %c0_16] : memref<512x128xbf16, #tpu.memory_space<vmem>>, vector<512x128xbf16>
    %cst_17 = arith.constant dense<0.000000e+00> : vector<8x128xf32>
    %24 = tpu.matmul %22, %23, %cst_17 {dimension_numbers = #tpu.dot_dimension_numbers<[1], [0], [0], [1], [0, 0, 1, 1], [], []>} : vector<8x512xbf16>, vector<512x128xbf16>, vector<8x128xf32> -> vector<8x128xf32>
    %c0_18 = arith.constant 0 : index
    %c0_19 = arith.constant 0 : index
    %25 = vector.load %arg9[%c0_18, %c0_19] : memref<1x128xf32, #tpu.memory_space<vmem>>, vector<1x128xf32>
    %26 = vector.broadcast %25 : vector<1x128xf32> to vector<8x128xf32>
    %27 = arith.addf %24, %26 : vector<8x128xf32>
    %c0_20 = arith.constant 0 : index
    %c0_21 = arith.constant 0 : index
    %28 = vector.load %arg10[%c0_20, %c0_21] : memref<8x128xf32, #tpu.memory_space<vmem>>, vector<8x128xf32>
    tpu.vector_store %arg10[%c0_20, %c0_21], %27 {strides = array<i32>} : memref<8x128xf32, #tpu.memory_space<vmem>>, vector<8x128xf32>,
    return
  }
  func.func @transform_0(%arg0: i32) -> (i32, i32) {
    %c0_i32 = arith.constant 0 : i32
    %c0_i32_0 = arith.constant 0 : i32
    return %arg0, %c0_i32 : i32, i32
  }
  func.func @transform_1(%arg0: i32) -> (i32, i32) {
    %c0_i32 = arith.constant 0 : i32
    %c0_i32_0 = arith.constant 0 : i32
    %c0_i32_1 = arith.constant 0 : i32
    return %c0_i32, %c0_i32_0 : i32, i32
  }
  func.func @transform_2(%arg0: i32) -> (i32, i32) {
    %c0_i32 = arith.constant 0 : i32
    %c0_i32_0 = arith.constant 0 : i32
    %c0_i32_1 = arith.constant 0 : i32
    return %c0_i32, %c0_i32_0 : i32, i32
  }
  func.func @transform_3(%arg0: i32) -> (i32, i32) {
    %c0_i32 = arith.constant 0 : i32
    %c0_i32_0 = arith.constant 0 : i32
    %c0_i32_1 = arith.constant 0 : i32
    return %c0_i32, %c0_i32_0 : i32, i32
  }
  func.func @transform_4(%arg0: i32) -> (i32, i32) {
    %c0_i32 = arith.constant 0 : i32
    %c0_i32_0 = arith.constant 0 : i32
    %c0_i32_1 = arith.constant 0 : i32
    return %c0_i32, %c0_i32_0 : i32, i32
  }
  func.func @transform_5(%arg0: i32) -> (i32, i32) {
    %c0_i32 = arith.constant 0 : i32
    %c0_i32_0 = arith.constant 0 : i32
    %c0_i32_1 = arith.constant 0 : i32
    return %c0_i32, %c0_i32_0 : i32, i32
  }
  func.func @transform_6(%arg0: i32) -> (i32, i32) {
    %c0_i32 = arith.constant 0 : i32
    %c0_i32_0 = arith.constant 0 : i32
    %c0_i32_1 = arith.constant 0 : i32
    return %c0_i32, %c0_i32_0 : i32, i32
  }
  func.func @transform_7(%arg0: i32) -> (i32, i32) {
    %c0_i32 = arith.constant 0 : i32
    %c0_i32_0 = arith.constant 0 : i32
    %c0_i32_1 = arith.constant 0 : i32
    return %c0_i32, %c0_i32_0 : i32, i32
  }
  func.func @transform_8(%arg0: i32) -> (i32, i32) {
    %c0_i32 = arith.constant 0 : i32
    %c0_i32_0 = arith.constant 0 : i32
    %c0_i32_1 = arith.constant 0 : i32
    return %c0_i32, %c0_i32_0 : i32, i32
  }
  func.func @transform_9(%arg0: i32) -> (i32, i32) {
    %c0_i32 = arith.constant 0 : i32
    %c0_i32_0 = arith.constant 0 : i32
    return %arg0, %c0_i32 : i32, i32
  }
}

</mosaic_0001>

<bundles_post_ra>
// kernel: decoder_forward.1
= control target key start
LH: loop header
LB: loop body
LE: loop exit
PB: predicated region body
PF: predicated region fallthrough
CT: control target
= control target key end

     0   :  { %14 = vsyncpa [#allocation3], 0  ;;  %s13280_s0 = inlined_call_operand.hbm [shape: f32[8,32], index: 0, kind: input, shape index: {}]   ;;  %s13281_s1 = inlined_call_operand.hbm [shape: bf16[32,2048], index: 1, kind: input, shape index: {}]   ;;  %s13282_s2 = inlined_call_operand.hbm [shape: f32[1,2048], index: 2, kind: input, shape index: {}]   ;;  %s13283_s3 = inlined_call_operand.hbm [shape: bf16[2048,1024], index: 3, kind: input, shape index: {}]   ;;  %s13284_s4 = inlined_call_operand.hbm [shape: f32[1,1024], index: 4, kind: input, shape index: {}]   ;;  %s13285_s5 = inlined_call_operand.hbm [shape: bf16[1024,512], index: 5, kind: input, shape index: {}]   ;;  %s13286_s6 = inlined_call_operand.hbm [shape: f32[1,512], index: 6, kind: input, shape index: {}]   ;;  %s13287_s7 = inlined_call_operand.hbm [shape: bf16[512,128], index: 7, kind: input, shape index: {}]   ;;  %s13288_s8 = inlined_call_operand.hbm [shape: f32[1,128], index: 8, kind: input, shape index: {}]   ;;  %s13289_s9 = inlined_call_operand.hbm [shape: f32[8,128], index: 9, kind: output, shape index: {}]  }
   0x1   :  { %15 = vsyncpa [#allocation6], 0 }
   0x2   :  { %16 = vsyncpa [#allocation9], 0 }
   0x3   :  { %17 = vsyncpa [#allocation12], 0 }
   0x4   :  { %18 = vsyncpa [#allocation15], 0 }
   0x5   :  { %19 = vsyncpa [#allocation4], 0  ;;  %s12829_s30 = smov [#allocation5]   ;;  %s12597_s13 = scalar_lea.hbm %s13281_s1, 4096 }
   0x6   :  { %s35_s10 = sshll.u32 %s12829_s30, 4  ;;  %p12598_p0 = scmp.ne.s32.totalorder %s13281_s1, %s12597_s13  ;;  %s36_s10 = int_to_ptr.vmem [resolvable:$true] %s35_s10 }
   0x7   :  { %p12601_p1 = scmp.lt.u32.totalorder %s12597_s13, %s13281_s1 }
   0x9   :  { %p12603_p2 = pnand %p12601_p1, %p12598_p0 }
   0xb   :  { %12606 = shalt.err (!%p12603_p2)
}
   0xc   :  { %s12607_s18 = scalar_lea.vmem %s36_s10, 4096  ;;  %p12612_p4 = scmp.lt.s32.totalorder %s36_s10, %s36_s10 }
   0xd   :  { %p12608_p3 = scmp.ne.s32.totalorder %s36_s10, %s12607_s18  ;;  %p12613_p5 = scmp.lt.s32.totalorder %s12607_s18, %s12607_s18 }
   0xf   :  { %p12614_p6 = por %p12613_p5, %p12612_p4 }
  0x11   :  { %p12615_p7 = pnand %p12614_p6, %p12608_p3 }
  0x13   :  { %12618 = shalt.err (!%p12615_p7)
}
  0x14   :  { %s12830_s19 = smov 1024   ;;  %s12831_s20 = smov 64  }
  0x15   :  { %41 = dma.hbm_to_vmem [thread:$0]  %s13281_s1, 4096, %s36_s10, [#allocation6], %s12830_s19, %s12830_s19, %s12831_s20  }
  0x16   :  { %s12832_s23 = smov [#allocation8]   ;;  %s12619_s27 = scalar_lea.hbm %s13283_s3, 131072 }
  0x17   :  { %s57_s24 = sshll.u32 %s12832_s23, 4  ;;  %p12620_p8 = scmp.ne.s32.totalorder %s13283_s3, %s12619_s27  ;;  %s58_s24 = int_to_ptr.vmem [resolvable:$true] %s57_s24 }
  0x18   :  { %p12623_p9 = scmp.lt.u32.totalorder %s12619_s27, %s13283_s3 }
  0x1a   :  { %p12625_p10 = pnand %p12623_p9, %p12620_p8 }
  0x1c   :  { %12628 = shalt.err (!%p12625_p10)
}
  0x1d   :  { %s12629_s12 = scalar_lea.vmem %s58_s24, 131072  ;;  %p12634_p12 = scmp.lt.s32.totalorder %s58_s24, %s58_s24 }
  0x1e   :  { %p12630_p11 = scmp.ne.s32.totalorder %s58_s24, %s12629_s12  ;;  %p12635_p13 = scmp.lt.s32.totalorder %s12629_s12, %s12629_s12 }
  0x20   :  { %p12636_p0 = por %p12635_p13, %p12634_p12 }
  0x22   :  { %p12637_p1 = pnand %p12636_p0, %p12630_p11 }
  0x24   :  { %12640 = shalt.err (!%p12637_p1)
}
  0x25   :  { %s12833_s1 = smov 512   ;;  %s12834_s10 = smov 32  }
  0x26   :  { %63 = dma.hbm_to_vmem [thread:$0]  %s13283_s3, 131072, %s58_s24, [#allocation9], %s12833_s1, %s12833_s1, %s12834_s10  }
  0x27   :  { %s12835_s15 = smov [#allocation11]   ;;  %s12641_s19 = scalar_lea.hbm %s13285_s5, 32768 }
  0x28   :  { %s79_s16 = sshll.u32 %s12835_s15, 4  ;;  %p12642_p2 = scmp.ne.s32.totalorder %s13285_s5, %s12641_s19  ;;  %s80_s16 = int_to_ptr.vmem [resolvable:$true] %s79_s16 }
  0x29   :  { %p12645_p3 = scmp.lt.u32.totalorder %s12641_s19, %s13285_s5 }
  0x2b   :  { %p12647_p4 = pnand %p12645_p3, %p12642_p2 }
  0x2d   :  { %12650 = shalt.err (!%p12647_p4)
}
  0x2e   :  { %s12651_s26 = scalar_lea.vmem %s80_s16, 32768  ;;  %p12656_p6 = scmp.lt.s32.totalorder %s80_s16, %s80_s16 }
  0x2f   :  { %p12652_p5 = scmp.ne.s32.totalorder %s80_s16, %s12651_s26  ;;  %p12657_p7 = scmp.lt.s32.totalorder %s12651_s26, %s12651_s26 }
  0x31   :  { %p12658_p8 = por %p12657_p7, %p12656_p6 }
  0x33   :  { %p12659_p9 = pnand %p12658_p8, %p12652_p5 }
  0x35   :  { %12662 = shalt.err (!%p12659_p9)
}
  0x36   :  { %s12836_s3 = smov 256   ;;  %s12837_s24 = smov 16  }
  0x37   :  { %85 = dma.hbm_to_vmem [thread:$0]  %s13285_s5, 32768, %s80_s16, [#allocation12], %s12836_s3, %s12836_s3, %s12837_s24  }
  0x38   :  { %s12838_s29 = smov [#allocation14]   ;;  %s12663_s1 = scalar_lea.hbm %s13287_s7, 4096 }
  0x39   :  { %s101_s30 = sshll.u32 %s12838_s29, 4  ;;  %p12664_p10 = scmp.ne.s32.totalorder %s13287_s7, %s12663_s1  ;;  %s102_s30 = int_to_ptr.vmem [resolvable:$true] %s101_s30 }
  0x3a   :  { %p12667_p11 = scmp.lt.u32.totalorder %s12663_s1, %s13287_s7 }
  0x3c   :  { %p12669_p12 = pnand %p12667_p11, %p12664_p10 }
  0x3e   :  { %12672 = shalt.err (!%p12669_p12)
}
  0x3f   :  { %s12673_s17 = scalar_lea.vmem %s102_s30, 4096  ;;  %p12678_p0 = scmp.lt.s32.totalorder %s102_s30, %s102_s30 }
  0x40   :  { %p12674_p13 = scmp.ne.s32.totalorder %s102_s30, %s12673_s17  ;;  %p12679_p1 = scmp.lt.s32.totalorder %s12673_s17, %s12673_s17 }
  0x42   :  { %p12680_p2 = por %p12679_p1, %p12678_p0 }
  0x44   :  { %p12681_p3 = pnand %p12680_p2, %p12674_p13 }
  0x46   :  { %12684 = shalt.err (!%p12681_p3)
}
  0x47   :  { %s12839_s5 = smov 4   ;;  %s12840_s19 = smov [#allocation2]  }
  0x48   :  { %107 = dma.hbm_to_vmem [thread:$0]  %s13287_s7, 4096, %s102_s30, [#allocation15], %s12831_s20, %s12831_s20, %s12839_s5  }
  0x49   :  { %s26_s21 = sshll.u32 %s12840_s19, 4  ;;  %s12841_s22 = smov [#allocation7]   ;;  %s27_s21 = int_to_ptr.vmem [resolvable:$true] %s26_s21 }
  0x4a   :  { %s48_s23 = sshll.u32 %s12841_s22, 4  ;;  %s12685_s3 = scalar_lea.hbm %s13280_s0, 128  ;;  %s49_s23 = int_to_ptr.vmem [resolvable:$true] %s48_s23 }
  0x4b   :  { %p12686_p4 = scmp.ne.s32.totalorder %s13280_s0, %s12685_s3  ;;  %p12689_p5 = scmp.lt.u32.totalorder %s12685_s3, %s13280_s0 }
  0x4d   :  { %p12691_p6 = pnand %p12689_p5, %p12686_p4 }
  0x4f   :  { %12694 = shalt.err (!%p12691_p6)
}
  0x50   :  { %s12695_s7 = scalar_lea.vmem %s27_s21, 128  ;;  %p12700_p8 = scmp.lt.s32.totalorder %s27_s21, %s27_s21 }
  0x51   :  { %p12696_p7 = scmp.ne.s32.totalorder %s27_s21, %s12695_s7  ;;  %p12701_p9 = scmp.lt.s32.totalorder %s12695_s7, %s12695_s7 }
  0x53   :  { %p12702_p10 = por %p12701_p9, %p12700_p8 }
  0x55   :  { %p12703_p11 = pnand %p12702_p10, %p12696_p7 }
  0x57   :  { %12706 = shalt.err (!%p12703_p11)
}
  0x58   :  { %29 = dma.hbm_to_vmem [thread:$0]  %s13280_s0, 128, %s27_s21, [#allocation3]  }
  0x59   :  { %s12707_s1 = scalar_lea.hbm %s13282_s2, 256 }
  0x5a   :  { %p12708_p12 = scmp.ne.s32.totalorder %s13282_s2, %s12707_s1  ;;  %p12711_p13 = scmp.lt.u32.totalorder %s12707_s1, %s13282_s2 }
  0x5c   :  { %p12713_p0 = pnand %p12711_p13, %p12708_p12 }
  0x5e   :  { %12716 = shalt.err (!%p12713_p0)
}
  0x5f   :  { %s12717_s17 = scalar_lea.vmem %s49_s23, 256  ;;  %p12722_p2 = scmp.lt.s32.totalorder %s49_s23, %s49_s23 }
  0x60   :  { %p12718_p1 = scmp.ne.s32.totalorder %s49_s23, %s12717_s17  ;;  %p12723_p3 = scmp.lt.s32.totalorder %s12717_s17, %s12717_s17 }
  0x62   :  { %p12724_p4 = por %p12723_p3, %p12722_p2 }
  0x64   :  { %p12725_p5 = pnand %p12724_p4, %p12718_p1 }
  0x66   :  { %12728 = shalt.err (!%p12725_p5)
}
  0x67   :  { %51 = dma.hbm_to_vmem [thread:$0]  %s13282_s2, 256, %s49_s23, [#allocation6]  }
  0x68   :  { %s12842_s16 = smov [#allocation10]   ;;  %s12843_s19 = smov [#allocation13]  }
  0x69   :  { %s70_s18 = sshll.u32 %s12842_s16, 4  ;;  %s92_s21 = sshll.u32 %s12843_s19, 4  ;;  %s71_s18 = int_to_ptr.vmem [resolvable:$true] %s70_s18  ;;  %s93_s21 = int_to_ptr.vmem [resolvable:$true] %s92_s21 }
  0x6a   :  { %s12729_s26 = scalar_lea.hbm %s13284_s4, 128 }
  0x6b   :  { %p12730_p6 = scmp.ne.s32.totalorder %s13284_s4, %s12729_s26  ;;  %p12733_p7 = scmp.lt.u32.totalorder %s12729_s26, %s13284_s4 }
  0x6d   :  { %p12735_p8 = pnand %p12733_p7, %p12730_p6 }
  0x6f   :  { %12738 = shalt.err (!%p12735_p8)
}
  0x70   :  { %s12739_s2 = scalar_lea.vmem %s71_s18, 128  ;;  %p12744_p10 = scmp.lt.s32.totalorder %s71_s18, %s71_s18 }
  0x71   :  { %p12740_p9 = scmp.ne.s32.totalorder %s71_s18, %s12739_s2  ;;  %p12745_p11 = scmp.lt.s32.totalorder %s12739_s2, %s12739_s2 }
  0x73   :  { %p12746_p12 = por %p12745_p11, %p12744_p10 }
  0x75   :  { %p12747_p13 = pnand %p12746_p12, %p12740_p9 }
  0x77   :  { %12750 = shalt.err (!%p12747_p13)
}
  0x78   :  { %73 = dma.hbm_to_vmem [thread:$0]  %s13284_s4, 128, %s71_s18, [#allocation9]  }
  0x79   :  { %s12751_s30 = scalar_lea.hbm %s13286_s6, 64 }
  0x7a   :  { %p12752_p0 = scmp.ne.s32.totalorder %s13286_s6, %s12751_s30  ;;  %p12755_p1 = scmp.lt.u32.totalorder %s12751_s30, %s13286_s6 }
  0x7c   :  { %p12757_p2 = pnand %p12755_p1, %p12752_p0 }
  0x7e   :  { %12760 = shalt.err (!%p12757_p2)
}
  0x7f   :  { %s12761_s13 = scalar_lea.vmem %s93_s21, 64  ;;  %p12766_p4 = scmp.lt.s32.totalorder %s93_s21, %s93_s21 }
  0x80   :  { %p12762_p3 = scmp.ne.s32.totalorder %s93_s21, %s12761_s13  ;;  %p12767_p5 = scmp.lt.s32.totalorder %s12761_s13, %s12761_s13 }
  0x82   :  { %p12768_p6 = por %p12767_p5, %p12766_p4 }
  0x84   :  { %p12769_p7 = pnand %p12768_p6, %p12762_p3 }
  0x86   :  { %12772 = shalt.err (!%p12769_p7)
}
  0x87   :  { %95 = dma.hbm_to_vmem [thread:$0]  %s13286_s6, 64, %s93_s21, [#allocation12]  }
  0x88   :  { %s12844_s15 = smov [#allocation16]   ;;  %s12773_s16 = scalar_lea.hbm %s13288_s8, 16 }
  0x89   :  { %s114_s17 = sshll.u32 %s12844_s15, 4  ;;  %p12774_p8 = scmp.ne.s32.totalorder %s13288_s8, %s12773_s16  ;;  %s115_s17 = int_to_ptr.vmem [resolvable:$true] %s114_s17 }
  0x8a   :  { %p12777_p9 = scmp.lt.u32.totalorder %s12773_s16, %s13288_s8 }
  0x8c   :  { %p12779_p10 = pnand %p12777_p9, %p12774_p8 }
  0x8e   :  { %12782 = shalt.err (!%p12779_p10)
}
  0x8f   :  { %s12783_s26 = scalar_lea.vmem %s115_s17, 16  ;;  %s12787_s6 = scalar_lea.vmem %s115_s17, 32 }
  0x90   :  { %p12784_p11 = scmp.ne.s32.totalorder %s115_s17, %s12783_s26  ;;  %p12788_p12 = scmp.lt.s32.totalorder %s115_s17, %s115_s17 }
  0x91   :  { %p12789_p13 = scmp.lt.s32.totalorder %s12787_s6, %s12783_s26 }
  0x93   :  { %p12790_p0 = por %p12789_p13, %p12788_p12 }
  0x95   :  { %p12791_p1 = pnand %p12790_p0, %p12784_p11 }
  0x97   :  { %12794 = shalt.err (!%p12791_p1)
}
  0x98   :  { %117 = dma.hbm_to_vmem [thread:$0]  %s13288_s8, 16, %s115_s17, [#allocation15]  }
  0x99   :  { %12817 = dma.done.wait [#allocation3], 128  }
  0x9a   :  { %12818 = vsyncadd [#allocation3], 4294967168 }
  0x9b   :  { %12819 = dma.done.wait [#allocation6], 4352  }
  0x9c   :  { %12820 = vsyncadd [#allocation6], 4294962944 }
  0x9d   :  { %12821 = dma.done.wait [#allocation9], 131200  }
  0x9e   :  { %12822 = vsyncadd [#allocation9], 4294836096 }
  0x9f   :  { %12823 = dma.done.wait [#allocation12], 32832  }
  0xa0   :  { %12824 = vsyncadd [#allocation12], 4294934464 }
  0xa1   :  { %12825 = dma.done.wait [#allocation15], 4112  }
  0xa2   :  { %12826 = vsyncadd [#allocation15], 4294963184  ;;  %v12845_v0 = vmov 0   ;;  %v148_v1 = vld [vmem:[#allocation5] sm:$0xff]  ;;  %v149_v7 = vld [vmem:[#allocation5 + $0x8] sm:$0xff]  ;;  %vm424_vm0 = vcmask 261120  }
  0xa3   :  { %460 = vmatprep.mubr.bf16.mxu0 %v12845_v0  ;;  %501 = vmatprep.mubr.bf16.mxu1 %v12845_v0  ;;  %v156_v2 = vld [vmem:[#allocation5 + $0x40] sm:$0xff]  ;;  %v157_v9 = vld [vmem:[#allocation5 + $0x48] sm:$0xff]  ;;  %v150_v15 = vld [vmem:[#allocation5 + $0x10] sm:$0xff]  ;;  %s12846_s8 = smov [#allocation17]  }
  0xa4   :  { %v164_v3 = vld [vmem:[#allocation5 + $0x80] sm:$0xff]  ;;  %v10560_v4 = vcombine.high %v148_v1, %v156_v2  ;;  %v10559_v5 = vcombine.low %v148_v1, %v156_v2  ;;  %v165_v10 = vld [vmem:[#allocation5 + $0x88] sm:$0xff]  ;;  %v10562_v12 = vcombine.high %v149_v7, %v157_v9  ;;  %v10561_v13 = vcombine.low %v149_v7, %v157_v9  ;;  %v158_v16 = vld [vmem:[#allocation5 + $0x50] sm:$0xff]  ;;  %s10546_s24 = sshll.u32 %s12846_s8, 4  ;;  %s10547_s24 = int_to_ptr.vmem [resolvable:$true] %s10546_s24 }
  0xa5   :  { %v172_v6 = vld [vmem:[#allocation5 + $0xc0] sm:$0xff]  ;;  %v173_v11 = vld [vmem:[#allocation5 + $0xc8] sm:$0xff]  ;;  %v146_v18 = vld [vmem:[#allocation2] sm:$0xff]  ;;  %v10564_v21 = vcombine.high %v150_v15, %v158_v16  ;;  %v10563_v27 = vcombine.low %v150_v15, %v158_v16  ;;  %s12795_s27 = scalar_lea.vmem %s10547_s24, 128  ;;  %p12800_p3 = scmp.lt.s32.totalorder %s10547_s24, %s10547_s24 }
  0xa6   :  { %v10576_v8 = vcombine.high %v164_v3, %v172_v6  ;;  %428 = vmatprep.subr.bf16.mxu0 %v10560_v4  ;;  %v10578_v14 = vcombine.high %v165_v10, %v173_v11  ;;  %v10575_v17 = vcombine.low %v164_v3, %v172_v6  ;;  %v151_v19 = vld [vmem:[#allocation5 + $0x18] sm:$0xff]  ;;  %469 = vmatprep.subr.bf16.mxu1 %v10562_v12  ;;  %v166_v23 = vld [vmem:[#allocation5 + $0x90] sm:$0xff]  ;;  %v152_v32 = vld [vmem:[#allocation5 + $0x20] sm:$0xff]  ;;  %p12796_p2 = scmp.ne.s32.totalorder %s10547_s24, %s12795_s27  ;;  %p12801_p4 = scmp.lt.s32.totalorder %s12795_s27, %s12795_s27 }
  0xa7   :  { %429 = vmatpush1.bf16.msra.mxu0 %v10559_v5  ;;  %v159_v20 = vld [vmem:[#allocation5 + $0x58] sm:$0xff]  ;;  %470 = vmatpush1.bf16.msra.mxu1 %v10561_v13  ;;  %v10577_v22 = vcombine.low %v165_v10, %v173_v11  ;;  %v174_v24 = vld [vmem:[#allocation5 + $0xd0] sm:$0xff]  ;;  %v13010_v25 = vpack.c.bf16 %v146_v18, %v146_v18  ;;  %v160_v33 = vld [vmem:[#allocation5 + $0x60] sm:$0xff] }
  0xa8   :  { %430 = vmatprep.subr.bf16.mxu0 %v10576_v8  ;;  %471 = vmatprep.subr.bf16.mxu1 %v10578_v14  ;;  %v10566_v26 = vcombine.high %v151_v19, %v159_v20  ;;  %v167_v28 = vld [vmem:[#allocation5 + $0x98] sm:$0xff]  ;;  %v10580_v30 = vcombine.high %v166_v23, %v174_v24  ;;  %v10565_v31 = vcombine.low %v151_v19, %v159_v20  ;;  %v153_v36 = vld [vmem:[#allocation5 + $0x28] sm:$0xff]  ;;  %v168_v40 = vld [vmem:[#allocation5 + $0xa0] sm:$0xff]  ;;  %p12802_p5 = por %p12801_p4, %p12800_p3 }
  0xa9   :  { %v175_v29 = vld [vmem:[#allocation5 + $0xd8] sm:$0xff]  ;;  %v10579_v35 = vcombine.low %v166_v23, %v174_v24  ;;  %v161_v37 = vld [vmem:[#allocation5 + $0x68] sm:$0xff]  ;;  %v10568_v38 = vcombine.high %v152_v32, %v160_v33  ;;  %v176_v41 = vld [vmem:[#allocation5 + $0xe0] sm:$0xff]  ;;  %v10567_v43 = vcombine.low %v152_v32, %v160_v33 }
  0xaa   :  { %v10582_v34 = vcombine.high %v167_v28, %v175_v29  ;;  %v10581_v39 = vcombine.low %v167_v28, %v175_v29  ;;  %v10570_v42 = vcombine.high %v153_v36, %v161_v37  ;;  %v169_v44 = vld [vmem:[#allocation5 + $0xa8] sm:$0xff]  ;;  %v10584_v46 = vcombine.high %v168_v40, %v176_v41  ;;  %v154_v48 = vld [vmem:[#allocation5 + $0x30] sm:$0xff]  ;;  %v155_v52 = vld [vmem:[#allocation5 + $0x38] sm:$0xff]  ;;  %p12803_p6 = pnand %p12802_p5, %p12796_p2 }
  0xab   :  { %431 = vmatpush1.bf16.msra.mxu0 %v10575_v17  ;;  %472 = vmatpush1.bf16.msra.mxu1 %v10577_v22  ;;  %v177_v45 = vld [vmem:[#allocation5 + $0xe8] sm:$0xff]  ;;  %v10569_v47 = vcombine.low %v153_v36, %v161_v37  ;;  %v162_v49 = vld [vmem:[#allocation5 + $0x70] sm:$0xff]  ;;  %v10583_v51 = vcombine.low %v168_v40, %v176_v41  ;;  %v163_v53 = vld [vmem:[#allocation5 + $0x78] sm:$0xff] }
  0xac   :  { %510 = vmatprep.subr.bf16.mxu0 %v10564_v21  ;;  %551 = vmatprep.subr.bf16.mxu1 %v10566_v26  ;;  %v10586_v50 = vcombine.high %v169_v44, %v177_v45  ;;  %v10572_v54 = vcombine.high %v154_v48, %v162_v49  ;;  %v10585_v55 = vcombine.low %v169_v44, %v177_v45  ;;  %v170_v56 = vld [vmem:[#allocation5 + $0xb0] sm:$0xff]  ;;  %v171_v60 = vld [vmem:[#allocation5 + $0xb8] sm:$0xff] }
  0xad   :  { %v178_v57 = vld [vmem:[#allocation5 + $0xf0] sm:$0xff]  ;;  %v10574_v58 = vcombine.high %v155_v52, %v163_v53  ;;  %v10571_v59 = vcombine.low %v154_v48, %v162_v49  ;;  %v179_v61 = vld [vmem:[#allocation5 + $0xf8] sm:$0xff]  ;;  %v10573_v63 = vcombine.low %v155_v52, %v163_v53 }
  0xae   :  { %10591 = vmatmul.mubr.msk.bf16.vlgmr.msra.gmra.mrb[0].mxu0 %vm424_vm0, %v13010_v25  ;;  %10592 = vmatmul.mubr.msk.bf16.vlgmr.msra.gmra.mrb[0].mxu1 %vm424_vm0, %v13010_v25  ;;  %v10588_v62 = vcombine.high %v170_v56, %v178_v57  ;;  %v788_v1 = vld [vmem:[#allocation8] sm:$0xff]  ;;  %v789_v3 = vld [vmem:[#allocation8 + $0x8] sm:$0xff]  ;;  %v10590_v4 = vcombine.high %v171_v60, %v179_v61  ;;  %v10587_v6 = vcombine.low %v170_v56, %v178_v57 }
  0xaf   :  { %511 = vmatpush1.bf16.msra.mxu0 %v10563_v27  ;;  %542 = vmatprep.mubr.bf16.mxu0 %v12845_v0  ;;  %v792_v2 = vld [vmem:[#allocation8 + $0x20] sm:$0xff]  ;;  %v793_v5 = vld [vmem:[#allocation8 + $0x28] sm:$0xff]  ;;  %v10589_v10 = vcombine.low %v171_v60, %v179_v61 }
  0xb0   :  { %512 = vmatprep.subr.bf16.mxu0 %v10580_v30  ;;  %552 = vmatpush1.bf16.msra.mxu1 %v10565_v31  ;;  %v796_v7 = vld [vmem:[#allocation8 + $0x40] sm:$0xff]  ;;  %v10600_v9 = vcombine.high %v788_v1, %v792_v2  ;;  %v797_v11 = vld [vmem:[#allocation8 + $0x48] sm:$0xff]  ;;  %v10602_v13 = vcombine.high %v789_v3, %v793_v5  ;;  %v10599_v14 = vcombine.low %v788_v1, %v792_v2 }
  0xb1   :  { %583 = vmatprep.mubr.bf16.mxu1 %v12845_v0  ;;  %553 = vmatprep.subr.bf16.mxu1 %v10582_v34  ;;  %v800_v8 = vld [vmem:[#allocation8 + $0x60] sm:$0xff]  ;;  %v801_v12 = vld [vmem:[#allocation8 + $0x68] sm:$0xff]  ;;  %v10601_v18 = vcombine.low %v789_v3, %v793_v5 }
  0xb2   :  { %v804_v15 = vld [vmem:[#allocation8 + $0x80] sm:$0xff]  ;;  %v10608_v17 = vcombine.high %v796_v7, %v800_v8  ;;  %v805_v19 = vld [vmem:[#allocation8 + $0x88] sm:$0xff]  ;;  %v10610_v21 = vcombine.high %v797_v11, %v801_v12  ;;  %v10609_v26 = vcombine.low %v797_v11, %v801_v12 }
  0xb3   :  { %513 = vmatpush1.bf16.msra.mxu0 %v10579_v35  ;;  %v808_v16 = vld [vmem:[#allocation8 + $0xa0] sm:$0xff]  ;;  %v809_v20 = vld [vmem:[#allocation8 + $0xa8] sm:$0xff] }
  0xb4   :  { %592 = vmatprep.subr.bf16.mxu0 %v10568_v38  ;;  %554 = vmatpush1.bf16.msra.mxu1 %v10581_v39  ;;  %v812_v22 = vld [vmem:[#allocation8 + $0xc0] sm:$0xff]  ;;  %v10616_v24 = vcombine.high %v804_v15, %v808_v16  ;;  %v813_v27 = vld [vmem:[#allocation8 + $0xc8] sm:$0xff]  ;;  %v10618_v29 = vcombine.high %v805_v19, %v809_v20  ;;  %v10615_v30 = vcombine.low %v804_v15, %v808_v16 }
  0xb5   :  { %633 = vmatprep.subr.bf16.mxu1 %v10570_v42  ;;  %v816_v23 = vld [vmem:[#allocation8 + $0xe0] sm:$0xff]  ;;  %v817_v28 = vld [vmem:[#allocation8 + $0xe8] sm:$0xff]  ;;  %v10617_v34 = vcombine.low %v805_v19, %v809_v20 }
  0xb6   :  { %10593 = vmatmul.mubr.msk.bf16.vlgmr.msra.gmra.mrb[4].mxu0 %vm424_vm0, %v13010_v25  ;;  %v820_v31 = vld [vmem:[#allocation8 + $0x100] sm:$0xff]  ;;  %v10624_v33 = vcombine.high %v812_v22, %v816_v23  ;;  %v821_v35 = vld [vmem:[#allocation8 + $0x108] sm:$0xff]  ;;  %v10623_v37 = vcombine.low %v812_v22, %v816_v23  ;;  %v10625_v41 = vcombine.low %v813_v27, %v817_v28 }
  0xb7   :  { %593 = vmatpush1.bf16.msra.mxu0 %v10567_v43  ;;  %624 = vmatprep.mubr.bf16.mxu0 %v12845_v0  ;;  %v824_v32 = vld [vmem:[#allocation8 + $0x120] sm:$0xff]  ;;  %v825_v36 = vld [vmem:[#allocation8 + $0x128] sm:$0xff] }
  0xb8   :  { %10594 = vmatmul.mubr.msk.bf16.vlgmr.msra.gmra.mrb[4].mxu1 %vm424_vm0, %v13010_v25  ;;  %594 = vmatprep.subr.bf16.mxu0 %v10584_v46  ;;  %v828_v38 = vld [vmem:[#allocation8 + $0x140] sm:$0xff]  ;;  %v10632_v40 = vcombine.high %v820_v31, %v824_v32  ;;  %v829_v42 = vld [vmem:[#allocation8 + $0x148] sm:$0xff]  ;;  %v10634_v44 = vcombine.high %v821_v35, %v825_v36  ;;  %v10631_v45 = vcombine.low %v820_v31, %v824_v32 }
  0xb9   :  { %634 = vmatpush1.bf16.msra.mxu1 %v10569_v47  ;;  %665 = vmatprep.mubr.bf16.mxu1 %v12845_v0  ;;  %v832_v39 = vld [vmem:[#allocation8 + $0x160] sm:$0xff]  ;;  %v833_v43 = vld [vmem:[#allocation8 + $0x168] sm:$0xff]  ;;  %v10633_v49 = vcombine.low %v821_v35, %v825_v36 }
  0xba   :  { %635 = vmatprep.subr.bf16.mxu1 %v10586_v50  ;;  %v836_v46 = vld [vmem:[#allocation8 + $0x180] sm:$0xff]  ;;  %v10640_v48 = vcombine.high %v828_v38, %v832_v39  ;;  %v837_v50 = vld [vmem:[#allocation8 + $0x188] sm:$0xff]  ;;  %v10642_v52 = vcombine.high %v829_v42, %v833_v43  ;;  %v10639_v53 = vcombine.low %v828_v38, %v832_v39  ;;  %v10641_v57 = vcombine.low %v829_v42, %v833_v43 }
  0xbb   :  { %595 = vmatpush1.bf16.msra.mxu0 %v10583_v51  ;;  %v840_v47 = vld [vmem:[#allocation8 + $0x1a0] sm:$0xff]  ;;  %v841_v51 = vld [vmem:[#allocation8 + $0x1a8] sm:$0xff] }
  0xbc   :  { %674 = vmatprep.subr.bf16.mxu0 %v10572_v54  ;;  %v844_v54 = vld [vmem:[#allocation8 + $0x1c0] sm:$0xff]  ;;  %v10648_v56 = vcombine.high %v836_v46, %v840_v47  ;;  %v10650_v60 = vcombine.high %v837_v50, %v841_v51  ;;  %v10647_v61 = vcombine.low %v836_v46, %v840_v47  ;;  %v10649_v2 = vcombine.low %v837_v50, %v841_v51  ;;  %v853_v3 = vld [vmem:[#allocation8 + $0x208] sm:$0xff] }
  0xbd   :  { %636 = vmatpush1.bf16.msra.mxu1 %v10585_v55  ;;  %v848_v55 = vld [vmem:[#allocation8 + $0x1e0] sm:$0xff]  ;;  %v861_v11 = vld [vmem:[#allocation8 + $0x248] sm:$0xff] }
  0xbe   :  { %10595 = vmatmul.mubr.msk.bf16.vlgmr.msra.gmra.mrb[8].mxu0 %vm424_vm0, %v13010_v25  ;;  %715 = vmatprep.subr.bf16.mxu1 %v10574_v58  ;;  %v845_v58 = vld [vmem:[#allocation8 + $0x1c8] sm:$0xff]  ;;  %v10656_v1 = vcombine.high %v844_v54, %v848_v55  ;;  %v868_v15 = vld [vmem:[#allocation8 + $0x280] sm:$0xff] }
  0xbf   :  { %675 = vmatpush1.bf16.msra.mxu0 %v10571_v59  ;;  %706 = vmatprep.mubr.bf16.mxu0 %v12845_v0  ;;  %v849_v59 = vld [vmem:[#allocation8 + $0x1e8] sm:$0xff]  ;;  %v872_v16 = vld [vmem:[#allocation8 + $0x2a0] sm:$0xff] }
  0xc0   :  { %10596 = vmatmul.mubr.msk.bf16.vlgmr.msra.gmra.mrb[8].mxu1 %vm424_vm0, %v13010_v25  ;;  %676 = vmatprep.subr.bf16.mxu0 %v10588_v62  ;;  %v852_v62 = vld [vmem:[#allocation8 + $0x200] sm:$0xff]  ;;  %v10658_v5 = vcombine.high %v845_v58, %v849_v59  ;;  %v865_v12 = vld [vmem:[#allocation8 + $0x268] sm:$0xff] }
  0xc1   :  { %716 = vmatpush1.bf16.msra.mxu1 %v10573_v63  ;;  %747 = vmatprep.mubr.bf16.mxu1 %v12845_v0  ;;  %v10607_v0 = vcombine.low %v796_v7, %v800_v8  ;;  %v856_v63 = vld [vmem:[#allocation8 + $0x220] sm:$0xff]  ;;  %v869_v19 = vld [vmem:[#allocation8 + $0x288] sm:$0xff] }
  0xc2   :  { %717 = vmatprep.subr.bf16.mxu1 %v10590_v4  ;;  %v857_v4 = vld [vmem:[#allocation8 + $0x228] sm:$0xff]  ;;  %v860_v7 = vld [vmem:[#allocation8 + $0x240] sm:$0xff] }
  0xc3   :  { %677 = vmatpush1.bf16.msra.mxu0 %v10587_v6  ;;  %v10655_v6 = vcombine.low %v844_v54, %v848_v55  ;;  %v864_v8 = vld [vmem:[#allocation8 + $0x260] sm:$0xff]  ;;  %v873_v20 = vld [vmem:[#allocation8 + $0x2a8] sm:$0xff] }
  0xc4   :  { %6974 = vmatprep.subr.bf16.mxu0 %v10600_v9  ;;  %v10664_v9 = vcombine.high %v852_v62, %v856_v63  ;;  %v876_v22 = vld [vmem:[#allocation8 + $0x2c0] sm:$0xff]  ;;  %v10681_v32 = vcombine.low %v869_v19, %v873_v20  ;;  %v889_v39 = vld [vmem:[#allocation8 + $0x328] sm:$0xff] }
  0xc5   :  { %718 = vmatpush1.bf16.msra.mxu1 %v10589_v10  ;;  %v10657_v10 = vcombine.low %v845_v58, %v849_v59  ;;  %v880_v23 = vld [vmem:[#allocation8 + $0x2e0] sm:$0xff]  ;;  %v897_v47 = vld [vmem:[#allocation8 + $0x368] sm:$0xff] }
  0xc6   :  { %10597 = vmatmul.mubr.msk.bf16.vlgmr.msra.gmra.mrb[12].mxu0 %vm424_vm0, %v13010_v25  ;;  %7302 = vmatprep.subr.bf16.mxu1 %v10602_v13  ;;  %v10666_v13 = vcombine.high %v853_v3, %v857_v4  ;;  %v10688_v31 = vcombine.high %v876_v22, %v880_v23  ;;  %v884_v36 = vld [vmem:[#allocation8 + $0x300] sm:$0xff]  ;;  %v905_v55 = vld [vmem:[#allocation8 + $0x3a8] sm:$0xff] }
  0xc7   :  { %6975 = vmatpush1.bf16.msra.mxu0 %v10599_v14  ;;  %v10663_v14 = vcombine.low %v852_v62, %v856_v63  ;;  %v892_v43 = vld [vmem:[#allocation8 + $0x340] sm:$0xff]  ;;  %v913_v63 = vld [vmem:[#allocation8 + $0x3e8] sm:$0xff] }
  0xc8   :  { %10598 = vmatmul.mubr.msk.bf16.vlgmr.msra.gmra.mrb[12].mxu1 %vm424_vm0, %v13010_v25  ;;  %6976 = vmatprep.subr.bf16.mxu0 %v10608_v17  ;;  %v10626_v25 = vcombine.high %v813_v27, %v817_v28  ;;  %v10672_v17 = vcombine.high %v860_v7, %v864_v8  ;;  %v877_v27 = vld [vmem:[#allocation8 + $0x2c8] sm:$0xff]  ;;  %v900_v51 = vld [vmem:[#allocation8 + $0x380] sm:$0xff] }
  0xc9   :  { %7303 = vmatpush1.bf16.msra.mxu1 %v10601_v18  ;;  %v10665_v18 = vcombine.low %v853_v3, %v857_v4  ;;  %v881_v28 = vld [vmem:[#allocation8 + $0x2e8] sm:$0xff]  ;;  %v908_v59 = vld [vmem:[#allocation8 + $0x3c0] sm:$0xff] }
  0xca   :  { %7304 = vmatprep.subr.bf16.mxu1 %v10610_v21  ;;  %v10674_v21 = vcombine.high %v861_v11, %v865_v12  ;;  %v10689_v35 = vcombine.low %v877_v27, %v881_v28  ;;  %v916_v4 = vld [vmem:[#allocation8 + $0x400] sm:$0xff] }
  0xcb   :  { %6977 = vmatpush1.bf16.msra.mxu0 %v10607_v0  ;;  %v10671_v0 = vcombine.low %v860_v7, %v864_v8  ;;  %v921_v8 = vld [vmem:[#allocation8 + $0x428] sm:$0xff] }
  0xcc   :  { %6978 = vmatprep.subr.bf16.mxu0 %v10616_v24  ;;  %v10680_v24 = vcombine.high %v868_v15, %v872_v16 }
  0xcd   :  { %7305 = vmatpush1.bf16.msra.mxu1 %v10609_v26  ;;  %v10673_v26 = vcombine.low %v861_v11, %v865_v12  ;;  %v184_v12 = vlaneseq }
  0xce   :  { %7306 = vmatprep.subr.bf16.mxu1 %v10618_v29  ;;  %v10682_v29 = vcombine.high %v869_v19, %v873_v20 }
  0xcf   :  { %6979 = vmatpush1.bf16.msra.mxu0 %v10615_v30  ;;  %v10679_v30 = vcombine.low %v868_v15, %v872_v16  ;;  %v13039_v15 = vld [vmem:[#allocation7] sm:$0xff] }
  0xd0   :  { %6980 = vmatprep.subr.bf16.mxu0 %v10624_v33  ;;  %v10690_v33 = vcombine.high %v877_v27, %v881_v28 }
  0xd1   :  { %7307 = vmatpush1.bf16.msra.mxu1 %v10617_v34  ;;  %v10687_v34 = vcombine.low %v876_v22, %v880_v23 }
  0xd2   :  { %7308 = vmatprep.subr.bf16.mxu1 %v10626_v25  ;;  %v888_v25 = vld [vmem:[#allocation8 + $0x320] sm:$0xff] }
  0xd3   :  { %6981 = vmatpush1.bf16.msra.mxu0 %v10623_v37  ;;  %v885_v37 = vld [vmem:[#allocation8 + $0x308] sm:$0xff]  ;;  %v10696_v38 = vcombine.high %v884_v36, %v888_v25 }
  0xd4   :  { %6982 = vmatprep.subr.bf16.mxu0 %v10632_v40  ;;  %v10695_v40 = vcombine.low %v884_v36, %v888_v25  ;;  %v10698_v42 = vcombine.high %v885_v37, %v889_v39  ;;  %v924_v36 = vld [vmem:[#allocation8 + $0x440] sm:$0xff] }
  0xd5   :  { %7309 = vmatpush1.bf16.msra.mxu1 %v10625_v41  ;;  %v10697_v41 = vcombine.low %v885_v37, %v889_v39  ;;  %v928_v37 = vld [vmem:[#allocation8 + $0x460] sm:$0xff]  ;;  %v929_v39 = vld [vmem:[#allocation8 + $0x468] sm:$0xff] }
  0xd6   :  { %7310 = vmatprep.subr.bf16.mxu1 %v10634_v44  ;;  %v896_v44 = vld [vmem:[#allocation8 + $0x360] sm:$0xff] }
  0xd7   :  { %6983 = vmatpush1.bf16.msra.mxu0 %v10631_v45  ;;  %v893_v45 = vld [vmem:[#allocation8 + $0x348] sm:$0xff]  ;;  %v10704_v46 = vcombine.high %v892_v43, %v896_v44 }
  0xd8   :  { %6984 = vmatprep.subr.bf16.mxu0 %v10640_v48  ;;  %v10703_v48 = vcombine.low %v892_v43, %v896_v44  ;;  %v10706_v50 = vcombine.high %v893_v45, %v897_v47  ;;  %v10736_v44 = vcombine.high %v924_v36, %v928_v37 }
  0xd9   :  { %7311 = vmatpush1.bf16.msra.mxu1 %v10633_v49  ;;  %v10705_v49 = vcombine.low %v893_v45, %v897_v47  ;;  %v936_v47 = vld [vmem:[#allocation8 + $0x4a0] sm:$0xff] }
  0xda   :  { %7312 = vmatprep.subr.bf16.mxu1 %v10642_v52  ;;  %v904_v52 = vld [vmem:[#allocation8 + $0x3a0] sm:$0xff] }
  0xdb   :  { %6985 = vmatpush1.bf16.msra.mxu0 %v10639_v53  ;;  %v901_v53 = vld [vmem:[#allocation8 + $0x388] sm:$0xff]  ;;  %v10712_v54 = vcombine.high %v900_v51, %v904_v52 }
  0xdc   :  { %6986 = vmatprep.subr.bf16.mxu0 %v10648_v56  ;;  %v10711_v56 = vcombine.low %v900_v51, %v904_v52  ;;  %v10714_v58 = vcombine.high %v901_v53, %v905_v55  ;;  %v10735_v51 = vcombine.low %v924_v36, %v928_v37 }
  0xdd   :  { %7313 = vmatpush1.bf16.msra.mxu1 %v10641_v57  ;;  %v10713_v57 = vcombine.low %v901_v53, %v905_v55  ;;  %v940_v55 = vld [vmem:[#allocation8 + $0x4c0] sm:$0xff] }
  0xde   :  { %7314 = vmatprep.subr.bf16.mxu1 %v10650_v60  ;;  %v912_v60 = vld [vmem:[#allocation8 + $0x3e0] sm:$0xff] }
  0xdf   :  { %6987 = vmatpush1.bf16.msra.mxu0 %v10647_v61  ;;  %v909_v61 = vld [vmem:[#allocation8 + $0x3c8] sm:$0xff]  ;;  %v10720_v62 = vcombine.high %v908_v59, %v912_v60 }
  0xe0   :  { %6988 = vmatprep.subr.bf16.mxu0 %v10656_v1  ;;  %v10719_v1 = vcombine.low %v908_v59, %v912_v60  ;;  %v10722_v3 = vcombine.high %v909_v61, %v913_v63 }
  0xe1   :  { %7315 = vmatpush1.bf16.msra.mxu1 %v10649_v2  ;;  %v10721_v2 = vcombine.low %v909_v61, %v913_v63  ;;  %v948_v63 = vld [vmem:[#allocation8 + $0x500] sm:$0xff] }
  0xe2   :  { %7316 = vmatprep.subr.bf16.mxu1 %v10658_v5  ;;  %v920_v5 = vld [vmem:[#allocation8 + $0x420] sm:$0xff] }
  0xe3   :  { %6989 = vmatpush1.bf16.msra.mxu0 %v10655_v6  ;;  %v917_v6 = vld [vmem:[#allocation8 + $0x408] sm:$0xff]  ;;  %v10728_v7 = vcombine.high %v916_v4, %v920_v5 }
  0xe4   :  { %6990 = vmatprep.subr.bf16.mxu0 %v10664_v9  ;;  %v10727_v9 = vcombine.low %v916_v4, %v920_v5  ;;  %v10730_v11 = vcombine.high %v917_v6, %v921_v8  ;;  %v953_v4 = vld [vmem:[#allocation8 + $0x528] sm:$0xff] }
  0xe5   :  { %7317 = vmatpush1.bf16.msra.mxu1 %v10657_v10  ;;  %v10729_v10 = vcombine.low %v917_v6, %v921_v8 }
  0xe6   :  { %7318 = vmatprep.subr.bf16.mxu1 %v10666_v13  ;;  %v13034_v13 = vshrl.u32 %v184_v12, 7  ;;  %v960_v12 = vld [vmem:[#allocation8 + $0x560] sm:$0xff] }
  0xe7   :  { %6991 = vmatpush1.bf16.msra.mxu0 %v10663_v14 }
  0xe8   :  { %6992 = vmatprep.subr.bf16.mxu0 %v10672_v17  ;;  %v13037_v14 = vsub.s32 0, %v13034_v13  ;;  %v13042_v16 = vsub.s32 1, %v13034_v13  ;;  %v13045_v17 = vsub.s32 3, %v13034_v13  ;;  %v13083_v36 = vsub.s32 5, %v13034_v13 }
  0xe9   :  { %7319 = vmatpush1.bf16.msra.mxu1 %v10665_v18 }
  0xea   :  { %7320 = vmatprep.subr.bf16.mxu1 %v10674_v21  ;;  %v187_v18 = vrot.slane %v13039_v15, %v13037_v14  ;;  %v191_v19 = vrot.slane %v13039_v15, %v13042_v16  ;;  %v199_v21 = vrot.slane %v13039_v15, %v13045_v17 }
  0xeb   :  { %6993 = vmatpush1.bf16.msra.mxu0 %v10671_v0 }
  0xec   :  { %6994 = vmatprep.subr.bf16.mxu0 %v10680_v24 }
  0xed   :  { %7321 = vmatpush1.bf16.msra.mxu1 %v10673_v26 }
  0xee   :  { %7322 = vmatprep.subr.bf16.mxu1 %v10682_v29 }
  0xef   :  { %6995 = vmatpush1.bf16.msra.mxu0 %v10679_v30 }
  0xf0   :  { %6996 = vmatprep.subr.bf16.mxu0 %v10688_v31 }
  0xf1   :  { %7323 = vmatpush1.bf16.msra.mxu1 %v10681_v32 }
  0xf2   :  { %7324 = vmatprep.subr.bf16.mxu1 %v10690_v33 }
  0xf3   :  { %6997 = vmatpush1.bf16.msra.mxu0 %v10687_v34 }
  0xf4   :  { %6998 = vmatprep.subr.bf16.mxu0 %v10696_v38  ;;  %v925_v38 = vld [vmem:[#allocation8 + $0x448] sm:$0xff] }
  0xf5   :  { %7325 = vmatpush1.bf16.msra.mxu1 %v10689_v35  ;;  %v10738_v45 = vcombine.high %v925_v38, %v929_v39  ;;  %v10737_v52 = vcombine.low %v925_v38, %v929_v39 }
  0xf6   :  { %7326 = vmatprep.subr.bf16.mxu1 %v10698_v42 }
  0xf7   :  { %6999 = vmatpush1.bf16.msra.mxu0 %v10695_v40 }
  0xf8   :  { %7000 = vmatprep.subr.bf16.mxu0 %v10704_v46  ;;  %v932_v46 = vld [vmem:[#allocation8 + $0x480] sm:$0xff] }
  0xf9   :  { %7327 = vmatpush1.bf16.msra.mxu1 %v10697_v41  ;;  %v10744_v53 = vcombine.high %v932_v46, %v936_v47  ;;  %v10743_v59 = vcombine.low %v932_v46, %v936_v47  ;;  %v976_v47 = vld [vmem:[#allocation8 + $0x5e0] sm:$0xff] }
  0xfa   :  { %7328 = vmatprep.subr.bf16.mxu1 %v10706_v50 }
  0xfb   :  { %7001 = vmatpush1.bf16.msra.mxu0 %v10703_v48  ;;  %v933_v48 = vld [vmem:[#allocation8 + $0x488] sm:$0xff] }
  0xfc   :  { %7002 = vmatprep.subr.bf16.mxu0 %v10712_v54 }
  0xfd   :  { %7329 = vmatpush1.bf16.msra.mxu1 %v10705_v49  ;;  %v937_v49 = vld [vmem:[#allocation8 + $0x4a8] sm:$0xff] }
  0xfe   :  { %7330 = vmatprep.subr.bf16.mxu1 %v10714_v58  ;;  %v10746_v54 = vcombine.high %v933_v48, %v937_v49  ;;  %v945_v58 = vld [vmem:[#allocation8 + $0x4e8] sm:$0xff]  ;;  %v10745_v60 = vcombine.low %v933_v48, %v937_v49 }
  0xff   :  { %7003 = vmatpush1.bf16.msra.mxu0 %v10711_v56  ;;  %v944_v56 = vld [vmem:[#allocation8 + $0x4e0] sm:$0xff]  ;;  %v973_v48 = vld [vmem:[#allocation8 + $0x5c8] sm:$0xff] }
 0x100   :  { %7004 = vmatprep.subr.bf16.mxu0 %v10720_v62  ;;  %v10752_v61 = vcombine.high %v940_v55, %v944_v56  ;;  %v10751_v5 = vcombine.low %v940_v55, %v944_v56  ;;  %v977_v49 = vld [vmem:[#allocation8 + $0x5e8] sm:$0xff] }
 0x101   :  { %7331 = vmatpush1.bf16.msra.mxu1 %v10713_v57  ;;  %v941_v57 = vld [vmem:[#allocation8 + $0x4c8] sm:$0xff]  ;;  %v10786_v56 = vcombine.high %v973_v48, %v977_v49 }
 0x102   :  { %7332 = vmatprep.subr.bf16.mxu1 %v10722_v3  ;;  %v10754_v62 = vcombine.high %v941_v57, %v945_v58  ;;  %v949_v3 = vld [vmem:[#allocation8 + $0x508] sm:$0xff]  ;;  %v10753_v6 = vcombine.low %v941_v57, %v945_v58  ;;  %v980_v57 = vld [vmem:[#allocation8 + $0x600] sm:$0xff] }
 0x103   :  { %7005 = vmatpush1.bf16.msra.mxu0 %v10719_v1  ;;  %v984_v58 = vld [vmem:[#allocation8 + $0x620] sm:$0xff] }
 0x104   :  { %7015 = vmatprep.subr.bf16.mxu0 %v10728_v7 }
 0x105   :  { %7333 = vmatpush1.bf16.msra.mxu1 %v10721_v2  ;;  %v952_v2 = vld [vmem:[#allocation8 + $0x520] sm:$0xff] }
 0x106   :  { %7343 = vmatprep.subr.bf16.mxu1 %v10730_v11  ;;  %v10760_v8 = vcombine.high %v948_v63, %v952_v2 }
 0x181   :  { %v462_v20 = vpop.f32.mrb[0].mxu0  ;;  %v13053_v26 = vpop.f32.mrb[0].mxu1 }
 0x182   :  { %v463_v0 = vadd.f32 %v462_v20, %v187_v18  ;;  %v464_v22 = vpop.f32.mrb[1].mxu0  ;;  %v505_v28 = vpop.f32.mrb[1].mxu1  ;;  %v957_v18 = vld [vmem:[#allocation8 + $0x548] sm:$0xff] }
 0x183   :  { %v465_v23 = vadd.f32 %v464_v22, %v191_v19  ;;  %v466_v24 = vpop.f32.mrb[2].mxu0  ;;  %v506_v29 = vadd.f32 %v505_v28, %v199_v21  ;;  %v507_v30 = vpop.f32.mrb[2].mxu1  ;;  %v961_v19 = vld [vmem:[#allocation8 + $0x568] sm:$0xff]  ;;  %v13076_v21 = vsub.s32 4, %v13034_v13  ;;  %v10761_v22 = vcombine.low %v949_v3, %v953_v4  ;;  %v964_v28 = vld [vmem:[#allocation8 + $0x580] sm:$0xff] }
 0x184   :  { %12538 = vtanh.f32 %v463_v0  ;;  %v467_v27 = vpop.f32.mrb[3].mxu0  ;;  %v508_v31 = vpop.f32.mrb[3].mxu1  ;;  %v10759_v0 = vcombine.low %v948_v63, %v952_v2  ;;  %v10769_v38 = vcombine.low %v957_v18, %v961_v19  ;;  %v10792_v63 = vcombine.high %v980_v57, %v984_v58 }
 0x185   :  { %12540 = vtanh.f32 %v465_v23  ;;  %v13078_v23 = vld [vmem:[#allocation7 + $0x8] sm:$0xff]  ;;  %v10770_v27 = vcombine.high %v957_v18, %v961_v19  ;;  %v968_v31 = vld [vmem:[#allocation8 + $0x5a0] sm:$0xff]  ;;  %v997_v19 = vld [vmem:[#allocation8 + $0x688] sm:$0xff] }
 0x186   :  { %12542 = vtanh.f32 %v506_v29  ;;  %v235_v29 = vrot.slane %v13078_v23, %v13076_v21  ;;  %v239_v39 = vrot.slane %v13078_v23, %v13083_v36  ;;  %v1000_v18 = vld [vmem:[#allocation8 + $0x6a0] sm:$0xff] }
 0x189   :  { %v13055_v32 = vpop.f32.mrb[4].mxu0 }
 0x18a   :  { %v13057_v33 = vpop.f32.mrb[5].mxu0 }
 0x18b   :  { %v548_v34 = vpop.f32.mrb[6].mxu0 }
 0x18c   :  { %v549_v35 = vpop.f32.mrb[7].mxu0  ;;  %v965_v34 = vld [vmem:[#allocation8 + $0x588] sm:$0xff] }
 0x18d   :  { %v969_v35 = vld [vmem:[#allocation8 + $0x5a8] sm:$0xff] }
 0x18e   :  { %v12539_v25 = vpop.eup %12538 }
 0x18f   :  { %v12541_v40 = vpop.eup %12540  ;;  %v13061_v43 = vpack.c.bf16 %v12539_v25, %v12539_v25 }
 0x190   :  { %v13059_v41 = vpack.c.bf16 %v12541_v40, %v12541_v40  ;;  %v12543_v42 = vpop.eup %12542 }
 0x191   :  { %v13065_v50 = vpack.c.bf16 %v12543_v42, %v12543_v42  ;;  %v13071_v1 = vpop.f32.mrb[8].mxu0  ;;  %v10776_v42 = vcombine.high %v964_v28, %v968_v31 }
 0x192   :  { %7006 = vmatprep.mubr.bf16.mxu0 %v13059_v41  ;;  %7334 = vmatprep.mubr.bf16.mxu1 %v13059_v41  ;;  %v13073_v7 = vpop.f32.mrb[9].mxu0 }
 0x193   :  { %7007 = vmatmul.mubr.bf16.vlgmr.msra.gmra.mrb[16].mxu0 %v13061_v43  ;;  %7335 = vmatmul.mubr.bf16.vlgmr.msra.gmra.mrb[16].mxu1 %v13061_v43  ;;  %v630_v11 = vpop.f32.mrb[10].mxu0 }
 0x194   :  { %7016 = vmatpush1.bf16.msra.mxu0 %v10727_v9  ;;  %7344 = vmatpush1.bf16.msra.mxu1 %v10729_v10  ;;  %v10762_v9 = vcombine.high %v949_v3, %v953_v4  ;;  %v956_v10 = vld [vmem:[#allocation8 + $0x540] sm:$0xff]  ;;  %v631_v20 = vpop.f32.mrb[11].mxu0 }
 0x195   :  { %7017 = vmatprep.subr.bf16.mxu0 %v10736_v44  ;;  %7345 = vmatprep.subr.bf16.mxu1 %v10738_v45  ;;  %v10768_v24 = vcombine.high %v956_v10, %v960_v12  ;;  %v10767_v37 = vcombine.low %v956_v10, %v960_v12  ;;  %v10778_v44 = vcombine.high %v965_v34, %v969_v35  ;;  %v972_v45 = vld [vmem:[#allocation8 + $0x5c0] sm:$0xff]  ;;  %v1001_v20 = vld [vmem:[#allocation8 + $0x6a8] sm:$0xff] }
 0x196   :  { %7047 = vmatprep.mubr.bf16.mxu0 %v13065_v50  ;;  %7375 = vmatprep.mubr.bf16.mxu1 %v13065_v50  ;;  %v10784_v55 = vcombine.high %v972_v45, %v976_v47  ;;  %v988_v3 = vld [vmem:[#allocation8 + $0x640] sm:$0xff] }
 0x197   :  { %v992_v4 = vld [vmem:[#allocation8 + $0x660] sm:$0xff] }
 0x198   :  { %7018 = vmatpush1.bf16.msra.mxu0 %v10735_v51  ;;  %7346 = vmatpush1.bf16.msra.mxu1 %v10737_v52  ;;  %v10800_v10 = vcombine.high %v988_v3, %v992_v4  ;;  %v996_v12 = vld [vmem:[#allocation8 + $0x680] sm:$0xff] }
 0x199   :  { %7019 = vmatprep.subr.bf16.mxu0 %v10744_v53  ;;  %7347 = vmatprep.subr.bf16.mxu1 %v10746_v54  ;;  %v708_v30 = vpop.f32.mrb[12].mxu0  ;;  %v10775_v53 = vcombine.low %v964_v28, %v968_v31  ;;  %v10777_v54 = vcombine.low %v965_v34, %v969_v35  ;;  %v1004_v28 = vld [vmem:[#allocation8 + $0x6c0] sm:$0xff]  ;;  %v1005_v31 = vld [vmem:[#allocation8 + $0x6c8] sm:$0xff]  ;;  %v10807_v35 = vcombine.low %v996_v12, %v1000_v18 }
 0x19a   :  { %v13085_v25 = vadd.f32 %v708_v30, %v235_v29  ;;  %v710_v40 = vpop.f32.mrb[13].mxu0  ;;  %v13092_v29 = vsub.s32 2, %v13034_v13  ;;  %v1008_v30 = vld [vmem:[#allocation8 + $0x6e0] sm:$0xff]  ;;  %v1009_v34 = vld [vmem:[#allocation8 + $0x6e8] sm:$0xff] }
 0x19b   :  { %v712_v46 = vpop.f32.mrb[14].mxu0  ;;  %v13089_v51 = vadd.f32 %v710_v40, %v239_v39  ;;  %v10816_v39 = vcombine.high %v1004_v28, %v1008_v30  ;;  %v10818_v40 = vcombine.high %v1005_v31, %v1009_v34 }
 0x19c   :  { %7020 = vmatpush1.bf16.msra.mxu0 %v10743_v59  ;;  %7348 = vmatpush1.bf16.msra.mxu1 %v10745_v60  ;;  %v713_v52 = vpop.f32.mrb[15].mxu0  ;;  %v981_v59 = vld [vmem:[#allocation8 + $0x608] sm:$0xff]  ;;  %v1016_v46 = vld [vmem:[#allocation8 + $0x720] sm:$0xff] }
 0x19d   :  { %7021 = vmatprep.subr.bf16.mxu0 %v10752_v61  ;;  %7349 = vmatprep.subr.bf16.mxu1 %v10754_v62  ;;  %v985_v60 = vld [vmem:[#allocation8 + $0x628] sm:$0xff]  ;;  %v10783_v61 = vcombine.low %v972_v45, %v976_v47  ;;  %v10785_v62 = vcombine.low %v973_v48, %v977_v49  ;;  %v195_v45 = vrot.slane %v13039_v15, %v13092_v29 }
 0x19e   :  { %v10794_v2 = vcombine.high %v981_v59, %v985_v60  ;;  %v1013_v47 = vld [vmem:[#allocation8 + $0x708] sm:$0xff] }
 0x19f   :  { %v1017_v48 = vld [vmem:[#allocation8 + $0x728] sm:$0xff] }
 0x1a0   :  { %7022 = vmatpush1.bf16.msra.mxu0 %v10751_v5  ;;  %7350 = vmatpush1.bf16.msra.mxu1 %v10753_v6  ;;  %v989_v5 = vld [vmem:[#allocation8 + $0x648] sm:$0xff] }
 0x1a1   :  { %7023 = vmatprep.subr.bf16.mxu0 %v10760_v8  ;;  %7351 = vmatprep.subr.bf16.mxu1 %v10762_v9  ;;  %v993_v6 = vld [vmem:[#allocation8 + $0x668] sm:$0xff]  ;;  %v10791_v8 = vcombine.low %v980_v57, %v984_v58  ;;  %v10793_v9 = vcombine.low %v981_v59, %v985_v60  ;;  %v1020_v57 = vld [vmem:[#allocation8 + $0x740] sm:$0xff]  ;;  %v207_v58 = vrot.slane %v13039_v15, %v13083_v36 }
 0x1a2   :  { %v10802_v11 = vcombine.high %v989_v5, %v993_v6  ;;  %v504_v59 = vadd.f32 %v13053_v26, %v195_v45  ;;  %v1024_v60 = vld [vmem:[#allocation8 + $0x760] sm:$0xff] }
 0x1a3   :  { %v547_v26 = vadd.f32 %v13057_v33, %v207_v58  ;;  %v1036_v33 = vld [vmem:[#allocation8 + $0x7c0] sm:$0xff] }
 0x1a4   :  { %7024 = vmatpush1.bf16.msra.mxu0 %v10759_v0  ;;  %7352 = vmatpush1.bf16.msra.mxu1 %v10761_v22  ;;  %v10799_v0 = vcombine.low %v988_v3, %v992_v4  ;;  %v10801_v22 = vcombine.low %v989_v5, %v993_v6  ;;  %v227_v3 = vrot.slane %v13078_v23, %v13092_v29  ;;  %12544 = vtanh.f32 %v504_v59 }
 0x1a5   :  { %7025 = vmatprep.subr.bf16.mxu0 %v10768_v24  ;;  %7353 = vmatprep.subr.bf16.mxu1 %v10770_v27  ;;  %v10808_v24 = vcombine.high %v996_v12, %v1000_v18  ;;  %v10810_v27 = vcombine.high %v997_v19, %v1001_v20  ;;  %v231_v5 = vrot.slane %v13078_v23, %v13045_v17  ;;  %v1029_v12 = vld [vmem:[#allocation8 + $0x788] sm:$0xff]  ;;  %12546 = vtanh.f32 %v547_v26 }
 0x1a6   :  { %v10832_v6 = vcombine.high %v1020_v57, %v1024_v60  ;;  %v1033_v18 = vld [vmem:[#allocation8 + $0x7a8] sm:$0xff] }
 0x1a8   :  { %7026 = vmatpush1.bf16.msra.mxu0 %v10767_v37  ;;  %7354 = vmatpush1.bf16.msra.mxu1 %v10769_v38  ;;  %v10809_v37 = vcombine.low %v997_v19, %v1001_v20  ;;  %v13094_v38 = vpop.f32.mrb[4].mxu1 }
 0x1a9   :  { %7027 = vmatprep.subr.bf16.mxu0 %v10776_v42  ;;  %7355 = vmatprep.subr.bf16.mxu1 %v10778_v44  ;;  %v1012_v42 = vld [vmem:[#allocation8 + $0x700] sm:$0xff]  ;;  %v13096_v44 = vpop.f32.mrb[5].mxu1 }
 0x1aa   :  { %v589_v49 = vpop.f32.mrb[6].mxu1 }
 0x1ab   :  { %v590_v52 = vpop.f32.mrb[7].mxu1 }
 0x1ac   :  { %7028 = vmatpush1.bf16.msra.mxu0 %v10775_v53  ;;  %7356 = vmatpush1.bf16.msra.mxu1 %v10777_v54  ;;  %v10815_v53 = vcombine.low %v1004_v28, %v1008_v30  ;;  %v10817_v54 = vcombine.low %v1005_v31, %v1009_v34  ;;  %v667_v4 = vpop.f32.mrb[8].mxu1  ;;  %v10842_v30 = vcombine.high %v1029_v12, %v1033_v18  ;;  %v1040_v31 = vld [vmem:[#allocation8 + $0x7e0] sm:$0xff]  ;;  %v1037_v34 = vld [vmem:[#allocation8 + $0x7c8] sm:$0xff] }
 0x1ad   :  { %7029 = vmatprep.subr.bf16.mxu0 %v10784_v55  ;;  %7357 = vmatprep.subr.bf16.mxu1 %v10786_v56  ;;  %v10824_v55 = vcombine.high %v1012_v42, %v1016_v46  ;;  %v10826_v56 = vcombine.high %v1013_v47, %v1017_v48  ;;  %v13108_v19 = vadd.f32 %v667_v4, %v227_v3  ;;  %v1044_v52 = vld [vmem:[#allocation8 + $0x800] sm:$0xff]  ;;  %v1053_v4 = vld [vmem:[#allocation8 + $0x848] sm:$0xff] }
 0x1ae   :  { %v1056_v3 = vld [vmem:[#allocation8 + $0x860] sm:$0xff] }
 0x1b0   :  { %7030 = vmatpush1.bf16.msra.mxu0 %v10783_v61  ;;  %7358 = vmatpush1.bf16.msra.mxu1 %v10785_v62  ;;  %v1021_v61 = vld [vmem:[#allocation8 + $0x748] sm:$0xff] }
 0x1b1   :  { %7031 = vmatprep.subr.bf16.mxu0 %v10792_v63  ;;  %7359 = vmatprep.subr.bf16.mxu1 %v10794_v2  ;;  %v1025_v62 = vld [vmem:[#allocation8 + $0x768] sm:$0xff]  ;;  %v10823_v63 = vcombine.low %v1012_v42, %v1016_v46  ;;  %v10825_v2 = vcombine.low %v1013_v47, %v1017_v48  ;;  %v10841_v42 = vcombine.low %v1029_v12, %v1033_v18  ;;  %v1060_v12 = vld [vmem:[#allocation8 + $0x880] sm:$0xff] }
 0x1b2   :  { %v10848_v48 = vcombine.high %v1036_v33, %v1040_v31  ;;  %v1064_v18 = vld [vmem:[#allocation8 + $0x8a0] sm:$0xff] }
 0x1b4   :  { %7032 = vmatpush1.bf16.msra.mxu0 %v10791_v8  ;;  %7360 = vmatpush1.bf16.msra.mxu1 %v10793_v9  ;;  %v10834_v8 = vcombine.high %v1021_v61, %v1025_v62  ;;  %v1028_v9 = vld [vmem:[#allocation8 + $0x780] sm:$0xff] }
 0x1b5   :  { %7033 = vmatprep.subr.bf16.mxu0 %v10800_v10  ;;  %7361 = vmatprep.subr.bf16.mxu1 %v10802_v11  ;;  %v669_v10 = vpop.f32.mrb[9].mxu1  ;;  %v1032_v11 = vld [vmem:[#allocation8 + $0x7a0] sm:$0xff] }
 0x1b6   :  { %v13110_v20 = vadd.f32 %v669_v10, %v231_v5  ;;  %v10840_v28 = vcombine.high %v1028_v9, %v1032_v11  ;;  %v1057_v5 = vld [vmem:[#allocation8 + $0x868] sm:$0xff] }
 0x1b8   :  { %7034 = vmatpush1.bf16.msra.mxu0 %v10799_v0  ;;  %7362 = vmatpush1.bf16.msra.mxu1 %v10801_v22  ;;  %v671_v0 = vpop.f32.mrb[10].mxu1 }
 0x1b9   :  { %7035 = vmatprep.subr.bf16.mxu0 %v10808_v24  ;;  %7363 = vmatprep.subr.bf16.mxu1 %v10810_v27  ;;  %v672_v22 = vpop.f32.mrb[11].mxu1  ;;  %v10831_v24 = vcombine.low %v1020_v57, %v1024_v60  ;;  %v10833_v27 = vcombine.low %v1021_v61, %v1025_v62  ;;  %v12545_v60 = vpop.eup %12544  ;;  %v10847_v61 = vcombine.low %v1036_v33, %v1040_v31  ;;  %v1061_v0 = vld [vmem:[#allocation8 + $0x888] sm:$0xff]  ;;  %v1068_v31 = vld [vmem:[#allocation8 + $0x8c0] sm:$0xff] }
 0x1ba   :  { %v749_v46 = vpop.f32.mrb[12].mxu1  ;;  %v1065_v22 = vld [vmem:[#allocation8 + $0x8a8] sm:$0xff] }
 0x1bb   :  { %v10874_v33 = vcombine.high %v1061_v0, %v1065_v22 }
 0x1bc   :  { %7036 = vmatpush1.bf16.msra.mxu0 %v10807_v35  ;;  %7364 = vmatpush1.bf16.msra.mxu1 %v10809_v37  ;;  %v1041_v35 = vld [vmem:[#allocation8 + $0x7e8] sm:$0xff]  ;;  %v13113_v37 = vsub.s32 6, %v13034_v13 }
 0x1bd   :  { %7037 = vmatprep.subr.bf16.mxu0 %v10816_v39  ;;  %7365 = vmatprep.subr.bf16.mxu1 %v10818_v40  ;;  %v13116_v39 = vsub.s32 7, %v13034_v13  ;;  %v10839_v40 = vcombine.low %v1028_v9, %v1032_v11  ;;  %v10850_v49 = vcombine.high %v1037_v34, %v1041_v35  ;;  %v1045_v13 = vld [vmem:[#allocation8 + $0x808] sm:$0xff]  ;;  %v10866_v11 = vcombine.high %v1053_v4, %v1057_v5 }
 0x1be   :  { %v243_v45 = vrot.slane %v13078_v23, %v13113_v37 }
 0x1bf   :  { %v247_v47 = vrot.slane %v13078_v23, %v13116_v39  ;;  %v10849_v23 = vcombine.low %v1037_v34, %v1041_v35  ;;  %v1072_v34 = vld [vmem:[#allocation8 + $0x8e0] sm:$0xff]  ;;  %v1069_v35 = vld [vmem:[#allocation8 + $0x8c8] sm:$0xff] }
 0x1c0   :  { %7038 = vmatpush1.bf16.msra.mxu0 %v10815_v53  ;;  %7366 = vmatpush1.bf16.msra.mxu1 %v10817_v54  ;;  %v751_v53 = vpop.f32.mrb[13].mxu1  ;;  %v1048_v54 = vld [vmem:[#allocation8 + $0x820] sm:$0xff] }
 0x1c1   :  { %7039 = vmatprep.subr.bf16.mxu0 %v10824_v55  ;;  %7367 = vmatprep.subr.bf16.mxu1 %v10826_v56  ;;  %v1049_v55 = vld [vmem:[#allocation8 + $0x828] sm:$0xff]  ;;  %v13122_v56 = vadd.f32 %v749_v46, %v243_v45  ;;  %v13124_v57 = vadd.f32 %v751_v53, %v247_v47  ;;  %v753_v58 = vpop.f32.mrb[14].mxu1  ;;  %v10856_v62 = vcombine.high %v1044_v52, %v1048_v54 }
 0x1c2   :  { %v754_v59 = vpop.f32.mrb[15].mxu1  ;;  %v10855_v9 = vcombine.low %v1044_v52, %v1048_v54  ;;  %v10857_v26 = vcombine.low %v1045_v13, %v1049_v55  ;;  %v10873_v45 = vcombine.low %v1061_v0, %v1065_v22  ;;  %v10880_v46 = vcombine.high %v1068_v31, %v1072_v34  ;;  %v1077_v52 = vld [vmem:[#allocation8 + $0x908] sm:$0xff]  ;;  %v1104_v0 = vld [vmem:[#allocation8 + $0x9e0] sm:$0xff] }
 0x1c3   :  { %v1081_v53 = vld [vmem:[#allocation8 + $0x928] sm:$0xff]  ;;  %v10879_v54 = vcombine.low %v1068_v31, %v1072_v34  ;;  %v1084_v59 = vld [vmem:[#allocation8 + $0x940] sm:$0xff] }
 0x1c4   :  { %7040 = vmatpush1.bf16.msra.mxu0 %v10823_v63  ;;  %7368 = vmatpush1.bf16.msra.mxu1 %v10825_v2  ;;  %v10858_v63 = vcombine.high %v1045_v13, %v1049_v55  ;;  %v1052_v2 = vld [vmem:[#allocation8 + $0x840] sm:$0xff]  ;;  %v10890_v58 = vcombine.high %v1077_v52, %v1081_v53  ;;  %v1101_v22 = vld [vmem:[#allocation8 + $0x9c8] sm:$0xff] }
 0x1c5   :  { %7041 = vmatprep.subr.bf16.mxu0 %v10832_v6  ;;  %7369 = vmatprep.subr.bf16.mxu1 %v10834_v8  ;;  %v12547_v6 = vpop.eup %12546  ;;  %v13126_v8 = vpack.c.bf16 %v12545_v60, %v12545_v60  ;;  %v10864_v10 = vcombine.high %v1052_v2, %v1056_v3  ;;  %v1088_v60 = vld [vmem:[#allocation8 + $0x960] sm:$0xff] }
 0x1c6   :  { %v1108_v34 = vld [vmem:[#allocation8 + $0xa00] sm:$0xff] }
 0x1c8   :  { %7042 = vmatpush1.bf16.msra.mxu0 %v10831_v24  ;;  %7370 = vmatpush1.bf16.msra.mxu1 %v10833_v27  ;;  %v13128_v24 = vpack.c.bf16 %v12547_v6, %v12547_v6  ;;  %v10863_v27 = vcombine.low %v1052_v2, %v1056_v3  ;;  %v10896_v2 = vcombine.high %v1084_v59, %v1088_v60  ;;  %v1093_v6 = vld [vmem:[#allocation8 + $0x988] sm:$0xff] }
 0x1c9   :  { %7043 = vmatprep.subr.bf16.mxu0 %v10840_v28  ;;  %7371 = vmatprep.subr.bf16.mxu1 %v10842_v30  ;;  %v10865_v28 = vcombine.low %v1053_v4, %v1057_v5  ;;  %v10872_v30 = vcombine.high %v1060_v12, %v1064_v18  ;;  %v1092_v4 = vld [vmem:[#allocation8 + $0x980] sm:$0xff] }
 0x1ca   :  { %v1096_v5 = vld [vmem:[#allocation8 + $0x9a0] sm:$0xff] }
 0x1cc   :  { %7044 = vmatpush1.bf16.msra.mxu0 %v10839_v40  ;;  %7372 = vmatpush1.bf16.msra.mxu1 %v10841_v42  ;;  %v1073_v40 = vld [vmem:[#allocation8 + $0x8e8] sm:$0xff]  ;;  %v10871_v42 = vcombine.low %v1060_v12, %v1064_v18  ;;  %v1100_v18 = vld [vmem:[#allocation8 + $0x9c0] sm:$0xff] }
 0x1cd   :  { %7045 = vmatprep.subr.bf16.mxu0 %v10848_v48  ;;  %7373 = vmatprep.subr.bf16.mxu1 %v10850_v49  ;;  %v10882_v47 = vcombine.high %v1069_v35, %v1073_v40  ;;  %v1076_v48 = vld [vmem:[#allocation8 + $0x900] sm:$0xff]  ;;  %v10881_v13 = vcombine.low %v1069_v35, %v1073_v40  ;;  %v1109_v40 = vld [vmem:[#allocation8 + $0xa08] sm:$0xff] }
 0x1ce   :  { %v1080_v49 = vld [vmem:[#allocation8 + $0x920] sm:$0xff] }
 0x1cf   :  { %v10888_v55 = vcombine.high %v1076_v48, %v1080_v49  ;;  %v1112_v35 = vld [vmem:[#allocation8 + $0xa20] sm:$0xff] }
 0x1d0   :  { %7046 = vmatpush1.bf16.msra.mxu0 %v10847_v61  ;;  %7374 = vmatpush1.bf16.msra.mxu1 %v10849_v23  ;;  %v1085_v61 = vld [vmem:[#allocation8 + $0x948] sm:$0xff] }
 0x1d1   :  { %7056 = vmatprep.subr.bf16.mxu0 %v10856_v62  ;;  %7384 = vmatprep.subr.bf16.mxu1 %v10858_v63  ;;  %v1089_v23 = vld [vmem:[#allocation8 + $0x968] sm:$0xff]  ;;  %v10887_v62 = vcombine.low %v1076_v48, %v1080_v49  ;;  %v10889_v63 = vcombine.low %v1077_v52, %v1081_v53  ;;  %v1116_v49 = vld [vmem:[#allocation8 + $0xa40] sm:$0xff] }
 0x1d2   :  { %v10898_v3 = vcombine.high %v1085_v61, %v1089_v23  ;;  %v1120_v52 = vld [vmem:[#allocation8 + $0xa60] sm:$0xff]  ;;  %v1117_v53 = vld [vmem:[#allocation8 + $0xa48] sm:$0xff] }
 0x1d3   :  { %7048 = vmatmul.mubr.bf16.vlgmr.msra.gmra.mrb[16].mxu0 %v13126_v8  ;;  %7376 = vmatmul.mubr.bf16.vlgmr.msra.gmra.mrb[16].mxu1 %v13126_v8 }
 0x1d4   :  { %7057 = vmatpush1.bf16.msra.mxu0 %v10855_v9  ;;  %7385 = vmatpush1.bf16.msra.mxu1 %v10857_v26  ;;  %v1097_v9 = vld [vmem:[#allocation8 + $0x9a8] sm:$0xff]  ;;  %v10895_v26 = vcombine.low %v1084_v59, %v1088_v60  ;;  %v1124_v60 = vld [vmem:[#allocation8 + $0xa80] sm:$0xff] }
 0x1d5   :  { %7058 = vmatprep.subr.bf16.mxu0 %v10864_v10  ;;  %7386 = vmatprep.subr.bf16.mxu1 %v10866_v11  ;;  %v10897_v10 = vcombine.low %v1085_v61, %v1089_v23  ;;  %v10904_v11 = vcombine.high %v1092_v4, %v1096_v5  ;;  %v10906_v12 = vcombine.high %v1093_v6, %v1097_v9  ;;  %v1128_v61 = vld [vmem:[#allocation8 + $0xaa0] sm:$0xff]  ;;  %v1125_v23 = vld [vmem:[#allocation8 + $0xa88] sm:$0xff] }
 0x1d6   :  { %7088 = vmatprep.mubr.bf16.mxu0 %v13128_v24  ;;  %7416 = vmatprep.mubr.bf16.mxu1 %v13128_v24 }
 0x1d8   :  { %7059 = vmatpush1.bf16.msra.mxu0 %v10863_v27  ;;  %7387 = vmatpush1.bf16.msra.mxu1 %v10865_v28  ;;  %v1105_v27 = vld [vmem:[#allocation8 + $0x9e8] sm:$0xff]  ;;  %v10903_v28 = vcombine.low %v1092_v4, %v1096_v5  ;;  %v1132_v5 = vld [vmem:[#allocation8 + $0xac0] sm:$0xff] }
 0x1d9   :  { %7060 = vmatprep.subr.bf16.mxu0 %v10872_v30  ;;  %7388 = vmatprep.subr.bf16.mxu1 %v10874_v33  ;;  %v10905_v30 = vcombine.low %v1093_v6, %v1097_v9  ;;  %v10912_v33 = vcombine.high %v1100_v18, %v1104_v0  ;;  %v10914_v31 = vcombine.high %v1101_v22, %v1105_v27  ;;  %v1136_v6 = vld [vmem:[#allocation8 + $0xae0] sm:$0xff]  ;;  %v1133_v9 = vld [vmem:[#allocation8 + $0xac8] sm:$0xff] }
 0x1dc   :  { %7061 = vmatpush1.bf16.msra.mxu0 %v10871_v42  ;;  %7389 = vmatpush1.bf16.msra.mxu1 %v10873_v45  ;;  %v1113_v42 = vld [vmem:[#allocation8 + $0xa28] sm:$0xff]  ;;  %v10911_v45 = vcombine.low %v1100_v18, %v1104_v0  ;;  %v1140_v0 = vld [vmem:[#allocation8 + $0xb00] sm:$0xff] }
 0x1dd   :  { %7062 = vmatprep.subr.bf16.mxu0 %v10880_v46  ;;  %7390 = vmatprep.subr.bf16.mxu1 %v10882_v47  ;;  %v10913_v46 = vcombine.low %v1101_v22, %v1105_v27  ;;  %v10920_v47 = vcombine.high %v1108_v34, %v1112_v35  ;;  %v10922_v48 = vcombine.high %v1109_v40, %v1113_v42  ;;  %v1144_v27 = vld [vmem:[#allocation8 + $0xb20] sm:$0xff] }
 0x1de   :  { %v203_v22 = vrot.slane %v13039_v15, %v13076_v21 }
 0x1e0   :  { %7063 = vmatpush1.bf16.msra.mxu0 %v10879_v54  ;;  %7391 = vmatpush1.bf16.msra.mxu1 %v10881_v13  ;;  %v1121_v54 = vld [vmem:[#allocation8 + $0xa68] sm:$0xff]  ;;  %v10919_v13 = vcombine.low %v1108_v34, %v1112_v35  ;;  %v10952_v34 = vcombine.high %v1140_v0, %v1144_v27 }
 0x1e1   :  { %7064 = vmatprep.subr.bf16.mxu0 %v10888_v55  ;;  %7392 = vmatprep.subr.bf16.mxu1 %v10890_v58  ;;  %v10921_v55 = vcombine.low %v1109_v40, %v1113_v42  ;;  %v10928_v58 = vcombine.high %v1116_v49, %v1120_v52  ;;  %v10930_v59 = vcombine.high %v1117_v53, %v1121_v54  ;;  %v1148_v40 = vld [vmem:[#allocation8 + $0xb40] sm:$0xff] }
 0x1e2   :  { %v215_v42 = vrot.slane %v13039_v15, %v13116_v39  ;;  %v1161_v15 = vld [vmem:[#allocation8 + $0xba8] sm:$0xff] }
 0x1e4   :  { %7065 = vmatpush1.bf16.msra.mxu0 %v10887_v62  ;;  %7393 = vmatpush1.bf16.msra.mxu1 %v10889_v63  ;;  %v1129_v62 = vld [vmem:[#allocation8 + $0xaa8] sm:$0xff]  ;;  %v10927_v63 = vcombine.low %v1116_v49, %v1120_v52  ;;  %v10951_v49 = vcombine.low %v1140_v0, %v1144_v27 }
 0x1e5   :  { %7066 = vmatprep.subr.bf16.mxu0 %v10896_v2  ;;  %7394 = vmatprep.subr.bf16.mxu1 %v10898_v3  ;;  %v10929_v2 = vcombine.low %v1117_v53, %v1121_v54  ;;  %v10936_v3 = vcombine.high %v1124_v60, %v1128_v61  ;;  %v10938_v4 = vcombine.high %v1125_v23, %v1129_v62 }
 0x1e8   :  { %7067 = vmatpush1.bf16.msra.mxu0 %v10895_v26  ;;  %7395 = vmatpush1.bf16.msra.mxu1 %v10897_v10  ;;  %v1137_v26 = vld [vmem:[#allocation8 + $0xae8] sm:$0xff]  ;;  %v10935_v10 = vcombine.low %v1124_v60, %v1128_v61 }
 0x1e9   :  { %7068 = vmatprep.subr.bf16.mxu0 %v10904_v11  ;;  %7396 = vmatprep.subr.bf16.mxu1 %v10906_v12  ;;  %v10937_v11 = vcombine.low %v1125_v23, %v1129_v62  ;;  %v10944_v12 = vcombine.high %v1132_v5, %v1136_v6  ;;  %v10946_v18 = vcombine.high %v1133_v9, %v1137_v26  ;;  %v1164_v62 = vld [vmem:[#allocation8 + $0xbc0] sm:$0xff] }
 0x1ec   :  { %7069 = vmatpush1.bf16.msra.mxu0 %v10903_v28  ;;  %7397 = vmatpush1.bf16.msra.mxu1 %v10905_v30  ;;  %v1141_v28 = vld [vmem:[#allocation8 + $0xb08] sm:$0xff] }
 0x1ed   :  { %7070 = vmatprep.subr.bf16.mxu0 %v10912_v33  ;;  %7398 = vmatprep.subr.bf16.mxu1 %v10914_v31  ;;  %v1145_v30 = vld [vmem:[#allocation8 + $0xb28] sm:$0xff]  ;;  %v10943_v33 = vcombine.low %v1132_v5, %v1136_v6  ;;  %v10945_v31 = vcombine.low %v1133_v9, %v1137_v26  ;;  %v1172_v9 = vld [vmem:[#allocation8 + $0xc00] sm:$0xff] }
 0x1ee   :  { %v10954_v35 = vcombine.high %v1141_v28, %v1145_v30  ;;  %v10953_v52 = vcombine.low %v1141_v28, %v1145_v30  ;;  %v1176_v26 = vld [vmem:[#allocation8 + $0xc20] sm:$0xff] }
 0x1ef   :  { %v1180_v28 = vld [vmem:[#allocation8 + $0xc40] sm:$0xff] }
 0x1f0   :  { %7071 = vmatpush1.bf16.msra.mxu0 %v10911_v45  ;;  %7399 = vmatpush1.bf16.msra.mxu1 %v10913_v46  ;;  %v545_v45 = vadd.f32 %v13055_v32, %v203_v22  ;;  %v1152_v46 = vld [vmem:[#allocation8 + $0xb60] sm:$0xff]  ;;  %v10984_v22 = vcombine.high %v1172_v9, %v1176_v26 }
 0x1f1   :  { %7072 = vmatprep.subr.bf16.mxu0 %v10920_v47  ;;  %7400 = vmatprep.subr.bf16.mxu1 %v10922_v48  ;;  %v1149_v47 = vld [vmem:[#allocation8 + $0xb48] sm:$0xff]  ;;  %v10960_v53 = vcombine.high %v1148_v40, %v1152_v46  ;;  %v10959_v32 = vcombine.low %v1148_v40, %v1152_v46  ;;  %v1184_v30 = vld [vmem:[#allocation8 + $0xc60] sm:$0xff]  ;;  %v10983_v40 = vcombine.low %v1172_v9, %v1176_v26 }
 0x1f2   :  { %v1153_v48 = vld [vmem:[#allocation8 + $0xb68] sm:$0xff]  ;;  %12548 = vtanh.f32 %v545_v45  ;;  %v10992_v45 = vcombine.high %v1180_v28, %v1184_v30 }
 0x1f3   :  { %v10962_v54 = vcombine.high %v1149_v47, %v1153_v48  ;;  %v10961_v60 = vcombine.low %v1149_v47, %v1153_v48  ;;  %v1188_v47 = vld [vmem:[#allocation8 + $0xc80] sm:$0xff] }
 0x1f4   :  { %7073 = vmatpush1.bf16.msra.mxu0 %v10919_v13  ;;  %7401 = vmatpush1.bf16.msra.mxu1 %v10921_v55  ;;  %v1156_v13 = vld [vmem:[#allocation8 + $0xb80] sm:$0xff]  ;;  %v588_v55 = vadd.f32 %v13096_v44, %v215_v42 }
 0x1f5   :  { %7074 = vmatprep.subr.bf16.mxu0 %v10928_v58  ;;  %7402 = vmatprep.subr.bf16.mxu1 %v10930_v59  ;;  %v1160_v58 = vld [vmem:[#allocation8 + $0xba0] sm:$0xff]  ;;  %v1157_v59 = vld [vmem:[#allocation8 + $0xb88] sm:$0xff] }
 0x1f6   :  { %v10968_v61 = vcombine.high %v1156_v13, %v1160_v58  ;;  %v10970_v23 = vcombine.high %v1157_v59, %v1161_v15  ;;  %12550 = vtanh.f32 %v588_v55  ;;  %v10967_v44 = vcombine.low %v1156_v13, %v1160_v58  ;;  %v1192_v48 = vld [vmem:[#allocation8 + $0xca0] sm:$0xff] }
 0x1f7   :  { %v11000_v55 = vcombine.high %v1188_v47, %v1192_v48 }
 0x1f8   :  { %7075 = vmatpush1.bf16.msra.mxu0 %v10927_v63  ;;  %7403 = vmatpush1.bf16.msra.mxu1 %v10929_v2  ;;  %v1168_v63 = vld [vmem:[#allocation8 + $0xbe0] sm:$0xff]  ;;  %v1165_v2 = vld [vmem:[#allocation8 + $0xbc8] sm:$0xff] }
 0x1f9   :  { %7076 = vmatprep.subr.bf16.mxu0 %v10936_v3  ;;  %7404 = vmatprep.subr.bf16.mxu1 %v10938_v4  ;;  %v1169_v3 = vld [vmem:[#allocation8 + $0xbe8] sm:$0xff]  ;;  %v10969_v4 = vcombine.low %v1157_v59, %v1161_v15  ;;  %v10976_v5 = vcombine.high %v1164_v62, %v1168_v63  ;;  %v1196_v59 = vld [vmem:[#allocation8 + $0xcc0] sm:$0xff] }
 0x1fa   :  { %v10978_v6 = vcombine.high %v1165_v2, %v1169_v3  ;;  %v10977_v0 = vcombine.low %v1165_v2, %v1169_v3  ;;  %v1200_v15 = vld [vmem:[#allocation8 + $0xce0] sm:$0xff] }
 0x1fb   :  { %v1204_v2 = vld [vmem:[#allocation8 + $0xd00] sm:$0xff] }
 0x1fc   :  { %7077 = vmatpush1.bf16.msra.mxu0 %v10935_v10  ;;  %7405 = vmatpush1.bf16.msra.mxu1 %v10937_v11  ;;  %v1173_v10 = vld [vmem:[#allocation8 + $0xc08] sm:$0xff]  ;;  %v1208_v3 = vld [vmem:[#allocation8 + $0xd20] sm:$0xff] }
 0x1fd   :  { %7078 = vmatprep.subr.bf16.mxu0 %v10944_v12  ;;  %7406 = vmatprep.subr.bf16.mxu1 %v10946_v18  ;;  %v1177_v11 = vld [vmem:[#allocation8 + $0xc28] sm:$0xff]  ;;  %v12549_v12 = vpop.eup %12548  ;;  %v10975_v18 = vcombine.low %v1164_v62, %v1168_v63  ;;  %v11008_v62 = vcombine.high %v1196_v59, %v1200_v15  ;;  %v11016_v9 = vcombine.high %v1204_v2, %v1208_v3 }
 0x1fe   :  { %v10986_v27 = vcombine.high %v1173_v10, %v1177_v11  ;;  %v10985_v42 = vcombine.low %v1173_v10, %v1177_v11  ;;  %v1212_v10 = vld [vmem:[#allocation8 + $0xd40] sm:$0xff] }
 0x1ff   :  { %v1216_v11 = vld [vmem:[#allocation8 + $0xd60] sm:$0xff] }
 0x200   :  { %7079 = vmatpush1.bf16.msra.mxu0 %v10943_v33  ;;  %7407 = vmatpush1.bf16.msra.mxu1 %v10945_v31  ;;  %v1181_v33 = vld [vmem:[#allocation8 + $0xc48] sm:$0xff] }
 0x201   :  { %7080 = vmatprep.subr.bf16.mxu0 %v10952_v34  ;;  %7408 = vmatprep.subr.bf16.mxu1 %v10954_v35  ;;  %v1185_v31 = vld [vmem:[#allocation8 + $0xc68] sm:$0xff]  ;;  %v12551_v34 = vpop.eup %12550  ;;  %v13140_v35 = vpack.c.bf16 %v12549_v12, %v12549_v12 }
 0x202   :  { %v10994_v46 = vcombine.high %v1181_v33, %v1185_v31  ;;  %v10993_v13 = vcombine.low %v1181_v33, %v1185_v31  ;;  %v1213_v12 = vld [vmem:[#allocation8 + $0xd48] sm:$0xff]  ;;  %v1224_v33 = vld [vmem:[#allocation8 + $0xda0] sm:$0xff] }
 0x203   :  { %v1221_v31 = vld [vmem:[#allocation8 + $0xd88] sm:$0xff] }
 0x204   :  { %7081 = vmatpush1.bf16.msra.mxu0 %v10951_v49  ;;  %7409 = vmatpush1.bf16.msra.mxu1 %v10953_v52  ;;  %v1189_v49 = vld [vmem:[#allocation8 + $0xc88] sm:$0xff] }
 0x205   :  { %7082 = vmatprep.subr.bf16.mxu0 %v10960_v53  ;;  %7410 = vmatprep.subr.bf16.mxu1 %v10962_v54  ;;  %v1193_v52 = vld [vmem:[#allocation8 + $0xca8] sm:$0xff]  ;;  %v13142_v53 = vpack.c.bf16 %v12551_v34, %v12551_v34  ;;  %v10991_v54 = vcombine.low %v1180_v28, %v1184_v30  ;;  %v1220_v30 = vld [vmem:[#allocation8 + $0xd80] sm:$0xff] }
 0x206   :  { %v11002_v58 = vcombine.high %v1189_v49, %v1193_v52  ;;  %v1225_v34 = vld [vmem:[#allocation8 + $0xda8] sm:$0xff] }
 0x208   :  { %7083 = vmatpush1.bf16.msra.mxu0 %v10959_v32  ;;  %7411 = vmatpush1.bf16.msra.mxu1 %v10961_v60  ;;  %v1197_v32 = vld [vmem:[#allocation8 + $0xcc8] sm:$0xff] }
 0x209   :  { %7084 = vmatprep.subr.bf16.mxu0 %v10968_v61  ;;  %7412 = vmatprep.subr.bf16.mxu1 %v10970_v23  ;;  %v1201_v60 = vld [vmem:[#allocation8 + $0xce8] sm:$0xff]  ;;  %v10999_v61 = vcombine.low %v1188_v47, %v1192_v48  ;;  %v11001_v23 = vcombine.low %v1189_v49, %v1193_v52  ;;  %v1228_v47 = vld [vmem:[#allocation8 + $0xdc0] sm:$0xff] }
 0x20a   :  { %v11010_v63 = vcombine.high %v1197_v32, %v1201_v60  ;;  %v1232_v48 = vld [vmem:[#allocation8 + $0xde0] sm:$0xff]  ;;  %v1229_v49 = vld [vmem:[#allocation8 + $0xdc8] sm:$0xff] }
 0x20b   :  { %v1233_v52 = vld [vmem:[#allocation8 + $0xde8] sm:$0xff] }
 0x20c   :  { %7085 = vmatpush1.bf16.msra.mxu0 %v10967_v44  ;;  %7413 = vmatpush1.bf16.msra.mxu1 %v10969_v4  ;;  %v1205_v44 = vld [vmem:[#allocation8 + $0xd08] sm:$0xff] }
 0x20d   :  { %7086 = vmatprep.subr.bf16.mxu0 %v10976_v5  ;;  %7414 = vmatprep.subr.bf16.mxu1 %v10978_v6  ;;  %v1209_v4 = vld [vmem:[#allocation8 + $0xd28] sm:$0xff]  ;;  %v11007_v5 = vcombine.low %v1196_v59, %v1200_v15  ;;  %v11009_v6 = vcombine.low %v1197_v32, %v1201_v60  ;;  %v1236_v59 = vld [vmem:[#allocation8 + $0xe00] sm:$0xff] }
 0x20e   :  { %v11018_v26 = vcombine.high %v1205_v44, %v1209_v4  ;;  %v1240_v15 = vld [vmem:[#allocation8 + $0xe20] sm:$0xff]  ;;  %v1237_v32 = vld [vmem:[#allocation8 + $0xe08] sm:$0xff] }
 0x20f   :  { %v1241_v60 = vld [vmem:[#allocation8 + $0xe28] sm:$0xff] }
 0x210   :  { %7087 = vmatpush1.bf16.msra.mxu0 %v10975_v18  ;;  %7415 = vmatpush1.bf16.msra.mxu1 %v10977_v0  ;;  %v1217_v18 = vld [vmem:[#allocation8 + $0xd68] sm:$0xff]  ;;  %v11015_v0 = vcombine.low %v1204_v2, %v1208_v3  ;;  %v1244_v2 = vld [vmem:[#allocation8 + $0xe40] sm:$0xff] }
 0x211   :  { %7097 = vmatprep.subr.bf16.mxu0 %v10984_v22  ;;  %7425 = vmatprep.subr.bf16.mxu1 %v10986_v27  ;;  %v11017_v22 = vcombine.low %v1205_v44, %v1209_v4  ;;  %v11024_v27 = vcombine.high %v1212_v10, %v1216_v11  ;;  %v11026_v28 = vcombine.high %v1213_v12, %v1217_v18  ;;  %v1248_v3 = vld [vmem:[#allocation8 + $0xe60] sm:$0xff]  ;;  %v1245_v44 = vld [vmem:[#allocation8 + $0xe48] sm:$0xff] }
 0x212   :  { %v1249_v4 = vld [vmem:[#allocation8 + $0xe68] sm:$0xff] }
 0x213   :  { %7089 = vmatmul.mubr.bf16.vlgmr.msra.gmra.mrb[16].mxu0 %v13140_v35  ;;  %7417 = vmatmul.mubr.bf16.vlgmr.msra.gmra.mrb[16].mxu1 %v13140_v35 }
 0x214   :  { %7098 = vmatpush1.bf16.msra.mxu0 %v10983_v40  ;;  %7426 = vmatpush1.bf16.msra.mxu1 %v10985_v42  ;;  %v11023_v40 = vcombine.low %v1212_v10, %v1216_v11  ;;  %v11025_v42 = vcombine.low %v1213_v12, %v1217_v18  ;;  %v1252_v10 = vld [vmem:[#allocation8 + $0xe80] sm:$0xff]  ;;  %v1253_v12 = vld [vmem:[#allocation8 + $0xe88] sm:$0xff] }
 0x215   :  { %7099 = vmatprep.subr.bf16.mxu0 %v10992_v45  ;;  %7427 = vmatprep.subr.bf16.mxu1 %v10994_v46  ;;  %v11032_v45 = vcombine.high %v1220_v30, %v1224_v33  ;;  %v11034_v46 = vcombine.high %v1221_v31, %v1225_v34  ;;  %v1256_v11 = vld [vmem:[#allocation8 + $0xea0] sm:$0xff]  ;;  %v1257_v18 = vld [vmem:[#allocation8 + $0xea8] sm:$0xff] }
 0x216   :  { %7129 = vmatprep.mubr.bf16.mxu0 %v13142_v53  ;;  %7457 = vmatprep.mubr.bf16.mxu1 %v13142_v53 }
 0x218   :  { %7100 = vmatpush1.bf16.msra.mxu0 %v10991_v54  ;;  %7428 = vmatpush1.bf16.msra.mxu1 %v10993_v13  ;;  %v11031_v54 = vcombine.low %v1220_v30, %v1224_v33  ;;  %v11033_v13 = vcombine.low %v1221_v31, %v1225_v34  ;;  %v1260_v30 = vld [vmem:[#allocation8 + $0xec0] sm:$0xff]  ;;  %v1261_v31 = vld [vmem:[#allocation8 + $0xec8] sm:$0xff] }
 0x219   :  { %7101 = vmatprep.subr.bf16.mxu0 %v11000_v55  ;;  %7429 = vmatprep.subr.bf16.mxu1 %v11002_v58  ;;  %v11040_v55 = vcombine.high %v1228_v47, %v1232_v48  ;;  %v11042_v58 = vcombine.high %v1229_v49, %v1233_v52  ;;  %v1264_v33 = vld [vmem:[#allocation8 + $0xee0] sm:$0xff]  ;;  %v1265_v34 = vld [vmem:[#allocation8 + $0xee8] sm:$0xff] }
 0x21c   :  { %7102 = vmatpush1.bf16.msra.mxu0 %v10999_v61  ;;  %7430 = vmatpush1.bf16.msra.mxu1 %v11001_v23  ;;  %v11039_v61 = vcombine.low %v1228_v47, %v1232_v48  ;;  %v11041_v23 = vcombine.low %v1229_v49, %v1233_v52  ;;  %v1268_v47 = vld [vmem:[#allocation8 + $0xf00] sm:$0xff]  ;;  %v1269_v49 = vld [vmem:[#allocation8 + $0xf08] sm:$0xff] }
 0x21d   :  { %7103 = vmatprep.subr.bf16.mxu0 %v11008_v62  ;;  %7431 = vmatprep.subr.bf16.mxu1 %v11010_v63  ;;  %v11048_v62 = vcombine.high %v1236_v59, %v1240_v15  ;;  %v11050_v63 = vcombine.high %v1237_v32, %v1241_v60  ;;  %v1272_v48 = vld [vmem:[#allocation8 + $0xf20] sm:$0xff]  ;;  %v1273_v52 = vld [vmem:[#allocation8 + $0xf28] sm:$0xff] }
 0x220   :  { %7104 = vmatpush1.bf16.msra.mxu0 %v11007_v5  ;;  %7432 = vmatpush1.bf16.msra.mxu1 %v11009_v6  ;;  %v11047_v5 = vcombine.low %v1236_v59, %v1240_v15  ;;  %v11049_v6 = vcombine.low %v1237_v32, %v1241_v60  ;;  %v13149_v59 = vld [vmem:[#allocation7 + $0x8] sm:$0xff]  ;;  %v11080_v32 = vcombine.high %v1268_v47, %v1272_v48 }
 0x221   :  { %7105 = vmatprep.subr.bf16.mxu0 %v11016_v9  ;;  %7433 = vmatprep.subr.bf16.mxu1 %v11018_v26  ;;  %v11056_v9 = vcombine.high %v1244_v2, %v1248_v3  ;;  %v11058_v26 = vcombine.high %v1245_v44, %v1249_v4  ;;  %v223_v15 = vrot.slane %v13149_v59, %v13042_v16 }
 0x222   :  { %v11082_v60 = vcombine.high %v1269_v49, %v1273_v52 }
 0x224   :  { %7106 = vmatpush1.bf16.msra.mxu0 %v11015_v0  ;;  %7434 = vmatpush1.bf16.msra.mxu1 %v11017_v22  ;;  %v11055_v0 = vcombine.low %v1244_v2, %v1248_v3  ;;  %v11057_v22 = vcombine.low %v1245_v44, %v1249_v4  ;;  %v11079_v3 = vcombine.low %v1268_v47, %v1272_v48 }
 0x225   :  { %7107 = vmatprep.subr.bf16.mxu0 %v11024_v27  ;;  %7435 = vmatprep.subr.bf16.mxu1 %v11026_v28  ;;  %v11064_v27 = vcombine.high %v1252_v10, %v1256_v11  ;;  %v11066_v28 = vcombine.high %v1253_v12, %v1257_v18  ;;  %v11081_v44 = vcombine.low %v1269_v49, %v1273_v52 }
 0x226   :  { %v629_v4 = vadd.f32 %v13073_v7, %v223_v15  ;;  %v1296_v7 = vld [vmem:[#allocation8 + $0xfe0] sm:$0xff]  ;;  %v1309_v15 = vld [vmem:[#allocation8 + $0x1048] sm:$0xff] }
 0x228   :  { %7108 = vmatpush1.bf16.msra.mxu0 %v11023_v40  ;;  %7436 = vmatpush1.bf16.msra.mxu1 %v11025_v42  ;;  %v11063_v40 = vcombine.low %v1252_v10, %v1256_v11  ;;  %v11065_v42 = vcombine.low %v1253_v12, %v1257_v18  ;;  %v1285_v10 = vld [vmem:[#allocation8 + $0xf88] sm:$0xff] }
 0x229   :  { %7109 = vmatprep.subr.bf16.mxu0 %v11032_v45  ;;  %7437 = vmatprep.subr.bf16.mxu1 %v11034_v46  ;;  %v11072_v45 = vcombine.high %v1260_v30, %v1264_v33  ;;  %v11074_v46 = vcombine.high %v1261_v31, %v1265_v34  ;;  %v1289_v11 = vld [vmem:[#allocation8 + $0xfa8] sm:$0xff] }
 0x22c   :  { %7110 = vmatpush1.bf16.msra.mxu0 %v11031_v54  ;;  %7438 = vmatpush1.bf16.msra.mxu1 %v11033_v13  ;;  %v12594_v54 = vld [vmem:[#allocation7] sm:$0xff] }
 0x22d   :  { %7111 = vmatprep.subr.bf16.mxu0 %v11040_v55  ;;  %7439 = vmatprep.subr.bf16.mxu1 %v11042_v58  ;;  %v211_v13 = vrot.slane %v12594_v54, %v13113_v37  ;;  %v11071_v55 = vcombine.low %v1260_v30, %v1264_v33  ;;  %v11073_v58 = vcombine.low %v1261_v31, %v1265_v34 }
 0x22e   :  { %v11097_v33 = vcombine.low %v1285_v10, %v1289_v11 }
 0x22f   :  { %v586_v2 = vadd.f32 %v13094_v38, %v211_v13  ;;  %v1308_v13 = vld [vmem:[#allocation8 + $0x1040] sm:$0xff] }
 0x230   :  { %7112 = vmatpush1.bf16.msra.mxu0 %v11039_v61  ;;  %7440 = vmatpush1.bf16.msra.mxu1 %v11041_v23  ;;  %v1276_v61 = vld [vmem:[#allocation8 + $0xf40] sm:$0xff] }
 0x231   :  { %7113 = vmatprep.subr.bf16.mxu0 %v11048_v62  ;;  %7441 = vmatprep.subr.bf16.mxu1 %v11050_v63  ;;  %v1280_v23 = vld [vmem:[#allocation8 + $0xf60] sm:$0xff]  ;;  %v1277_v62 = vld [vmem:[#allocation8 + $0xf48] sm:$0xff]  ;;  %12552 = vtanh.f32 %v586_v2 }
 0x232   :  { %v1281_v63 = vld [vmem:[#allocation8 + $0xf68] sm:$0xff]  ;;  %v11087_v12 = vcombine.low %v1276_v61, %v1280_v23  ;;  %12554 = vtanh.f32 %v629_v4 }
 0x233   :  { %v11089_v18 = vcombine.low %v1277_v62, %v1281_v63  ;;  %v1317_v4 = vld [vmem:[#allocation8 + $0x1088] sm:$0xff] }
 0x234   :  { %7114 = vmatpush1.bf16.msra.mxu0 %v11047_v5  ;;  %7442 = vmatpush1.bf16.msra.mxu1 %v11049_v6  ;;  %v11088_v5 = vcombine.high %v1276_v61, %v1280_v23  ;;  %v11090_v6 = vcombine.high %v1277_v62, %v1281_v63 }
 0x235   :  { %7115 = vmatprep.subr.bf16.mxu0 %v11056_v9  ;;  %7443 = vmatprep.subr.bf16.mxu1 %v11058_v26  ;;  %v1284_v9 = vld [vmem:[#allocation8 + $0xf80] sm:$0xff] }
 0x236   :  { %v1288_v26 = vld [vmem:[#allocation8 + $0xfa0] sm:$0xff] }
 0x237   :  { %v11096_v38 = vcombine.high %v1284_v9, %v1288_v26  ;;  %v11095_v30 = vcombine.low %v1284_v9, %v1288_v26 }
 0x238   :  { %7116 = vmatpush1.bf16.msra.mxu0 %v11055_v0  ;;  %7444 = vmatpush1.bf16.msra.mxu1 %v11057_v22  ;;  %v11098_v0 = vcombine.high %v1285_v10, %v1289_v11  ;;  %v1292_v22 = vld [vmem:[#allocation8 + $0xfc0] sm:$0xff] }
 0x239   :  { %7117 = vmatprep.subr.bf16.mxu0 %v11064_v27  ;;  %7445 = vmatprep.subr.bf16.mxu1 %v11066_v28  ;;  %v1293_v27 = vld [vmem:[#allocation8 + $0xfc8] sm:$0xff]  ;;  %v11104_v31 = vcombine.high %v1292_v22, %v1296_v7  ;;  %v11103_v47 = vcombine.low %v1292_v22, %v1296_v7  ;;  %v1324_v11 = vld [vmem:[#allocation8 + $0x10c0] sm:$0xff] }
 0x23a   :  { %v1297_v28 = vld [vmem:[#allocation8 + $0xfe8] sm:$0xff] }
 0x23b   :  { %v11106_v34 = vcombine.high %v1293_v27, %v1297_v28  ;;  %v11105_v48 = vcombine.low %v1293_v27, %v1297_v28  ;;  %v12553_v54 = vpop.eup %12552  ;;  %v1332_v28 = vld [vmem:[#allocation8 + $0x1100] sm:$0xff] }
 0x23c   :  { %7118 = vmatpush1.bf16.msra.mxu0 %v11063_v40  ;;  %7446 = vmatpush1.bf16.msra.mxu1 %v11065_v42  ;;  %v1300_v40 = vld [vmem:[#allocation8 + $0x1000] sm:$0xff]  ;;  %v13155_v61 = vpack.c.bf16 %v12553_v54, %v12553_v54 }
 0x23d   :  { %7119 = vmatprep.subr.bf16.mxu0 %v11072_v45  ;;  %7447 = vmatprep.subr.bf16.mxu1 %v11074_v46  ;;  %v1304_v42 = vld [vmem:[#allocation8 + $0x1020] sm:$0xff]  ;;  %v1301_v45 = vld [vmem:[#allocation8 + $0x1008] sm:$0xff] }
 0x23e   :  { %v1305_v46 = vld [vmem:[#allocation8 + $0x1028] sm:$0xff]  ;;  %v11112_v49 = vcombine.high %v1300_v40, %v1304_v42 }
 0x23f   :  { %v11114_v52 = vcombine.high %v1301_v45, %v1305_v46  ;;  %v11113_v23 = vcombine.low %v1301_v45, %v1305_v46  ;;  %v1340_v46 = vld [vmem:[#allocation8 + $0x1140] sm:$0xff] }
 0x240   :  { %7120 = vmatpush1.bf16.msra.mxu0 %v11071_v55  ;;  %7448 = vmatpush1.bf16.msra.mxu1 %v11073_v58  ;;  %v12555_v55 = vpop.eup %12554  ;;  %v1312_v58 = vld [vmem:[#allocation8 + $0x1060] sm:$0xff] }
 0x241   :  { %7121 = vmatprep.subr.bf16.mxu0 %v11080_v32  ;;  %7449 = vmatprep.subr.bf16.mxu1 %v11082_v60  ;;  %v1313_v32 = vld [vmem:[#allocation8 + $0x1068] sm:$0xff]  ;;  %v11111_v60 = vcombine.low %v1300_v40, %v1304_v42  ;;  %v13157_v62 = vpack.c.bf16 %v12555_v55, %v12555_v55  ;;  %v11120_v63 = vcombine.high %v1308_v13, %v1312_v58 }
 0x242   :  { %v11122_v2 = vcombine.high %v1309_v15, %v1313_v32  ;;  %v11121_v9 = vcombine.low %v1309_v15, %v1313_v32  ;;  %v1352_v15 = vld [vmem:[#allocation8 + $0x11a0] sm:$0xff]  ;;  %v1349_v32 = vld [vmem:[#allocation8 + $0x1188] sm:$0xff] }
 0x244   :  { %7122 = vmatpush1.bf16.msra.mxu0 %v11079_v3  ;;  %7450 = vmatpush1.bf16.msra.mxu1 %v11081_v44  ;;  %v1316_v3 = vld [vmem:[#allocation8 + $0x1080] sm:$0xff] }
 0x245   :  { %7123 = vmatprep.subr.bf16.mxu0 %v11088_v5  ;;  %7451 = vmatprep.subr.bf16.mxu1 %v11090_v6  ;;  %v1320_v44 = vld [vmem:[#allocation8 + $0x10a0] sm:$0xff]  ;;  %v1321_v5 = vld [vmem:[#allocation8 + $0x10a8] sm:$0xff]  ;;  %v11119_v6 = vcombine.low %v1308_v13, %v1312_v58 }
 0x246   :  { %v11128_v26 = vcombine.high %v1316_v3, %v1320_v44  ;;  %v11130_v10 = vcombine.high %v1317_v4, %v1321_v5  ;;  %v11129_v22 = vcombine.low %v1317_v4, %v1321_v5  ;;  %v1348_v58 = vld [vmem:[#allocation8 + $0x1180] sm:$0xff]  ;;  %v1357_v5 = vld [vmem:[#allocation8 + $0x11c8] sm:$0xff] }
 0x247   :  { %v1360_v4 = vld [vmem:[#allocation8 + $0x11e0] sm:$0xff] }
 0x248   :  { %7124 = vmatpush1.bf16.msra.mxu0 %v11087_v12  ;;  %7452 = vmatpush1.bf16.msra.mxu1 %v11089_v18  ;;  %v1328_v12 = vld [vmem:[#allocation8 + $0x10e0] sm:$0xff]  ;;  %v1325_v18 = vld [vmem:[#allocation8 + $0x10c8] sm:$0xff] }
 0x249   :  { %7125 = vmatprep.subr.bf16.mxu0 %v11096_v38  ;;  %7453 = vmatprep.subr.bf16.mxu1 %v11098_v0  ;;  %v1329_v38 = vld [vmem:[#allocation8 + $0x10e8] sm:$0xff]  ;;  %v11127_v0 = vcombine.low %v1316_v3, %v1320_v44  ;;  %v11136_v7 = vcombine.high %v1324_v11, %v1328_v12  ;;  %v1356_v44 = vld [vmem:[#allocation8 + $0x11c0] sm:$0xff] }
 0x24a   :  { %v11138_v27 = vcombine.high %v1325_v18, %v1329_v38  ;;  %v11137_v40 = vcombine.low %v1325_v18, %v1329_v38  ;;  %v1368_v18 = vld [vmem:[#allocation8 + $0x1220] sm:$0xff]  ;;  %v1365_v38 = vld [vmem:[#allocation8 + $0x1208] sm:$0xff] }
 0x24c   :  { %7126 = vmatpush1.bf16.msra.mxu0 %v11095_v30  ;;  %7454 = vmatpush1.bf16.msra.mxu1 %v11097_v33  ;;  %v1336_v30 = vld [vmem:[#allocation8 + $0x1120] sm:$0xff]  ;;  %v1333_v33 = vld [vmem:[#allocation8 + $0x1108] sm:$0xff] }
 0x24d   :  { %7127 = vmatprep.subr.bf16.mxu0 %v11104_v31  ;;  %7455 = vmatprep.subr.bf16.mxu1 %v11106_v34  ;;  %v1337_v31 = vld [vmem:[#allocation8 + $0x1128] sm:$0xff]  ;;  %v11135_v34 = vcombine.low %v1324_v11, %v1328_v12  ;;  %v11144_v42 = vcombine.high %v1332_v28, %v1336_v30  ;;  %v1364_v12 = vld [vmem:[#allocation8 + $0x1200] sm:$0xff] }
 0x24e   :  { %v11146_v45 = vcombine.high %v1333_v33, %v1337_v31  ;;  %v11145_v54 = vcombine.low %v1333_v33, %v1337_v31  ;;  %v1376_v33 = vld [vmem:[#allocation8 + $0x1260] sm:$0xff]  ;;  %v1373_v31 = vld [vmem:[#allocation8 + $0x1248] sm:$0xff] }
 0x250   :  { %7128 = vmatpush1.bf16.msra.mxu0 %v11103_v47  ;;  %7456 = vmatpush1.bf16.msra.mxu1 %v11105_v48  ;;  %v1344_v47 = vld [vmem:[#allocation8 + $0x1160] sm:$0xff]  ;;  %v1341_v48 = vld [vmem:[#allocation8 + $0x1148] sm:$0xff] }
 0x251   :  { %7138 = vmatprep.subr.bf16.mxu0 %v11112_v49  ;;  %7466 = vmatprep.subr.bf16.mxu1 %v11114_v52  ;;  %v1345_v49 = vld [vmem:[#allocation8 + $0x1168] sm:$0xff]  ;;  %v11143_v52 = vcombine.low %v1332_v28, %v1336_v30  ;;  %v11152_v13 = vcombine.high %v1340_v46, %v1344_v47  ;;  %v1372_v30 = vld [vmem:[#allocation8 + $0x1240] sm:$0xff] }
 0x252   :  { %v11154_v55 = vcombine.high %v1341_v48, %v1345_v49 }
 0x253   :  { %7130 = vmatmul.mubr.bf16.vlgmr.msra.gmra.mrb[16].mxu0 %v13155_v61  ;;  %7458 = vmatmul.mubr.bf16.vlgmr.msra.gmra.mrb[16].mxu1 %v13155_v61 }
 0x254   :  { %7139 = vmatpush1.bf16.msra.mxu0 %v11111_v60  ;;  %7170 = vmatprep.mubr.bf16.mxu0 %v13157_v62  ;;  %v1353_v60 = vld [vmem:[#allocation8 + $0x11a8] sm:$0xff] }
 0x255   :  { %7467 = vmatpush1.bf16.msra.mxu1 %v11113_v23  ;;  %7498 = vmatprep.mubr.bf16.mxu1 %v13157_v62  ;;  %v11151_v23 = vcombine.low %v1340_v46, %v1344_v47  ;;  %v11162_v3 = vcombine.high %v1349_v32, %v1353_v60  ;;  %v1380_v47 = vld [vmem:[#allocation8 + $0x1280] sm:$0xff] }
 0x256   :  { %7140 = vmatprep.subr.bf16.mxu0 %v11120_v63  ;;  %7468 = vmatprep.subr.bf16.mxu1 %v11122_v2  ;;  %v11153_v63 = vcombine.low %v1341_v48, %v1345_v49  ;;  %v11160_v2 = vcombine.high %v1348_v58, %v1352_v15  ;;  %v1384_v48 = vld [vmem:[#allocation8 + $0x12a0] sm:$0xff]  ;;  %v1381_v49 = vld [vmem:[#allocation8 + $0x1288] sm:$0xff] }
 0x258   :  { %7141 = vmatpush1.bf16.msra.mxu0 %v11119_v6  ;;  %v1361_v6 = vld [vmem:[#allocation8 + $0x11e8] sm:$0xff] }
 0x259   :  { %7469 = vmatpush1.bf16.msra.mxu1 %v11121_v9  ;;  %7142 = vmatprep.subr.bf16.mxu0 %v11128_v26  ;;  %v11159_v9 = vcombine.low %v1348_v58, %v1352_v15  ;;  %v11161_v26 = vcombine.low %v1349_v32, %v1353_v60  ;;  %v11170_v11 = vcombine.high %v1357_v5, %v1361_v6  ;;  %v1388_v15 = vld [vmem:[#allocation8 + $0x12c0] sm:$0xff]  ;;  %v1389_v60 = vld [vmem:[#allocation8 + $0x12c8] sm:$0xff] }
 0x25a   :  { %7470 = vmatprep.subr.bf16.mxu1 %v11130_v10  ;;  %v11168_v10 = vcombine.high %v1356_v44, %v1360_v4  ;;  %v1392_v32 = vld [vmem:[#allocation8 + $0x12e0] sm:$0xff] }
 0x25c   :  { %7143 = vmatpush1.bf16.msra.mxu0 %v11127_v0  ;;  %v1369_v0 = vld [vmem:[#allocation8 + $0x1228] sm:$0xff] }
 0x25d   :  { %7471 = vmatpush1.bf16.msra.mxu1 %v11129_v22  ;;  %7144 = vmatprep.subr.bf16.mxu0 %v11136_v7  ;;  %v11167_v22 = vcombine.low %v1356_v44, %v1360_v4  ;;  %v11169_v7 = vcombine.low %v1357_v5, %v1361_v6  ;;  %v11178_v28 = vcombine.high %v1365_v38, %v1369_v0  ;;  %v1396_v4 = vld [vmem:[#allocation8 + $0x1300] sm:$0xff]  ;;  %v1397_v6 = vld [vmem:[#allocation8 + $0x1308] sm:$0xff] }
 0x25e   :  { %7472 = vmatprep.subr.bf16.mxu1 %v11138_v27  ;;  %v11176_v27 = vcombine.high %v1364_v12, %v1368_v18  ;;  %v1400_v5 = vld [vmem:[#allocation8 + $0x1320] sm:$0xff] }
 0x260   :  { %7145 = vmatpush1.bf16.msra.mxu0 %v11135_v34  ;;  %v1377_v34 = vld [vmem:[#allocation8 + $0x1268] sm:$0xff] }
 0x261   :  { %7473 = vmatpush1.bf16.msra.mxu1 %v11137_v40  ;;  %7146 = vmatprep.subr.bf16.mxu0 %v11144_v42  ;;  %v11175_v40 = vcombine.low %v1364_v12, %v1368_v18  ;;  %v11177_v42 = vcombine.low %v1365_v38, %v1369_v0  ;;  %v11186_v46 = vcombine.high %v1373_v31, %v1377_v34  ;;  %v1404_v38 = vld [vmem:[#allocation8 + $0x1340] sm:$0xff] }
 0x262   :  { %7474 = vmatprep.subr.bf16.mxu1 %v11146_v45  ;;  %v11184_v45 = vcombine.high %v1372_v30, %v1376_v33  ;;  %v11208_v12 = vcombine.high %v1396_v4, %v1400_v5  ;;  %v1408_v0 = vld [vmem:[#allocation8 + $0x1360] sm:$0xff] }
 0x264   :  { %7147 = vmatpush1.bf16.msra.mxu0 %v11143_v52  ;;  %v1385_v52 = vld [vmem:[#allocation8 + $0x12a8] sm:$0xff] }
 0x265   :  { %7475 = vmatpush1.bf16.msra.mxu1 %v11145_v54  ;;  %7148 = vmatprep.subr.bf16.mxu0 %v11152_v13  ;;  %v11183_v54 = vcombine.low %v1372_v30, %v1376_v33  ;;  %v11185_v13 = vcombine.low %v1373_v31, %v1377_v34  ;;  %v11194_v58 = vcombine.high %v1381_v49, %v1385_v52  ;;  %v1412_v31 = vld [vmem:[#allocation8 + $0x1380] sm:$0xff] }
 0x266   :  { %7476 = vmatprep.subr.bf16.mxu1 %v11154_v55  ;;  %v11192_v55 = vcombine.high %v1380_v47, %v1384_v48  ;;  %v1416_v34 = vld [vmem:[#allocation8 + $0x13a0] sm:$0xff] }
 0x268   :  { %7149 = vmatpush1.bf16.msra.mxu0 %v11151_v23  ;;  %v1393_v23 = vld [vmem:[#allocation8 + $0x12e8] sm:$0xff] }
 0x269   :  { %7477 = vmatpush1.bf16.msra.mxu1 %v11153_v63  ;;  %7150 = vmatprep.subr.bf16.mxu0 %v11160_v2  ;;  %v11191_v63 = vcombine.low %v1380_v47, %v1384_v48  ;;  %v11193_v2 = vcombine.low %v1381_v49, %v1385_v52  ;;  %v11202_v44 = vcombine.high %v1389_v60, %v1393_v23  ;;  %v1420_v48 = vld [vmem:[#allocation8 + $0x13c0] sm:$0xff]  ;;  %v1421_v52 = vld [vmem:[#allocation8 + $0x13c8] sm:$0xff] }
 0x26a   :  { %7478 = vmatprep.subr.bf16.mxu1 %v11162_v3  ;;  %v11200_v3 = vcombine.high %v1388_v15, %v1392_v32  ;;  %v11224_v47 = vcombine.high %v1412_v31, %v1416_v34  ;;  %v1424_v49 = vld [vmem:[#allocation8 + $0x13e0] sm:$0xff] }
 0x26c   :  { %7151 = vmatpush1.bf16.msra.mxu0 %v11159_v9  ;;  %v1401_v9 = vld [vmem:[#allocation8 + $0x1328] sm:$0xff] }
 0x26d   :  { %7479 = vmatpush1.bf16.msra.mxu1 %v11161_v26  ;;  %7152 = vmatprep.subr.bf16.mxu0 %v11168_v10  ;;  %v219_v26 = vrot.slane %v13149_v59, %v13037_v14  ;;  %v11199_v10 = vcombine.low %v1388_v15, %v1392_v32  ;;  %v11210_v18 = vcombine.high %v1397_v6, %v1401_v9  ;;  %v1428_v32 = vld [vmem:[#allocation8 + $0x1400] sm:$0xff] }
 0x26e   :  { %7480 = vmatprep.subr.bf16.mxu1 %v11170_v11  ;;  %v11201_v11 = vcombine.low %v1389_v60, %v1393_v23  ;;  %v11209_v30 = vcombine.low %v1397_v6, %v1401_v9  ;;  %v11216_v59 = vcombine.high %v1404_v38, %v1408_v0  ;;  %v1432_v60 = vld [vmem:[#allocation8 + $0x1420] sm:$0xff]  ;;  %v1429_v23 = vld [vmem:[#allocation8 + $0x1408] sm:$0xff] }
 0x26f   :  { %v1440_v6 = vld [vmem:[#allocation8 + $0x1460] sm:$0xff] }
 0x270   :  { %7153 = vmatpush1.bf16.msra.mxu0 %v11167_v22  ;;  %v1405_v22 = vld [vmem:[#allocation8 + $0x1348] sm:$0xff] }
 0x271   :  { %7481 = vmatpush1.bf16.msra.mxu1 %v11169_v7  ;;  %7154 = vmatprep.subr.bf16.mxu0 %v11176_v27  ;;  %v1409_v7 = vld [vmem:[#allocation8 + $0x1368] sm:$0xff]  ;;  %v627_v27 = vadd.f32 %v13071_v1, %v219_v26  ;;  %v11239_v26 = vcombine.low %v1428_v32, %v1432_v60 }
 0x272   :  { %7482 = vmatprep.subr.bf16.mxu1 %v11178_v28  ;;  %v11207_v28 = vcombine.low %v1396_v4, %v1400_v5  ;;  %v11218_v33 = vcombine.high %v1405_v22, %v1409_v7  ;;  %v1436_v5 = vld [vmem:[#allocation8 + $0x1440] sm:$0xff] }
 0x273   :  { %12556 = vtanh.f32 %v627_v27 }
 0x274   :  { %7155 = vmatpush1.bf16.msra.mxu0 %v11175_v40  ;;  %v1413_v40 = vld [vmem:[#allocation8 + $0x1388] sm:$0xff]  ;;  %12558 = vtanh.f32 %v13110_v20  ;;  %v11231_v20 = vcombine.low %v1420_v48, %v1424_v49 }
 0x275   :  { %7483 = vmatpush1.bf16.msra.mxu1 %v11177_v42  ;;  %7156 = vmatprep.subr.bf16.mxu0 %v11184_v45  ;;  %v1417_v42 = vld [vmem:[#allocation8 + $0x13a8] sm:$0xff]  ;;  %v11215_v45 = vcombine.low %v1404_v38, %v1408_v0  ;;  %v11248_v38 = vcombine.high %v1436_v5, %v1440_v6  ;;  %v1444_v0 = vld [vmem:[#allocation8 + $0x1480] sm:$0xff]  ;;  %12560 = vtanh.f32 %v13108_v19 }
 0x276   :  { %7484 = vmatprep.subr.bf16.mxu1 %v11186_v46  ;;  %v11217_v46 = vcombine.low %v1405_v22, %v1409_v7  ;;  %v11226_v1 = vcombine.high %v1413_v40, %v1417_v42  ;;  %v1448_v22 = vld [vmem:[#allocation8 + $0x14a0] sm:$0xff]  ;;  %12562 = vtanh.f32 %v13089_v51 }
 0x277   :  { %12564 = vtanh.f32 %v13085_v25 }
 0x278   :  { %7157 = vmatpush1.bf16.msra.mxu0 %v11183_v54  ;;  %v1425_v54 = vld [vmem:[#allocation8 + $0x13e8] sm:$0xff]  ;;  %12566 = vtanh.f32 %v13124_v57 }
 0x279   :  { %7485 = vmatpush1.bf16.msra.mxu1 %v11185_v13  ;;  %7158 = vmatprep.subr.bf16.mxu0 %v11192_v55  ;;  %v11223_v13 = vcombine.low %v1412_v31, %v1416_v34  ;;  %v11225_v55 = vcombine.low %v1413_v40, %v1417_v42  ;;  %v11234_v15 = vcombine.high %v1421_v52, %v1425_v54  ;;  %v1452_v40 = vld [vmem:[#allocation8 + $0x14c0] sm:$0xff]  ;;  %12568 = vtanh.f32 %v13122_v56 }
 0x27a   :  { %7486 = vmatprep.subr.bf16.mxu1 %v11194_v58  ;;  %v11232_v58 = vcombine.high %v1420_v48, %v1424_v49  ;;  %v11256_v31 = vcombine.high %v1444_v0, %v1448_v22  ;;  %v1456_v42 = vld [vmem:[#allocation8 + $0x14e0] sm:$0xff] }
 0x27b   :  { %v11264_v48 = vcombine.high %v1452_v40, %v1456_v42 }
 0x27c   :  { %7159 = vmatpush1.bf16.msra.mxu0 %v11191_v63  ;;  %v1433_v63 = vld [vmem:[#allocation8 + $0x1428] sm:$0xff] }
 0x27d   :  { %7487 = vmatpush1.bf16.msra.mxu1 %v11193_v2  ;;  %7160 = vmatprep.subr.bf16.mxu0 %v11200_v3  ;;  %v11233_v2 = vcombine.low %v1421_v52, %v1425_v54  ;;  %v11240_v3 = vcombine.high %v1428_v32, %v1432_v60  ;;  %v11242_v4 = vcombine.high %v1429_v23, %v1433_v63  ;;  %v1460_v52 = vld [vmem:[#allocation8 + $0x1500] sm:$0xff] }
 0x27e   :  { %7488 = vmatprep.subr.bf16.mxu1 %v11202_v44  ;;  %v12557_v44 = vpop.eup %12556  ;;  %v1464_v54 = vld [vmem:[#allocation8 + $0x1520] sm:$0xff] }
 0x27f   :  { %v12559_v9 = vpop.eup %12558  ;;  %v11272_v32 = vcombine.high %v1460_v52, %v1464_v54 }
 0x280   :  { %7161 = vmatpush1.bf16.msra.mxu0 %v11199_v10  ;;  %v1437_v10 = vld [vmem:[#allocation8 + $0x1448] sm:$0xff]  ;;  %v13169_v7 = vpack.c.bf16 %v12559_v9, %v12559_v9  ;;  %v1480_v9 = vld [vmem:[#allocation8 + $0x15a0] sm:$0xff] }
 0x281   :  { %7489 = vmatpush1.bf16.msra.mxu1 %v11201_v11  ;;  %7162 = vmatprep.subr.bf16.mxu0 %v11208_v12  ;;  %v1441_v11 = vld [vmem:[#allocation8 + $0x1468] sm:$0xff]  ;;  %v13167_v12 = vpack.c.bf16 %v12557_v44, %v12557_v44 }
 0x282   :  { %7490 = vmatprep.subr.bf16.mxu1 %v11210_v18  ;;  %v11241_v18 = vcombine.low %v1429_v23, %v1433_v63  ;;  %v11250_v27 = vcombine.high %v1437_v10, %v1441_v11  ;;  %v1468_v23 = vld [vmem:[#allocation8 + $0x1540] sm:$0xff] }
 0x283   :  { %v1472_v63 = vld [vmem:[#allocation8 + $0x1560] sm:$0xff] }
 0x284   :  { %7163 = vmatpush1.bf16.msra.mxu0 %v11207_v28  ;;  %v1445_v28 = vld [vmem:[#allocation8 + $0x1488] sm:$0xff] }
 0x285   :  { %7491 = vmatpush1.bf16.msra.mxu1 %v11209_v30  ;;  %7164 = vmatprep.subr.bf16.mxu0 %v11216_v59  ;;  %v1449_v30 = vld [vmem:[#allocation8 + $0x14a8] sm:$0xff]  ;;  %v11247_v59 = vcombine.low %v1436_v5, %v1440_v6  ;;  %v1476_v6 = vld [vmem:[#allocation8 + $0x1580] sm:$0xff] }
 0x286   :  { %7492 = vmatprep.subr.bf16.mxu1 %v11218_v33  ;;  %v11249_v33 = vcombine.low %v1437_v10, %v1441_v11  ;;  %v11258_v34 = vcombine.high %v1445_v28, %v1449_v30  ;;  %v1481_v10 = vld [vmem:[#allocation8 + $0x15a8] sm:$0xff]  ;;  %v11279_v11 = vcombine.low %v1468_v23, %v1472_v63 }
 0x288   :  { %7165 = vmatpush1.bf16.msra.mxu0 %v11215_v45  ;;  %v1453_v45 = vld [vmem:[#allocation8 + $0x14c8] sm:$0xff] }
 0x289   :  { %7493 = vmatpush1.bf16.msra.mxu1 %v11217_v46  ;;  %7166 = vmatprep.subr.bf16.mxu0 %v11224_v47  ;;  %v1457_v46 = vld [vmem:[#allocation8 + $0x14e8] sm:$0xff]  ;;  %v11255_v47 = vcombine.low %v1444_v0, %v1448_v22  ;;  %v1484_v22 = vld [vmem:[#allocation8 + $0x15c0] sm:$0xff] }
 0x28a   :  { %7494 = vmatprep.subr.bf16.mxu1 %v11226_v1  ;;  %v11257_v1 = vcombine.low %v1445_v28, %v1449_v30  ;;  %v11266_v49 = vcombine.high %v1453_v45, %v1457_v46  ;;  %v1485_v28 = vld [vmem:[#allocation8 + $0x15c8] sm:$0xff] }
 0x28b   :  { %v1489_v30 = vld [vmem:[#allocation8 + $0x15e8] sm:$0xff] }
 0x28c   :  { %7167 = vmatpush1.bf16.msra.mxu0 %v11223_v13  ;;  %v1461_v13 = vld [vmem:[#allocation8 + $0x1508] sm:$0xff] }
 0x28d   :  { %7495 = vmatpush1.bf16.msra.mxu1 %v11225_v55  ;;  %7168 = vmatprep.subr.bf16.mxu0 %v11232_v58  ;;  %v1465_v55 = vld [vmem:[#allocation8 + $0x1528] sm:$0xff]  ;;  %v11263_v58 = vcombine.low %v1452_v40, %v1456_v42  ;;  %v1492_v40 = vld [vmem:[#allocation8 + $0x1600] sm:$0xff] }
 0x28e   :  { %7496 = vmatprep.subr.bf16.mxu1 %v11234_v15  ;;  %v11265_v15 = vcombine.low %v1453_v45, %v1457_v46  ;;  %v11274_v60 = vcombine.high %v1461_v13, %v1465_v55  ;;  %v11273_v44 = vcombine.low %v1461_v13, %v1465_v55  ;;  %v1496_v42 = vld [vmem:[#allocation8 + $0x1620] sm:$0xff]  ;;  %v1493_v45 = vld [vmem:[#allocation8 + $0x1608] sm:$0xff] }
 0x28f   :  { %v1497_v46 = vld [vmem:[#allocation8 + $0x1628] sm:$0xff] }
 0x290   :  { %7169 = vmatpush1.bf16.msra.mxu0 %v11231_v20  ;;  %v1469_v20 = vld [vmem:[#allocation8 + $0x1548] sm:$0xff] }
 0x291   :  { %7497 = vmatpush1.bf16.msra.mxu1 %v11233_v2  ;;  %7179 = vmatprep.subr.bf16.mxu0 %v11240_v3  ;;  %v1473_v2 = vld [vmem:[#allocation8 + $0x1568] sm:$0xff]  ;;  %v11271_v3 = vcombine.low %v1460_v52, %v1464_v54  ;;  %v1500_v52 = vld [vmem:[#allocation8 + $0x1640] sm:$0xff] }
 0x292   :  { %7507 = vmatprep.subr.bf16.mxu1 %v11242_v4  ;;  %v11280_v4 = vcombine.high %v1468_v23, %v1472_v63  ;;  %v11282_v5 = vcombine.high %v1469_v20, %v1473_v2  ;;  %v1504_v54 = vld [vmem:[#allocation8 + $0x1660] sm:$0xff]  ;;  %v1501_v13 = vld [vmem:[#allocation8 + $0x1648] sm:$0xff] }
 0x293   :  { %7171 = vmatmul.mubr.bf16.vlgmr.msra.gmra.mrb[16].mxu0 %v13167_v12  ;;  %v1505_v55 = vld [vmem:[#allocation8 + $0x1668] sm:$0xff]  ;;  %v1508_v23 = vld [vmem:[#allocation8 + $0x1680] sm:$0xff] }
 0x294   :  { %7499 = vmatmul.mubr.bf16.vlgmr.msra.gmra.mrb[16].mxu1 %v13167_v12  ;;  %7180 = vmatpush1.bf16.msra.mxu0 %v11239_v26  ;;  %v1477_v26 = vld [vmem:[#allocation8 + $0x1588] sm:$0xff]  ;;  %v1512_v63 = vld [vmem:[#allocation8 + $0x16a0] sm:$0xff] }
 0x295   :  { %7211 = vmatprep.mubr.bf16.mxu0 %v13169_v7  ;;  %7508 = vmatpush1.bf16.msra.mxu1 %v11241_v18  ;;  %v11281_v18 = vcombine.low %v1469_v20, %v1473_v2  ;;  %v11290_v0 = vcombine.high %v1477_v26, %v1481_v10  ;;  %v1509_v20 = vld [vmem:[#allocation8 + $0x1688] sm:$0xff] }
 0x296   :  { %7539 = vmatprep.mubr.bf16.mxu1 %v13169_v7  ;;  %7181 = vmatprep.subr.bf16.mxu0 %v11248_v38  ;;  %v11288_v38 = vcombine.high %v1476_v6, %v1480_v9  ;;  %v1513_v2 = vld [vmem:[#allocation8 + $0x16a8] sm:$0xff] }
 0x297   :  { %7509 = vmatprep.subr.bf16.mxu1 %v11250_v27  ;;  %v1488_v27 = vld [vmem:[#allocation8 + $0x15e0] sm:$0xff] }
 0x298   :  { %7182 = vmatpush1.bf16.msra.mxu0 %v11247_v59  ;;  %v11287_v59 = vcombine.low %v1476_v6, %v1480_v9  ;;  %v1516_v6 = vld [vmem:[#allocation8 + $0x16c0] sm:$0xff] }
 0x299   :  { %7510 = vmatpush1.bf16.msra.mxu1 %v11249_v33  ;;  %7183 = vmatprep.subr.bf16.mxu0 %v11256_v31  ;;  %v11289_v33 = vcombine.low %v1477_v26, %v1481_v10  ;;  %v11296_v31 = vcombine.high %v1484_v22, %v1488_v27  ;;  %v1520_v9 = vld [vmem:[#allocation8 + $0x16e0] sm:$0xff]  ;;  %v1517_v26 = vld [vmem:[#allocation8 + $0x16c8] sm:$0xff] }
 0x29a   :  { %7511 = vmatprep.subr.bf16.mxu1 %v11258_v34  ;;  %v11298_v34 = vcombine.high %v1485_v28, %v1489_v30  ;;  %v1521_v10 = vld [vmem:[#allocation8 + $0x16e8] sm:$0xff] }
 0x29c   :  { %7184 = vmatpush1.bf16.msra.mxu0 %v11255_v47  ;;  %v11295_v47 = vcombine.low %v1484_v22, %v1488_v27  ;;  %v1524_v22 = vld [vmem:[#allocation8 + $0x1700] sm:$0xff] }
 0x29d   :  { %7512 = vmatpush1.bf16.msra.mxu1 %v11257_v1  ;;  %7185 = vmatprep.subr.bf16.mxu0 %v11264_v48  ;;  %v11297_v1 = vcombine.low %v1485_v28, %v1489_v30  ;;  %v11304_v48 = vcombine.high %v1492_v40, %v1496_v42  ;;  %v1528_v27 = vld [vmem:[#allocation8 + $0x1720] sm:$0xff]  ;;  %v1525_v28 = vld [vmem:[#allocation8 + $0x1708] sm:$0xff] }
 0x29e   :  { %7513 = vmatprep.subr.bf16.mxu1 %v11266_v49  ;;  %v11306_v49 = vcombine.high %v1493_v45, %v1497_v46  ;;  %v1529_v30 = vld [vmem:[#allocation8 + $0x1728] sm:$0xff] }
 0x2a0   :  { %7186 = vmatpush1.bf16.msra.mxu0 %v11263_v58  ;;  %v11303_v58 = vcombine.low %v1492_v40, %v1496_v42  ;;  %v1532_v40 = vld [vmem:[#allocation8 + $0x1740] sm:$0xff] }
 0x2a1   :  { %7514 = vmatpush1.bf16.msra.mxu1 %v11265_v15  ;;  %7187 = vmatprep.subr.bf16.mxu0 %v11272_v32  ;;  %v11305_v15 = vcombine.low %v1493_v45, %v1497_v46  ;;  %v11312_v32 = vcombine.high %v1500_v52, %v1504_v54  ;;  %v1536_v42 = vld [vmem:[#allocation8 + $0x1760] sm:$0xff]  ;;  %v1533_v45 = vld [vmem:[#allocation8 + $0x1748] sm:$0xff] }
 0x2a2   :  { %7515 = vmatprep.subr.bf16.mxu1 %v11274_v60  ;;  %v11314_v60 = vcombine.high %v1501_v13, %v1505_v55  ;;  %v1537_v46 = vld [vmem:[#allocation8 + $0x1768] sm:$0xff] }
 0x2a4   :  { %7188 = vmatpush1.bf16.msra.mxu0 %v11271_v3  ;;  %v11311_v3 = vcombine.low %v1500_v52, %v1504_v54  ;;  %v1540_v52 = vld [vmem:[#allocation8 + $0x1780] sm:$0xff] }
 0x2a5   :  { %7516 = vmatpush1.bf16.msra.mxu1 %v11273_v44  ;;  %7189 = vmatprep.subr.bf16.mxu0 %v11280_v4  ;;  %v11313_v44 = vcombine.low %v1501_v13, %v1505_v55  ;;  %v11320_v4 = vcombine.high %v1508_v23, %v1512_v63  ;;  %v1544_v54 = vld [vmem:[#allocation8 + $0x17a0] sm:$0xff]  ;;  %v1541_v13 = vld [vmem:[#allocation8 + $0x1788] sm:$0xff] }
 0x2a6   :  { %7517 = vmatprep.subr.bf16.mxu1 %v11282_v5  ;;  %v11322_v5 = vcombine.high %v1509_v20, %v1513_v2  ;;  %v1545_v55 = vld [vmem:[#allocation8 + $0x17a8] sm:$0xff] }
 0x2a8   :  { %7190 = vmatpush1.bf16.msra.mxu0 %v11279_v11  ;;  %v11319_v11 = vcombine.low %v1508_v23, %v1512_v63  ;;  %v1548_v23 = vld [vmem:[#allocation8 + $0x17c0] sm:$0xff] }
 0x2a9   :  { %7518 = vmatpush1.bf16.msra.mxu1 %v11281_v18  ;;  %7191 = vmatprep.subr.bf16.mxu0 %v11288_v38  ;;  %v11321_v18 = vcombine.low %v1509_v20, %v1513_v2  ;;  %v11328_v38 = vcombine.high %v1516_v6, %v1520_v9  ;;  %v1552_v63 = vld [vmem:[#allocation8 + $0x17e0] sm:$0xff]  ;;  %v1549_v20 = vld [vmem:[#allocation8 + $0x17c8] sm:$0xff] }
 0x2aa   :  { %7519 = vmatprep.subr.bf16.mxu1 %v11290_v0  ;;  %v11330_v0 = vcombine.high %v1517_v26, %v1521_v10  ;;  %v1553_v2 = vld [vmem:[#allocation8 + $0x17e8] sm:$0xff]  ;;  %v11360_v19 = vcombine.high %v1548_v23, %v1552_v63  ;;  %v11359_v51 = vcombine.low %v1548_v23, %v1552_v63 }
 0x2ac   :  { %7192 = vmatpush1.bf16.msra.mxu0 %v11287_v59  ;;  %v11327_v59 = vcombine.low %v1516_v6, %v1520_v9  ;;  %v1560_v6 = vld [vmem:[#allocation8 + $0x1820] sm:$0xff]  ;;  %v1557_v9 = vld [vmem:[#allocation8 + $0x1808] sm:$0xff] }
 0x2ad   :  { %7520 = vmatpush1.bf16.msra.mxu1 %v11289_v33  ;;  %7193 = vmatprep.subr.bf16.mxu0 %v11296_v31  ;;  %v11329_v33 = vcombine.low %v1517_v26, %v1521_v10  ;;  %v11336_v31 = vcombine.high %v1524_v22, %v1528_v27  ;;  %v1561_v26 = vld [vmem:[#allocation8 + $0x1828] sm:$0xff]  ;;  %v11361_v10 = vcombine.low %v1549_v20, %v1553_v2 }
 0x2ae   :  { %7521 = vmatprep.subr.bf16.mxu1 %v11298_v34  ;;  %v11338_v34 = vcombine.high %v1525_v28, %v1529_v30 }
 0x2b0   :  { %7194 = vmatpush1.bf16.msra.mxu0 %v11295_v47  ;;  %v11335_v47 = vcombine.low %v1524_v22, %v1528_v27  ;;  %v1568_v22 = vld [vmem:[#allocation8 + $0x1860] sm:$0xff] }
 0x2b1   :  { %7522 = vmatpush1.bf16.msra.mxu1 %v11297_v1  ;;  %7195 = vmatprep.subr.bf16.mxu0 %v11304_v48  ;;  %v11337_v1 = vcombine.low %v1525_v28, %v1529_v30  ;;  %v11344_v48 = vcombine.high %v1532_v40, %v1536_v42  ;;  %v1565_v30 = vld [vmem:[#allocation8 + $0x1848] sm:$0xff] }
 0x2b2   :  { %7523 = vmatprep.subr.bf16.mxu1 %v11306_v49  ;;  %v11346_v49 = vcombine.high %v1533_v45, %v1537_v46 }
 0x2b4   :  { %7196 = vmatpush1.bf16.msra.mxu0 %v11303_v58  ;;  %v11343_v58 = vcombine.low %v1532_v40, %v1536_v42  ;;  %v1572_v40 = vld [vmem:[#allocation8 + $0x1880] sm:$0xff] }
 0x2b5   :  { %7524 = vmatpush1.bf16.msra.mxu1 %v11305_v15  ;;  %7197 = vmatprep.subr.bf16.mxu0 %v11312_v32  ;;  %v11345_v15 = vcombine.low %v1533_v45, %v1537_v46  ;;  %v11352_v32 = vcombine.high %v1540_v52, %v1544_v54  ;;  %v1576_v42 = vld [vmem:[#allocation8 + $0x18a0] sm:$0xff] }
 0x2b6   :  { %7525 = vmatprep.subr.bf16.mxu1 %v11314_v60  ;;  %v11354_v60 = vcombine.high %v1541_v13, %v1545_v55 }
 0x2b8   :  { %7198 = vmatpush1.bf16.msra.mxu0 %v11311_v3  ;;  %v11351_v3 = vcombine.low %v1540_v52, %v1544_v54  ;;  %v11384_v52 = vcombine.high %v1572_v40, %v1576_v42 }
 0x2b9   :  { %7526 = vmatpush1.bf16.msra.mxu1 %v11313_v44  ;;  %7199 = vmatprep.subr.bf16.mxu0 %v11320_v4  ;;  %v11353_v44 = vcombine.low %v1541_v13, %v1545_v55  ;;  %v11362_v4 = vcombine.high %v1549_v20, %v1553_v2  ;;  %v1580_v13 = vld [vmem:[#allocation8 + $0x18c0] sm:$0xff] }
 0x2ba   :  { %7527 = vmatprep.subr.bf16.mxu1 %v11322_v5  ;;  %v1556_v5 = vld [vmem:[#allocation8 + $0x1800] sm:$0xff] }
 0x2bb   :  { %v11367_v28 = vcombine.low %v1556_v5, %v1560_v6  ;;  %v1584_v55 = vld [vmem:[#allocation8 + $0x18e0] sm:$0xff] }
 0x2bc   :  { %7200 = vmatpush1.bf16.msra.mxu0 %v11319_v11  ;;  %v11368_v11 = vcombine.high %v1556_v5, %v1560_v6  ;;  %v11392_v23 = vcombine.high %v1580_v13, %v1584_v55  ;;  %v1588_v20 = vld [vmem:[#allocation8 + $0x1900] sm:$0xff] }
 0x2bd   :  { %7528 = vmatpush1.bf16.msra.mxu1 %v11321_v18  ;;  %7201 = vmatprep.subr.bf16.mxu0 %v11328_v38  ;;  %v12561_v18 = vpop.eup %12560  ;;  %v11370_v38 = vcombine.high %v1557_v9, %v1561_v26  ;;  %v1592_v2 = vld [vmem:[#allocation8 + $0x1920] sm:$0xff] }
 0x2be   :  { %7529 = vmatprep.subr.bf16.mxu1 %v11330_v0  ;;  %v1564_v0 = vld [vmem:[#allocation8 + $0x1840] sm:$0xff]  ;;  %v12563_v27 = vpop.eup %12562  ;;  %v11400_v5 = vcombine.high %v1588_v20, %v1592_v2 }
 0x2bf   :  { %v13179_v45 = vpack.c.bf16 %v12563_v27, %v12563_v27  ;;  %v1608_v27 = vld [vmem:[#allocation8 + $0x19a0] sm:$0xff] }
 0x2c0   :  { %7202 = vmatpush1.bf16.msra.mxu0 %v11327_v59  ;;  %v1569_v59 = vld [vmem:[#allocation8 + $0x1868] sm:$0xff] }
 0x2c1   :  { %7530 = vmatpush1.bf16.msra.mxu1 %v11329_v33  ;;  %7203 = vmatprep.subr.bf16.mxu0 %v11336_v31  ;;  %v13177_v33 = vpack.c.bf16 %v12561_v18, %v12561_v18  ;;  %v11369_v31 = vcombine.low %v1557_v9, %v1561_v26  ;;  %v11378_v46 = vcombine.high %v1565_v30, %v1569_v59  ;;  %v1596_v9 = vld [vmem:[#allocation8 + $0x1940] sm:$0xff] }
 0x2c2   :  { %7531 = vmatprep.subr.bf16.mxu1 %v11338_v34  ;;  %v11376_v34 = vcombine.high %v1564_v0, %v1568_v22  ;;  %v1600_v26 = vld [vmem:[#allocation8 + $0x1960] sm:$0xff] }
 0x2c4   :  { %7204 = vmatpush1.bf16.msra.mxu0 %v11335_v47  ;;  %v1573_v47 = vld [vmem:[#allocation8 + $0x1888] sm:$0xff] }
 0x2c5   :  { %7532 = vmatpush1.bf16.msra.mxu1 %v11337_v1  ;;  %7205 = vmatprep.subr.bf16.mxu0 %v11344_v48  ;;  %v1577_v1 = vld [vmem:[#allocation8 + $0x18a8] sm:$0xff]  ;;  %v11375_v48 = vcombine.low %v1564_v0, %v1568_v22  ;;  %v1604_v22 = vld [vmem:[#allocation8 + $0x1980] sm:$0xff] }
 0x2c6   :  { %7533 = vmatprep.subr.bf16.mxu1 %v11346_v49  ;;  %v11377_v49 = vcombine.low %v1565_v30, %v1569_v59  ;;  %v11386_v54 = vcombine.high %v1573_v47, %v1577_v1  ;;  %v1609_v30 = vld [vmem:[#allocation8 + $0x19a8] sm:$0xff]  ;;  %v11407_v59 = vcombine.low %v1596_v9, %v1600_v26 }
 0x2c8   :  { %7206 = vmatpush1.bf16.msra.mxu0 %v11343_v58  ;;  %v1581_v58 = vld [vmem:[#allocation8 + $0x18c8] sm:$0xff] }
 0x2c9   :  { %7534 = vmatpush1.bf16.msra.mxu1 %v11345_v15  ;;  %7207 = vmatprep.subr.bf16.mxu0 %v11352_v32  ;;  %v1585_v15 = vld [vmem:[#allocation8 + $0x18e8] sm:$0xff]  ;;  %v11383_v32 = vcombine.low %v1572_v40, %v1576_v42  ;;  %v1612_v42 = vld [vmem:[#allocation8 + $0x19c0] sm:$0xff] }
 0x2ca   :  { %7535 = vmatprep.subr.bf16.mxu1 %v11354_v60  ;;  %v11385_v60 = vcombine.low %v1573_v47, %v1577_v1  ;;  %v11394_v63 = vcombine.high %v1581_v58, %v1585_v15  ;;  %v1613_v47 = vld [vmem:[#allocation8 + $0x19c8] sm:$0xff] }
 0x2cb   :  { %v1617_v1 = vld [vmem:[#allocation8 + $0x19e8] sm:$0xff] }
 0x2cc   :  { %7208 = vmatpush1.bf16.msra.mxu0 %v11351_v3  ;;  %v1589_v3 = vld [vmem:[#allocation8 + $0x1908] sm:$0xff] }
 0x2cd   :  { %7536 = vmatpush1.bf16.msra.mxu1 %v11353_v44  ;;  %7209 = vmatprep.subr.bf16.mxu0 %v11360_v19  ;;  %v1593_v44 = vld [vmem:[#allocation8 + $0x1928] sm:$0xff]  ;;  %v11391_v19 = vcombine.low %v1580_v13, %v1584_v55  ;;  %v1620_v13 = vld [vmem:[#allocation8 + $0x1a00] sm:$0xff] }
 0x2ce   :  { %7537 = vmatprep.subr.bf16.mxu1 %v11362_v4  ;;  %v11393_v4 = vcombine.low %v1581_v58, %v1585_v15  ;;  %v11402_v6 = vcombine.high %v1589_v3, %v1593_v44  ;;  %v11401_v18 = vcombine.low %v1589_v3, %v1593_v44  ;;  %v1624_v55 = vld [vmem:[#allocation8 + $0x1a20] sm:$0xff]  ;;  %v1621_v58 = vld [vmem:[#allocation8 + $0x1a08] sm:$0xff] }
 0x2cf   :  { %v1625_v15 = vld [vmem:[#allocation8 + $0x1a28] sm:$0xff] }
 0x2d0   :  { %7210 = vmatpush1.bf16.msra.mxu0 %v11359_v51  ;;  %v1597_v51 = vld [vmem:[#allocation8 + $0x1948] sm:$0xff] }
 0x2d1   :  { %7538 = vmatpush1.bf16.msra.mxu1 %v11361_v10  ;;  %7220 = vmatprep.subr.bf16.mxu0 %v11368_v11  ;;  %v1601_v10 = vld [vmem:[#allocation8 + $0x1968] sm:$0xff]  ;;  %v11399_v11 = vcombine.low %v1588_v20, %v1592_v2  ;;  %v1628_v20 = vld [vmem:[#allocation8 + $0x1a40] sm:$0xff] }
 0x2d2   :  { %7548 = vmatprep.subr.bf16.mxu1 %v11370_v38  ;;  %v11408_v38 = vcombine.high %v1596_v9, %v1600_v26  ;;  %v11410_v0 = vcombine.high %v1597_v51, %v1601_v10  ;;  %v1632_v2 = vld [vmem:[#allocation8 + $0x1a60] sm:$0xff]  ;;  %v1629_v3 = vld [vmem:[#allocation8 + $0x1a48] sm:$0xff] }
 0x2d3   :  { %7212 = vmatmul.mubr.bf16.vlgmr.msra.gmra.mrb[16].mxu0 %v13177_v33  ;;  %v1633_v44 = vld [vmem:[#allocation8 + $0x1a68] sm:$0xff]  ;;  %v1636_v9 = vld [vmem:[#allocation8 + $0x1a80] sm:$0xff] }
 0x2d4   :  { %7540 = vmatmul.mubr.bf16.vlgmr.msra.gmra.mrb[16].mxu1 %v13177_v33  ;;  %7221 = vmatpush1.bf16.msra.mxu0 %v11367_v28  ;;  %v1605_v28 = vld [vmem:[#allocation8 + $0x1988] sm:$0xff]  ;;  %v1640_v26 = vld [vmem:[#allocation8 + $0x1aa0] sm:$0xff] }
 0x2d5   :  { %7252 = vmatprep.mubr.bf16.mxu0 %v13179_v45  ;;  %7549 = vmatpush1.bf16.msra.mxu1 %v11369_v31  ;;  %v11409_v31 = vcombine.low %v1597_v51, %v1601_v10  ;;  %v11418_v40 = vcombine.high %v1605_v28, %v1609_v30  ;;  %v1637_v51 = vld [vmem:[#allocation8 + $0x1a88] sm:$0xff] }
 0x2d6   :  { %7580 = vmatprep.mubr.bf16.mxu1 %v13179_v45  ;;  %7222 = vmatprep.subr.bf16.mxu0 %v11376_v34  ;;  %v11416_v34 = vcombine.high %v1604_v22, %v1608_v27  ;;  %v1641_v10 = vld [vmem:[#allocation8 + $0x1aa8] sm:$0xff] }
 0x2d7   :  { %7550 = vmatprep.subr.bf16.mxu1 %v11378_v46  ;;  %v1616_v46 = vld [vmem:[#allocation8 + $0x19e0] sm:$0xff] }
 0x2d8   :  { %7223 = vmatpush1.bf16.msra.mxu0 %v11375_v48  ;;  %v11415_v48 = vcombine.low %v1604_v22, %v1608_v27  ;;  %v1644_v22 = vld [vmem:[#allocation8 + $0x1ac0] sm:$0xff] }
 0x2d9   :  { %7551 = vmatpush1.bf16.msra.mxu1 %v11377_v49  ;;  %7224 = vmatprep.subr.bf16.mxu0 %v11384_v52  ;;  %v11417_v49 = vcombine.low %v1605_v28, %v1609_v30  ;;  %v11424_v52 = vcombine.high %v1612_v42, %v1616_v46  ;;  %v1648_v27 = vld [vmem:[#allocation8 + $0x1ae0] sm:$0xff]  ;;  %v1645_v28 = vld [vmem:[#allocation8 + $0x1ac8] sm:$0xff] }
 0x2da   :  { %7552 = vmatprep.subr.bf16.mxu1 %v11386_v54  ;;  %v11426_v54 = vcombine.high %v1613_v47, %v1617_v1  ;;  %v1649_v30 = vld [vmem:[#allocation8 + $0x1ae8] sm:$0xff] }
 0x2dc   :  { %7225 = vmatpush1.bf16.msra.mxu0 %v11383_v32  ;;  %v11423_v32 = vcombine.low %v1612_v42, %v1616_v46  ;;  %v1652_v42 = vld [vmem:[#allocation8 + $0x1b00] sm:$0xff] }
 0x2dd   :  { %7553 = vmatpush1.bf16.msra.mxu1 %v11385_v60  ;;  %7226 = vmatprep.subr.bf16.mxu0 %v11392_v23  ;;  %v11425_v60 = vcombine.low %v1613_v47, %v1617_v1  ;;  %v11432_v23 = vcombine.high %v1620_v13, %v1624_v55  ;;  %v1656_v46 = vld [vmem:[#allocation8 + $0x1b20] sm:$0xff]  ;;  %v1653_v47 = vld [vmem:[#allocation8 + $0x1b08] sm:$0xff] }
 0x2de   :  { %7554 = vmatprep.subr.bf16.mxu1 %v11394_v63  ;;  %v11434_v63 = vcombine.high %v1621_v58, %v1625_v15  ;;  %v1657_v1 = vld [vmem:[#allocation8 + $0x1b28] sm:$0xff] }
 0x2e0   :  { %7227 = vmatpush1.bf16.msra.mxu0 %v11391_v19  ;;  %v11431_v19 = vcombine.low %v1620_v13, %v1624_v55  ;;  %v1660_v13 = vld [vmem:[#allocation8 + $0x1b40] sm:$0xff] }
 0x2e1   :  { %7555 = vmatpush1.bf16.msra.mxu1 %v11393_v4  ;;  %7228 = vmatprep.subr.bf16.mxu0 %v11400_v5  ;;  %v11433_v4 = vcombine.low %v1621_v58, %v1625_v15  ;;  %v11440_v5 = vcombine.high %v1628_v20, %v1632_v2  ;;  %v1664_v55 = vld [vmem:[#allocation8 + $0x1b60] sm:$0xff]  ;;  %v1661_v58 = vld [vmem:[#allocation8 + $0x1b48] sm:$0xff] }
 0x2e2   :  { %7556 = vmatprep.subr.bf16.mxu1 %v11402_v6  ;;  %v11442_v6 = vcombine.high %v1629_v3, %v1633_v44  ;;  %v1665_v15 = vld [vmem:[#allocation8 + $0x1b68] sm:$0xff] }
 0x2e4   :  { %7229 = vmatpush1.bf16.msra.mxu0 %v11399_v11  ;;  %v11439_v11 = vcombine.low %v1628_v20, %v1632_v2  ;;  %v1668_v20 = vld [vmem:[#allocation8 + $0x1b80] sm:$0xff] }
 0x2e5   :  { %7557 = vmatpush1.bf16.msra.mxu1 %v11401_v18  ;;  %7230 = vmatprep.subr.bf16.mxu0 %v11408_v38  ;;  %v11441_v18 = vcombine.low %v1629_v3, %v1633_v44  ;;  %v11448_v38 = vcombine.high %v1636_v9, %v1640_v26  ;;  %v1672_v2 = vld [vmem:[#allocation8 + $0x1ba0] sm:$0xff]  ;;  %v1669_v3 = vld [vmem:[#allocation8 + $0x1b88] sm:$0xff] }
 0x2e6   :  { %7558 = vmatprep.subr.bf16.mxu1 %v11410_v0  ;;  %v11450_v0 = vcombine.high %v1637_v51, %v1641_v10  ;;  %v1673_v44 = vld [vmem:[#allocation8 + $0x1ba8] sm:$0xff] }
 0x2e8   :  { %7231 = vmatpush1.bf16.msra.mxu0 %v11407_v59  ;;  %v11447_v59 = vcombine.low %v1636_v9, %v1640_v26  ;;  %v1676_v9 = vld [vmem:[#allocation8 + $0x1bc0] sm:$0xff] }
 0x2e9   :  { %7559 = vmatpush1.bf16.msra.mxu1 %v11409_v31  ;;  %7232 = vmatprep.subr.bf16.mxu0 %v11416_v34  ;;  %v11449_v31 = vcombine.low %v1637_v51, %v1641_v10  ;;  %v11456_v34 = vcombine.high %v1644_v22, %v1648_v27  ;;  %v1680_v26 = vld [vmem:[#allocation8 + $0x1be0] sm:$0xff]  ;;  %v1677_v51 = vld [vmem:[#allocation8 + $0x1bc8] sm:$0xff] }
 0x2ea   :  { %7560 = vmatprep.subr.bf16.mxu1 %v11418_v40  ;;  %v11458_v40 = vcombine.high %v1645_v28, %v1649_v30  ;;  %v1681_v10 = vld [vmem:[#allocation8 + $0x1be8] sm:$0xff]  ;;  %v11488_v25 = vcombine.high %v1676_v9, %v1680_v26  ;;  %v11487_v57 = vcombine.low %v1676_v9, %v1680_v26 }
 0x2ec   :  { %7233 = vmatpush1.bf16.msra.mxu0 %v11415_v48  ;;  %v11455_v48 = vcombine.low %v1644_v22, %v1648_v27  ;;  %v1688_v22 = vld [vmem:[#allocation8 + $0x1c20] sm:$0xff]  ;;  %v1685_v27 = vld [vmem:[#allocation8 + $0x1c08] sm:$0xff] }
 0x2ed   :  { %7561 = vmatpush1.bf16.msra.mxu1 %v11417_v49  ;;  %7234 = vmatprep.subr.bf16.mxu0 %v11424_v52  ;;  %v11457_v49 = vcombine.low %v1645_v28, %v1649_v30  ;;  %v11464_v52 = vcombine.high %v1652_v42, %v1656_v46  ;;  %v1689_v28 = vld [vmem:[#allocation8 + $0x1c28] sm:$0xff]  ;;  %v11489_v30 = vcombine.low %v1677_v51, %v1681_v10 }
 0x2ee   :  { %7562 = vmatprep.subr.bf16.mxu1 %v11426_v54  ;;  %v11466_v54 = vcombine.high %v1653_v47, %v1657_v1 }
 0x2f0   :  { %7235 = vmatpush1.bf16.msra.mxu0 %v11423_v32  ;;  %v11463_v32 = vcombine.low %v1652_v42, %v1656_v46  ;;  %v1696_v42 = vld [vmem:[#allocation8 + $0x1c60] sm:$0xff] }
 0x2f1   :  { %7563 = vmatpush1.bf16.msra.mxu1 %v11425_v60  ;;  %7236 = vmatprep.subr.bf16.mxu0 %v11432_v23  ;;  %v11465_v60 = vcombine.low %v1653_v47, %v1657_v1  ;;  %v11472_v23 = vcombine.high %v1660_v13, %v1664_v55  ;;  %v1693_v1 = vld [vmem:[#allocation8 + $0x1c48] sm:$0xff] }
 0x2f2   :  { %7564 = vmatprep.subr.bf16.mxu1 %v11434_v63  ;;  %v11474_v63 = vcombine.high %v1661_v58, %v1665_v15 }
 0x2f4   :  { %7237 = vmatpush1.bf16.msra.mxu0 %v11431_v19  ;;  %v11471_v19 = vcombine.low %v1660_v13, %v1664_v55  ;;  %v1700_v13 = vld [vmem:[#allocation8 + $0x1c80] sm:$0xff] }
 0x2f5   :  { %7565 = vmatpush1.bf16.msra.mxu1 %v11433_v4  ;;  %7238 = vmatprep.subr.bf16.mxu0 %v11440_v5  ;;  %v11473_v4 = vcombine.low %v1661_v58, %v1665_v15  ;;  %v11480_v5 = vcombine.high %v1668_v20, %v1672_v2  ;;  %v1704_v55 = vld [vmem:[#allocation8 + $0x1ca0] sm:$0xff] }
 0x2f6   :  { %7566 = vmatprep.subr.bf16.mxu1 %v11442_v6  ;;  %v11482_v6 = vcombine.high %v1669_v3, %v1673_v44 }
 0x2f8   :  { %7239 = vmatpush1.bf16.msra.mxu0 %v11439_v11  ;;  %v11479_v11 = vcombine.low %v1668_v20, %v1672_v2  ;;  %v11512_v20 = vcombine.high %v1700_v13, %v1704_v55 }
 0x2f9   :  { %7567 = vmatpush1.bf16.msra.mxu1 %v11441_v18  ;;  %7240 = vmatprep.subr.bf16.mxu0 %v11448_v38  ;;  %v11481_v18 = vcombine.low %v1669_v3, %v1673_v44  ;;  %v11490_v38 = vcombine.high %v1677_v51, %v1681_v10  ;;  %v1708_v3 = vld [vmem:[#allocation8 + $0x1cc0] sm:$0xff] }
 0x2fa   :  { %7568 = vmatprep.subr.bf16.mxu1 %v11450_v0  ;;  %v1684_v0 = vld [vmem:[#allocation8 + $0x1c00] sm:$0xff] }
 0x2fb   :  { %v11495_v47 = vcombine.low %v1684_v0, %v1688_v22  ;;  %v1712_v44 = vld [vmem:[#allocation8 + $0x1ce0] sm:$0xff] }
 0x2fc   :  { %7241 = vmatpush1.bf16.msra.mxu0 %v11447_v59  ;;  %v11496_v59 = vcombine.high %v1684_v0, %v1688_v22  ;;  %v11520_v9 = vcombine.high %v1708_v3, %v1712_v44  ;;  %v1716_v51 = vld [vmem:[#allocation8 + $0x1d00] sm:$0xff] }
 0x2fd   :  { %7569 = vmatpush1.bf16.msra.mxu1 %v11449_v31  ;;  %7242 = vmatprep.subr.bf16.mxu0 %v11456_v34  ;;  %v12565_v31 = vpop.eup %12564  ;;  %v11498_v34 = vcombine.high %v1685_v27, %v1689_v28  ;;  %v1720_v10 = vld [vmem:[#allocation8 + $0x1d20] sm:$0xff] }
 0x2fe   :  { %7570 = vmatprep.subr.bf16.mxu1 %v11458_v40  ;;  %v1692_v40 = vld [vmem:[#allocation8 + $0x1c40] sm:$0xff]  ;;  %v12567_v46 = vpop.eup %12566  ;;  %v11528_v0 = vcombine.high %v1716_v51, %v1720_v10 }
 0x2ff   :  { %v13189_v58 = vpack.c.bf16 %v12567_v46, %v12567_v46  ;;  %v1736_v46 = vld [vmem:[#allocation8 + $0x1da0] sm:$0xff] }
 0x300   :  { %7243 = vmatpush1.bf16.msra.mxu0 %v11455_v48  ;;  %v1697_v48 = vld [vmem:[#allocation8 + $0x1c68] sm:$0xff] }
 0x301   :  { %7571 = vmatpush1.bf16.msra.mxu1 %v11457_v49  ;;  %7244 = vmatprep.subr.bf16.mxu0 %v11464_v52  ;;  %v13187_v49 = vpack.c.bf16 %v12565_v31, %v12565_v31  ;;  %v11497_v52 = vcombine.low %v1685_v27, %v1689_v28  ;;  %v11506_v15 = vcombine.high %v1693_v1, %v1697_v48  ;;  %v1724_v27 = vld [vmem:[#allocation8 + $0x1d40] sm:$0xff] }
 0x302   :  { %7572 = vmatprep.subr.bf16.mxu1 %v11466_v54  ;;  %v11504_v54 = vcombine.high %v1692_v40, %v1696_v42  ;;  %v1728_v28 = vld [vmem:[#allocation8 + $0x1d60] sm:$0xff] }
 0x304   :  { %7245 = vmatpush1.bf16.msra.mxu0 %v11463_v32  ;;  %v1701_v32 = vld [vmem:[#allocation8 + $0x1c88] sm:$0xff] }
 0x305   :  { %7573 = vmatpush1.bf16.msra.mxu1 %v11465_v60  ;;  %7246 = vmatprep.subr.bf16.mxu0 %v11472_v23  ;;  %v1705_v60 = vld [vmem:[#allocation8 + $0x1ca8] sm:$0xff]  ;;  %v11503_v23 = vcombine.low %v1692_v40, %v1696_v42  ;;  %v1732_v42 = vld [vmem:[#allocation8 + $0x1d80] sm:$0xff] }
 0x306   :  { %7574 = vmatprep.subr.bf16.mxu1 %v11474_v63  ;;  %v11505_v63 = vcombine.low %v1693_v1, %v1697_v48  ;;  %v11514_v2 = vcombine.high %v1701_v32, %v1705_v60  ;;  %v1737_v1 = vld [vmem:[#allocation8 + $0x1da8] sm:$0xff]  ;;  %v11535_v48 = vcombine.low %v1724_v27, %v1728_v28 }
 0x308   :  { %7247 = vmatpush1.bf16.msra.mxu0 %v11471_v19  ;;  %v1709_v19 = vld [vmem:[#allocation8 + $0x1cc8] sm:$0xff] }
 0x309   :  { %7575 = vmatpush1.bf16.msra.mxu1 %v11473_v4  ;;  %7248 = vmatprep.subr.bf16.mxu0 %v11480_v5  ;;  %v1713_v4 = vld [vmem:[#allocation8 + $0x1ce8] sm:$0xff]  ;;  %v11511_v5 = vcombine.low %v1700_v13, %v1704_v55  ;;  %v1740_v55 = vld [vmem:[#allocation8 + $0x1dc0] sm:$0xff] }
 0x30a   :  { %7576 = vmatprep.subr.bf16.mxu1 %v11482_v6  ;;  %v11513_v6 = vcombine.low %v1701_v32, %v1705_v60  ;;  %v11522_v26 = vcombine.high %v1709_v19, %v1713_v4  ;;  %v1741_v32 = vld [vmem:[#allocation8 + $0x1dc8] sm:$0xff] }
 0x30b   :  { %v1745_v60 = vld [vmem:[#allocation8 + $0x1de8] sm:$0xff] }
 0x30c   :  { %7249 = vmatpush1.bf16.msra.mxu0 %v11479_v11  ;;  %v1717_v11 = vld [vmem:[#allocation8 + $0x1d08] sm:$0xff] }
 0x30d   :  { %7577 = vmatpush1.bf16.msra.mxu1 %v11481_v18  ;;  %7250 = vmatprep.subr.bf16.mxu0 %v11488_v25  ;;  %v1721_v18 = vld [vmem:[#allocation8 + $0x1d28] sm:$0xff]  ;;  %v11519_v25 = vcombine.low %v1708_v3, %v1712_v44  ;;  %v1748_v3 = vld [vmem:[#allocation8 + $0x1e00] sm:$0xff] }
 0x30e   :  { %7578 = vmatprep.subr.bf16.mxu1 %v11490_v38  ;;  %v11521_v38 = vcombine.low %v1709_v19, %v1713_v4  ;;  %v11530_v22 = vcombine.high %v1717_v11, %v1721_v18  ;;  %v11529_v31 = vcombine.low %v1717_v11, %v1721_v18  ;;  %v1752_v44 = vld [vmem:[#allocation8 + $0x1e20] sm:$0xff]  ;;  %v1749_v19 = vld [vmem:[#allocation8 + $0x1e08] sm:$0xff] }
 0x30f   :  { %v1753_v4 = vld [vmem:[#allocation8 + $0x1e28] sm:$0xff] }
 0x310   :  { %7251 = vmatpush1.bf16.msra.mxu0 %v11487_v57  ;;  %v1725_v57 = vld [vmem:[#allocation8 + $0x1d48] sm:$0xff] }
 0x311   :  { %7579 = vmatpush1.bf16.msra.mxu1 %v11489_v30  ;;  %7261 = vmatprep.subr.bf16.mxu0 %v11496_v59  ;;  %v1729_v30 = vld [vmem:[#allocation8 + $0x1d68] sm:$0xff]  ;;  %v11527_v59 = vcombine.low %v1716_v51, %v1720_v10  ;;  %v1756_v51 = vld [vmem:[#allocation8 + $0x1e40] sm:$0xff] }
 0x312   :  { %7589 = vmatprep.subr.bf16.mxu1 %v11498_v34  ;;  %v11536_v34 = vcombine.high %v1724_v27, %v1728_v28  ;;  %v11538_v40 = vcombine.high %v1725_v57, %v1729_v30  ;;  %v1760_v10 = vld [vmem:[#allocation8 + $0x1e60] sm:$0xff]  ;;  %v1757_v11 = vld [vmem:[#allocation8 + $0x1e48] sm:$0xff] }
 0x313   :  { %7253 = vmatmul.mubr.bf16.vlgmr.msra.gmra.mrb[16].mxu0 %v13187_v49  ;;  %v1761_v18 = vld [vmem:[#allocation8 + $0x1e68] sm:$0xff]  ;;  %v1764_v27 = vld [vmem:[#allocation8 + $0x1e80] sm:$0xff] }
 0x314   :  { %7581 = vmatmul.mubr.bf16.vlgmr.msra.gmra.mrb[16].mxu1 %v13187_v49  ;;  %7262 = vmatpush1.bf16.msra.mxu0 %v11495_v47  ;;  %v1733_v47 = vld [vmem:[#allocation8 + $0x1d88] sm:$0xff]  ;;  %v1768_v28 = vld [vmem:[#allocation8 + $0x1ea0] sm:$0xff] }
 0x315   :  { %7293 = vmatprep.mubr.bf16.mxu0 %v13189_v58  ;;  %7590 = vmatpush1.bf16.msra.mxu1 %v11497_v52  ;;  %v11537_v52 = vcombine.low %v1725_v57, %v1729_v30  ;;  %v11546_v13 = vcombine.high %v1733_v47, %v1737_v1  ;;  %v1765_v57 = vld [vmem:[#allocation8 + $0x1e88] sm:$0xff] }
 0x316   :  { %7621 = vmatprep.mubr.bf16.mxu1 %v13189_v58  ;;  %7263 = vmatprep.subr.bf16.mxu0 %v11504_v54  ;;  %v11544_v54 = vcombine.high %v1732_v42, %v1736_v46  ;;  %v1769_v30 = vld [vmem:[#allocation8 + $0x1ea8] sm:$0xff] }
 0x317   :  { %7591 = vmatprep.subr.bf16.mxu1 %v11506_v15  ;;  %v1744_v15 = vld [vmem:[#allocation8 + $0x1de0] sm:$0xff] }
 0x318   :  { %7264 = vmatpush1.bf16.msra.mxu0 %v11503_v23  ;;  %v11543_v23 = vcombine.low %v1732_v42, %v1736_v46  ;;  %v1772_v42 = vld [vmem:[#allocation8 + $0x1ec0] sm:$0xff] }
 0x319   :  { %7592 = vmatpush1.bf16.msra.mxu1 %v11505_v63  ;;  %7265 = vmatprep.subr.bf16.mxu0 %v11512_v20  ;;  %v11545_v63 = vcombine.low %v1733_v47, %v1737_v1  ;;  %v11552_v20 = vcombine.high %v1740_v55, %v1744_v15  ;;  %v1776_v46 = vld [vmem:[#allocation8 + $0x1ee0] sm:$0xff]  ;;  %v1773_v47 = vld [vmem:[#allocation8 + $0x1ec8] sm:$0xff] }
 0x31a   :  { %7593 = vmatprep.subr.bf16.mxu1 %v11514_v2  ;;  %v11554_v2 = vcombine.high %v1741_v32, %v1745_v60  ;;  %v1777_v1 = vld [vmem:[#allocation8 + $0x1ee8] sm:$0xff] }
 0x31c   :  { %7266 = vmatpush1.bf16.msra.mxu0 %v11511_v5  ;;  %v11551_v5 = vcombine.low %v1740_v55, %v1744_v15  ;;  %v1780_v55 = vld [vmem:[#allocation8 + $0x1f00] sm:$0xff] }
 0x31d   :  { %7594 = vmatpush1.bf16.msra.mxu1 %v11513_v6  ;;  %7267 = vmatprep.subr.bf16.mxu0 %v11520_v9  ;;  %v11553_v6 = vcombine.low %v1741_v32, %v1745_v60  ;;  %v11560_v9 = vcombine.high %v1748_v3, %v1752_v44  ;;  %v1784_v15 = vld [vmem:[#allocation8 + $0x1f20] sm:$0xff]  ;;  %v1781_v32 = vld [vmem:[#allocation8 + $0x1f08] sm:$0xff] }
 0x31e   :  { %7595 = vmatprep.subr.bf16.mxu1 %v11522_v26  ;;  %v11562_v26 = vcombine.high %v1749_v19, %v1753_v4  ;;  %v1785_v60 = vld [vmem:[#allocation8 + $0x1f28] sm:$0xff] }
 0x320   :  { %7268 = vmatpush1.bf16.msra.mxu0 %v11519_v25  ;;  %v11559_v25 = vcombine.low %v1748_v3, %v1752_v44  ;;  %v1788_v3 = vld [vmem:[#allocation8 + $0x1f40] sm:$0xff] }
 0x321   :  { %7596 = vmatpush1.bf16.msra.mxu1 %v11521_v38  ;;  %7269 = vmatprep.subr.bf16.mxu0 %v11528_v0  ;;  %v11561_v38 = vcombine.low %v1749_v19, %v1753_v4  ;;  %v11568_v0 = vcombine.high %v1756_v51, %v1760_v10  ;;  %v1792_v44 = vld [vmem:[#allocation8 + $0x1f60] sm:$0xff]  ;;  %v1789_v19 = vld [vmem:[#allocation8 + $0x1f48] sm:$0xff] }
 0x322   :  { %7597 = vmatprep.subr.bf16.mxu1 %v11530_v22  ;;  %v11570_v22 = vcombine.high %v1757_v11, %v1761_v18  ;;  %v1793_v4 = vld [vmem:[#allocation8 + $0x1f68] sm:$0xff] }
 0x324   :  { %7270 = vmatpush1.bf16.msra.mxu0 %v11527_v59  ;;  %v11567_v59 = vcombine.low %v1756_v51, %v1760_v10  ;;  %v1796_v51 = vld [vmem:[#allocation8 + $0x1f80] sm:$0xff] }
 0x325   :  { %7598 = vmatpush1.bf16.msra.mxu1 %v11529_v31  ;;  %7271 = vmatprep.subr.bf16.mxu0 %v11536_v34  ;;  %v11569_v31 = vcombine.low %v1757_v11, %v1761_v18  ;;  %v11576_v34 = vcombine.high %v1764_v27, %v1768_v28  ;;  %v1800_v10 = vld [vmem:[#allocation8 + $0x1fa0] sm:$0xff]  ;;  %v1797_v11 = vld [vmem:[#allocation8 + $0x1f88] sm:$0xff] }
 0x326   :  { %7599 = vmatprep.subr.bf16.mxu1 %v11538_v40  ;;  %v11578_v40 = vcombine.high %v1765_v57, %v1769_v30  ;;  %v1801_v18 = vld [vmem:[#allocation8 + $0x1fa8] sm:$0xff] }
 0x328   :  { %7272 = vmatpush1.bf16.msra.mxu0 %v11535_v48  ;;  %v11575_v48 = vcombine.low %v1764_v27, %v1768_v28  ;;  %v1804_v27 = vld [vmem:[#allocation8 + $0x1fc0] sm:$0xff] }
 0x329   :  { %7600 = vmatpush1.bf16.msra.mxu1 %v11537_v52  ;;  %7273 = vmatprep.subr.bf16.mxu0 %v11544_v54  ;;  %v11577_v52 = vcombine.low %v1765_v57, %v1769_v30  ;;  %v11584_v54 = vcombine.high %v1772_v42, %v1776_v46  ;;  %v1808_v28 = vld [vmem:[#allocation8 + $0x1fe0] sm:$0xff]  ;;  %v1805_v57 = vld [vmem:[#allocation8 + $0x1fc8] sm:$0xff] }
 0x32a   :  { %7601 = vmatprep.subr.bf16.mxu1 %v11546_v13  ;;  %v11586_v13 = vcombine.high %v1773_v47, %v1777_v1  ;;  %v1809_v30 = vld [vmem:[#allocation8 + $0x1fe8] sm:$0xff] }
 0x32b   :  { %v11618_v56 = vcombine.high %v1805_v57, %v1809_v30 }
 0x32c   :  { %7274 = vmatpush1.bf16.msra.mxu0 %v11543_v23  ;;  %v11583_v23 = vcombine.low %v1772_v42, %v1776_v46  ;;  %v794_v42 = vld [vmem:[#allocation8 + $0x30] sm:$0xff]  ;;  %v791_v46 = vld [vmem:[#allocation8 + $0x18] sm:$0xff] }
 0x32d   :  { %7602 = vmatpush1.bf16.msra.mxu1 %v11545_v63  ;;  %7275 = vmatprep.subr.bf16.mxu0 %v11552_v20  ;;  %v11585_v63 = vcombine.low %v1773_v47, %v1777_v1  ;;  %v11592_v20 = vcombine.high %v1780_v55, %v1784_v15  ;;  %v795_v47 = vld [vmem:[#allocation8 + $0x38] sm:$0xff]  ;;  %v11615_v1 = vcombine.low %v1804_v27, %v1808_v28 }
 0x32e   :  { %7603 = vmatprep.subr.bf16.mxu1 %v11554_v2  ;;  %v11594_v2 = vcombine.high %v1781_v32, %v1785_v60 }
 0x330   :  { %7276 = vmatpush1.bf16.msra.mxu0 %v11551_v5  ;;  %v11591_v5 = vcombine.low %v1780_v55, %v1784_v15  ;;  %v798_v55 = vld [vmem:[#allocation8 + $0x50] sm:$0xff] }
 0x331   :  { %7604 = vmatpush1.bf16.msra.mxu1 %v11553_v6  ;;  %7277 = vmatprep.subr.bf16.mxu0 %v11560_v9  ;;  %v11593_v6 = vcombine.low %v1781_v32, %v1785_v60  ;;  %v11600_v9 = vcombine.high %v1788_v3, %v1792_v44  ;;  %v802_v15 = vld [vmem:[#allocation8 + $0x70] sm:$0xff]  ;;  %v799_v60 = vld [vmem:[#allocation8 + $0x58] sm:$0xff] }
 0x332   :  { %7605 = vmatprep.subr.bf16.mxu1 %v11562_v26  ;;  %v11602_v26 = vcombine.high %v1789_v19, %v1793_v4 }
 0x334   :  { %7278 = vmatpush1.bf16.msra.mxu0 %v11559_v25  ;;  %v11599_v25 = vcombine.low %v1788_v3, %v1792_v44  ;;  %v806_v3 = vld [vmem:[#allocation8 + $0x90] sm:$0xff] }
 0x335   :  { %7606 = vmatpush1.bf16.msra.mxu1 %v11561_v38  ;;  %7279 = vmatprep.subr.bf16.mxu0 %v11568_v0  ;;  %v11601_v38 = vcombine.low %v1789_v19, %v1793_v4  ;;  %v11608_v0 = vcombine.high %v1796_v51, %v1800_v10  ;;  %v810_v44 = vld [vmem:[#allocation8 + $0xb0] sm:$0xff]  ;;  %v807_v4 = vld [vmem:[#allocation8 + $0x98] sm:$0xff] }
 0x336   :  { %7607 = vmatprep.subr.bf16.mxu1 %v11570_v22  ;;  %v11610_v22 = vcombine.high %v1797_v11, %v1801_v18 }
 0x338   :  { %7280 = vmatpush1.bf16.msra.mxu0 %v11567_v59  ;;  %v11607_v59 = vcombine.low %v1796_v51, %v1800_v10  ;;  %v814_v10 = vld [vmem:[#allocation8 + $0xd0] sm:$0xff] }
 0x339   :  { %7608 = vmatpush1.bf16.msra.mxu1 %v11569_v31  ;;  %7281 = vmatprep.subr.bf16.mxu0 %v11576_v34  ;;  %v11609_v31 = vcombine.low %v1797_v11, %v1801_v18  ;;  %v11616_v34 = vcombine.high %v1804_v27, %v1808_v28  ;;  %v818_v11 = vld [vmem:[#allocation8 + $0xf0] sm:$0xff]  ;;  %v815_v18 = vld [vmem:[#allocation8 + $0xd8] sm:$0xff] }
 0x33a   :  { %7609 = vmatprep.subr.bf16.mxu1 %v11578_v40  ;;  %v790_v40 = vld [vmem:[#allocation8 + $0x10] sm:$0xff] }
 0x33b   :  { %v10603_v32 = vcombine.low %v790_v40, %v794_v42  ;;  %v822_v28 = vld [vmem:[#allocation8 + $0x110] sm:$0xff] }
 0x33c   :  { %7282 = vmatpush1.bf16.msra.mxu0 %v11575_v48  ;;  %v11617_v48 = vcombine.low %v1805_v57, %v1809_v30  ;;  %v826_v57 = vld [vmem:[#allocation8 + $0x130] sm:$0xff]  ;;  %v823_v30 = vld [vmem:[#allocation8 + $0x118] sm:$0xff] }
 0x33d   :  { %7610 = vmatpush1.bf16.msra.mxu1 %v11577_v52  ;;  %7283 = vmatprep.subr.bf16.mxu0 %v11584_v54  ;;  %v10604_v52 = vcombine.high %v790_v40, %v794_v42  ;;  %v12569_v54 = vpop.eup %12568  ;;  %v830_v40 = vld [vmem:[#allocation8 + $0x150] sm:$0xff] }
 0x33e   :  { %7611 = vmatprep.subr.bf16.mxu1 %v11586_v13  ;;  %v10606_v13 = vcombine.high %v791_v46, %v795_v47  ;;  %v834_v42 = vld [vmem:[#allocation8 + $0x170] sm:$0xff] }
 0x340   :  { %7284 = vmatpush1.bf16.msra.mxu0 %v11583_v23  ;;  %v803_v23 = vld [vmem:[#allocation8 + $0x78] sm:$0xff] }
 0x341   :  { %7612 = vmatpush1.bf16.msra.mxu1 %v11585_v63  ;;  %7285 = vmatprep.subr.bf16.mxu0 %v11592_v20  ;;  %v13196_v63 = vpack.c.bf16 %v12569_v54, %v12569_v54  ;;  %v10605_v20 = vcombine.low %v791_v46, %v795_v47  ;;  %v10614_v19 = vcombine.high %v799_v60, %v803_v23  ;;  %v831_v46 = vld [vmem:[#allocation8 + $0x158] sm:$0xff] }
 0x342   :  { %7613 = vmatprep.subr.bf16.mxu1 %v11594_v2  ;;  %v10612_v2 = vcombine.high %v798_v55, %v802_v15  ;;  %v835_v47 = vld [vmem:[#allocation8 + $0x178] sm:$0xff] }
 0x343   :  { %v10646_v54 = vcombine.high %v831_v46, %v835_v47 }
 0x344   :  { %7286 = vmatpush1.bf16.msra.mxu0 %v11591_v5  ;;  %v811_v5 = vld [vmem:[#allocation8 + $0xb8] sm:$0xff] }
 0x345   :  { %7614 = vmatpush1.bf16.msra.mxu1 %v11593_v6  ;;  %7287 = vmatprep.subr.bf16.mxu0 %v11600_v9  ;;  %v10611_v6 = vcombine.low %v798_v55, %v802_v15  ;;  %v10613_v9 = vcombine.low %v799_v60, %v803_v23  ;;  %v10622_v51 = vcombine.high %v807_v4, %v811_v5  ;;  %v842_v55 = vld [vmem:[#allocation8 + $0x1b0] sm:$0xff]  ;;  %v839_v15 = vld [vmem:[#allocation8 + $0x198] sm:$0xff] }
 0x346   :  { %7615 = vmatprep.subr.bf16.mxu1 %v11602_v26  ;;  %v10620_v26 = vcombine.high %v806_v3, %v810_v44  ;;  %v10643_v60 = vcombine.low %v830_v40, %v834_v42  ;;  %v10645_v23 = vcombine.low %v831_v46, %v835_v47  ;;  %v875_v46 = vld [vmem:[#allocation8 + $0x2b8] sm:$0xff] }
 0x348   :  { %7288 = vmatpush1.bf16.msra.mxu0 %v11599_v25  ;;  %v819_v25 = vld [vmem:[#allocation8 + $0xf8] sm:$0xff] }
 0x349   :  { %7616 = vmatpush1.bf16.msra.mxu1 %v11601_v38  ;;  %7289 = vmatprep.subr.bf16.mxu0 %v11608_v0  ;;  %v10619_v38 = vcombine.low %v806_v3, %v810_v44  ;;  %v10621_v0 = vcombine.low %v807_v4, %v811_v5  ;;  %v10630_v27 = vcombine.high %v815_v18, %v819_v25  ;;  %v846_v3 = vld [vmem:[#allocation8 + $0x1d0] sm:$0xff]  ;;  %v851_v4 = vld [vmem:[#allocation8 + $0x1f8] sm:$0xff] }
 0x34a   :  { %7617 = vmatprep.subr.bf16.mxu1 %v11610_v22  ;;  %v10628_v22 = vcombine.high %v814_v10, %v818_v11  ;;  %v850_v44 = vld [vmem:[#allocation8 + $0x1f0] sm:$0xff] }
 0x34c   :  { %7290 = vmatpush1.bf16.msra.mxu0 %v11607_v59  ;;  %v827_v59 = vld [vmem:[#allocation8 + $0x138] sm:$0xff] }
 0x34d   :  { %7618 = vmatpush1.bf16.msra.mxu1 %v11609_v31  ;;  %7291 = vmatprep.subr.bf16.mxu0 %v11616_v34  ;;  %v10629_v31 = vcombine.low %v815_v18, %v819_v25  ;;  %v10636_v34 = vcombine.high %v822_v28, %v826_v57  ;;  %v859_v18 = vld [vmem:[#allocation8 + $0x238] sm:$0xff]  ;;  %v10659_v25 = vcombine.low %v846_v3, %v850_v44 }
 0x34e   :  { %7619 = vmatprep.subr.bf16.mxu1 %v11618_v56  ;;  %v10638_v56 = vcombine.high %v823_v30, %v827_v59 }
 0x350   :  { %7292 = vmatpush1.bf16.msra.mxu0 %v11615_v1  ;;  %v10635_v1 = vcombine.low %v822_v28, %v826_v57  ;;  %v866_v28 = vld [vmem:[#allocation8 + $0x270] sm:$0xff]  ;;  %v863_v57 = vld [vmem:[#allocation8 + $0x258] sm:$0xff] }
 0x351   :  { %7620 = vmatpush1.bf16.msra.mxu1 %v11617_v48  ;;  %7630 = vmatprep.subr.bf16.mxu0 %v10604_v52  ;;  %v10637_v48 = vcombine.low %v823_v30, %v827_v59  ;;  %v10644_v52 = vcombine.high %v830_v40, %v834_v42  ;;  %v867_v30 = vld [vmem:[#allocation8 + $0x278] sm:$0xff]  ;;  %v874_v40 = vld [vmem:[#allocation8 + $0x2b0] sm:$0xff] }
 0x352   :  { %7958 = vmatprep.subr.bf16.mxu1 %v10606_v13  ;;  %v838_v13 = vld [vmem:[#allocation8 + $0x190] sm:$0xff]  ;;  %v871_v42 = vld [vmem:[#allocation8 + $0x298] sm:$0xff] }
 0x353   :  { %7294 = vmatmul.mubr.bf16.vlgmr.msra.gmra.mrb[16].mxu0 %v13196_v63  ;;  %v10651_v5 = vcombine.low %v838_v13, %v842_v55 }
 0x354   :  { %7622 = vmatmul.mubr.bf16.vlgmr.msra.gmra.mrb[16].mxu1 %v13196_v63  ;;  %7631 = vmatpush1.bf16.msra.mxu0 %v10603_v32  ;;  %v843_v32 = vld [vmem:[#allocation8 + $0x1b8] sm:$0xff] }
 0x355   :  { %7662 = vmatprep.mubr.bf16.mxu0 %v13059_v41  ;;  %7959 = vmatpush1.bf16.msra.mxu1 %v10605_v20  ;;  %v10652_v20 = vcombine.high %v838_v13, %v842_v55  ;;  %v882_v13 = vld [vmem:[#allocation8 + $0x2f0] sm:$0xff]  ;;  %v879_v55 = vld [vmem:[#allocation8 + $0x2d8] sm:$0xff] }
 0x356   :  { %7990 = vmatprep.mubr.bf16.mxu1 %v13059_v41  ;;  %7632 = vmatprep.subr.bf16.mxu0 %v10612_v2  ;;  %v10627_v41 = vcombine.low %v814_v10, %v818_v11  ;;  %v10654_v2 = vcombine.high %v839_v15, %v843_v32  ;;  %v858_v10 = vld [vmem:[#allocation8 + $0x230] sm:$0xff]  ;;  %v855_v11 = vld [vmem:[#allocation8 + $0x218] sm:$0xff] }
 0x357   :  { %7960 = vmatprep.subr.bf16.mxu1 %v10614_v19  ;;  %v847_v19 = vld [vmem:[#allocation8 + $0x1d8] sm:$0xff] }
 0x358   :  { %7633 = vmatpush1.bf16.msra.mxu0 %v10611_v6  ;;  %v10653_v6 = vcombine.low %v839_v15, %v843_v32  ;;  %v883_v15 = vld [vmem:[#allocation8 + $0x2f8] sm:$0xff] }
 0x359   :  { %7961 = vmatpush1.bf16.msra.mxu1 %v10613_v9  ;;  %7634 = vmatprep.subr.bf16.mxu0 %v10620_v26  ;;  %v10660_v9 = vcombine.high %v846_v3, %v850_v44  ;;  %v10662_v26 = vcombine.high %v847_v19, %v851_v4  ;;  %v890_v3 = vld [vmem:[#allocation8 + $0x330] sm:$0xff]  ;;  %v887_v44 = vld [vmem:[#allocation8 + $0x318] sm:$0xff] }
 0x35a   :  { %7962 = vmatprep.subr.bf16.mxu1 %v10622_v51  ;;  %v854_v51 = vld [vmem:[#allocation8 + $0x210] sm:$0xff] }
 0x35b   :  { %v10667_v59 = vcombine.low %v854_v51, %v858_v10 }
 0x35c   :  { %7635 = vmatpush1.bf16.msra.mxu0 %v10619_v38  ;;  %v10661_v38 = vcombine.low %v847_v19, %v851_v4  ;;  %v891_v19 = vld [vmem:[#allocation8 + $0x338] sm:$0xff] }
 0x35d   :  { %7963 = vmatpush1.bf16.msra.mxu1 %v10621_v0  ;;  %7636 = vmatprep.subr.bf16.mxu0 %v10628_v22  ;;  %v10668_v0 = vcombine.high %v854_v51, %v858_v10  ;;  %v10670_v22 = vcombine.high %v855_v11, %v859_v18  ;;  %v898_v51 = vld [vmem:[#allocation8 + $0x370] sm:$0xff]  ;;  %v895_v10 = vld [vmem:[#allocation8 + $0x358] sm:$0xff] }
 0x35e   :  { %7964 = vmatprep.subr.bf16.mxu1 %v10630_v27  ;;  %v862_v27 = vld [vmem:[#allocation8 + $0x250] sm:$0xff] }
 0x35f   :  { %v10675_v47 = vcombine.low %v862_v27, %v866_v28 }
 0x360   :  { %7637 = vmatpush1.bf16.msra.mxu0 %v10627_v41  ;;  %v10669_v41 = vcombine.low %v855_v11, %v859_v18  ;;  %v899_v11 = vld [vmem:[#allocation8 + $0x378] sm:$0xff] }
 0x361   :  { %7965 = vmatpush1.bf16.msra.mxu1 %v10629_v31  ;;  %7638 = vmatprep.subr.bf16.mxu0 %v10636_v34  ;;  %v10676_v31 = vcombine.high %v862_v27, %v866_v28  ;;  %v10678_v34 = vcombine.high %v863_v57, %v867_v30  ;;  %v906_v27 = vld [vmem:[#allocation8 + $0x3b0] sm:$0xff]  ;;  %v903_v28 = vld [vmem:[#allocation8 + $0x398] sm:$0xff] }
 0x362   :  { %7966 = vmatprep.subr.bf16.mxu1 %v10638_v56  ;;  %v870_v56 = vld [vmem:[#allocation8 + $0x290] sm:$0xff] }
 0x363   :  { %v10683_v32 = vcombine.low %v870_v56, %v874_v40 }
 0x364   :  { %7639 = vmatpush1.bf16.msra.mxu0 %v10635_v1  ;;  %v10677_v1 = vcombine.low %v863_v57, %v867_v30  ;;  %v907_v57 = vld [vmem:[#allocation8 + $0x3b8] sm:$0xff] }
 0x365   :  { %7967 = vmatpush1.bf16.msra.mxu1 %v10637_v48  ;;  %7640 = vmatprep.subr.bf16.mxu0 %v10644_v52  ;;  %v10684_v48 = vcombine.high %v870_v56, %v874_v40  ;;  %v10686_v52 = vcombine.high %v871_v42, %v875_v46  ;;  %v914_v56 = vld [vmem:[#allocation8 + $0x3f0] sm:$0xff]  ;;  %v911_v40 = vld [vmem:[#allocation8 + $0x3d8] sm:$0xff] }
 0x366   :  { %7968 = vmatprep.subr.bf16.mxu1 %v10646_v54  ;;  %v878_v54 = vld [vmem:[#allocation8 + $0x2d0] sm:$0xff] }
 0x367   :  { %v10691_v4 = vcombine.low %v878_v54, %v882_v13 }
 0x368   :  { %7641 = vmatpush1.bf16.msra.mxu0 %v10643_v60  ;;  %v10685_v60 = vcombine.low %v871_v42, %v875_v46  ;;  %v915_v42 = vld [vmem:[#allocation8 + $0x3f8] sm:$0xff] }
 0x369   :  { %7969 = vmatpush1.bf16.msra.mxu1 %v10645_v23  ;;  %7642 = vmatprep.subr.bf16.mxu0 %v10652_v20  ;;  %v10692_v23 = vcombine.high %v878_v54, %v882_v13  ;;  %v10694_v20 = vcombine.high %v879_v55, %v883_v15  ;;  %v922_v54 = vld [vmem:[#allocation8 + $0x430] sm:$0xff]  ;;  %v919_v13 = vld [vmem:[#allocation8 + $0x418] sm:$0xff] }
 0x36a   :  { %7970 = vmatprep.subr.bf16.mxu1 %v10654_v2  ;;  %v886_v2 = vld [vmem:[#allocation8 + $0x310] sm:$0xff] }
 0x36b   :  { %v10699_v18 = vcombine.low %v886_v2, %v890_v3 }
 0x36c   :  { %7643 = vmatpush1.bf16.msra.mxu0 %v10651_v5  ;;  %v10693_v5 = vcombine.low %v879_v55, %v883_v15  ;;  %v923_v55 = vld [vmem:[#allocation8 + $0x438] sm:$0xff] }
 0x36d   :  { %7971 = vmatpush1.bf16.msra.mxu1 %v10653_v6  ;;  %7644 = vmatprep.subr.bf16.mxu0 %v10660_v9  ;;  %v10700_v6 = vcombine.high %v886_v2, %v890_v3  ;;  %v10702_v9 = vcombine.high %v887_v44, %v891_v19  ;;  %v930_v2 = vld [vmem:[#allocation8 + $0x470] sm:$0xff] }
 0x36e   :  { %7972 = vmatprep.subr.bf16.mxu1 %v10662_v26  ;;  %v894_v26 = vld [vmem:[#allocation8 + $0x350] sm:$0xff] }
 0x36f   :  { %v10707_v30 = vcombine.low %v894_v26, %v898_v51 }
 0x370   :  { %7645 = vmatpush1.bf16.msra.mxu0 %v10659_v25  ;;  %v10701_v25 = vcombine.low %v887_v44, %v891_v19  ;;  %v927_v44 = vld [vmem:[#allocation8 + $0x458] sm:$0xff] }
 0x371   :  { %7973 = vmatpush1.bf16.msra.mxu1 %v10661_v38  ;;  %7646 = vmatprep.subr.bf16.mxu0 %v10668_v0  ;;  %v10708_v38 = vcombine.high %v894_v26, %v898_v51  ;;  %v10710_v0 = vcombine.high %v895_v10, %v899_v11  ;;  %v931_v19 = vld [vmem:[#allocation8 + $0x478] sm:$0xff] }
 0x372   :  { %7974 = vmatprep.subr.bf16.mxu1 %v10670_v22  ;;  %v902_v22 = vld [vmem:[#allocation8 + $0x390] sm:$0xff]  ;;  %v10742_v26 = vcombine.high %v927_v44, %v931_v19  ;;  %v935_v51 = vld [vmem:[#allocation8 + $0x498] sm:$0xff] }
 0x373   :  { %v10715_v46 = vcombine.low %v902_v22, %v906_v27 }
 0x374   :  { %7647 = vmatpush1.bf16.msra.mxu0 %v10667_v59  ;;  %v10709_v59 = vcombine.low %v895_v10, %v899_v11  ;;  %v939_v10 = vld [vmem:[#allocation8 + $0x4b8] sm:$0xff] }
 0x375   :  { %7975 = vmatpush1.bf16.msra.mxu1 %v10669_v41  ;;  %7648 = vmatprep.subr.bf16.mxu0 %v10676_v31  ;;  %v10716_v41 = vcombine.high %v902_v22, %v906_v27  ;;  %v10718_v31 = vcombine.high %v903_v28, %v907_v57  ;;  %v946_v22 = vld [vmem:[#allocation8 + $0x4f0] sm:$0xff]  ;;  %v943_v27 = vld [vmem:[#allocation8 + $0x4d8] sm:$0xff] }
 0x376   :  { %7976 = vmatprep.subr.bf16.mxu1 %v10678_v34  ;;  %v910_v34 = vld [vmem:[#allocation8 + $0x3d0] sm:$0xff] }
 0x377   :  { %v10723_v15 = vcombine.low %v910_v34, %v914_v56 }
 0x378   :  { %7649 = vmatpush1.bf16.msra.mxu0 %v10675_v47  ;;  %v10717_v47 = vcombine.low %v903_v28, %v907_v57  ;;  %v947_v28 = vld [vmem:[#allocation8 + $0x4f8] sm:$0xff] }
 0x379   :  { %7977 = vmatpush1.bf16.msra.mxu1 %v10677_v1  ;;  %7650 = vmatprep.subr.bf16.mxu0 %v10684_v48  ;;  %v10724_v1 = vcombine.high %v910_v34, %v914_v56  ;;  %v10726_v48 = vcombine.high %v911_v40, %v915_v42  ;;  %v951_v34 = vld [vmem:[#allocation8 + $0x518] sm:$0xff] }
 0x37a   :  { %7978 = vmatprep.subr.bf16.mxu1 %v10686_v52  ;;  %v918_v52 = vld [vmem:[#allocation8 + $0x410] sm:$0xff]  ;;  %v955_v56 = vld [vmem:[#allocation8 + $0x538] sm:$0xff] }
 0x37b   :  { %v10731_v3 = vcombine.low %v918_v52, %v922_v54 }
 0x37c   :  { %7651 = vmatpush1.bf16.msra.mxu0 %v10683_v32  ;;  %v10725_v32 = vcombine.low %v911_v40, %v915_v42  ;;  %v10757_v40 = vcombine.low %v943_v27, %v947_v28 }
 0x37d   :  { %7979 = vmatpush1.bf16.msra.mxu1 %v10685_v60  ;;  %7652 = vmatprep.subr.bf16.mxu0 %v10692_v23  ;;  %v10732_v60 = vcombine.high %v918_v52, %v922_v54  ;;  %v10734_v23 = vcombine.high %v919_v13, %v923_v55  ;;  %v963_v52 = vld [vmem:[#allocation8 + $0x578] sm:$0xff] }
 0x37e   :  { %7980 = vmatprep.subr.bf16.mxu1 %v10694_v20  ;;  %v926_v20 = vld [vmem:[#allocation8 + $0x450] sm:$0xff] }
 0x37f   :  { %v10739_v11 = vcombine.low %v926_v20, %v930_v2 }
 0x380   :  { %7653 = vmatpush1.bf16.msra.mxu0 %v10691_v4  ;;  %v10733_v4 = vcombine.low %v919_v13, %v923_v55  ;;  %v10765_v13 = vcombine.low %v951_v34, %v955_v56 }
 0x381   :  { %7981 = vmatpush1.bf16.msra.mxu1 %v10693_v5  ;;  %7654 = vmatprep.subr.bf16.mxu0 %v10700_v6  ;;  %v10740_v5 = vcombine.high %v926_v20, %v930_v2  ;;  %v934_v6 = vld [vmem:[#allocation8 + $0x490] sm:$0xff]  ;;  %v971_v20 = vld [vmem:[#allocation8 + $0x5b8] sm:$0xff] }
 0x382   :  { %7982 = vmatprep.subr.bf16.mxu1 %v10702_v9  ;;  %v938_v9 = vld [vmem:[#allocation8 + $0x4b0] sm:$0xff] }
 0x383   :  { %v10747_v57 = vcombine.low %v934_v6, %v938_v9 }
 0x384   :  { %7655 = vmatpush1.bf16.msra.mxu0 %v10699_v18  ;;  %v10741_v18 = vcombine.low %v927_v44, %v931_v19 }
 0x385   :  { %7983 = vmatpush1.bf16.msra.mxu1 %v10701_v25  ;;  %7656 = vmatprep.subr.bf16.mxu0 %v10708_v38  ;;  %v10748_v25 = vcombine.high %v934_v6, %v938_v9  ;;  %v10750_v38 = vcombine.high %v935_v51, %v939_v10  ;;  %v975_v6 = vld [vmem:[#allocation8 + $0x5d8] sm:$0xff] }
 0x386   :  { %7984 = vmatprep.subr.bf16.mxu1 %v10710_v0  ;;  %v942_v0 = vld [vmem:[#allocation8 + $0x4d0] sm:$0xff]  ;;  %v979_v9 = vld [vmem:[#allocation8 + $0x5f8] sm:$0xff] }
 0x388   :  { %7657 = vmatpush1.bf16.msra.mxu0 %v10707_v30  ;;  %v10756_v30 = vcombine.high %v942_v0, %v946_v22 }
 0x389   :  { %7985 = vmatpush1.bf16.msra.mxu1 %v10709_v59  ;;  %7658 = vmatprep.subr.bf16.mxu0 %v10716_v41  ;;  %v10758_v59 = vcombine.high %v943_v27, %v947_v28  ;;  %v950_v41 = vld [vmem:[#allocation8 + $0x510] sm:$0xff]  ;;  %v10789_v27 = vcombine.low %v975_v6, %v979_v9 }
 0x38a   :  { %7986 = vmatprep.subr.bf16.mxu1 %v10718_v31  ;;  %v954_v31 = vld [vmem:[#allocation8 + $0x530] sm:$0xff] }
 0x38b   :  { %v10764_v42 = vcombine.high %v950_v41, %v954_v31  ;;  %v10763_v54 = vcombine.low %v950_v41, %v954_v31  ;;  %v995_v41 = vld [vmem:[#allocation8 + $0x678] sm:$0xff] }
 0x38c   :  { %7659 = vmatpush1.bf16.msra.mxu0 %v10715_v46  ;;  %v10766_v46 = vcombine.high %v951_v34, %v955_v56 }
 0x38d   :  { %7987 = vmatpush1.bf16.msra.mxu1 %v10717_v47  ;;  %7660 = vmatprep.subr.bf16.mxu0 %v10724_v1  ;;  %v958_v47 = vld [vmem:[#allocation8 + $0x550] sm:$0xff] }
 0x38e   :  { %7988 = vmatprep.subr.bf16.mxu1 %v10726_v48  ;;  %v962_v1 = vld [vmem:[#allocation8 + $0x570] sm:$0xff]  ;;  %v959_v48 = vld [vmem:[#allocation8 + $0x558] sm:$0xff] }
 0x38f   :  { %v10772_v55 = vcombine.high %v958_v47, %v962_v1  ;;  %v10771_v2 = vcombine.low %v958_v47, %v962_v1  ;;  %v1003_v47 = vld [vmem:[#allocation8 + $0x6b8] sm:$0xff] }
 0x390   :  { %7661 = vmatpush1.bf16.msra.mxu0 %v10723_v15  ;;  %v10774_v15 = vcombine.high %v959_v48, %v963_v52 }
 0x391   :  { %7989 = vmatpush1.bf16.msra.mxu1 %v10725_v32  ;;  %7671 = vmatprep.subr.bf16.mxu0 %v10732_v60  ;;  %v966_v32 = vld [vmem:[#allocation8 + $0x590] sm:$0xff] }
 0x392   :  { %7999 = vmatprep.subr.bf16.mxu1 %v10734_v23  ;;  %v970_v60 = vld [vmem:[#allocation8 + $0x5b0] sm:$0xff]  ;;  %v967_v23 = vld [vmem:[#allocation8 + $0x598] sm:$0xff] }
 0x393   :  { %7663 = vmatmul.mubr.bf16.vlgmr.msra.gmra.mrb[20].mxu0 %v13061_v43  ;;  %v10780_v44 = vcombine.high %v966_v32, %v970_v60  ;;  %v10782_v19 = vcombine.high %v967_v23, %v971_v20 }
 0x394   :  { %7991 = vmatmul.mubr.bf16.vlgmr.msra.gmra.mrb[20].mxu1 %v13061_v43  ;;  %7672 = vmatpush1.bf16.msra.mxu0 %v10731_v3  ;;  %v10749_v43 = vcombine.low %v935_v51, %v939_v10  ;;  %v10773_v3 = vcombine.low %v959_v48, %v963_v52  ;;  %v10781_v51 = vcombine.low %v967_v23, %v971_v20 }
 0x395   :  { %7703 = vmatprep.mubr.bf16.mxu0 %v13065_v50  ;;  %8000 = vmatpush1.bf16.msra.mxu1 %v10733_v4  ;;  %v974_v4 = vld [vmem:[#allocation8 + $0x5d0] sm:$0xff] }
 0x396   :  { %8031 = vmatprep.mubr.bf16.mxu1 %v13065_v50  ;;  %7673 = vmatprep.subr.bf16.mxu0 %v10740_v5  ;;  %v10755_v50 = vcombine.low %v942_v0, %v946_v22  ;;  %v978_v5 = vld [vmem:[#allocation8 + $0x5f0] sm:$0xff]  ;;  %v987_v0 = vld [vmem:[#allocation8 + $0x638] sm:$0xff] }
 0x397   :  { %8001 = vmatprep.subr.bf16.mxu1 %v10742_v26  ;;  %v10779_v26 = vcombine.low %v966_v32, %v970_v60  ;;  %v10788_v10 = vcombine.high %v974_v4, %v978_v5  ;;  %v10787_v22 = vcombine.low %v974_v4, %v978_v5  ;;  %v1011_v32 = vld [vmem:[#allocation8 + $0x6f8] sm:$0xff] }
 0x398   :  { %7674 = vmatpush1.bf16.msra.mxu0 %v10739_v11  ;;  %v10790_v11 = vcombine.high %v975_v6, %v979_v9  ;;  %v1019_v4 = vld [vmem:[#allocation8 + $0x738] sm:$0xff] }
 0x399   :  { %8002 = vmatpush1.bf16.msra.mxu1 %v10741_v18  ;;  %7675 = vmatprep.subr.bf16.mxu0 %v10748_v25  ;;  %v982_v18 = vld [vmem:[#allocation8 + $0x610] sm:$0xff] }
 0x39a   :  { %8003 = vmatprep.subr.bf16.mxu1 %v10750_v38  ;;  %v986_v25 = vld [vmem:[#allocation8 + $0x630] sm:$0xff]  ;;  %v983_v38 = vld [vmem:[#allocation8 + $0x618] sm:$0xff] }
 0x39b   :  { %v10796_v28 = vcombine.high %v982_v18, %v986_v25  ;;  %v10795_v31 = vcombine.low %v982_v18, %v986_v25  ;;  %v10797_v34 = vcombine.low %v983_v38, %v987_v0  ;;  %v1027_v18 = vld [vmem:[#allocation8 + $0x778] sm:$0xff] }
 0x39c   :  { %7676 = vmatpush1.bf16.msra.mxu0 %v10747_v57  ;;  %v10798_v57 = vcombine.high %v983_v38, %v987_v0 }
 0x39d   :  { %8004 = vmatpush1.bf16.msra.mxu1 %v10749_v43  ;;  %7677 = vmatprep.subr.bf16.mxu0 %v10756_v30  ;;  %v990_v43 = vld [vmem:[#allocation8 + $0x650] sm:$0xff] }
 0x39e   :  { %8005 = vmatprep.subr.bf16.mxu1 %v10758_v59  ;;  %v994_v30 = vld [vmem:[#allocation8 + $0x670] sm:$0xff]  ;;  %v991_v59 = vld [vmem:[#allocation8 + $0x658] sm:$0xff] }
 0x39f   :  { %v10804_v56 = vcombine.high %v990_v43, %v994_v30  ;;  %v10803_v1 = vcombine.low %v990_v43, %v994_v30  ;;  %v10805_v48 = vcombine.low %v991_v59, %v995_v41  ;;  %v1035_v43 = vld [vmem:[#allocation8 + $0x7b8] sm:$0xff] }
 0x3a0   :  { %7678 = vmatpush1.bf16.msra.mxu0 %v10755_v50  ;;  %v10806_v50 = vcombine.high %v991_v59, %v995_v41 }
 0x3a1   :  { %8006 = vmatpush1.bf16.msra.mxu1 %v10757_v40  ;;  %7679 = vmatprep.subr.bf16.mxu0 %v10764_v42  ;;  %v998_v40 = vld [vmem:[#allocation8 + $0x690] sm:$0xff] }
 0x3a2   :  { %8007 = vmatprep.subr.bf16.mxu1 %v10766_v46  ;;  %v1002_v42 = vld [vmem:[#allocation8 + $0x6b0] sm:$0xff]  ;;  %v999_v46 = vld [vmem:[#allocation8 + $0x698] sm:$0xff] }
 0x3a3   :  { %v10812_v52 = vcombine.high %v998_v40, %v1002_v42  ;;  %v10811_v60 = vcombine.low %v998_v40, %v1002_v42  ;;  %v10813_v23 = vcombine.low %v999_v46, %v1003_v47  ;;  %v1043_v40 = vld [vmem:[#allocation8 + $0x7f8] sm:$0xff] }
 0x3a4   :  { %7680 = vmatpush1.bf16.msra.mxu0 %v10763_v54  ;;  %v10814_v54 = vcombine.high %v999_v46, %v1003_v47 }
 0x3a5   :  { %8008 = vmatpush1.bf16.msra.mxu1 %v10765_v13  ;;  %7681 = vmatprep.subr.bf16.mxu0 %v10772_v55  ;;  %v1006_v13 = vld [vmem:[#allocation8 + $0x6d0] sm:$0xff] }
 0x3a6   :  { %8009 = vmatprep.subr.bf16.mxu1 %v10774_v15  ;;  %v1010_v55 = vld [vmem:[#allocation8 + $0x6f0] sm:$0xff]  ;;  %v1007_v15 = vld [vmem:[#allocation8 + $0x6d8] sm:$0xff] }
 0x3a7   :  { %v10820_v20 = vcombine.high %v1006_v13, %v1010_v55  ;;  %v10819_v5 = vcombine.low %v1006_v13, %v1010_v55  ;;  %v10821_v6 = vcombine.low %v1007_v15, %v1011_v32  ;;  %v1051_v13 = vld [vmem:[#allocation8 + $0x838] sm:$0xff] }
 0x3a8   :  { %7682 = vmatpush1.bf16.msra.mxu0 %v10771_v2  ;;  %v10822_v2 = vcombine.high %v1007_v15, %v1011_v32 }
 0x3a9   :  { %8010 = vmatpush1.bf16.msra.mxu1 %v10773_v3  ;;  %7683 = vmatprep.subr.bf16.mxu0 %v10780_v44  ;;  %v1014_v3 = vld [vmem:[#allocation8 + $0x710] sm:$0xff] }
 0x3aa   :  { %8011 = vmatprep.subr.bf16.mxu1 %v10782_v19  ;;  %v1018_v44 = vld [vmem:[#allocation8 + $0x730] sm:$0xff]  ;;  %v1015_v19 = vld [vmem:[#allocation8 + $0x718] sm:$0xff] }
 0x3ab   :  { %v10828_v9 = vcombine.high %v1014_v3, %v1018_v44  ;;  %v10827_v25 = vcombine.low %v1014_v3, %v1018_v44  ;;  %v10829_v38 = vcombine.low %v1015_v19, %v1019_v4  ;;  %v1055_v3 = vld [vmem:[#allocation8 + $0x858] sm:$0xff] }
 0x3ac   :  { %7684 = vmatpush1.bf16.msra.mxu0 %v10779_v26  ;;  %v10830_v26 = vcombine.high %v1015_v19, %v1019_v4  ;;  %v1059_v44 = vld [vmem:[#allocation8 + $0x878] sm:$0xff] }
 0x3ad   :  { %8012 = vmatpush1.bf16.msra.mxu1 %v10781_v51  ;;  %7685 = vmatprep.subr.bf16.mxu0 %v10788_v10  ;;  %v1022_v51 = vld [vmem:[#allocation8 + $0x750] sm:$0xff] }
 0x3ae   :  { %8013 = vmatprep.subr.bf16.mxu1 %v10790_v11  ;;  %v1026_v10 = vld [vmem:[#allocation8 + $0x770] sm:$0xff]  ;;  %v1023_v11 = vld [vmem:[#allocation8 + $0x758] sm:$0xff] }
 0x3af   :  { %v10836_v0 = vcombine.high %v1022_v51, %v1026_v10  ;;  %v10835_v30 = vcombine.low %v1022_v51, %v1026_v10  ;;  %v10837_v59 = vcombine.low %v1023_v11, %v1027_v18  ;;  %v1067_v51 = vld [vmem:[#allocation8 + $0x8b8] sm:$0xff] }
 0x3b0   :  { %7686 = vmatpush1.bf16.msra.mxu0 %v10787_v22  ;;  %v10838_v22 = vcombine.high %v1023_v11, %v1027_v18  ;;  %v10869_v11 = vcombine.low %v1055_v3, %v1059_v44 }
 0x3b1   :  { %8014 = vmatpush1.bf16.msra.mxu1 %v10789_v27  ;;  %7687 = vmatprep.subr.bf16.mxu0 %v10796_v28  ;;  %v1030_v27 = vld [vmem:[#allocation8 + $0x790] sm:$0xff] }
 0x3b2   :  { %8015 = vmatprep.subr.bf16.mxu1 %v10798_v57  ;;  %v1034_v28 = vld [vmem:[#allocation8 + $0x7b0] sm:$0xff]  ;;  %v1031_v57 = vld [vmem:[#allocation8 + $0x798] sm:$0xff] }
 0x3b3   :  { %v10844_v41 = vcombine.high %v1030_v27, %v1034_v28  ;;  %v10843_v42 = vcombine.low %v1030_v27, %v1034_v28  ;;  %v10845_v46 = vcombine.low %v1031_v57, %v1035_v43  ;;  %v1075_v27 = vld [vmem:[#allocation8 + $0x8f8] sm:$0xff] }
 0x3b4   :  { %7688 = vmatpush1.bf16.msra.mxu0 %v10795_v31  ;;  %v10846_v31 = vcombine.high %v1031_v57, %v1035_v43 }
 0x3b5   :  { %8016 = vmatpush1.bf16.msra.mxu1 %v10797_v34  ;;  %7689 = vmatprep.subr.bf16.mxu0 %v10804_v56  ;;  %v1038_v34 = vld [vmem:[#allocation8 + $0x7d0] sm:$0xff] }
 0x3b6   :  { %8017 = vmatprep.subr.bf16.mxu1 %v10806_v50  ;;  %v1042_v56 = vld [vmem:[#allocation8 + $0x7f0] sm:$0xff]  ;;  %v1039_v50 = vld [vmem:[#allocation8 + $0x7d8] sm:$0xff] }
 0x3b7   :  { %v10852_v47 = vcombine.high %v1038_v34, %v1042_v56  ;;  %v10851_v55 = vcombine.low %v1038_v34, %v1042_v56  ;;  %v10853_v15 = vcombine.low %v1039_v50, %v1043_v40 }
 0x3b8   :  { %7690 = vmatpush1.bf16.msra.mxu0 %v10803_v1  ;;  %v10854_v1 = vcombine.high %v1039_v50, %v1043_v40  ;;  %v1086_v40 = vld [vmem:[#allocation8 + $0x950] sm:$0xff] }
 0x3b9   :  { %8018 = vmatpush1.bf16.msra.mxu1 %v10805_v48  ;;  %7691 = vmatprep.subr.bf16.mxu0 %v10812_v52  ;;  %v1046_v48 = vld [vmem:[#allocation8 + $0x810] sm:$0xff] }
 0x3ba   :  { %8019 = vmatprep.subr.bf16.mxu1 %v10814_v54  ;;  %v1050_v52 = vld [vmem:[#allocation8 + $0x830] sm:$0xff]  ;;  %v1047_v54 = vld [vmem:[#allocation8 + $0x818] sm:$0xff] }
 0x3bb   :  { %v10860_v32 = vcombine.high %v1046_v48, %v1050_v52  ;;  %v10861_v19 = vcombine.low %v1047_v54, %v1051_v13 }
 0x3bc   :  { %7692 = vmatpush1.bf16.msra.mxu0 %v10811_v60  ;;  %v10862_v60 = vcombine.high %v1047_v54, %v1051_v13  ;;  %v1094_v13 = vld [vmem:[#allocation8 + $0x990] sm:$0xff] }
 0x3bd   :  { %8020 = vmatpush1.bf16.msra.mxu1 %v10813_v23  ;;  %7693 = vmatprep.subr.bf16.mxu0 %v10820_v20  ;;  %v1054_v23 = vld [vmem:[#allocation8 + $0x850] sm:$0xff] }
 0x3be   :  { %8021 = vmatprep.subr.bf16.mxu1 %v10822_v2  ;;  %v1058_v20 = vld [vmem:[#allocation8 + $0x870] sm:$0xff]  ;;  %v10859_v2 = vcombine.low %v1046_v48, %v1050_v52 }
 0x3bf   :  { %v10868_v4 = vcombine.high %v1054_v23, %v1058_v20  ;;  %v10867_v10 = vcombine.low %v1054_v23, %v1058_v20 }
 0x3c0   :  { %7694 = vmatpush1.bf16.msra.mxu0 %v10819_v5  ;;  %v1062_v5 = vld [vmem:[#allocation8 + $0x890] sm:$0xff] }
 0x3c1   :  { %8022 = vmatpush1.bf16.msra.mxu1 %v10821_v6  ;;  %7695 = vmatprep.subr.bf16.mxu0 %v10828_v9  ;;  %v1066_v6 = vld [vmem:[#allocation8 + $0x8b0] sm:$0xff]  ;;  %v10870_v9 = vcombine.high %v1055_v3, %v1059_v44 }
 0x3c2   :  { %8023 = vmatprep.subr.bf16.mxu1 %v10830_v26  ;;  %v1063_v26 = vld [vmem:[#allocation8 + $0x898] sm:$0xff]  ;;  %v10876_v18 = vcombine.high %v1062_v5, %v1066_v6  ;;  %v10875_v28 = vcombine.low %v1062_v5, %v1066_v6  ;;  %v1102_v3 = vld [vmem:[#allocation8 + $0x9d0] sm:$0xff] }
 0x3c3   :  { %v1106_v44 = vld [vmem:[#allocation8 + $0x9f0] sm:$0xff] }
 0x3c4   :  { %7696 = vmatpush1.bf16.msra.mxu0 %v10827_v25  ;;  %v10878_v25 = vcombine.high %v1063_v26, %v1067_v51 }
 0x3c5   :  { %8024 = vmatpush1.bf16.msra.mxu1 %v10829_v38  ;;  %7697 = vmatprep.subr.bf16.mxu0 %v10836_v0  ;;  %v1070_v38 = vld [vmem:[#allocation8 + $0x8d0] sm:$0xff] }
 0x3c6   :  { %8025 = vmatprep.subr.bf16.mxu1 %v10838_v22  ;;  %v1074_v0 = vld [vmem:[#allocation8 + $0x8f0] sm:$0xff]  ;;  %v1071_v22 = vld [vmem:[#allocation8 + $0x8d8] sm:$0xff] }
 0x3c7   :  { %v10884_v57 = vcombine.high %v1070_v38, %v1074_v0  ;;  %v10886_v43 = vcombine.high %v1071_v22, %v1075_v27  ;;  %v10885_v34 = vcombine.low %v1071_v22, %v1075_v27  ;;  %v1118_v27 = vld [vmem:[#allocation8 + $0xa50] sm:$0xff] }
 0x3c8   :  { %7698 = vmatpush1.bf16.msra.mxu0 %v10835_v30  ;;  %v1078_v30 = vld [vmem:[#allocation8 + $0x910] sm:$0xff] }
 0x3c9   :  { %8026 = vmatpush1.bf16.msra.mxu1 %v10837_v59  ;;  %7699 = vmatprep.subr.bf16.mxu0 %v10844_v41  ;;  %v1082_v59 = vld [vmem:[#allocation8 + $0x930] sm:$0xff]  ;;  %v1079_v41 = vld [vmem:[#allocation8 + $0x918] sm:$0xff] }
 0x3ca   :  { %8027 = vmatprep.subr.bf16.mxu1 %v10846_v31  ;;  %v1083_v31 = vld [vmem:[#allocation8 + $0x938] sm:$0xff]  ;;  %v10892_v56 = vcombine.high %v1078_v30, %v1082_v59 }
 0x3cb   :  { %v10894_v50 = vcombine.high %v1079_v41, %v1083_v31  ;;  %v10893_v48 = vcombine.low %v1079_v41, %v1083_v31  ;;  %v1126_v31 = vld [vmem:[#allocation8 + $0xa90] sm:$0xff] }
 0x3cc   :  { %7700 = vmatpush1.bf16.msra.mxu0 %v10843_v42  ;;  %v1090_v42 = vld [vmem:[#allocation8 + $0x970] sm:$0xff] }
 0x3cd   :  { %8028 = vmatpush1.bf16.msra.mxu1 %v10845_v46  ;;  %7701 = vmatprep.subr.bf16.mxu0 %v10852_v47  ;;  %v1087_v46 = vld [vmem:[#allocation8 + $0x958] sm:$0xff]  ;;  %v10900_v52 = vcombine.high %v1086_v40, %v1090_v42 }
 0x3ce   :  { %8029 = vmatprep.subr.bf16.mxu1 %v10854_v1  ;;  %v1091_v47 = vld [vmem:[#allocation8 + $0x978] sm:$0xff]  ;;  %v10891_v1 = vcombine.low %v1078_v30, %v1082_v59 }
 0x3cf   :  { %v10902_v54 = vcombine.high %v1087_v46, %v1091_v47  ;;  %v10901_v23 = vcombine.low %v1087_v46, %v1091_v47  ;;  %v1134_v47 = vld [vmem:[#allocation8 + $0xad0] sm:$0xff] }
 0x3d0   :  { %7702 = vmatpush1.bf16.msra.mxu0 %v10851_v55  ;;  %v1098_v55 = vld [vmem:[#allocation8 + $0x9b0] sm:$0xff] }
 0x3d1   :  { %8030 = vmatpush1.bf16.msra.mxu1 %v10853_v15  ;;  %7712 = vmatprep.subr.bf16.mxu0 %v10860_v32  ;;  %v1095_v15 = vld [vmem:[#allocation8 + $0x998] sm:$0xff]  ;;  %v10908_v20 = vcombine.high %v1094_v13, %v1098_v55  ;;  %v10907_v5 = vcombine.low %v1094_v13, %v1098_v55 }
 0x3d2   :  { %8040 = vmatprep.subr.bf16.mxu1 %v10862_v60  ;;  %v1099_v32 = vld [vmem:[#allocation8 + $0x9b8] sm:$0xff]  ;;  %v10899_v60 = vcombine.low %v1086_v40, %v1090_v42 }
 0x3d3   :  { %7704 = vmatmul.mubr.bf16.vlgmr.msra.gmra.mrb[20].mxu0 %v13126_v8  ;;  %v10909_v6 = vcombine.low %v1095_v15, %v1099_v32 }
 0x3d4   :  { %8032 = vmatmul.mubr.bf16.vlgmr.msra.gmra.mrb[20].mxu1 %v13126_v8  ;;  %7713 = vmatpush1.bf16.msra.mxu0 %v10859_v2  ;;  %v10877_v8 = vcombine.low %v1063_v26, %v1067_v51  ;;  %v10910_v2 = vcombine.high %v1095_v15, %v1099_v32  ;;  %v1110_v51 = vld [vmem:[#allocation8 + $0xa10] sm:$0xff] }
 0x3d5   :  { %7744 = vmatprep.mubr.bf16.mxu0 %v13128_v24  ;;  %8041 = vmatpush1.bf16.msra.mxu1 %v10861_v19  ;;  %v1103_v19 = vld [vmem:[#allocation8 + $0x9d8] sm:$0xff]  ;;  %v1142_v32 = vld [vmem:[#allocation8 + $0xb10] sm:$0xff] }
 0x3d6   :  { %8072 = vmatprep.mubr.bf16.mxu1 %v13128_v24  ;;  %7714 = vmatprep.subr.bf16.mxu0 %v10868_v4  ;;  %v10883_v24 = vcombine.low %v1070_v38, %v1074_v0  ;;  %v1107_v4 = vld [vmem:[#allocation8 + $0x9f8] sm:$0xff] }
 0x3d7   :  { %8042 = vmatprep.subr.bf16.mxu1 %v10870_v9  ;;  %v10916_v9 = vcombine.high %v1102_v3, %v1106_v44  ;;  %v10918_v26 = vcombine.high %v1103_v19, %v1107_v4  ;;  %v10917_v38 = vcombine.low %v1103_v19, %v1107_v4  ;;  %v1150_v4 = vld [vmem:[#allocation8 + $0xb50] sm:$0xff] }
 0x3d8   :  { %7715 = vmatpush1.bf16.msra.mxu0 %v10867_v10  ;;  %v1114_v10 = vld [vmem:[#allocation8 + $0xa30] sm:$0xff] }
 0x3d9   :  { %8043 = vmatpush1.bf16.msra.mxu1 %v10869_v11  ;;  %7716 = vmatprep.subr.bf16.mxu0 %v10876_v18  ;;  %v1111_v11 = vld [vmem:[#allocation8 + $0xa18] sm:$0xff]  ;;  %v10924_v0 = vcombine.high %v1110_v51, %v1114_v10 }
 0x3da   :  { %8044 = vmatprep.subr.bf16.mxu1 %v10878_v25  ;;  %v1115_v18 = vld [vmem:[#allocation8 + $0xa38] sm:$0xff]  ;;  %v10915_v25 = vcombine.low %v1102_v3, %v1106_v44 }
 0x3db   :  { %v10926_v22 = vcombine.high %v1111_v11, %v1115_v18  ;;  %v10925_v30 = vcombine.low %v1111_v11, %v1115_v18  ;;  %v1158_v18 = vld [vmem:[#allocation8 + $0xb90] sm:$0xff] }
 0x3dc   :  { %7717 = vmatpush1.bf16.msra.mxu0 %v10875_v28  ;;  %v1122_v28 = vld [vmem:[#allocation8 + $0xa70] sm:$0xff] }
 0x3dd   :  { %8045 = vmatpush1.bf16.msra.mxu1 %v10877_v8  ;;  %7718 = vmatprep.subr.bf16.mxu0 %v10884_v57  ;;  %v1119_v8 = vld [vmem:[#allocation8 + $0xa58] sm:$0xff]  ;;  %v10932_v59 = vcombine.high %v1118_v27, %v1122_v28 }
 0x3de   :  { %8046 = vmatprep.subr.bf16.mxu1 %v10886_v43  ;;  %v1123_v57 = vld [vmem:[#allocation8 + $0xa78] sm:$0xff]  ;;  %v10923_v43 = vcombine.low %v1110_v51, %v1114_v10 }
 0x3df   :  { %v10934_v41 = vcombine.high %v1119_v8, %v1123_v57  ;;  %v10933_v40 = vcombine.low %v1119_v8, %v1123_v57  ;;  %v1166_v57 = vld [vmem:[#allocation8 + $0xbd0] sm:$0xff] }
 0x3e0   :  { %7719 = vmatpush1.bf16.msra.mxu0 %v10883_v24  ;;  %v1130_v24 = vld [vmem:[#allocation8 + $0xab0] sm:$0xff] }
 0x3e1   :  { %8047 = vmatpush1.bf16.msra.mxu1 %v10885_v34  ;;  %7720 = vmatprep.subr.bf16.mxu0 %v10892_v56  ;;  %v1127_v34 = vld [vmem:[#allocation8 + $0xa98] sm:$0xff]  ;;  %v10940_v42 = vcombine.high %v1126_v31, %v1130_v24 }
 0x3e2   :  { %8048 = vmatprep.subr.bf16.mxu1 %v10894_v50  ;;  %v1131_v56 = vld [vmem:[#allocation8 + $0xab8] sm:$0xff]  ;;  %v10931_v50 = vcombine.low %v1118_v27, %v1122_v28 }
 0x3e3   :  { %v10942_v46 = vcombine.high %v1127_v34, %v1131_v56  ;;  %v10941_v13 = vcombine.low %v1127_v34, %v1131_v56  ;;  %v1174_v56 = vld [vmem:[#allocation8 + $0xc10] sm:$0xff] }
 0x3e4   :  { %7721 = vmatpush1.bf16.msra.mxu0 %v10891_v1  ;;  %v1138_v1 = vld [vmem:[#allocation8 + $0xaf0] sm:$0xff] }
 0x3e5   :  { %8049 = vmatpush1.bf16.msra.mxu1 %v10893_v48  ;;  %7722 = vmatprep.subr.bf16.mxu0 %v10900_v52  ;;  %v1135_v48 = vld [vmem:[#allocation8 + $0xad8] sm:$0xff]  ;;  %v10948_v55 = vcombine.high %v1134_v47, %v1138_v1 }
 0x3e6   :  { %8050 = vmatprep.subr.bf16.mxu1 %v10902_v54  ;;  %v1139_v52 = vld [vmem:[#allocation8 + $0xaf8] sm:$0xff]  ;;  %v10939_v54 = vcombine.low %v1126_v31, %v1130_v24 }
 0x3e7   :  { %v10950_v15 = vcombine.high %v1135_v48, %v1139_v52  ;;  %v10949_v3 = vcombine.low %v1135_v48, %v1139_v52  ;;  %v1182_v52 = vld [vmem:[#allocation8 + $0xc50] sm:$0xff] }
 0x3e8   :  { %7723 = vmatpush1.bf16.msra.mxu0 %v10899_v60  ;;  %v1146_v60 = vld [vmem:[#allocation8 + $0xb30] sm:$0xff] }
 0x3e9   :  { %8051 = vmatpush1.bf16.msra.mxu1 %v10901_v23  ;;  %7724 = vmatprep.subr.bf16.mxu0 %v10908_v20  ;;  %v1143_v23 = vld [vmem:[#allocation8 + $0xb18] sm:$0xff]  ;;  %v10956_v44 = vcombine.high %v1142_v32, %v1146_v60 }
 0x3ea   :  { %8052 = vmatprep.subr.bf16.mxu1 %v10910_v2  ;;  %v1147_v20 = vld [vmem:[#allocation8 + $0xb38] sm:$0xff]  ;;  %v10947_v2 = vcombine.low %v1134_v47, %v1138_v1 }
 0x3eb   :  { %v10958_v19 = vcombine.high %v1143_v23, %v1147_v20  ;;  %v10957_v51 = vcombine.low %v1143_v23, %v1147_v20  ;;  %v1190_v23 = vld [vmem:[#allocation8 + $0xc90] sm:$0xff] }
 0x3ec   :  { %7725 = vmatpush1.bf16.msra.mxu0 %v10907_v5  ;;  %v1154_v5 = vld [vmem:[#allocation8 + $0xb70] sm:$0xff] }
 0x3ed   :  { %8053 = vmatpush1.bf16.msra.mxu1 %v10909_v6  ;;  %7726 = vmatprep.subr.bf16.mxu0 %v10916_v9  ;;  %v1151_v6 = vld [vmem:[#allocation8 + $0xb58] sm:$0xff]  ;;  %v10964_v10 = vcombine.high %v1150_v4, %v1154_v5  ;;  %v1194_v20 = vld [vmem:[#allocation8 + $0xcb0] sm:$0xff] }
 0x3ee   :  { %8054 = vmatprep.subr.bf16.mxu1 %v10918_v26  ;;  %v1155_v9 = vld [vmem:[#allocation8 + $0xb78] sm:$0xff]  ;;  %v10955_v26 = vcombine.low %v1142_v32, %v1146_v60 }
 0x3ef   :  { %v10966_v11 = vcombine.high %v1151_v6, %v1155_v9  ;;  %v10965_v27 = vcombine.low %v1151_v6, %v1155_v9  ;;  %v1198_v9 = vld [vmem:[#allocation8 + $0xcd0] sm:$0xff] }
 0x3f0   :  { %7727 = vmatpush1.bf16.msra.mxu0 %v10915_v25  ;;  %v1162_v25 = vld [vmem:[#allocation8 + $0xbb0] sm:$0xff] }
 0x3f1   :  { %8055 = vmatpush1.bf16.msra.mxu1 %v10917_v38  ;;  %7728 = vmatprep.subr.bf16.mxu0 %v10924_v0  ;;  %v1159_v38 = vld [vmem:[#allocation8 + $0xb98] sm:$0xff]  ;;  %v10972_v28 = vcombine.high %v1158_v18, %v1162_v25 }
 0x3f2   :  { %8056 = vmatprep.subr.bf16.mxu1 %v10926_v22  ;;  %v1163_v0 = vld [vmem:[#allocation8 + $0xbb8] sm:$0xff]  ;;  %v10963_v22 = vcombine.low %v1150_v4, %v1154_v5  ;;  %v11004_v5 = vcombine.high %v1190_v23, %v1194_v20 }
 0x3f3   :  { %v10974_v8 = vcombine.high %v1159_v38, %v1163_v0  ;;  %v10973_v31 = vcombine.low %v1159_v38, %v1163_v0  ;;  %v1206_v38 = vld [vmem:[#allocation8 + $0xd10] sm:$0xff] }
 0x3f4   :  { %7729 = vmatpush1.bf16.msra.mxu0 %v10923_v43  ;;  %v1170_v43 = vld [vmem:[#allocation8 + $0xbf0] sm:$0xff] }
 0x3f5   :  { %8057 = vmatpush1.bf16.msra.mxu1 %v10925_v30  ;;  %7730 = vmatprep.subr.bf16.mxu0 %v10932_v59  ;;  %v1167_v30 = vld [vmem:[#allocation8 + $0xbd8] sm:$0xff]  ;;  %v10980_v24 = vcombine.high %v1166_v57, %v1170_v43  ;;  %v1210_v0 = vld [vmem:[#allocation8 + $0xd30] sm:$0xff] }
 0x3f6   :  { %8058 = vmatprep.subr.bf16.mxu1 %v10934_v41  ;;  %v1171_v59 = vld [vmem:[#allocation8 + $0xbf8] sm:$0xff]  ;;  %v10971_v41 = vcombine.low %v1158_v18, %v1162_v25 }
 0x3f7   :  { %v10982_v34 = vcombine.high %v1167_v30, %v1171_v59  ;;  %v10981_v47 = vcombine.low %v1167_v30, %v1171_v59  ;;  %v1218_v30 = vld [vmem:[#allocation8 + $0xd70] sm:$0xff]  ;;  %v1215_v59 = vld [vmem:[#allocation8 + $0xd58] sm:$0xff] }
 0x3f8   :  { %7731 = vmatpush1.bf16.msra.mxu0 %v10931_v50  ;;  %v1178_v50 = vld [vmem:[#allocation8 + $0xc30] sm:$0xff] }
 0x3f9   :  { %8059 = vmatpush1.bf16.msra.mxu1 %v10933_v40  ;;  %7732 = vmatprep.subr.bf16.mxu0 %v10940_v42  ;;  %v1175_v40 = vld [vmem:[#allocation8 + $0xc18] sm:$0xff]  ;;  %v10988_v1 = vcombine.high %v1174_v56, %v1178_v50 }
 0x3fa   :  { %8060 = vmatprep.subr.bf16.mxu1 %v10942_v46  ;;  %v1179_v42 = vld [vmem:[#allocation8 + $0xc38] sm:$0xff]  ;;  %v10979_v46 = vcombine.low %v1166_v57, %v1170_v43  ;;  %v1214_v43 = vld [vmem:[#allocation8 + $0xd50] sm:$0xff] }
 0x3fb   :  { %v10990_v48 = vcombine.high %v1175_v40, %v1179_v42  ;;  %v10989_v32 = vcombine.low %v1175_v40, %v1179_v42  ;;  %v1226_v40 = vld [vmem:[#allocation8 + $0xdb0] sm:$0xff]  ;;  %v1223_v42 = vld [vmem:[#allocation8 + $0xd98] sm:$0xff] }
 0x3fc   :  { %7733 = vmatpush1.bf16.msra.mxu0 %v10939_v54  ;;  %v1186_v54 = vld [vmem:[#allocation8 + $0xc70] sm:$0xff] }
 0x3fd   :  { %8061 = vmatpush1.bf16.msra.mxu1 %v10941_v13  ;;  %7734 = vmatprep.subr.bf16.mxu0 %v10948_v55  ;;  %v10987_v13 = vcombine.low %v1174_v56, %v1178_v50  ;;  %v1183_v55 = vld [vmem:[#allocation8 + $0xc58] sm:$0xff]  ;;  %v10996_v60 = vcombine.high %v1182_v52, %v1186_v54  ;;  %v1222_v50 = vld [vmem:[#allocation8 + $0xd90] sm:$0xff] }
 0x3fe   :  { %8062 = vmatprep.subr.bf16.mxu1 %v10950_v15  ;;  %v1187_v15 = vld [vmem:[#allocation8 + $0xc78] sm:$0xff] }
 0x3ff   :  { %v10997_v4 = vcombine.low %v1183_v55, %v1187_v15 }
 0x400   :  { %7735 = vmatpush1.bf16.msra.mxu0 %v10947_v2  ;;  %v10998_v2 = vcombine.high %v1183_v55, %v1187_v15  ;;  %v1234_v55 = vld [vmem:[#allocation8 + $0xdf0] sm:$0xff] }
 0x401   :  { %8063 = vmatpush1.bf16.msra.mxu1 %v10949_v3  ;;  %7736 = vmatprep.subr.bf16.mxu0 %v10956_v44  ;;  %v1191_v3 = vld [vmem:[#allocation8 + $0xc98] sm:$0xff] }
 0x402   :  { %8064 = vmatprep.subr.bf16.mxu1 %v10958_v19  ;;  %v1195_v44 = vld [vmem:[#allocation8 + $0xcb8] sm:$0xff]  ;;  %v10995_v19 = vcombine.low %v1182_v52, %v1186_v54 }
 0x403   :  { %v11006_v6 = vcombine.high %v1191_v3, %v1195_v44 }
 0x404   :  { %7737 = vmatpush1.bf16.msra.mxu0 %v10955_v26  ;;  %v1202_v26 = vld [vmem:[#allocation8 + $0xcf0] sm:$0xff] }
 0x405   :  { %8065 = vmatpush1.bf16.msra.mxu1 %v10957_v51  ;;  %7738 = vmatprep.subr.bf16.mxu0 %v10964_v10  ;;  %v1199_v51 = vld [vmem:[#allocation8 + $0xcd8] sm:$0xff]  ;;  %v11012_v18 = vcombine.high %v1198_v9, %v1202_v26 }
 0x406   :  { %8066 = vmatprep.subr.bf16.mxu1 %v10966_v11  ;;  %v1203_v10 = vld [vmem:[#allocation8 + $0xcf8] sm:$0xff]  ;;  %v11003_v11 = vcombine.low %v1190_v23, %v1194_v20 }
 0x407   :  { %v11014_v25 = vcombine.high %v1199_v51, %v1203_v10  ;;  %v1235_v23 = vld [vmem:[#allocation8 + $0xdf8] sm:$0xff] }
 0x408   :  { %7739 = vmatpush1.bf16.msra.mxu0 %v10963_v22  ;;  %v1207_v22 = vld [vmem:[#allocation8 + $0xd18] sm:$0xff] }
 0x409   :  { %8067 = vmatpush1.bf16.msra.mxu1 %v10965_v27  ;;  %7740 = vmatprep.subr.bf16.mxu0 %v10972_v28  ;;  %v1211_v27 = vld [vmem:[#allocation8 + $0xd38] sm:$0xff]  ;;  %v11013_v28 = vcombine.low %v1199_v51, %v1203_v10  ;;  %v1242_v51 = vld [vmem:[#allocation8 + $0xe30] sm:$0xff] }
 0x40a   :  { %8068 = vmatprep.subr.bf16.mxu1 %v10974_v8  ;;  %v11020_v8 = vcombine.high %v1206_v38, %v1210_v0  ;;  %v11022_v57 = vcombine.high %v1207_v22, %v1211_v27  ;;  %v1239_v10 = vld [vmem:[#allocation8 + $0xe18] sm:$0xff] }
 0x40c   :  { %7741 = vmatpush1.bf16.msra.mxu0 %v10971_v41  ;;  %v1219_v41 = vld [vmem:[#allocation8 + $0xd78] sm:$0xff] }
 0x40d   :  { %8069 = vmatpush1.bf16.msra.mxu1 %v10973_v31  ;;  %7742 = vmatprep.subr.bf16.mxu0 %v10980_v24  ;;  %v11019_v31 = vcombine.low %v1206_v38, %v1210_v0  ;;  %v11021_v24 = vcombine.low %v1207_v22, %v1211_v27  ;;  %v11030_v56 = vcombine.high %v1215_v59, %v1219_v41  ;;  %v1246_v0 = vld [vmem:[#allocation8 + $0xe50] sm:$0xff]  ;;  %v1247_v27 = vld [vmem:[#allocation8 + $0xe58] sm:$0xff] }
 0x40e   :  { %8070 = vmatprep.subr.bf16.mxu1 %v10982_v34  ;;  %v11028_v34 = vcombine.high %v1214_v43, %v1218_v30  ;;  %v1250_v22 = vld [vmem:[#allocation8 + $0xe70] sm:$0xff] }
 0x410   :  { %7743 = vmatpush1.bf16.msra.mxu0 %v10979_v46  ;;  %v1227_v46 = vld [vmem:[#allocation8 + $0xdb8] sm:$0xff] }
 0x411   :  { %8071 = vmatpush1.bf16.msra.mxu1 %v10981_v47  ;;  %7753 = vmatprep.subr.bf16.mxu0 %v10988_v1  ;;  %v11027_v47 = vcombine.low %v1214_v43, %v1218_v30  ;;  %v11029_v1 = vcombine.low %v1215_v59, %v1219_v41  ;;  %v11038_v54 = vcombine.high %v1223_v42, %v1227_v46  ;;  %v1254_v30 = vld [vmem:[#allocation8 + $0xe90] sm:$0xff]  ;;  %v1255_v41 = vld [vmem:[#allocation8 + $0xe98] sm:$0xff] }
 0x412   :  { %8081 = vmatprep.subr.bf16.mxu1 %v10990_v48  ;;  %v11036_v48 = vcombine.high %v1222_v50, %v1226_v40  ;;  %v1258_v59 = vld [vmem:[#allocation8 + $0xeb0] sm:$0xff] }
 0x413   :  { %7745 = vmatmul.mubr.bf16.vlgmr.msra.gmra.mrb[20].mxu0 %v13140_v35 }
 0x414   :  { %8073 = vmatmul.mubr.bf16.vlgmr.msra.gmra.mrb[20].mxu1 %v13140_v35  ;;  %7754 = vmatpush1.bf16.msra.mxu0 %v10987_v13  ;;  %v11005_v35 = vcombine.low %v1191_v3, %v1195_v44  ;;  %v1230_v13 = vld [vmem:[#allocation8 + $0xdd0] sm:$0xff]  ;;  %v11035_v3 = vcombine.low %v1222_v50, %v1226_v40 }
 0x415   :  { %7785 = vmatprep.mubr.bf16.mxu0 %v13142_v53  ;;  %8082 = vmatpush1.bf16.msra.mxu1 %v10989_v32  ;;  %v1262_v40 = vld [vmem:[#allocation8 + $0xed0] sm:$0xff] }
 0x416   :  { %8113 = vmatprep.mubr.bf16.mxu1 %v13142_v53  ;;  %7755 = vmatprep.subr.bf16.mxu0 %v10996_v60  ;;  %v11011_v53 = vcombine.low %v1198_v9, %v1202_v26  ;;  %v1231_v60 = vld [vmem:[#allocation8 + $0xdd8] sm:$0xff]  ;;  %v1238_v26 = vld [vmem:[#allocation8 + $0xe10] sm:$0xff] }
 0x417   :  { %8083 = vmatprep.subr.bf16.mxu1 %v10998_v2  ;;  %v11046_v9 = vcombine.high %v1231_v60, %v1235_v23 }
 0x418   :  { %7756 = vmatpush1.bf16.msra.mxu0 %v10995_v19 }
 0x419   :  { %8084 = vmatpush1.bf16.msra.mxu1 %v10997_v4  ;;  %7757 = vmatprep.subr.bf16.mxu0 %v11004_v5  ;;  %v11037_v4 = vcombine.low %v1223_v42, %v1227_v46  ;;  %v11044_v5 = vcombine.high %v1230_v13, %v1234_v55  ;;  %v1266_v42 = vld [vmem:[#allocation8 + $0xef0] sm:$0xff]  ;;  %v1263_v46 = vld [vmem:[#allocation8 + $0xed8] sm:$0xff] }
 0x41a   :  { %8085 = vmatprep.subr.bf16.mxu1 %v11006_v6 }
 0x41c   :  { %7758 = vmatpush1.bf16.msra.mxu0 %v11003_v11  ;;  %v1243_v11 = vld [vmem:[#allocation8 + $0xe38] sm:$0xff] }
 0x41d   :  { %8086 = vmatpush1.bf16.msra.mxu1 %v11005_v35  ;;  %7759 = vmatprep.subr.bf16.mxu0 %v11012_v18  ;;  %v11043_v35 = vcombine.low %v1230_v13, %v1234_v55  ;;  %v11045_v18 = vcombine.low %v1231_v60, %v1235_v23  ;;  %v11054_v38 = vcombine.high %v1239_v10, %v1243_v11  ;;  %v1270_v55 = vld [vmem:[#allocation8 + $0xf10] sm:$0xff]  ;;  %v1271_v23 = vld [vmem:[#allocation8 + $0xf18] sm:$0xff] }
 0x41e   :  { %8087 = vmatprep.subr.bf16.mxu1 %v11014_v25  ;;  %v11052_v25 = vcombine.high %v1238_v26, %v1242_v51  ;;  %v1274_v60 = vld [vmem:[#allocation8 + $0xf30] sm:$0xff] }
 0x420   :  { %7760 = vmatpush1.bf16.msra.mxu0 %v11011_v53  ;;  %v1251_v53 = vld [vmem:[#allocation8 + $0xe78] sm:$0xff] }
 0x421   :  { %8088 = vmatpush1.bf16.msra.mxu1 %v11013_v28  ;;  %7761 = vmatprep.subr.bf16.mxu0 %v11020_v8  ;;  %v11051_v28 = vcombine.low %v1238_v26, %v1242_v51  ;;  %v11053_v8 = vcombine.low %v1239_v10, %v1243_v11  ;;  %v11062_v43 = vcombine.high %v1247_v27, %v1251_v53  ;;  %v1283_v26 = vld [vmem:[#allocation8 + $0xf78] sm:$0xff] }
 0x422   :  { %8089 = vmatprep.subr.bf16.mxu1 %v11022_v57  ;;  %v11060_v57 = vcombine.high %v1246_v0, %v1250_v22  ;;  %v11083_v51 = vcombine.low %v1270_v55, %v1274_v60 }
 0x424   :  { %7762 = vmatpush1.bf16.msra.mxu0 %v11019_v31  ;;  %v1259_v31 = vld [vmem:[#allocation8 + $0xeb8] sm:$0xff] }
 0x425   :  { %8090 = vmatpush1.bf16.msra.mxu1 %v11021_v24  ;;  %7763 = vmatprep.subr.bf16.mxu0 %v11028_v34  ;;  %v11059_v24 = vcombine.low %v1246_v0, %v1250_v22  ;;  %v11061_v34 = vcombine.low %v1247_v27, %v1251_v53  ;;  %v11070_v50 = vcombine.high %v1255_v41, %v1259_v31  ;;  %v1291_v0 = vld [vmem:[#allocation8 + $0xfb8] sm:$0xff] }
 0x426   :  { %v13214_v52 = vpop.f32.mrb[16].mxu0  ;;  %8091 = vmatprep.subr.bf16.mxu1 %v11030_v56  ;;  %v11068_v56 = vcombine.high %v1254_v30, %v1258_v59 }
 0x427   :  { %v13216_v15 = vpop.f32.mrb[16].mxu1  ;;  %v13218_v32 = vpop.f32.mrb[17].mxu0 }
 0x428   :  { %v13220_v20 = vpop.f32.mrb[17].mxu1  ;;  %v7299_v2 = vpop.f32.mrb[18].mxu0  ;;  %7764 = vmatpush1.bf16.msra.mxu0 %v11027_v47  ;;  %v1267_v47 = vld [vmem:[#allocation8 + $0xef8] sm:$0xff] }
 0x429   :  { %v7627_v44 = vpop.f32.mrb[18].mxu1  ;;  %8092 = vmatpush1.bf16.msra.mxu1 %v11029_v1  ;;  %v7300_v19 = vpop.f32.mrb[19].mxu0  ;;  %7765 = vmatprep.subr.bf16.mxu0 %v11036_v48  ;;  %v11067_v1 = vcombine.low %v1254_v30, %v1258_v59  ;;  %v11069_v48 = vcombine.low %v1255_v41, %v1259_v31  ;;  %v11078_v13 = vcombine.high %v1263_v46, %v1267_v47  ;;  %v1275_v2 = vld [vmem:[#allocation8 + $0xf38] sm:$0xff] }
 0x42a   :  { %v7628_v6 = vpop.f32.mrb[19].mxu1  ;;  %8093 = vmatprep.subr.bf16.mxu1 %v11038_v54  ;;  %v11076_v54 = vcombine.high %v1262_v40, %v1266_v42  ;;  %v11077_v44 = vcombine.low %v1263_v46, %v1267_v47  ;;  %v11084_v19 = vcombine.high %v1270_v55, %v1274_v60  ;;  %v11085_v10 = vcombine.low %v1271_v23, %v1275_v2  ;;  %v1299_v30 = vld [vmem:[#allocation8 + $0xff8] sm:$0xff] }
 0x42b   :  { %v1282_v6 = vld [vmem:[#allocation8 + $0xf70] sm:$0xff]  ;;  %v1311_v55 = vld [vmem:[#allocation8 + $0x1058] sm:$0xff] }
 0x42c   :  { %7766 = vmatpush1.bf16.msra.mxu0 %v11035_v3  ;;  %v11075_v3 = vcombine.low %v1262_v40, %v1266_v42  ;;  %v1307_v40 = vld [vmem:[#allocation8 + $0x1038] sm:$0xff] }
 0x42d   :  { %8094 = vmatpush1.bf16.msra.mxu1 %v11037_v4  ;;  %7767 = vmatprep.subr.bf16.mxu0 %v11044_v5  ;;  %v11086_v4 = vcombine.high %v1271_v23, %v1275_v2  ;;  %v1278_v5 = vld [vmem:[#allocation8 + $0xf50] sm:$0xff]  ;;  %v1315_v60 = vld [vmem:[#allocation8 + $0x1078] sm:$0xff] }
 0x42e   :  { %8095 = vmatprep.subr.bf16.mxu1 %v11046_v9  ;;  %v1279_v9 = vld [vmem:[#allocation8 + $0xf58] sm:$0xff]  ;;  %v11092_v11 = vcombine.high %v1278_v5, %v1282_v6  ;;  %v11091_v22 = vcombine.low %v1278_v5, %v1282_v6 }
 0x42f   :  { %v11093_v27 = vcombine.low %v1279_v9, %v1283_v26  ;;  %v1323_v5 = vld [vmem:[#allocation8 + $0x10b8] sm:$0xff] }
 0x430   :  { %7768 = vmatpush1.bf16.msra.mxu0 %v11043_v35  ;;  %v11094_v35 = vcombine.high %v1279_v9, %v1283_v26  ;;  %v11125_v9 = vcombine.low %v1311_v55, %v1315_v60 }
 0x431   :  { %8096 = vmatpush1.bf16.msra.mxu1 %v11045_v18  ;;  %7769 = vmatprep.subr.bf16.mxu0 %v11052_v25  ;;  %v1286_v18 = vld [vmem:[#allocation8 + $0xf90] sm:$0xff] }
 0x432   :  { %8097 = vmatprep.subr.bf16.mxu1 %v11054_v38  ;;  %v1290_v25 = vld [vmem:[#allocation8 + $0xfb0] sm:$0xff]  ;;  %v1287_v38 = vld [vmem:[#allocation8 + $0xf98] sm:$0xff] }
 0x433   :  { %v11100_v53 = vcombine.high %v1286_v18, %v1290_v25  ;;  %v11099_v59 = vcombine.low %v1286_v18, %v1290_v25  ;;  %v11101_v41 = vcombine.low %v1287_v38, %v1291_v0  ;;  %v1331_v18 = vld [vmem:[#allocation8 + $0x10f8] sm:$0xff] }
 0x434   :  { %7770 = vmatpush1.bf16.msra.mxu0 %v11051_v28  ;;  %v11102_v28 = vcombine.high %v1287_v38, %v1291_v0 }
 0x435   :  { %8098 = vmatpush1.bf16.msra.mxu1 %v11053_v8  ;;  %7771 = vmatprep.subr.bf16.mxu0 %v11060_v57  ;;  %v1294_v8 = vld [vmem:[#allocation8 + $0xfd0] sm:$0xff] }
 0x436   :  { %8099 = vmatprep.subr.bf16.mxu1 %v11062_v43  ;;  %v1298_v57 = vld [vmem:[#allocation8 + $0xff0] sm:$0xff]  ;;  %v1295_v43 = vld [vmem:[#allocation8 + $0xfd8] sm:$0xff] }
 0x437   :  { %v11108_v31 = vcombine.high %v1294_v8, %v1298_v57  ;;  %v11107_v42 = vcombine.low %v1294_v8, %v1298_v57  ;;  %v11109_v46 = vcombine.low %v1295_v43, %v1299_v30 }
 0x438   :  { %7772 = vmatpush1.bf16.msra.mxu0 %v11059_v24  ;;  %v11110_v24 = vcombine.high %v1295_v43, %v1299_v30  ;;  %v1342_v30 = vld [vmem:[#allocation8 + $0x1150] sm:$0xff] }
 0x439   :  { %8100 = vmatpush1.bf16.msra.mxu1 %v11061_v34  ;;  %7773 = vmatprep.subr.bf16.mxu0 %v11068_v56  ;;  %v1302_v34 = vld [vmem:[#allocation8 + $0x1010] sm:$0xff] }
 0x43a   :  { %8101 = vmatprep.subr.bf16.mxu1 %v11070_v50  ;;  %v1306_v56 = vld [vmem:[#allocation8 + $0x1030] sm:$0xff]  ;;  %v1303_v50 = vld [vmem:[#allocation8 + $0x1018] sm:$0xff] }
 0x43b   :  { %v11116_v47 = vcombine.high %v1302_v34, %v1306_v56  ;;  %v11117_v23 = vcombine.low %v1303_v50, %v1307_v40 }
 0x43c   :  { %7774 = vmatpush1.bf16.msra.mxu0 %v11067_v1  ;;  %v11118_v1 = vcombine.high %v1303_v50, %v1307_v40  ;;  %v1350_v40 = vld [vmem:[#allocation8 + $0x1190] sm:$0xff] }
 0x43d   :  { %8102 = vmatpush1.bf16.msra.mxu1 %v11069_v48  ;;  %7775 = vmatprep.subr.bf16.mxu0 %v11076_v54  ;;  %v1310_v48 = vld [vmem:[#allocation8 + $0x1050] sm:$0xff] }
 0x43e   :  { %8103 = vmatprep.subr.bf16.mxu1 %v11078_v13  ;;  %v1314_v54 = vld [vmem:[#allocation8 + $0x1070] sm:$0xff]  ;;  %v11115_v13 = vcombine.low %v1302_v34, %v1306_v56 }
 0x43f   :  { %v11124_v2 = vcombine.high %v1310_v48, %v1314_v54  ;;  %v11123_v6 = vcombine.low %v1310_v48, %v1314_v54 }
 0x440   :  { %7776 = vmatpush1.bf16.msra.mxu0 %v11075_v3  ;;  %v1318_v3 = vld [vmem:[#allocation8 + $0x1090] sm:$0xff] }
 0x441   :  { %8104 = vmatpush1.bf16.msra.mxu1 %v11077_v44  ;;  %7777 = vmatprep.subr.bf16.mxu0 %v11084_v19  ;;  %v1322_v44 = vld [vmem:[#allocation8 + $0x10b0] sm:$0xff]  ;;  %v11126_v19 = vcombine.high %v1311_v55, %v1315_v60 }
 0x442   :  { %8105 = vmatprep.subr.bf16.mxu1 %v11086_v4  ;;  %v1319_v4 = vld [vmem:[#allocation8 + $0x1098] sm:$0xff]  ;;  %v11132_v26 = vcombine.high %v1318_v3, %v1322_v44  ;;  %v11131_v25 = vcombine.low %v1318_v3, %v1322_v44  ;;  %v1358_v55 = vld [vmem:[#allocation8 + $0x11d0] sm:$0xff] }
 0x443   :  { %v1362_v60 = vld [vmem:[#allocation8 + $0x11f0] sm:$0xff] }
 0x444   :  { %7778 = vmatpush1.bf16.msra.mxu0 %v11083_v51  ;;  %v11134_v51 = vcombine.high %v1319_v4, %v1323_v5 }
 0x445   :  { %8106 = vmatpush1.bf16.msra.mxu1 %v11085_v10  ;;  %7779 = vmatprep.subr.bf16.mxu0 %v11092_v11  ;;  %v1326_v10 = vld [vmem:[#allocation8 + $0x10d0] sm:$0xff] }
 0x446   :  { %8107 = vmatprep.subr.bf16.mxu1 %v11094_v35  ;;  %v1330_v11 = vld [vmem:[#allocation8 + $0x10f0] sm:$0xff]  ;;  %v1327_v35 = vld [vmem:[#allocation8 + $0x10d8] sm:$0xff] }
 0x447   :  { %v11140_v38 = vcombine.high %v1326_v10, %v1330_v11  ;;  %v11142_v0 = vcombine.high %v1327_v35, %v1331_v18  ;;  %v11141_v8 = vcombine.low %v1327_v35, %v1331_v18  ;;  %v1374_v18 = vld [vmem:[#allocation8 + $0x1250] sm:$0xff] }
 0x448   :  { %7780 = vmatpush1.bf16.msra.mxu0 %v11091_v22  ;;  %v1334_v22 = vld [vmem:[#allocation8 + $0x1110] sm:$0xff] }
 0x449   :  { %8108 = vmatpush1.bf16.msra.mxu1 %v11093_v27  ;;  %7781 = vmatprep.subr.bf16.mxu0 %v11100_v53  ;;  %v1338_v27 = vld [vmem:[#allocation8 + $0x1130] sm:$0xff]  ;;  %v1335_v53 = vld [vmem:[#allocation8 + $0x1118] sm:$0xff] }
 0x44a   :  { %8109 = vmatprep.subr.bf16.mxu1 %v11102_v28  ;;  %v1339_v28 = vld [vmem:[#allocation8 + $0x1138] sm:$0xff]  ;;  %v11148_v57 = vcombine.high %v1334_v22, %v1338_v27 }
 0x44b   :  { %v11150_v43 = vcombine.high %v1335_v53, %v1339_v28  ;;  %v11149_v34 = vcombine.low %v1335_v53, %v1339_v28  ;;  %v1382_v28 = vld [vmem:[#allocation8 + $0x1290] sm:$0xff] }
 0x44c   :  { %7782 = vmatpush1.bf16.msra.mxu0 %v11099_v59  ;;  %v1346_v59 = vld [vmem:[#allocation8 + $0x1170] sm:$0xff] }
 0x44d   :  { %8110 = vmatpush1.bf16.msra.mxu1 %v11101_v41  ;;  %7783 = vmatprep.subr.bf16.mxu0 %v11108_v31  ;;  %v1343_v41 = vld [vmem:[#allocation8 + $0x1158] sm:$0xff]  ;;  %v11156_v56 = vcombine.high %v1342_v30, %v1346_v59 }
 0x44e   :  { %8111 = vmatprep.subr.bf16.mxu1 %v11110_v24  ;;  %v1347_v31 = vld [vmem:[#allocation8 + $0x1178] sm:$0xff]  ;;  %v11147_v24 = vcombine.low %v1334_v22, %v1338_v27 }
 0x44f   :  { %v11158_v50 = vcombine.high %v1343_v41, %v1347_v31  ;;  %v11157_v48 = vcombine.low %v1343_v41, %v1347_v31  ;;  %v1390_v31 = vld [vmem:[#allocation8 + $0x12d0] sm:$0xff] }
 0x450   :  { %7784 = vmatpush1.bf16.msra.mxu0 %v11107_v42  ;;  %v1354_v42 = vld [vmem:[#allocation8 + $0x11b0] sm:$0xff] }
 0x451   :  { %8112 = vmatpush1.bf16.msra.mxu1 %v11109_v46  ;;  %7794 = vmatprep.subr.bf16.mxu0 %v11116_v47  ;;  %v1351_v46 = vld [vmem:[#allocation8 + $0x1198] sm:$0xff]  ;;  %v11164_v54 = vcombine.high %v1350_v40, %v1354_v42  ;;  %v11163_v3 = vcombine.low %v1350_v40, %v1354_v42 }
 0x452   :  { %8122 = vmatprep.subr.bf16.mxu1 %v11118_v1  ;;  %v1355_v47 = vld [vmem:[#allocation8 + $0x11b8] sm:$0xff]  ;;  %v11155_v1 = vcombine.low %v1342_v30, %v1346_v59 }
 0x453   :  { %7786 = vmatmul.mubr.bf16.vlgmr.msra.gmra.mrb[20].mxu0 %v13155_v61  ;;  %v11165_v44 = vcombine.low %v1351_v46, %v1355_v47 }
 0x454   :  { %8114 = vmatmul.mubr.bf16.vlgmr.msra.gmra.mrb[20].mxu1 %v13155_v61  ;;  %7795 = vmatpush1.bf16.msra.mxu0 %v11115_v13  ;;  %v11133_v61 = vcombine.low %v1319_v4, %v1323_v5  ;;  %v11166_v13 = vcombine.high %v1351_v46, %v1355_v47  ;;  %v1366_v5 = vld [vmem:[#allocation8 + $0x1210] sm:$0xff] }
 0x455   :  { %7826 = vmatprep.mubr.bf16.mxu0 %v13157_v62  ;;  %8123 = vmatpush1.bf16.msra.mxu1 %v11117_v23  ;;  %v1359_v23 = vld [vmem:[#allocation8 + $0x11d8] sm:$0xff]  ;;  %v1398_v47 = vld [vmem:[#allocation8 + $0x1310] sm:$0xff] }
 0x456   :  { %8154 = vmatprep.mubr.bf16.mxu1 %v13157_v62  ;;  %7796 = vmatprep.subr.bf16.mxu0 %v11124_v2  ;;  %v11139_v62 = vcombine.low %v1326_v10, %v1330_v11  ;;  %v1363_v2 = vld [vmem:[#allocation8 + $0x11f8] sm:$0xff] }
 0x457   :  { %8124 = vmatprep.subr.bf16.mxu1 %v11126_v19  ;;  %v11172_v19 = vcombine.high %v1358_v55, %v1362_v60  ;;  %v11174_v4 = vcombine.high %v1359_v23, %v1363_v2  ;;  %v11173_v10 = vcombine.low %v1359_v23, %v1363_v2  ;;  %v1406_v2 = vld [vmem:[#allocation8 + $0x1350] sm:$0xff] }
 0x458   :  { %7797 = vmatpush1.bf16.msra.mxu0 %v11123_v6  ;;  %v1370_v6 = vld [vmem:[#allocation8 + $0x1230] sm:$0xff] }
 0x459   :  { %8125 = vmatpush1.bf16.msra.mxu1 %v11125_v9  ;;  %7798 = vmatprep.subr.bf16.mxu0 %v11132_v26  ;;  %v1367_v9 = vld [vmem:[#allocation8 + $0x1218] sm:$0xff]  ;;  %v11180_v11 = vcombine.high %v1366_v5, %v1370_v6 }
 0x45a   :  { %8126 = vmatprep.subr.bf16.mxu1 %v11134_v51  ;;  %v1371_v26 = vld [vmem:[#allocation8 + $0x1238] sm:$0xff]  ;;  %v11171_v51 = vcombine.low %v1358_v55, %v1362_v60 }
 0x45b   :  { %v11182_v35 = vcombine.high %v1367_v9, %v1371_v26  ;;  %v11181_v22 = vcombine.low %v1367_v9, %v1371_v26  ;;  %v1414_v26 = vld [vmem:[#allocation8 + $0x1390] sm:$0xff] }
 0x45c   :  { %7799 = vmatpush1.bf16.msra.mxu0 %v11131_v25  ;;  %v1378_v25 = vld [vmem:[#allocation8 + $0x1270] sm:$0xff] }
 0x45d   :  { %8127 = vmatpush1.bf16.msra.mxu1 %v11133_v61  ;;  %7800 = vmatprep.subr.bf16.mxu0 %v11140_v38  ;;  %v1375_v61 = vld [vmem:[#allocation8 + $0x1258] sm:$0xff]  ;;  %v11188_v27 = vcombine.high %v1374_v18, %v1378_v25 }
 0x45e   :  { %8128 = vmatprep.subr.bf16.mxu1 %v11142_v0  ;;  %v1379_v38 = vld [vmem:[#allocation8 + $0x1278] sm:$0xff]  ;;  %v11179_v0 = vcombine.low %v1366_v5, %v1370_v6 }
 0x45f   :  { %v11190_v53 = vcombine.high %v1375_v61, %v1379_v38  ;;  %v11189_v30 = vcombine.low %v1375_v61, %v1379_v38  ;;  %v1422_v38 = vld [vmem:[#allocation8 + $0x13d0] sm:$0xff] }
 0x460   :  { %7801 = vmatpush1.bf16.msra.mxu0 %v11139_v62  ;;  %v1386_v62 = vld [vmem:[#allocation8 + $0x12b0] sm:$0xff] }
 0x461   :  { %8129 = vmatpush1.bf16.msra.mxu1 %v11141_v8  ;;  %7802 = vmatprep.subr.bf16.mxu0 %v11148_v57  ;;  %v1383_v8 = vld [vmem:[#allocation8 + $0x1298] sm:$0xff]  ;;  %v11196_v59 = vcombine.high %v1382_v28, %v1386_v62 }
 0x462   :  { %8130 = vmatprep.subr.bf16.mxu1 %v11150_v43  ;;  %v1387_v57 = vld [vmem:[#allocation8 + $0x12b8] sm:$0xff]  ;;  %v11187_v43 = vcombine.low %v1374_v18, %v1378_v25 }
 0x463   :  { %v11198_v41 = vcombine.high %v1383_v8, %v1387_v57  ;;  %v11197_v40 = vcombine.low %v1383_v8, %v1387_v57  ;;  %v1430_v57 = vld [vmem:[#allocation8 + $0x1410] sm:$0xff] }
 0x464   :  { %7803 = vmatpush1.bf16.msra.mxu0 %v11147_v24  ;;  %v1394_v24 = vld [vmem:[#allocation8 + $0x12f0] sm:$0xff] }
 0x465   :  { %8131 = vmatpush1.bf16.msra.mxu1 %v11149_v34  ;;  %7804 = vmatprep.subr.bf16.mxu0 %v11156_v56  ;;  %v1391_v34 = vld [vmem:[#allocation8 + $0x12d8] sm:$0xff]  ;;  %v11204_v42 = vcombine.high %v1390_v31, %v1394_v24 }
 0x466   :  { %8132 = vmatprep.subr.bf16.mxu1 %v11158_v50  ;;  %v1395_v56 = vld [vmem:[#allocation8 + $0x12f8] sm:$0xff]  ;;  %v11195_v50 = vcombine.low %v1382_v28, %v1386_v62 }
 0x467   :  { %v11206_v46 = vcombine.high %v1391_v34, %v1395_v56  ;;  %v11205_v55 = vcombine.low %v1391_v34, %v1395_v56  ;;  %v1438_v56 = vld [vmem:[#allocation8 + $0x1450] sm:$0xff] }
 0x468   :  { %7805 = vmatpush1.bf16.msra.mxu0 %v11155_v1  ;;  %v1402_v1 = vld [vmem:[#allocation8 + $0x1330] sm:$0xff] }
 0x469   :  { %8133 = vmatpush1.bf16.msra.mxu1 %v11157_v48  ;;  %7806 = vmatprep.subr.bf16.mxu0 %v11164_v54  ;;  %v1399_v48 = vld [vmem:[#allocation8 + $0x1318] sm:$0xff]  ;;  %v11212_v60 = vcombine.high %v1398_v47, %v1402_v1 }
 0x46a   :  { %8134 = vmatprep.subr.bf16.mxu1 %v11166_v13  ;;  %v1403_v54 = vld [vmem:[#allocation8 + $0x1338] sm:$0xff]  ;;  %v11203_v13 = vcombine.low %v1390_v31, %v1394_v24 }
 0x46b   :  { %v11214_v23 = vcombine.high %v1399_v48, %v1403_v54  ;;  %v11213_v5 = vcombine.low %v1399_v48, %v1403_v54  ;;  %v1446_v48 = vld [vmem:[#allocation8 + $0x1490] sm:$0xff] }
 0x46c   :  { %7807 = vmatpush1.bf16.msra.mxu0 %v11163_v3  ;;  %v1410_v3 = vld [vmem:[#allocation8 + $0x1370] sm:$0xff] }
 0x46d   :  { %8135 = vmatpush1.bf16.msra.mxu1 %v11165_v44  ;;  %7808 = vmatprep.subr.bf16.mxu0 %v11172_v19  ;;  %v1407_v44 = vld [vmem:[#allocation8 + $0x1358] sm:$0xff]  ;;  %v11220_v6 = vcombine.high %v1406_v2, %v1410_v3  ;;  %v1450_v54 = vld [vmem:[#allocation8 + $0x14b0] sm:$0xff] }
 0x46e   :  { %8136 = vmatprep.subr.bf16.mxu1 %v11174_v4  ;;  %v1411_v19 = vld [vmem:[#allocation8 + $0x1378] sm:$0xff]  ;;  %v11211_v4 = vcombine.low %v1398_v47, %v1402_v1 }
 0x46f   :  { %v11222_v9 = vcombine.high %v1407_v44, %v1411_v19  ;;  %v11221_v18 = vcombine.low %v1407_v44, %v1411_v19  ;;  %v1454_v19 = vld [vmem:[#allocation8 + $0x14d0] sm:$0xff] }
 0x470   :  { %7809 = vmatpush1.bf16.msra.mxu0 %v11171_v51  ;;  %v1418_v51 = vld [vmem:[#allocation8 + $0x13b0] sm:$0xff] }
 0x471   :  { %8137 = vmatpush1.bf16.msra.mxu1 %v11173_v10  ;;  %7810 = vmatprep.subr.bf16.mxu0 %v11180_v11  ;;  %v1415_v10 = vld [vmem:[#allocation8 + $0x1398] sm:$0xff]  ;;  %v11228_v25 = vcombine.high %v1414_v26, %v1418_v51 }
 0x472   :  { %8138 = vmatprep.subr.bf16.mxu1 %v11182_v35  ;;  %v1419_v11 = vld [vmem:[#allocation8 + $0x13b8] sm:$0xff]  ;;  %v11219_v35 = vcombine.low %v1406_v2, %v1410_v3  ;;  %v11260_v3 = vcombine.high %v1446_v48, %v1450_v54 }
 0x473   :  { %v11230_v61 = vcombine.high %v1415_v10, %v1419_v11  ;;  %v11229_v28 = vcombine.low %v1415_v10, %v1419_v11  ;;  %v1462_v10 = vld [vmem:[#allocation8 + $0x1510] sm:$0xff] }
 0x474   :  { %7811 = vmatpush1.bf16.msra.mxu0 %v11179_v0  ;;  %v1426_v0 = vld [vmem:[#allocation8 + $0x13f0] sm:$0xff] }
 0x475   :  { %8139 = vmatpush1.bf16.msra.mxu1 %v11181_v22  ;;  %7812 = vmatprep.subr.bf16.mxu0 %v11188_v27  ;;  %v1423_v22 = vld [vmem:[#allocation8 + $0x13d8] sm:$0xff]  ;;  %v11236_v62 = vcombine.high %v1422_v38, %v1426_v0  ;;  %v1466_v11 = vld [vmem:[#allocation8 + $0x1530] sm:$0xff] }
 0x476   :  { %8140 = vmatprep.subr.bf16.mxu1 %v11190_v53  ;;  %v1427_v27 = vld [vmem:[#allocation8 + $0x13f8] sm:$0xff]  ;;  %v11227_v53 = vcombine.low %v1414_v26, %v1418_v51 }
 0x477   :  { %v11238_v8 = vcombine.high %v1423_v22, %v1427_v27  ;;  %v11237_v31 = vcombine.low %v1423_v22, %v1427_v27  ;;  %v1474_v22 = vld [vmem:[#allocation8 + $0x1570] sm:$0xff]  ;;  %v1471_v27 = vld [vmem:[#allocation8 + $0x1558] sm:$0xff] }
 0x478   :  { %7813 = vmatpush1.bf16.msra.mxu0 %v11187_v43  ;;  %v1434_v43 = vld [vmem:[#allocation8 + $0x1430] sm:$0xff] }
 0x479   :  { %8141 = vmatpush1.bf16.msra.mxu1 %v11189_v30  ;;  %7814 = vmatprep.subr.bf16.mxu0 %v11196_v59  ;;  %v1431_v30 = vld [vmem:[#allocation8 + $0x1418] sm:$0xff]  ;;  %v11244_v24 = vcombine.high %v1430_v57, %v1434_v43 }
 0x47a   :  { %8142 = vmatprep.subr.bf16.mxu1 %v11198_v41  ;;  %v1435_v59 = vld [vmem:[#allocation8 + $0x1438] sm:$0xff]  ;;  %v11235_v41 = vcombine.low %v1422_v38, %v1426_v0  ;;  %v1470_v0 = vld [vmem:[#allocation8 + $0x1550] sm:$0xff] }
 0x47b   :  { %v11246_v34 = vcombine.high %v1431_v30, %v1435_v59  ;;  %v11245_v47 = vcombine.low %v1431_v30, %v1435_v59  ;;  %v1482_v30 = vld [vmem:[#allocation8 + $0x15b0] sm:$0xff]  ;;  %v1479_v59 = vld [vmem:[#allocation8 + $0x1598] sm:$0xff] }
 0x47c   :  { %7815 = vmatpush1.bf16.msra.mxu0 %v11195_v50  ;;  %v1442_v50 = vld [vmem:[#allocation8 + $0x1470] sm:$0xff] }
 0x47d   :  { %8143 = vmatpush1.bf16.msra.mxu1 %v11197_v40  ;;  %7816 = vmatprep.subr.bf16.mxu0 %v11204_v42  ;;  %v11243_v40 = vcombine.low %v1430_v57, %v1434_v43  ;;  %v1439_v42 = vld [vmem:[#allocation8 + $0x1458] sm:$0xff]  ;;  %v11252_v1 = vcombine.high %v1438_v56, %v1442_v50  ;;  %v1478_v43 = vld [vmem:[#allocation8 + $0x1590] sm:$0xff] }
 0x47e   :  { %8144 = vmatprep.subr.bf16.mxu1 %v11206_v46  ;;  %v1443_v46 = vld [vmem:[#allocation8 + $0x1478] sm:$0xff] }
 0x47f   :  { %v11253_v2 = vcombine.low %v1439_v42, %v1443_v46 }
 0x480   :  { %7817 = vmatpush1.bf16.msra.mxu0 %v11203_v13  ;;  %v11254_v13 = vcombine.high %v1439_v42, %v1443_v46  ;;  %v1487_v42 = vld [vmem:[#allocation8 + $0x15d8] sm:$0xff] }
 0x481   :  { %8145 = vmatpush1.bf16.msra.mxu1 %v11205_v55  ;;  %7818 = vmatprep.subr.bf16.mxu0 %v11212_v60  ;;  %v1447_v55 = vld [vmem:[#allocation8 + $0x1498] sm:$0xff] }
 0x482   :  { %8146 = vmatprep.subr.bf16.mxu1 %v11214_v23  ;;  %v1451_v60 = vld [vmem:[#allocation8 + $0x14b8] sm:$0xff]  ;;  %v11251_v23 = vcombine.low %v1438_v56, %v1442_v50  ;;  %v1486_v50 = vld [vmem:[#allocation8 + $0x15d0] sm:$0xff] }
 0x483   :  { %v11262_v44 = vcombine.high %v1447_v55, %v1451_v60  ;;  %v1491_v46 = vld [vmem:[#allocation8 + $0x15f8] sm:$0xff] }
 0x484   :  { %7819 = vmatpush1.bf16.msra.mxu0 %v11211_v4  ;;  %v1458_v4 = vld [vmem:[#allocation8 + $0x14f0] sm:$0xff] }
 0x485   :  { %8147 = vmatpush1.bf16.msra.mxu1 %v11213_v5  ;;  %7820 = vmatprep.subr.bf16.mxu0 %v11220_v6  ;;  %v1455_v5 = vld [vmem:[#allocation8 + $0x14d8] sm:$0xff]  ;;  %v11268_v26 = vcombine.high %v1454_v19, %v1458_v4 }
 0x486   :  { %8148 = vmatprep.subr.bf16.mxu1 %v11222_v9  ;;  %v1459_v6 = vld [vmem:[#allocation8 + $0x14f8] sm:$0xff]  ;;  %v11259_v9 = vcombine.low %v1446_v48, %v1450_v54  ;;  %v11302_v54 = vcombine.high %v1487_v42, %v1491_v46 }
 0x487   :  { %v11270_v51 = vcombine.high %v1455_v5, %v1459_v6 }
 0x488   :  { %7821 = vmatpush1.bf16.msra.mxu0 %v11219_v35  ;;  %v1463_v35 = vld [vmem:[#allocation8 + $0x1518] sm:$0xff] }
 0x489   :  { %8149 = vmatpush1.bf16.msra.mxu1 %v11221_v18  ;;  %7822 = vmatprep.subr.bf16.mxu0 %v11228_v25  ;;  %v1467_v18 = vld [vmem:[#allocation8 + $0x1538] sm:$0xff]  ;;  %v11269_v25 = vcombine.low %v1455_v5, %v1459_v6  ;;  %v1506_v5 = vld [vmem:[#allocation8 + $0x1670] sm:$0xff] }
 0x48a   :  { %8150 = vmatprep.subr.bf16.mxu1 %v11230_v61  ;;  %v11276_v61 = vcombine.high %v1462_v10, %v1466_v11  ;;  %v11278_v38 = vcombine.high %v1463_v35, %v1467_v18  ;;  %v1503_v6 = vld [vmem:[#allocation8 + $0x1658] sm:$0xff] }
 0x48c   :  { %7823 = vmatpush1.bf16.msra.mxu0 %v11227_v53  ;;  %v1475_v53 = vld [vmem:[#allocation8 + $0x1578] sm:$0xff] }
 0x48d   :  { %8151 = vmatpush1.bf16.msra.mxu1 %v11229_v28  ;;  %7824 = vmatprep.subr.bf16.mxu0 %v11236_v62  ;;  %v11275_v28 = vcombine.low %v1462_v10, %v1466_v11  ;;  %v11277_v62 = vcombine.low %v1463_v35, %v1467_v18  ;;  %v11286_v57 = vcombine.high %v1471_v27, %v1475_v53  ;;  %v1510_v11 = vld [vmem:[#allocation8 + $0x1690] sm:$0xff]  ;;  %v1511_v18 = vld [vmem:[#allocation8 + $0x1698] sm:$0xff] }
 0x48e   :  { %8152 = vmatprep.subr.bf16.mxu1 %v11238_v8  ;;  %v11284_v8 = vcombine.high %v1470_v0, %v1474_v22  ;;  %v1514_v35 = vld [vmem:[#allocation8 + $0x16b0] sm:$0xff] }
 0x490   :  { %7825 = vmatpush1.bf16.msra.mxu0 %v11235_v41  ;;  %v1483_v41 = vld [vmem:[#allocation8 + $0x15b8] sm:$0xff] }
 0x491   :  { %8153 = vmatpush1.bf16.msra.mxu1 %v11237_v31  ;;  %7835 = vmatprep.subr.bf16.mxu0 %v11244_v24  ;;  %v11283_v31 = vcombine.low %v1470_v0, %v1474_v22  ;;  %v11285_v24 = vcombine.low %v1471_v27, %v1475_v53  ;;  %v11294_v56 = vcombine.high %v1479_v59, %v1483_v41  ;;  %v1518_v22 = vld [vmem:[#allocation8 + $0x16d0] sm:$0xff]  ;;  %v1519_v53 = vld [vmem:[#allocation8 + $0x16d8] sm:$0xff] }
 0x492   :  { %8163 = vmatprep.subr.bf16.mxu1 %v11246_v34  ;;  %v11292_v34 = vcombine.high %v1478_v43, %v1482_v30  ;;  %v1522_v27 = vld [vmem:[#allocation8 + $0x16f0] sm:$0xff] }
 0x493   :  { %7827 = vmatmul.mubr.bf16.vlgmr.msra.gmra.mrb[20].mxu0 %v13167_v12 }
 0x494   :  { %8155 = vmatmul.mubr.bf16.vlgmr.msra.gmra.mrb[20].mxu1 %v13167_v12  ;;  %7836 = vmatpush1.bf16.msra.mxu0 %v11243_v40  ;;  %v11261_v12 = vcombine.low %v1447_v55, %v1451_v60  ;;  %v1490_v40 = vld [vmem:[#allocation8 + $0x15f0] sm:$0xff]  ;;  %v1495_v60 = vld [vmem:[#allocation8 + $0x1618] sm:$0xff] }
 0x495   :  { %7867 = vmatprep.mubr.bf16.mxu0 %v13169_v7  ;;  %8164 = vmatpush1.bf16.msra.mxu1 %v11245_v47  ;;  %v11291_v47 = vcombine.low %v1478_v43, %v1482_v30  ;;  %v11300_v48 = vcombine.high %v1486_v50, %v1490_v40  ;;  %v1498_v55 = vld [vmem:[#allocation8 + $0x1630] sm:$0xff] }
 0x496   :  { %8195 = vmatprep.mubr.bf16.mxu1 %v13169_v7  ;;  %7837 = vmatprep.subr.bf16.mxu0 %v11252_v1  ;;  %v11267_v7 = vcombine.low %v1454_v19, %v1458_v4  ;;  %v11293_v1 = vcombine.low %v1479_v59, %v1483_v41  ;;  %v1502_v4 = vld [vmem:[#allocation8 + $0x1650] sm:$0xff]  ;;  %v1527_v41 = vld [vmem:[#allocation8 + $0x1718] sm:$0xff] }
 0x497   :  { %8165 = vmatprep.subr.bf16.mxu1 %v11254_v13  ;;  %v1494_v13 = vld [vmem:[#allocation8 + $0x1610] sm:$0xff] }
 0x498   :  { %7838 = vmatpush1.bf16.msra.mxu0 %v11251_v23  ;;  %v1499_v23 = vld [vmem:[#allocation8 + $0x1638] sm:$0xff]  ;;  %v1526_v30 = vld [vmem:[#allocation8 + $0x1710] sm:$0xff] }
 0x499   :  { %8166 = vmatpush1.bf16.msra.mxu1 %v11253_v2  ;;  %7839 = vmatprep.subr.bf16.mxu0 %v11260_v3  ;;  %v11299_v2 = vcombine.low %v1486_v50, %v1490_v40  ;;  %v11301_v3 = vcombine.low %v1487_v42, %v1491_v46  ;;  %v11310_v19 = vcombine.high %v1495_v60, %v1499_v23  ;;  %v1530_v59 = vld [vmem:[#allocation8 + $0x1730] sm:$0xff]  ;;  %v1535_v46 = vld [vmem:[#allocation8 + $0x1758] sm:$0xff] }
 0x49a   :  { %8167 = vmatprep.subr.bf16.mxu1 %v11262_v44  ;;  %v11308_v44 = vcombine.high %v1494_v13, %v1498_v55  ;;  %v1534_v40 = vld [vmem:[#allocation8 + $0x1750] sm:$0xff] }
 0x49b   :  { %v1538_v42 = vld [vmem:[#allocation8 + $0x1770] sm:$0xff] }
 0x49c   :  { %7840 = vmatpush1.bf16.msra.mxu0 %v11259_v9  ;;  %v1507_v9 = vld [vmem:[#allocation8 + $0x1678] sm:$0xff] }
 0x49d   :  { %8168 = vmatpush1.bf16.msra.mxu1 %v11261_v12  ;;  %7841 = vmatprep.subr.bf16.mxu0 %v11268_v26  ;;  %v11307_v12 = vcombine.low %v1494_v13, %v1498_v55  ;;  %v11309_v26 = vcombine.low %v1495_v60, %v1499_v23  ;;  %v11318_v10 = vcombine.high %v1503_v6, %v1507_v9  ;;  %v1542_v55 = vld [vmem:[#allocation8 + $0x1790] sm:$0xff]  ;;  %v1543_v23 = vld [vmem:[#allocation8 + $0x1798] sm:$0xff] }
 0x49e   :  { %8169 = vmatprep.subr.bf16.mxu1 %v11270_v51  ;;  %v11316_v51 = vcombine.high %v1502_v4, %v1506_v5  ;;  %v1546_v60 = vld [vmem:[#allocation8 + $0x17b0] sm:$0xff] }
 0x4a0   :  { %7842 = vmatpush1.bf16.msra.mxu0 %v11267_v7  ;;  %v1515_v7 = vld [vmem:[#allocation8 + $0x16b8] sm:$0xff] }
 0x4a1   :  { %8170 = vmatpush1.bf16.msra.mxu1 %v11269_v25  ;;  %7843 = vmatprep.subr.bf16.mxu0 %v11276_v61  ;;  %v11315_v25 = vcombine.low %v1502_v4, %v1506_v5  ;;  %v11317_v61 = vcombine.low %v1503_v6, %v1507_v9  ;;  %v11326_v0 = vcombine.high %v1511_v18, %v1515_v7  ;;  %v1550_v5 = vld [vmem:[#allocation8 + $0x17d0] sm:$0xff]  ;;  %v1551_v9 = vld [vmem:[#allocation8 + $0x17d8] sm:$0xff] }
 0x4a2   :  { %8171 = vmatprep.subr.bf16.mxu1 %v11278_v38  ;;  %v11324_v38 = vcombine.high %v1510_v11, %v1514_v35  ;;  %v1554_v6 = vld [vmem:[#allocation8 + $0x17f0] sm:$0xff] }
 0x4a4   :  { %7844 = vmatpush1.bf16.msra.mxu0 %v11275_v28  ;;  %v1523_v28 = vld [vmem:[#allocation8 + $0x16f8] sm:$0xff] }
 0x4a5   :  { %8172 = vmatpush1.bf16.msra.mxu1 %v11277_v62  ;;  %7845 = vmatprep.subr.bf16.mxu0 %v11284_v8  ;;  %v11323_v62 = vcombine.low %v1510_v11, %v1514_v35  ;;  %v11325_v8 = vcombine.low %v1511_v18, %v1515_v7  ;;  %v11334_v43 = vcombine.high %v1519_v53, %v1523_v28  ;;  %v1558_v35 = vld [vmem:[#allocation8 + $0x1810] sm:$0xff]  ;;  %v1559_v7 = vld [vmem:[#allocation8 + $0x1818] sm:$0xff] }
 0x4a6   :  { %8173 = vmatprep.subr.bf16.mxu1 %v11286_v57  ;;  %v11332_v57 = vcombine.high %v1518_v22, %v1522_v27  ;;  %v1562_v18 = vld [vmem:[#allocation8 + $0x1830] sm:$0xff] }
 0x4a8   :  { %7846 = vmatpush1.bf16.msra.mxu0 %v11283_v31  ;;  %v1531_v31 = vld [vmem:[#allocation8 + $0x1738] sm:$0xff] }
 0x4a9   :  { %8174 = vmatpush1.bf16.msra.mxu1 %v11285_v24  ;;  %7847 = vmatprep.subr.bf16.mxu0 %v11292_v34  ;;  %v11331_v24 = vcombine.low %v1518_v22, %v1522_v27  ;;  %v11333_v34 = vcombine.low %v1519_v53, %v1523_v28  ;;  %v11342_v50 = vcombine.high %v1527_v41, %v1531_v31  ;;  %v1566_v27 = vld [vmem:[#allocation8 + $0x1850] sm:$0xff] }
 0x4aa   :  { %8175 = vmatprep.subr.bf16.mxu1 %v11294_v56  ;;  %v11340_v56 = vcombine.high %v1526_v30, %v1530_v59  ;;  %v1570_v53 = vld [vmem:[#allocation8 + $0x1870] sm:$0xff]  ;;  %v11371_v28 = vcombine.low %v1558_v35, %v1562_v18 }
 0x4ac   :  { %7848 = vmatpush1.bf16.msra.mxu0 %v11291_v47  ;;  %v1539_v47 = vld [vmem:[#allocation8 + $0x1778] sm:$0xff] }
 0x4ad   :  { %8176 = vmatpush1.bf16.msra.mxu1 %v11293_v1  ;;  %7849 = vmatprep.subr.bf16.mxu0 %v11300_v48  ;;  %v11339_v1 = vcombine.low %v1526_v30, %v1530_v59  ;;  %v11341_v48 = vcombine.low %v1527_v41, %v1531_v31  ;;  %v11350_v13 = vcombine.high %v1535_v46, %v1539_v47  ;;  %v1574_v30 = vld [vmem:[#allocation8 + $0x1890] sm:$0xff]  ;;  %v1575_v31 = vld [vmem:[#allocation8 + $0x1898] sm:$0xff] }
 0x4ae   :  { %8177 = vmatprep.subr.bf16.mxu1 %v11302_v54  ;;  %v11348_v54 = vcombine.high %v1534_v40, %v1538_v42  ;;  %v1578_v59 = vld [vmem:[#allocation8 + $0x18b0] sm:$0xff] }
 0x4b0   :  { %7850 = vmatpush1.bf16.msra.mxu0 %v11299_v2  ;;  %v1547_v2 = vld [vmem:[#allocation8 + $0x17b8] sm:$0xff] }
 0x4b1   :  { %8178 = vmatpush1.bf16.msra.mxu1 %v11301_v3  ;;  %7851 = vmatprep.subr.bf16.mxu0 %v11308_v44  ;;  %v11347_v3 = vcombine.low %v1534_v40, %v1538_v42  ;;  %v11349_v44 = vcombine.low %v1535_v46, %v1539_v47  ;;  %v11358_v4 = vcombine.high %v1543_v23, %v1547_v2  ;;  %v1582_v42 = vld [vmem:[#allocation8 + $0x18d0] sm:$0xff]  ;;  %v1583_v47 = vld [vmem:[#allocation8 + $0x18d8] sm:$0xff] }
 0x4b2   :  { %8179 = vmatprep.subr.bf16.mxu1 %v11310_v19  ;;  %v11356_v19 = vcombine.high %v1542_v55, %v1546_v60  ;;  %v1586_v46 = vld [vmem:[#allocation8 + $0x18f0] sm:$0xff] }
 0x4b4   :  { %7852 = vmatpush1.bf16.msra.mxu0 %v11307_v12  ;;  %v1555_v12 = vld [vmem:[#allocation8 + $0x17f8] sm:$0xff] }
 0x4b5   :  { %8180 = vmatpush1.bf16.msra.mxu1 %v11309_v26  ;;  %7853 = vmatprep.subr.bf16.mxu0 %v11316_v51  ;;  %v11355_v26 = vcombine.low %v1542_v55, %v1546_v60  ;;  %v11357_v51 = vcombine.low %v1543_v23, %v1547_v2  ;;  %v11366_v11 = vcombine.high %v1551_v9, %v1555_v12  ;;  %v1590_v55 = vld [vmem:[#allocation8 + $0x1910] sm:$0xff]  ;;  %v1591_v23 = vld [vmem:[#allocation8 + $0x1918] sm:$0xff] }
 0x4b6   :  { %8181 = vmatprep.subr.bf16.mxu1 %v11318_v10  ;;  %v11364_v10 = vcombine.high %v1550_v5, %v1554_v6  ;;  %v1594_v60 = vld [vmem:[#allocation8 + $0x1930] sm:$0xff]  ;;  %v1595_v2 = vld [vmem:[#allocation8 + $0x1938] sm:$0xff] }
 0x4b8   :  { %7854 = vmatpush1.bf16.msra.mxu0 %v11315_v25  ;;  %v1563_v25 = vld [vmem:[#allocation8 + $0x1838] sm:$0xff] }
 0x4b9   :  { %8182 = vmatpush1.bf16.msra.mxu1 %v11317_v61  ;;  %7855 = vmatprep.subr.bf16.mxu0 %v11324_v38  ;;  %v11363_v61 = vcombine.low %v1550_v5, %v1554_v6  ;;  %v11365_v38 = vcombine.low %v1551_v9, %v1555_v12  ;;  %v11374_v22 = vcombine.high %v1559_v7, %v1563_v25  ;;  %v1602_v5 = vld [vmem:[#allocation8 + $0x1970] sm:$0xff]  ;;  %v1599_v6 = vld [vmem:[#allocation8 + $0x1958] sm:$0xff] }
 0x4ba   :  { %8183 = vmatprep.subr.bf16.mxu1 %v11326_v0  ;;  %v11372_v0 = vcombine.high %v1558_v35, %v1562_v18  ;;  %v1603_v9 = vld [vmem:[#allocation8 + $0x1978] sm:$0xff]  ;;  %v11403_v12 = vcombine.low %v1590_v55, %v1594_v60  ;;  %v1610_v35 = vld [vmem:[#allocation8 + $0x19b0] sm:$0xff] }
 0x4bb   :  { %v1607_v18 = vld [vmem:[#allocation8 + $0x1998] sm:$0xff] }
 0x4bc   :  { %7856 = vmatpush1.bf16.msra.mxu0 %v11323_v62  ;;  %v1567_v62 = vld [vmem:[#allocation8 + $0x1858] sm:$0xff] }
 0x4bd   :  { %8184 = vmatpush1.bf16.msra.mxu1 %v11325_v8  ;;  %7857 = vmatprep.subr.bf16.mxu0 %v11332_v57  ;;  %v1571_v8 = vld [vmem:[#allocation8 + $0x1878] sm:$0xff]  ;;  %v11373_v57 = vcombine.low %v1559_v7, %v1563_v25 }
 0x4be   :  { %8185 = vmatprep.subr.bf16.mxu1 %v11334_v43  ;;  %v11380_v43 = vcombine.high %v1566_v27, %v1570_v53  ;;  %v11382_v41 = vcombine.high %v1567_v62, %v1571_v8  ;;  %v1611_v7 = vld [vmem:[#allocation8 + $0x19b8] sm:$0xff] }
 0x4c0   :  { %7858 = vmatpush1.bf16.msra.mxu0 %v11331_v24  ;;  %v1579_v24 = vld [vmem:[#allocation8 + $0x18b8] sm:$0xff] }
 0x4c1   :  { %8186 = vmatpush1.bf16.msra.mxu1 %v11333_v34  ;;  %7859 = vmatprep.subr.bf16.mxu0 %v11340_v56  ;;  %v11379_v34 = vcombine.low %v1566_v27, %v1570_v53  ;;  %v11381_v56 = vcombine.low %v1567_v62, %v1571_v8  ;;  %v11390_v40 = vcombine.high %v1575_v31, %v1579_v24  ;;  %v1618_v27 = vld [vmem:[#allocation8 + $0x19f0] sm:$0xff]  ;;  %v1615_v53 = vld [vmem:[#allocation8 + $0x19d8] sm:$0xff] }
 0x4c2   :  { %8187 = vmatprep.subr.bf16.mxu1 %v11342_v50  ;;  %v11388_v50 = vcombine.high %v1574_v30, %v1578_v59  ;;  %v11421_v8 = vcombine.low %v1607_v18, %v1611_v7 }
 0x4c4   :  { %7860 = vmatpush1.bf16.msra.mxu0 %v11339_v1  ;;  %v1587_v1 = vld [vmem:[#allocation8 + $0x18f8] sm:$0xff] }
 0x4c5   :  { %8188 = vmatpush1.bf16.msra.mxu1 %v11341_v48  ;;  %7861 = vmatprep.subr.bf16.mxu0 %v11348_v54  ;;  %v11387_v48 = vcombine.low %v1574_v30, %v1578_v59  ;;  %v11396_v54 = vcombine.high %v1582_v42, %v1586_v46  ;;  %v1622_v30 = vld [vmem:[#allocation8 + $0x1a10] sm:$0xff] }
 0x4c6   :  { %8189 = vmatprep.subr.bf16.mxu1 %v11350_v13  ;;  %v11398_v13 = vcombine.high %v1583_v47, %v1587_v1  ;;  %v1626_v59 = vld [vmem:[#allocation8 + $0x1a30] sm:$0xff] }
 0x4c8   :  { %7862 = vmatpush1.bf16.msra.mxu0 %v11347_v3  ;;  %v11397_v3 = vcombine.low %v1583_v47, %v1587_v1  ;;  %v1635_v47 = vld [vmem:[#allocation8 + $0x1a78] sm:$0xff]  ;;  %v11435_v1 = vcombine.low %v1622_v30, %v1626_v59 }
 0x4c9   :  { %8190 = vmatpush1.bf16.msra.mxu1 %v11349_v44  ;;  %7863 = vmatprep.subr.bf16.mxu0 %v11356_v19  ;;  %v11404_v44 = vcombine.high %v1590_v55, %v1594_v60  ;;  %v11406_v19 = vcombine.high %v1591_v23, %v1595_v2  ;;  %v1642_v55 = vld [vmem:[#allocation8 + $0x1ab0] sm:$0xff]  ;;  %v1639_v60 = vld [vmem:[#allocation8 + $0x1a98] sm:$0xff] }
 0x4ca   :  { %8191 = vmatprep.subr.bf16.mxu1 %v11358_v4  ;;  %v1598_v4 = vld [vmem:[#allocation8 + $0x1950] sm:$0xff] }
 0x4cb   :  { %v11411_v25 = vcombine.low %v1598_v4, %v1602_v5 }
 0x4cc   :  { %7864 = vmatpush1.bf16.msra.mxu0 %v11355_v26  ;;  %v11405_v26 = vcombine.low %v1591_v23, %v1595_v2  ;;  %v1643_v23 = vld [vmem:[#allocation8 + $0x1ab8] sm:$0xff] }
 0x4cd   :  { %8192 = vmatpush1.bf16.msra.mxu1 %v11357_v51  ;;  %7865 = vmatprep.subr.bf16.mxu0 %v11364_v10  ;;  %v11412_v51 = vcombine.high %v1598_v4, %v1602_v5  ;;  %v11414_v10 = vcombine.high %v1599_v6, %v1603_v9  ;;  %v1650_v4 = vld [vmem:[#allocation8 + $0x1af0] sm:$0xff]  ;;  %v1647_v5 = vld [vmem:[#allocation8 + $0x1ad8] sm:$0xff] }
 0x4ce   :  { %8193 = vmatprep.subr.bf16.mxu1 %v11366_v11  ;;  %v1606_v11 = vld [vmem:[#allocation8 + $0x1990] sm:$0xff] }
 0x4cf   :  { %v11419_v62 = vcombine.low %v1606_v11, %v1610_v35 }
 0x4d0   :  { %7866 = vmatpush1.bf16.msra.mxu0 %v11363_v61  ;;  %v11413_v61 = vcombine.low %v1599_v6, %v1603_v9  ;;  %v1651_v6 = vld [vmem:[#allocation8 + $0x1af8] sm:$0xff] }
 0x4d1   :  { %8194 = vmatpush1.bf16.msra.mxu1 %v11365_v38  ;;  %7876 = vmatprep.subr.bf16.mxu0 %v11372_v0  ;;  %v11420_v38 = vcombine.high %v1606_v11, %v1610_v35  ;;  %v11422_v0 = vcombine.high %v1607_v18, %v1611_v7  ;;  %v1658_v11 = vld [vmem:[#allocation8 + $0x1b30] sm:$0xff]  ;;  %v1655_v35 = vld [vmem:[#allocation8 + $0x1b18] sm:$0xff] }
 0x4d2   :  { %8204 = vmatprep.subr.bf16.mxu1 %v11374_v22  ;;  %v1614_v22 = vld [vmem:[#allocation8 + $0x19d0] sm:$0xff]  ;;  %v1659_v18 = vld [vmem:[#allocation8 + $0x1b38] sm:$0xff] }
 0x4d3   :  { %7868 = vmatmul.mubr.bf16.vlgmr.msra.gmra.mrb[20].mxu0 %v13177_v33 }
 0x4d4   :  { %8196 = vmatmul.mubr.bf16.vlgmr.msra.gmra.mrb[20].mxu1 %v13177_v33  ;;  %7877 = vmatpush1.bf16.msra.mxu0 %v11371_v28  ;;  %v11389_v33 = vcombine.low %v1575_v31, %v1579_v24  ;;  %v1619_v28 = vld [vmem:[#allocation8 + $0x19f8] sm:$0xff]  ;;  %v11427_v24 = vcombine.low %v1614_v22, %v1618_v27 }
 0x4d5   :  { %7908 = vmatprep.mubr.bf16.mxu0 %v13179_v45  ;;  %8205 = vmatpush1.bf16.msra.mxu1 %v11373_v57  ;;  %v11428_v57 = vcombine.high %v1614_v22, %v1618_v27  ;;  %v1627_v31 = vld [vmem:[#allocation8 + $0x1a38] sm:$0xff]  ;;  %v1666_v22 = vld [vmem:[#allocation8 + $0x1b70] sm:$0xff] }
 0x4d6   :  { %8236 = vmatprep.mubr.bf16.mxu1 %v13179_v45  ;;  %7878 = vmatprep.subr.bf16.mxu0 %v11380_v43  ;;  %v11395_v45 = vcombine.low %v1582_v42, %v1586_v46  ;;  %v11430_v43 = vcombine.high %v1615_v53, %v1619_v28  ;;  %v1634_v42 = vld [vmem:[#allocation8 + $0x1a70] sm:$0xff]  ;;  %v1631_v46 = vld [vmem:[#allocation8 + $0x1a58] sm:$0xff] }
 0x4d7   :  { %8206 = vmatprep.subr.bf16.mxu1 %v11382_v41  ;;  %v1623_v41 = vld [vmem:[#allocation8 + $0x1a18] sm:$0xff] }
 0x4d8   :  { %7879 = vmatpush1.bf16.msra.mxu0 %v11379_v34  ;;  %v11429_v34 = vcombine.low %v1615_v53, %v1619_v28  ;;  %v1663_v27 = vld [vmem:[#allocation8 + $0x1b58] sm:$0xff] }
 0x4d9   :  { %8207 = vmatpush1.bf16.msra.mxu1 %v11381_v56  ;;  %7880 = vmatprep.subr.bf16.mxu0 %v11388_v50  ;;  %v11436_v56 = vcombine.high %v1622_v30, %v1626_v59  ;;  %v11438_v50 = vcombine.high %v1623_v41, %v1627_v31  ;;  %v1667_v53 = vld [vmem:[#allocation8 + $0x1b78] sm:$0xff]  ;;  %v1674_v30 = vld [vmem:[#allocation8 + $0x1bb0] sm:$0xff] }
 0x4da   :  { %8208 = vmatprep.subr.bf16.mxu1 %v11390_v40  ;;  %v1630_v40 = vld [vmem:[#allocation8 + $0x1a50] sm:$0xff]  ;;  %v1671_v59 = vld [vmem:[#allocation8 + $0x1b98] sm:$0xff] }
 0x4db   :  { %v11443_v2 = vcombine.low %v1630_v40, %v1634_v42 }
 0x4dc   :  { %7881 = vmatpush1.bf16.msra.mxu0 %v11387_v48  ;;  %v11437_v48 = vcombine.low %v1623_v41, %v1627_v31  ;;  %v1675_v41 = vld [vmem:[#allocation8 + $0x1bb8] sm:$0xff] }
 0x4dd   :  { %8209 = vmatpush1.bf16.msra.mxu1 %v11389_v33  ;;  %7882 = vmatprep.subr.bf16.mxu0 %v11396_v54  ;;  %v11444_v33 = vcombine.high %v1630_v40, %v1634_v42  ;;  %v11446_v54 = vcombine.high %v1631_v46, %v1635_v47  ;;  %v1682_v40 = vld [vmem:[#allocation8 + $0x1bf0] sm:$0xff]  ;;  %v1679_v42 = vld [vmem:[#allocation8 + $0x1bd8] sm:$0xff] }
 0x4de   :  { %8210 = vmatprep.subr.bf16.mxu1 %v11398_v13  ;;  %v1638_v13 = vld [vmem:[#allocation8 + $0x1a90] sm:$0xff] }
 0x4df   :  { %v11451_v9 = vcombine.low %v1638_v13, %v1642_v55 }
 0x4e0   :  { %7883 = vmatpush1.bf16.msra.mxu0 %v11395_v45  ;;  %v11445_v45 = vcombine.low %v1631_v46, %v1635_v47  ;;  %v1683_v46 = vld [vmem:[#allocation8 + $0x1bf8] sm:$0xff] }
 0x4e1   :  { %8211 = vmatpush1.bf16.msra.mxu1 %v11397_v3  ;;  %7884 = vmatprep.subr.bf16.mxu0 %v11404_v44  ;;  %v11452_v3 = vcombine.high %v1638_v13, %v1642_v55  ;;  %v11454_v44 = vcombine.high %v1639_v60, %v1643_v23  ;;  %v1690_v13 = vld [vmem:[#allocation8 + $0x1c30] sm:$0xff]  ;;  %v1687_v55 = vld [vmem:[#allocation8 + $0x1c18] sm:$0xff] }
 0x4e2   :  { %8212 = vmatprep.subr.bf16.mxu1 %v11406_v19  ;;  %v1646_v19 = vld [vmem:[#allocation8 + $0x1ad0] sm:$0xff] }
 0x4e3   :  { %v11459_v7 = vcombine.low %v1646_v19, %v1650_v4 }
 0x4e4   :  { %7885 = vmatpush1.bf16.msra.mxu0 %v11403_v12  ;;  %v11453_v12 = vcombine.low %v1639_v60, %v1643_v23  ;;  %v1691_v60 = vld [vmem:[#allocation8 + $0x1c38] sm:$0xff] }
 0x4e5   :  { %8213 = vmatpush1.bf16.msra.mxu1 %v11405_v26  ;;  %7886 = vmatprep.subr.bf16.mxu0 %v11412_v51  ;;  %v11460_v26 = vcombine.high %v1646_v19, %v1650_v4  ;;  %v11462_v51 = vcombine.high %v1647_v5, %v1651_v6  ;;  %v1698_v19 = vld [vmem:[#allocation8 + $0x1c70] sm:$0xff] }
 0x4e6   :  { %8214 = vmatprep.subr.bf16.mxu1 %v11414_v10  ;;  %v1654_v10 = vld [vmem:[#allocation8 + $0x1b10] sm:$0xff] }
 0x4e7   :  { %v11467_v28 = vcombine.low %v1654_v10, %v1658_v11 }
 0x4e8   :  { %7887 = vmatpush1.bf16.msra.mxu0 %v11411_v25  ;;  %v11461_v25 = vcombine.low %v1647_v5, %v1651_v6  ;;  %v1695_v5 = vld [vmem:[#allocation8 + $0x1c58] sm:$0xff] }
 0x4e9   :  { %8215 = vmatpush1.bf16.msra.mxu1 %v11413_v61  ;;  %7888 = vmatprep.subr.bf16.mxu0 %v11420_v38  ;;  %v11468_v61 = vcombine.high %v1654_v10, %v1658_v11  ;;  %v11470_v38 = vcombine.high %v1655_v35, %v1659_v18  ;;  %v1699_v6 = vld [vmem:[#allocation8 + $0x1c78] sm:$0xff] }
 0x4ea   :  { %8216 = vmatprep.subr.bf16.mxu1 %v11422_v0  ;;  %v1662_v0 = vld [vmem:[#allocation8 + $0x1b50] sm:$0xff]  ;;  %v11510_v10 = vcombine.high %v1695_v5, %v1699_v6  ;;  %v1703_v11 = vld [vmem:[#allocation8 + $0x1c98] sm:$0xff] }
 0x4eb   :  { %v11475_v31 = vcombine.low %v1662_v0, %v1666_v22 }
 0x4ec   :  { %7889 = vmatpush1.bf16.msra.mxu0 %v11419_v62  ;;  %v11469_v62 = vcombine.low %v1655_v35, %v1659_v18  ;;  %v1707_v35 = vld [vmem:[#allocation8 + $0x1cb8] sm:$0xff] }
 0x4ed   :  { %8217 = vmatpush1.bf16.msra.mxu1 %v11421_v8  ;;  %7890 = vmatprep.subr.bf16.mxu0 %v11428_v57  ;;  %v11476_v8 = vcombine.high %v1662_v0, %v1666_v22  ;;  %v11478_v57 = vcombine.high %v1663_v27, %v1667_v53  ;;  %v1714_v0 = vld [vmem:[#allocation8 + $0x1cf0] sm:$0xff]  ;;  %v1711_v22 = vld [vmem:[#allocation8 + $0x1cd8] sm:$0xff] }
 0x4ee   :  { %8218 = vmatprep.subr.bf16.mxu1 %v11430_v43  ;;  %v1670_v43 = vld [vmem:[#allocation8 + $0x1b90] sm:$0xff] }
 0x4ef   :  { %v11483_v47 = vcombine.low %v1670_v43, %v1674_v30 }
 0x4f0   :  { %7891 = vmatpush1.bf16.msra.mxu0 %v11427_v24  ;;  %v11477_v24 = vcombine.low %v1663_v27, %v1667_v53  ;;  %v1715_v27 = vld [vmem:[#allocation8 + $0x1cf8] sm:$0xff] }
 0x4f1   :  { %8219 = vmatpush1.bf16.msra.mxu1 %v11429_v34  ;;  %7892 = vmatprep.subr.bf16.mxu0 %v11436_v56  ;;  %v11484_v34 = vcombine.high %v1670_v43, %v1674_v30  ;;  %v11486_v56 = vcombine.high %v1671_v59, %v1675_v41  ;;  %v1719_v43 = vld [vmem:[#allocation8 + $0x1d18] sm:$0xff] }
 0x4f2   :  { %8220 = vmatprep.subr.bf16.mxu1 %v11438_v50  ;;  %v1678_v50 = vld [vmem:[#allocation8 + $0x1bd0] sm:$0xff]  ;;  %v1723_v30 = vld [vmem:[#allocation8 + $0x1d38] sm:$0xff] }
 0x4f3   :  { %v11491_v23 = vcombine.low %v1678_v50, %v1682_v40 }
 0x4f4   :  { %7893 = vmatpush1.bf16.msra.mxu0 %v11435_v1  ;;  %v11485_v1 = vcombine.low %v1671_v59, %v1675_v41  ;;  %v11525_v59 = vcombine.low %v1711_v22, %v1715_v27 }
 0x4f5   :  { %8221 = vmatpush1.bf16.msra.mxu1 %v11437_v48  ;;  %7894 = vmatprep.subr.bf16.mxu0 %v11444_v33  ;;  %v11492_v48 = vcombine.high %v1678_v50, %v1682_v40  ;;  %v11494_v33 = vcombine.high %v1679_v42, %v1683_v46  ;;  %v1731_v50 = vld [vmem:[#allocation8 + $0x1d78] sm:$0xff] }
 0x4f6   :  { %8222 = vmatprep.subr.bf16.mxu1 %v11446_v54  ;;  %v1686_v54 = vld [vmem:[#allocation8 + $0x1c10] sm:$0xff] }
 0x4f7   :  { %v11499_v4 = vcombine.low %v1686_v54, %v1690_v13 }
 0x4f8   :  { %7895 = vmatpush1.bf16.msra.mxu0 %v11443_v2  ;;  %v11493_v2 = vcombine.low %v1679_v42, %v1683_v46  ;;  %v11533_v42 = vcombine.low %v1719_v43, %v1723_v30 }
 0x4f9   :  { %8223 = vmatpush1.bf16.msra.mxu1 %v11445_v45  ;;  %7896 = vmatprep.subr.bf16.mxu0 %v11452_v3  ;;  %v11500_v45 = vcombine.high %v1686_v54, %v1690_v13  ;;  %v11502_v3 = vcombine.high %v1687_v55, %v1691_v60  ;;  %v1739_v54 = vld [vmem:[#allocation8 + $0x1db8] sm:$0xff] }
 0x4fa   :  { %8224 = vmatprep.subr.bf16.mxu1 %v11454_v44  ;;  %v1694_v44 = vld [vmem:[#allocation8 + $0x1c50] sm:$0xff] }
 0x4fb   :  { %v11507_v18 = vcombine.low %v1694_v44, %v1698_v19 }
 0x4fc   :  { %7897 = vmatpush1.bf16.msra.mxu0 %v11451_v9  ;;  %v11501_v9 = vcombine.low %v1687_v55, %v1691_v60 }
 0x4fd   :  { %8225 = vmatpush1.bf16.msra.mxu1 %v11453_v12  ;;  %7898 = vmatprep.subr.bf16.mxu0 %v11460_v26  ;;  %v11508_v12 = vcombine.high %v1694_v44, %v1698_v19  ;;  %v1702_v26 = vld [vmem:[#allocation8 + $0x1c90] sm:$0xff]  ;;  %v1747_v44 = vld [vmem:[#allocation8 + $0x1df8] sm:$0xff] }
 0x4fe   :  { %8226 = vmatprep.subr.bf16.mxu1 %v11462_v51  ;;  %v1706_v51 = vld [vmem:[#allocation8 + $0x1cb0] sm:$0xff] }
 0x4ff   :  { %v11515_v53 = vcombine.low %v1702_v26, %v1706_v51 }
 0x500   :  { %7899 = vmatpush1.bf16.msra.mxu0 %v11459_v7  ;;  %v11509_v7 = vcombine.low %v1695_v5, %v1699_v6 }
 0x501   :  { %8227 = vmatpush1.bf16.msra.mxu1 %v11461_v25  ;;  %7900 = vmatprep.subr.bf16.mxu0 %v11468_v61  ;;  %v11516_v25 = vcombine.high %v1702_v26, %v1706_v51  ;;  %v11518_v61 = vcombine.high %v1703_v11, %v1707_v35  ;;  %v1751_v26 = vld [vmem:[#allocation8 + $0x1e18] sm:$0xff] }
 0x502   :  { %8228 = vmatprep.subr.bf16.mxu1 %v11470_v38  ;;  %v1710_v38 = vld [vmem:[#allocation8 + $0x1cd0] sm:$0xff]  ;;  %v1755_v51 = vld [vmem:[#allocation8 + $0x1e38] sm:$0xff] }
 0x504   :  { %7901 = vmatpush1.bf16.msra.mxu0 %v11467_v28  ;;  %v11524_v28 = vcombine.high %v1710_v38, %v1714_v0 }
 0x505   :  { %8229 = vmatpush1.bf16.msra.mxu1 %v11469_v62  ;;  %7902 = vmatprep.subr.bf16.mxu0 %v11476_v8  ;;  %v11526_v62 = vcombine.high %v1711_v22, %v1715_v27  ;;  %v1718_v8 = vld [vmem:[#allocation8 + $0x1d10] sm:$0xff]  ;;  %v11565_v22 = vcombine.low %v1751_v26, %v1755_v51 }
 0x506   :  { %8230 = vmatprep.subr.bf16.mxu1 %v11478_v57  ;;  %v1722_v57 = vld [vmem:[#allocation8 + $0x1d30] sm:$0xff] }
 0x507   :  { %v11532_v41 = vcombine.high %v1718_v8, %v1722_v57  ;;  %v11531_v40 = vcombine.low %v1718_v8, %v1722_v57  ;;  %v1771_v8 = vld [vmem:[#allocation8 + $0x1eb8] sm:$0xff] }
 0x508   :  { %7903 = vmatpush1.bf16.msra.mxu0 %v11475_v31  ;;  %v11534_v31 = vcombine.high %v1719_v43, %v1723_v30 }
 0x509   :  { %8231 = vmatpush1.bf16.msra.mxu1 %v11477_v24  ;;  %7904 = vmatprep.subr.bf16.mxu0 %v11484_v34  ;;  %v1726_v24 = vld [vmem:[#allocation8 + $0x1d50] sm:$0xff] }
 0x50a   :  { %8232 = vmatprep.subr.bf16.mxu1 %v11486_v56  ;;  %v1730_v34 = vld [vmem:[#allocation8 + $0x1d70] sm:$0xff]  ;;  %v1727_v56 = vld [vmem:[#allocation8 + $0x1d58] sm:$0xff] }
 0x50b   :  { %v11540_v46 = vcombine.high %v1726_v24, %v1730_v34  ;;  %v11539_v13 = vcombine.low %v1726_v24, %v1730_v34  ;;  %v11541_v55 = vcombine.low %v1727_v56, %v1731_v50  ;;  %v1779_v24 = vld [vmem:[#allocation8 + $0x1ef8] sm:$0xff] }
 0x50c   :  { %7905 = vmatpush1.bf16.msra.mxu0 %v11483_v47  ;;  %v11542_v47 = vcombine.high %v1727_v56, %v1731_v50 }
 0x50d   :  { %8233 = vmatpush1.bf16.msra.mxu1 %v11485_v1  ;;  %7906 = vmatprep.subr.bf16.mxu0 %v11492_v48  ;;  %v1734_v1 = vld [vmem:[#allocation8 + $0x1d90] sm:$0xff] }
 0x50e   :  { %8234 = vmatprep.subr.bf16.mxu1 %v11494_v33  ;;  %v1738_v48 = vld [vmem:[#allocation8 + $0x1db0] sm:$0xff]  ;;  %v1735_v33 = vld [vmem:[#allocation8 + $0x1d98] sm:$0xff] }
 0x50f   :  { %v11548_v60 = vcombine.high %v1734_v1, %v1738_v48  ;;  %v11547_v19 = vcombine.low %v1734_v1, %v1738_v48  ;;  %v1783_v1 = vld [vmem:[#allocation8 + $0x1f18] sm:$0xff] }
 0x510   :  { %7907 = vmatpush1.bf16.msra.mxu0 %v11491_v23  ;;  %v11550_v23 = vcombine.high %v1735_v33, %v1739_v54  ;;  %v1787_v48 = vld [vmem:[#allocation8 + $0x1f38] sm:$0xff] }
 0x511   :  { %8235 = vmatpush1.bf16.msra.mxu1 %v11493_v2  ;;  %7917 = vmatprep.subr.bf16.mxu0 %v11500_v45  ;;  %v1742_v2 = vld [vmem:[#allocation8 + $0x1dd0] sm:$0xff] }
 0x512   :  { %8245 = vmatprep.subr.bf16.mxu1 %v11502_v3  ;;  %v1746_v45 = vld [vmem:[#allocation8 + $0x1df0] sm:$0xff]  ;;  %v1743_v3 = vld [vmem:[#allocation8 + $0x1dd8] sm:$0xff] }
 0x513   :  { %7909 = vmatmul.mubr.bf16.vlgmr.msra.gmra.mrb[20].mxu0 %v13187_v49  ;;  %v11556_v5 = vcombine.high %v1742_v2, %v1746_v45  ;;  %v11558_v6 = vcombine.high %v1743_v3, %v1747_v44 }
 0x514   :  { %8237 = vmatmul.mubr.bf16.vlgmr.msra.gmra.mrb[20].mxu1 %v13187_v49  ;;  %7918 = vmatpush1.bf16.msra.mxu0 %v11499_v4  ;;  %v11517_v49 = vcombine.low %v1703_v11, %v1707_v35  ;;  %v11549_v4 = vcombine.low %v1735_v33, %v1739_v54  ;;  %v11557_v11 = vcombine.low %v1743_v3, %v1747_v44  ;;  %v1795_v3 = vld [vmem:[#allocation8 + $0x1f78] sm:$0xff] }
 0x515   :  { %7949 = vmatprep.mubr.bf16.mxu0 %v13189_v58  ;;  %8246 = vmatpush1.bf16.msra.mxu1 %v11501_v9  ;;  %v1750_v9 = vld [vmem:[#allocation8 + $0x1e10] sm:$0xff] }
 0x516   :  { %8277 = vmatprep.mubr.bf16.mxu1 %v13189_v58  ;;  %7919 = vmatprep.subr.bf16.mxu0 %v11508_v12  ;;  %v11523_v58 = vcombine.low %v1710_v38, %v1714_v0  ;;  %v1754_v12 = vld [vmem:[#allocation8 + $0x1e30] sm:$0xff]  ;;  %v1763_v38 = vld [vmem:[#allocation8 + $0x1e78] sm:$0xff] }
 0x517   :  { %8247 = vmatprep.subr.bf16.mxu1 %v11510_v10  ;;  %v11555_v10 = vcombine.low %v1742_v2, %v1746_v45  ;;  %v11564_v35 = vcombine.high %v1750_v9, %v1754_v12  ;;  %v11563_v0 = vcombine.low %v1750_v9, %v1754_v12  ;;  %v1794_v2 = vld [vmem:[#allocation8 + $0x1f70] sm:$0xff]  ;;  %v1791_v45 = vld [vmem:[#allocation8 + $0x1f58] sm:$0xff] }
 0x518   :  { %7920 = vmatpush1.bf16.msra.mxu0 %v11507_v18  ;;  %v11566_v18 = vcombine.high %v1751_v26, %v1755_v51  ;;  %v1798_v9 = vld [vmem:[#allocation8 + $0x1f90] sm:$0xff]  ;;  %v1799_v26 = vld [vmem:[#allocation8 + $0x1f98] sm:$0xff] }
 0x519   :  { %8248 = vmatpush1.bf16.msra.mxu1 %v11509_v7  ;;  %7921 = vmatprep.subr.bf16.mxu0 %v11516_v25  ;;  %v1758_v7 = vld [vmem:[#allocation8 + $0x1e50] sm:$0xff]  ;;  %v1803_v51 = vld [vmem:[#allocation8 + $0x1fb8] sm:$0xff] }
 0x51a   :  { %8249 = vmatprep.subr.bf16.mxu1 %v11518_v61  ;;  %v1762_v25 = vld [vmem:[#allocation8 + $0x1e70] sm:$0xff]  ;;  %v1759_v61 = vld [vmem:[#allocation8 + $0x1e58] sm:$0xff] }
 0x51b   :  { %v11572_v27 = vcombine.high %v1758_v7, %v1762_v25  ;;  %v11571_v57 = vcombine.low %v1758_v7, %v1762_v25  ;;  %v11573_v43 = vcombine.low %v1759_v61, %v1763_v38  ;;  %v1802_v12 = vld [vmem:[#allocation8 + $0x1fb0] sm:$0xff] }
 0x51c   :  { %7922 = vmatpush1.bf16.msra.mxu0 %v11515_v53  ;;  %v11574_v53 = vcombine.high %v1759_v61, %v1763_v38  ;;  %v1806_v7 = vld [vmem:[#allocation8 + $0x1fd0] sm:$0xff]  ;;  %v1807_v61 = vld [vmem:[#allocation8 + $0x1fd8] sm:$0xff] }
 0x51d   :  { %8250 = vmatpush1.bf16.msra.mxu1 %v11517_v49  ;;  %7923 = vmatprep.subr.bf16.mxu0 %v11524_v28  ;;  %v1766_v49 = vld [vmem:[#allocation8 + $0x1e90] sm:$0xff]  ;;  %v1811_v38 = vld [vmem:[#allocation8 + $0x1ff8] sm:$0xff] }
 0x51e   :  { %8251 = vmatprep.subr.bf16.mxu1 %v11526_v62  ;;  %v1770_v28 = vld [vmem:[#allocation8 + $0x1eb0] sm:$0xff]  ;;  %v1767_v62 = vld [vmem:[#allocation8 + $0x1e98] sm:$0xff] }
 0x51f   :  { %v11580_v30 = vcombine.high %v1766_v49, %v1770_v28  ;;  %v11579_v34 = vcombine.low %v1766_v49, %v1770_v28  ;;  %v11581_v56 = vcombine.low %v1767_v62, %v1771_v8  ;;  %v1810_v25 = vld [vmem:[#allocation8 + $0x1ff0] sm:$0xff]  ;;  %v11621_v49 = vcombine.low %v1807_v61, %v1811_v38  ;;  %v12124_v28 = vld [vmem:[#allocation11 + $0x4] ss:$16 sps:$4 sm:$0xff]  }
 0x520   :  { %7924 = vmatpush1.bf16.msra.mxu0 %v11523_v58  ;;  %v11582_v58 = vcombine.high %v1767_v62, %v1771_v8  ;;  %v12127_v62 = vld [vmem:[#allocation11 + $0xc] ss:$16 sps:$4 sm:$0xff]  }
 0x521   :  { %8252 = vmatpush1.bf16.msra.mxu1 %v11525_v59  ;;  %7925 = vmatprep.subr.bf16.mxu0 %v11532_v41  ;;  %v1774_v59 = vld [vmem:[#allocation8 + $0x1ed0] sm:$0xff] }
 0x522   :  { %8253 = vmatprep.subr.bf16.mxu1 %v11534_v31  ;;  %v1778_v41 = vld [vmem:[#allocation8 + $0x1ef0] sm:$0xff]  ;;  %v1775_v31 = vld [vmem:[#allocation8 + $0x1ed8] sm:$0xff] }
 0x523   :  { %v11588_v50 = vcombine.high %v1774_v59, %v1778_v41  ;;  %v11587_v33 = vcombine.low %v1774_v59, %v1778_v41  ;;  %v11589_v54 = vcombine.low %v1775_v31, %v1779_v24  ;;  %v12133_v59 = vld [vmem:[#allocation11 + $0x2c] ss:$16 sps:$4 sm:$0xff]   ;;  %v12128_v41 = vld [vmem:[#allocation11 + $0x20] ss:$16 sps:$4 sm:$0xff]  }
 0x524   :  { %7926 = vmatpush1.bf16.msra.mxu0 %v11531_v40  ;;  %v11590_v40 = vcombine.high %v1775_v31, %v1779_v24  ;;  %v12131_v31 = vld [vmem:[#allocation11 + $0x28] ss:$16 sps:$4 sm:$0xff]   ;;  %v12136_v24 = vld [vmem:[#allocation11 + $0x44] ss:$16 sps:$4 sm:$0xff]  }
 0x525   :  { %8254 = vmatpush1.bf16.msra.mxu1 %v11533_v42  ;;  %7927 = vmatprep.subr.bf16.mxu0 %v11540_v46  ;;  %v1782_v42 = vld [vmem:[#allocation8 + $0x1f10] sm:$0xff] }
 0x526   :  { %8255 = vmatprep.subr.bf16.mxu1 %v11542_v47  ;;  %v1786_v46 = vld [vmem:[#allocation8 + $0x1f30] sm:$0xff]  ;;  %v13238_v47 = vld [vmem:[#allocation10] sm:$0xff] }
 0x527   :  { %v11595_v44 = vcombine.low %v1782_v42, %v1786_v46 }
 0x528   :  { %7928 = vmatpush1.bf16.msra.mxu0 %v11539_v13  ;;  %v11596_v13 = vcombine.high %v1782_v42, %v1786_v46  ;;  %v12145_v42 = vld [vmem:[#allocation11 + $0x6c] ss:$16 sps:$4 sm:$0xff]   ;;  %v12143_v46 = vld [vmem:[#allocation11 + $0x68] ss:$16 sps:$4 sm:$0xff]  }
 0x529   :  { %8256 = vmatpush1.bf16.msra.mxu1 %v11541_v55  ;;  %7929 = vmatprep.subr.bf16.mxu0 %v11548_v60  ;;  %v1821_v55 = vrot.slane %v13238_v47, %v13042_v16  ;;  %v11598_v60 = vcombine.high %v1783_v1, %v1787_v48 }
 0x52a   :  { %8257 = vmatprep.subr.bf16.mxu1 %v11550_v23  ;;  %v1790_v23 = vld [vmem:[#allocation8 + $0x1f50] sm:$0xff] }
 0x52c   :  { %7930 = vmatpush1.bf16.msra.mxu0 %v11547_v19  ;;  %v11597_v19 = vcombine.low %v1783_v1, %v1787_v48  ;;  %v12148_v1 = vld [vmem:[#allocation11 + $0x84] ss:$16 sps:$4 sm:$0xff]   ;;  %v12151_v48 = vld [vmem:[#allocation11 + $0x8c] ss:$16 sps:$4 sm:$0xff]  }
 0x52d   :  { %8258 = vmatpush1.bf16.msra.mxu1 %v11549_v4  ;;  %7931 = vmatprep.subr.bf16.mxu0 %v11556_v5  ;;  %v11604_v4 = vcombine.high %v1790_v23, %v1794_v2  ;;  %v11957_v5 = vadd.f32 %v13218_v32, %v1821_v55  ;;  %v11611_v32 = vcombine.low %v1798_v9, %v1802_v12  ;;  %v12157_v55 = vld [vmem:[#allocation11 + $0xac] ss:$16 sps:$4 sm:$0xff]  }
 0x52e   :  { %8259 = vmatprep.subr.bf16.mxu1 %v11558_v6  ;;  %v11606_v6 = vcombine.high %v1791_v45, %v1795_v3 }
 0x52f   :  { %12570 = vtanh.f32 %v11957_v5  ;;  %v12164_v5 = vld [vmem:[#allocation11 + $0xe0] ss:$16 sps:$4 sm:$0xff]  }
 0x530   :  { %7932 = vmatpush1.bf16.msra.mxu0 %v11555_v10  ;;  %v11603_v10 = vcombine.low %v1790_v23, %v1794_v2  ;;  %v12155_v23 = vld [vmem:[#allocation11 + $0xa8] ss:$16 sps:$4 sm:$0xff]   ;;  %v12160_v2 = vld [vmem:[#allocation11 + $0xc4] ss:$16 sps:$4 sm:$0xff]  }
 0x531   :  { %8260 = vmatpush1.bf16.msra.mxu1 %v11557_v11  ;;  %7933 = vmatprep.subr.bf16.mxu0 %v11564_v35  ;;  %v11605_v11 = vcombine.low %v1791_v45, %v1795_v3  ;;  %v11612_v35 = vcombine.high %v1798_v9, %v1802_v12  ;;  %v12163_v45 = vld [vmem:[#allocation11 + $0xcc] ss:$16 sps:$4 sm:$0xff]   ;;  %v12158_v3 = vld [vmem:[#allocation11 + $0xc0] ss:$16 sps:$4 sm:$0xff]   ;;  %v12172_v9 = vld [vmem:[#allocation11 + $0x104] ss:$16 sps:$4 sm:$0xff]  }
 0x532   :  { %8261 = vmatprep.subr.bf16.mxu1 %v11566_v18  ;;  %v11614_v18 = vcombine.high %v1799_v26, %v1803_v51  ;;  %v12175_v12 = vld [vmem:[#allocation11 + $0x10c] ss:$16 sps:$4 sm:$0xff]  }
 0x534   :  { %7934 = vmatpush1.bf16.msra.mxu0 %v11563_v0  ;;  %v11613_v0 = vcombine.low %v1799_v26, %v1803_v51  ;;  %v12170_v26 = vld [vmem:[#allocation11 + $0x100] ss:$16 sps:$4 sm:$0xff]   ;;  %v12173_v51 = vld [vmem:[#allocation11 + $0x108] ss:$16 sps:$4 sm:$0xff]  }
 0x535   :  { %8262 = vmatpush1.bf16.msra.mxu1 %v11565_v22  ;;  %7935 = vmatprep.subr.bf16.mxu0 %v11572_v27  ;;  %v11620_v22 = vcombine.high %v1806_v7, %v1810_v25  ;;  %v11622_v27 = vcombine.high %v1807_v61, %v1811_v38  ;;  %v12182_v61 = vld [vmem:[#allocation11 + $0x140] ss:$16 sps:$4 sm:$0xff]   ;;  %v12185_v38 = vld [vmem:[#allocation11 + $0x148] ss:$16 sps:$4 sm:$0xff]  }
 0x536   :  { %8263 = vmatprep.subr.bf16.mxu1 %v11574_v53  ;;  %v11619_v53 = vcombine.low %v1806_v7, %v1810_v25  ;;  %v12184_v7 = vld [vmem:[#allocation11 + $0x144] ss:$16 sps:$4 sm:$0xff]   ;;  %v12187_v25 = vld [vmem:[#allocation11 + $0x14c] ss:$16 sps:$4 sm:$0xff]  }
 0x538   :  { %7936 = vmatpush1.bf16.msra.mxu0 %v11571_v57  ;;  %v12122_v57 = vld [vmem:[#allocation11] ss:$16 sps:$4 sm:$0xff]  }
 0x539   :  { %8264 = vmatpush1.bf16.msra.mxu1 %v11573_v43  ;;  %7937 = vmatprep.subr.bf16.mxu0 %v11580_v30  ;;  %v12571_v8 = vpop.eup %12570  ;;  %v12125_v43 = vld [vmem:[#allocation11 + $0x8] ss:$16 sps:$4 sm:$0xff]   ;;  %v12130_v30 = vld [vmem:[#allocation11 + $0x24] ss:$16 sps:$4 sm:$0xff]  }
 0x53a   :  { %8265 = vmatprep.subr.bf16.mxu1 %v11582_v58  ;;  %v8295_v58 = vpack.c.bf16 %v12571_v8, %v12571_v8 }
 0x53c   :  { %7938 = vmatpush1.bf16.msra.mxu0 %v11579_v34  ;;  %v12139_v34 = vld [vmem:[#allocation11 + $0x4c] ss:$16 sps:$4 sm:$0xff]  }
 0x53d   :  { %8266 = vmatpush1.bf16.msra.mxu1 %v11581_v56  ;;  %7939 = vmatprep.subr.bf16.mxu0 %v11588_v50  ;;  %v12134_v56 = vld [vmem:[#allocation11 + $0x40] ss:$16 sps:$4 sm:$0xff]   ;;  %v12137_v50 = vld [vmem:[#allocation11 + $0x48] ss:$16 sps:$4 sm:$0xff]  }
 0x53e   :  { %8267 = vmatprep.subr.bf16.mxu1 %v11590_v40  ;;  %v12142_v40 = vld [vmem:[#allocation11 + $0x64] ss:$16 sps:$4 sm:$0xff]  }
 0x540   :  { %7940 = vmatpush1.bf16.msra.mxu0 %v11587_v33  ;;  %v12146_v33 = vld [vmem:[#allocation11 + $0x80] ss:$16 sps:$4 sm:$0xff]  }
 0x541   :  { %8268 = vmatpush1.bf16.msra.mxu1 %v11589_v54  ;;  %7941 = vmatprep.subr.bf16.mxu0 %v11596_v13  ;;  %v12149_v54 = vld [vmem:[#allocation11 + $0x88] ss:$16 sps:$4 sm:$0xff]   ;;  %v12154_v13 = vld [vmem:[#allocation11 + $0xa4] ss:$16 sps:$4 sm:$0xff]  }
 0x542   :  { %8269 = vmatprep.subr.bf16.mxu1 %v11598_v60  ;;  %v12152_v60 = vld [vmem:[#allocation11 + $0xa0] ss:$16 sps:$4 sm:$0xff]  }
 0x544   :  { %7942 = vmatpush1.bf16.msra.mxu0 %v11595_v44  ;;  %v12161_v44 = vld [vmem:[#allocation11 + $0xc8] ss:$16 sps:$4 sm:$0xff]  }
 0x545   :  { %8270 = vmatpush1.bf16.msra.mxu1 %v11597_v19  ;;  %7943 = vmatprep.subr.bf16.mxu0 %v11604_v4  ;;  %v12166_v19 = vld [vmem:[#allocation11 + $0xe4] ss:$16 sps:$4 sm:$0xff]   ;;  %v12169_v4 = vld [vmem:[#allocation11 + $0xec] ss:$16 sps:$4 sm:$0xff]  }
 0x546   :  { %8271 = vmatprep.subr.bf16.mxu1 %v11606_v6  ;;  %v12167_v6 = vld [vmem:[#allocation11 + $0xe8] ss:$16 sps:$4 sm:$0xff]  }
 0x548   :  { %7944 = vmatpush1.bf16.msra.mxu0 %v11603_v10  ;;  %v12178_v10 = vld [vmem:[#allocation11 + $0x124] ss:$16 sps:$4 sm:$0xff]  }
 0x549   :  { %8272 = vmatpush1.bf16.msra.mxu1 %v11605_v11  ;;  %7945 = vmatprep.subr.bf16.mxu0 %v11612_v35  ;;  %v12181_v11 = vld [vmem:[#allocation11 + $0x12c] ss:$16 sps:$4 sm:$0xff]   ;;  %v12176_v35 = vld [vmem:[#allocation11 + $0x120] ss:$16 sps:$4 sm:$0xff]  }
 0x54a   :  { %8273 = vmatprep.subr.bf16.mxu1 %v11614_v18  ;;  %v12179_v18 = vld [vmem:[#allocation11 + $0x128] ss:$16 sps:$4 sm:$0xff]  }
 0x54c   :  { %7946 = vmatpush1.bf16.msra.mxu0 %v11611_v32  ;;  %v12190_v32 = vld [vmem:[#allocation11 + $0x164] ss:$16 sps:$4 sm:$0xff]  }
 0x54d   :  { %8274 = vmatpush1.bf16.msra.mxu1 %v11613_v0  ;;  %7947 = vmatprep.subr.bf16.mxu0 %v11620_v22  ;;  %v12193_v0 = vld [vmem:[#allocation11 + $0x16c] ss:$16 sps:$4 sm:$0xff]   ;;  %v1817_v22 = vrot.slane %v13238_v47, %v13037_v14 }
 0x54e   :  { %8275 = vmatprep.subr.bf16.mxu1 %v11622_v27  ;;  %v12188_v27 = vld [vmem:[#allocation11 + $0x160] ss:$16 sps:$4 sm:$0xff]  }
 0x54f   :  { %v11956_v8 = vadd.f32 %v13214_v52, %v1817_v22  ;;  %v12211_v52 = vld [vmem:[#allocation11 + $0x1cc] ss:$16 sps:$4 sm:$0xff]   ;;  %v12262_v22 = vld [vmem:[#allocation11 + $0x2e4] ss:$16 sps:$4 sm:$0xff]  }
 0x550   :  { %7948 = vmatpush1.bf16.msra.mxu0 %v11619_v53  ;;  %v12191_v53 = vld [vmem:[#allocation11 + $0x168] ss:$16 sps:$4 sm:$0xff]  }
 0x551   :  { %8276 = vmatpush1.bf16.msra.mxu1 %v11621_v49  ;;  %9860 = vmatprep.subr.bf16.mxu0 %v12124_v28  ;;  %v12196_v49 = vld [vmem:[#allocation11 + $0x184] ss:$16 sps:$4 sm:$0xff]   ;;  %v1829_v28 = vrot.slane %v13238_v47, %v13045_v17  ;;  %12572 = vtanh.f32 %v11956_v8  ;;  %v12266_v8 = vld [vmem:[#allocation11 + $0x300] ss:$16 sps:$4 sm:$0xff]  }
 0x552   :  { %10024 = vmatprep.subr.bf16.mxu1 %v12127_v62  ;;  %v12199_v62 = vld [vmem:[#allocation11 + $0x18c] ss:$16 sps:$4 sm:$0xff]  }
 0x553   :  { %7950 = vmatmul.mubr.bf16.vlgmr.msra.gmra.mrb[20].mxu0 %v13196_v63 }
 0x554   :  { %8278 = vmatmul.mubr.bf16.vlgmr.msra.gmra.mrb[20].mxu1 %v13196_v63  ;;  %9861 = vmatpush1.bf16.msra.mxu0 %v12122_v57  ;;  %v12140_v63 = vld [vmem:[#allocation11 + $0x60] ss:$16 sps:$4 sm:$0xff]  }
 0x555   :  { %9892 = vmatprep.mubr.bf16.mxu0 %v8295_v58  ;;  %10025 = vmatpush1.bf16.msra.mxu1 %v12125_v43  ;;  %v12194_v57 = vld [vmem:[#allocation11 + $0x180] ss:$16 sps:$4 sm:$0xff]   ;;  %v12197_v43 = vld [vmem:[#allocation11 + $0x188] ss:$16 sps:$4 sm:$0xff]  }
 0x556   :  { %10056 = vmatprep.mubr.bf16.mxu1 %v8295_v58  ;;  %9862 = vmatprep.subr.bf16.mxu0 %v12130_v30  ;;  %v12202_v30 = vld [vmem:[#allocation11 + $0x1a4] ss:$16 sps:$4 sm:$0xff]   ;;  %v11959_v58 = vadd.f32 %v13220_v20, %v1829_v28  ;;  %v12217_v20 = vld [vmem:[#allocation11 + $0x1ec] ss:$16 sps:$4 sm:$0xff]  }
 0x557   :  { %10026 = vmatprep.subr.bf16.mxu1 %v12133_v59  ;;  %v12205_v59 = vld [vmem:[#allocation11 + $0x1ac] ss:$16 sps:$4 sm:$0xff]   ;;  %v12268_v28 = vld [vmem:[#allocation11 + $0x304] ss:$16 sps:$4 sm:$0xff]  }
 0x558   :  { %9863 = vmatpush1.bf16.msra.mxu0 %v12128_v41  ;;  %v12200_v41 = vld [vmem:[#allocation11 + $0x1a0] ss:$16 sps:$4 sm:$0xff]   ;;  %12574 = vtanh.f32 %v11959_v58 }
 0x559   :  { %10027 = vmatpush1.bf16.msra.mxu1 %v12131_v31  ;;  %9864 = vmatprep.subr.bf16.mxu0 %v12136_v24  ;;  %v12203_v31 = vld [vmem:[#allocation11 + $0x1a8] ss:$16 sps:$4 sm:$0xff]   ;;  %v12208_v24 = vld [vmem:[#allocation11 + $0x1c4] ss:$16 sps:$4 sm:$0xff]   ;;  %v12272_v58 = vld [vmem:[#allocation11 + $0x320] ss:$16 sps:$4 sm:$0xff]  }
 0x55a   :  { %10028 = vmatprep.subr.bf16.mxu1 %v12139_v34  ;;  %v12206_v34 = vld [vmem:[#allocation11 + $0x1c0] ss:$16 sps:$4 sm:$0xff]  }
 0x55c   :  { %9865 = vmatpush1.bf16.msra.mxu0 %v12134_v56  ;;  %v12209_v56 = vld [vmem:[#allocation11 + $0x1c8] ss:$16 sps:$4 sm:$0xff]  }
 0x55d   :  { %10029 = vmatpush1.bf16.msra.mxu1 %v12137_v50  ;;  %9866 = vmatprep.subr.bf16.mxu0 %v12142_v40  ;;  %v12214_v50 = vld [vmem:[#allocation11 + $0x1e4] ss:$16 sps:$4 sm:$0xff]   ;;  %v12212_v40 = vld [vmem:[#allocation11 + $0x1e0] ss:$16 sps:$4 sm:$0xff]  }
 0x55e   :  { %10030 = vmatprep.subr.bf16.mxu1 %v12145_v42  ;;  %v12215_v42 = vld [vmem:[#allocation11 + $0x1e8] ss:$16 sps:$4 sm:$0xff]  }
 0x560   :  { %9867 = vmatpush1.bf16.msra.mxu0 %v12140_v63  ;;  %v12220_v63 = vld [vmem:[#allocation11 + $0x204] ss:$16 sps:$4 sm:$0xff]  }
 0x561   :  { %10031 = vmatpush1.bf16.msra.mxu1 %v12143_v46  ;;  %9868 = vmatprep.subr.bf16.mxu0 %v12148_v1  ;;  %v12573_v46 = vpop.eup %12572  ;;  %v12223_v1 = vld [vmem:[#allocation11 + $0x20c] ss:$16 sps:$4 sm:$0xff]  }
 0x562   :  { %10032 = vmatprep.subr.bf16.mxu1 %v12151_v48  ;;  %v12575_v48 = vpop.eup %12574 }
 0x564   :  { %9869 = vmatpush1.bf16.msra.mxu0 %v12146_v33  ;;  %v12218_v33 = vld [vmem:[#allocation11 + $0x200] ss:$16 sps:$4 sm:$0xff]  }
 0x565   :  { %10033 = vmatpush1.bf16.msra.mxu1 %v12149_v54  ;;  %9870 = vmatprep.subr.bf16.mxu0 %v12154_v13  ;;  %v8294_v54 = vpack.c.bf16 %v12573_v46, %v12573_v46  ;;  %v12221_v13 = vld [vmem:[#allocation11 + $0x208] ss:$16 sps:$4 sm:$0xff]  }
 0x566   :  { %10034 = vmatprep.subr.bf16.mxu1 %v12157_v55  ;;  %v12226_v55 = vld [vmem:[#allocation11 + $0x224] ss:$16 sps:$4 sm:$0xff]  }
 0x568   :  { %9871 = vmatpush1.bf16.msra.mxu0 %v12152_v60  ;;  %v8297_v60 = vpack.c.bf16 %v12575_v48, %v12575_v48  ;;  %v12293_v48 = vld [vmem:[#allocation11 + $0x388] ss:$16 sps:$4 sm:$0xff]  }
 0x569   :  { %10035 = vmatpush1.bf16.msra.mxu1 %v12155_v23  ;;  %9872 = vmatprep.subr.bf16.mxu0 %v12160_v2  ;;  %v12229_v23 = vld [vmem:[#allocation11 + $0x22c] ss:$16 sps:$4 sm:$0xff]   ;;  %v12224_v2 = vld [vmem:[#allocation11 + $0x220] ss:$16 sps:$4 sm:$0xff]  }
 0x56a   :  { %10036 = vmatprep.subr.bf16.mxu1 %v12163_v45  ;;  %v12227_v45 = vld [vmem:[#allocation11 + $0x228] ss:$16 sps:$4 sm:$0xff]  }
 0x56c   :  { %9873 = vmatpush1.bf16.msra.mxu0 %v12158_v3  ;;  %v12232_v3 = vld [vmem:[#allocation11 + $0x244] ss:$16 sps:$4 sm:$0xff]  }
 0x56d   :  { %10037 = vmatpush1.bf16.msra.mxu1 %v12161_v44  ;;  %9874 = vmatprep.subr.bf16.mxu0 %v12166_v19  ;;  %v12235_v44 = vld [vmem:[#allocation11 + $0x24c] ss:$16 sps:$4 sm:$0xff]   ;;  %v12230_v19 = vld [vmem:[#allocation11 + $0x240] ss:$16 sps:$4 sm:$0xff]  }
 0x56e   :  { %10038 = vmatprep.subr.bf16.mxu1 %v12169_v4  ;;  %v12233_v4 = vld [vmem:[#allocation11 + $0x248] ss:$16 sps:$4 sm:$0xff]  }
 0x570   :  { %9875 = vmatpush1.bf16.msra.mxu0 %v12164_v5  ;;  %v12238_v5 = vld [vmem:[#allocation11 + $0x264] ss:$16 sps:$4 sm:$0xff]  }
 0x571   :  { %10039 = vmatpush1.bf16.msra.mxu1 %v12167_v6  ;;  %9876 = vmatprep.subr.bf16.mxu0 %v12172_v9  ;;  %v12241_v6 = vld [vmem:[#allocation11 + $0x26c] ss:$16 sps:$4 sm:$0xff]   ;;  %v12236_v9 = vld [vmem:[#allocation11 + $0x260] ss:$16 sps:$4 sm:$0xff]  }
 0x572   :  { %10040 = vmatprep.subr.bf16.mxu1 %v12175_v12  ;;  %v12239_v12 = vld [vmem:[#allocation11 + $0x268] ss:$16 sps:$4 sm:$0xff]  }
 0x574   :  { %9877 = vmatpush1.bf16.msra.mxu0 %v12170_v26  ;;  %v12244_v26 = vld [vmem:[#allocation11 + $0x284] ss:$16 sps:$4 sm:$0xff]  }
 0x575   :  { %10041 = vmatpush1.bf16.msra.mxu1 %v12173_v51  ;;  %9878 = vmatprep.subr.bf16.mxu0 %v12178_v10  ;;  %v12247_v51 = vld [vmem:[#allocation11 + $0x28c] ss:$16 sps:$4 sm:$0xff]   ;;  %v12242_v10 = vld [vmem:[#allocation11 + $0x280] ss:$16 sps:$4 sm:$0xff]  }
 0x576   :  { %10042 = vmatprep.subr.bf16.mxu1 %v12181_v11  ;;  %v12245_v11 = vld [vmem:[#allocation11 + $0x288] ss:$16 sps:$4 sm:$0xff]  }
 0x578   :  { %9879 = vmatpush1.bf16.msra.mxu0 %v12176_v35  ;;  %v12250_v35 = vld [vmem:[#allocation11 + $0x2a4] ss:$16 sps:$4 sm:$0xff]  }
 0x579   :  { %10043 = vmatpush1.bf16.msra.mxu1 %v12179_v18  ;;  %9880 = vmatprep.subr.bf16.mxu0 %v12184_v7  ;;  %v12253_v18 = vld [vmem:[#allocation11 + $0x2ac] ss:$16 sps:$4 sm:$0xff]   ;;  %v12248_v7 = vld [vmem:[#allocation11 + $0x2a0] ss:$16 sps:$4 sm:$0xff]  }
 0x57a   :  { %10044 = vmatprep.subr.bf16.mxu1 %v12187_v25  ;;  %v12251_v25 = vld [vmem:[#allocation11 + $0x2a8] ss:$16 sps:$4 sm:$0xff]  }
 0x57c   :  { %9881 = vmatpush1.bf16.msra.mxu0 %v12182_v61  ;;  %v12256_v61 = vld [vmem:[#allocation11 + $0x2c4] ss:$16 sps:$4 sm:$0xff]  }
 0x57d   :  { %10045 = vmatpush1.bf16.msra.mxu1 %v12185_v38  ;;  %9882 = vmatprep.subr.bf16.mxu0 %v12190_v32  ;;  %v12259_v38 = vld [vmem:[#allocation11 + $0x2cc] ss:$16 sps:$4 sm:$0xff]   ;;  %v12254_v32 = vld [vmem:[#allocation11 + $0x2c0] ss:$16 sps:$4 sm:$0xff]  }
 0x57e   :  { %10046 = vmatprep.subr.bf16.mxu1 %v12193_v0  ;;  %v12257_v0 = vld [vmem:[#allocation11 + $0x2c8] ss:$16 sps:$4 sm:$0xff]  }
 0x580   :  { %9883 = vmatpush1.bf16.msra.mxu0 %v12188_v27  ;;  %v12265_v27 = vld [vmem:[#allocation11 + $0x2ec] ss:$16 sps:$4 sm:$0xff]  }
 0x581   :  { %10047 = vmatpush1.bf16.msra.mxu1 %v12191_v53  ;;  %9884 = vmatprep.subr.bf16.mxu0 %v12196_v49  ;;  %v12260_v53 = vld [vmem:[#allocation11 + $0x2e0] ss:$16 sps:$4 sm:$0xff]   ;;  %v12263_v49 = vld [vmem:[#allocation11 + $0x2e8] ss:$16 sps:$4 sm:$0xff]  }
 0x582   :  { %10048 = vmatprep.subr.bf16.mxu1 %v12199_v62  ;;  %v12271_v62 = vld [vmem:[#allocation11 + $0x30c] ss:$16 sps:$4 sm:$0xff]  }
 0x584   :  { %9885 = vmatpush1.bf16.msra.mxu0 %v12194_v57  ;;  %v12269_v57 = vld [vmem:[#allocation11 + $0x308] ss:$16 sps:$4 sm:$0xff]  }
 0x585   :  { %10049 = vmatpush1.bf16.msra.mxu1 %v12197_v43  ;;  %9886 = vmatprep.subr.bf16.mxu0 %v12202_v30  ;;  %v12274_v43 = vld [vmem:[#allocation11 + $0x324] ss:$16 sps:$4 sm:$0xff]   ;;  %v12277_v30 = vld [vmem:[#allocation11 + $0x32c] ss:$16 sps:$4 sm:$0xff]  }
 0x586   :  { %10050 = vmatprep.subr.bf16.mxu1 %v12205_v59  ;;  %v12275_v59 = vld [vmem:[#allocation11 + $0x328] ss:$16 sps:$4 sm:$0xff]  }
 0x588   :  { %9887 = vmatpush1.bf16.msra.mxu0 %v12200_v41  ;;  %v12280_v41 = vld [vmem:[#allocation11 + $0x344] ss:$16 sps:$4 sm:$0xff]  }
 0x589   :  { %10051 = vmatpush1.bf16.msra.mxu1 %v12203_v31  ;;  %9888 = vmatprep.subr.bf16.mxu0 %v12208_v24  ;;  %v12283_v31 = vld [vmem:[#allocation11 + $0x34c] ss:$16 sps:$4 sm:$0xff]   ;;  %v12278_v24 = vld [vmem:[#allocation11 + $0x340] ss:$16 sps:$4 sm:$0xff]  }
 0x58a   :  { %10052 = vmatprep.subr.bf16.mxu1 %v12211_v52  ;;  %v12281_v52 = vld [vmem:[#allocation11 + $0x348] ss:$16 sps:$4 sm:$0xff]  }
 0x58c   :  { %9889 = vmatpush1.bf16.msra.mxu0 %v12206_v34  ;;  %v12286_v34 = vld [vmem:[#allocation11 + $0x364] ss:$16 sps:$4 sm:$0xff]  }
 0x58d   :  { %10053 = vmatpush1.bf16.msra.mxu1 %v12209_v56  ;;  %9890 = vmatprep.subr.bf16.mxu0 %v12214_v50  ;;  %v12289_v56 = vld [vmem:[#allocation11 + $0x36c] ss:$16 sps:$4 sm:$0xff]   ;;  %v1825_v50 = vrot.slane %v13238_v47, %v13092_v29 }
 0x58e   :  { %10054 = vmatprep.subr.bf16.mxu1 %v12217_v20  ;;  %v12284_v20 = vld [vmem:[#allocation11 + $0x360] ss:$16 sps:$4 sm:$0xff]  }
 0x58f   :  { %v11958_v46 = vadd.f32 %v13216_v15, %v1825_v50  ;;  %v12305_v15 = vld [vmem:[#allocation11 + $0x3c8] ss:$16 sps:$4 sm:$0xff]   ;;  %v12367_v50 = vld [vmem:[#allocation11 + $0x50c] ss:$16 sps:$4 sm:$0xff]  }
 0x590   :  { %9891 = vmatpush1.bf16.msra.mxu0 %v12212_v40  ;;  %v12287_v40 = vld [vmem:[#allocation11 + $0x368] ss:$16 sps:$4 sm:$0xff]  }
 0x591   :  { %10055 = vmatpush1.bf16.msra.mxu1 %v12215_v42  ;;  %9901 = vmatprep.subr.bf16.mxu0 %v12220_v63  ;;  %v12292_v42 = vld [vmem:[#allocation11 + $0x384] ss:$16 sps:$4 sm:$0xff]   ;;  %v12295_v63 = vld [vmem:[#allocation11 + $0x38c] ss:$16 sps:$4 sm:$0xff]   ;;  %12576 = vtanh.f32 %v11958_v46  ;;  %v12368_v46 = vld [vmem:[#allocation11 + $0x520] ss:$16 sps:$4 sm:$0xff]  }
 0x592   :  { %10065 = vmatprep.subr.bf16.mxu1 %v12223_v1  ;;  %v12290_v1 = vld [vmem:[#allocation11 + $0x380] ss:$16 sps:$4 sm:$0xff]  }
 0x593   :  { %9893 = vmatmul.mubr.bf16.vlgmr.msra.gmra.mrb[24].mxu0 %v8294_v54 }
 0x594   :  { %10057 = vmatmul.mubr.bf16.vlgmr.msra.gmra.mrb[24].mxu1 %v8294_v54  ;;  %9902 = vmatpush1.bf16.msra.mxu0 %v12218_v33  ;;  %v12298_v33 = vld [vmem:[#allocation11 + $0x3a4] ss:$16 sps:$4 sm:$0xff]   ;;  %v12301_v54 = vld [vmem:[#allocation11 + $0x3ac] ss:$16 sps:$4 sm:$0xff]  }
 0x595   :  { %9933 = vmatprep.mubr.bf16.mxu0 %v8297_v60  ;;  %10066 = vmatpush1.bf16.msra.mxu1 %v12221_v13  ;;  %v12296_v13 = vld [vmem:[#allocation11 + $0x3a0] ss:$16 sps:$4 sm:$0xff]  }
 0x596   :  { %10097 = vmatprep.mubr.bf16.mxu1 %v8297_v60  ;;  %9903 = vmatprep.subr.bf16.mxu0 %v12226_v55  ;;  %v12299_v55 = vld [vmem:[#allocation11 + $0x3a8] ss:$16 sps:$4 sm:$0xff]   ;;  %v12304_v60 = vld [vmem:[#allocation11 + $0x3c4] ss:$16 sps:$4 sm:$0xff]  }
 0x597   :  { %10067 = vmatprep.subr.bf16.mxu1 %v12229_v23  ;;  %v12307_v23 = vld [vmem:[#allocation11 + $0x3cc] ss:$16 sps:$4 sm:$0xff]  }
 0x598   :  { %9904 = vmatpush1.bf16.msra.mxu0 %v12224_v2  ;;  %v12302_v2 = vld [vmem:[#allocation11 + $0x3c0] ss:$16 sps:$4 sm:$0xff]  }
 0x599   :  { %10068 = vmatpush1.bf16.msra.mxu1 %v12227_v45  ;;  %9905 = vmatprep.subr.bf16.mxu0 %v12232_v3  ;;  %v12310_v45 = vld [vmem:[#allocation11 + $0x3e4] ss:$16 sps:$4 sm:$0xff]   ;;  %v12313_v3 = vld [vmem:[#allocation11 + $0x3ec] ss:$16 sps:$4 sm:$0xff]  }
 0x59a   :  { %10069 = vmatprep.subr.bf16.mxu1 %v12235_v44  ;;  %v12308_v44 = vld [vmem:[#allocation11 + $0x3e0] ss:$16 sps:$4 sm:$0xff]  }
 0x59c   :  { %9906 = vmatpush1.bf16.msra.mxu0 %v12230_v19  ;;  %v12311_v19 = vld [vmem:[#allocation11 + $0x3e8] ss:$16 sps:$4 sm:$0xff]  }
 0x59d   :  { %10070 = vmatpush1.bf16.msra.mxu1 %v12233_v4  ;;  %9907 = vmatprep.subr.bf16.mxu0 %v12238_v5  ;;  %v12316_v4 = vld [vmem:[#allocation11 + $0x404] ss:$16 sps:$4 sm:$0xff]   ;;  %v12577_v5 = vpop.eup %12576 }
 0x59e   :  { %10071 = vmatprep.subr.bf16.mxu1 %v12241_v6  ;;  %v12319_v6 = vld [vmem:[#allocation11 + $0x40c] ss:$16 sps:$4 sm:$0xff]  }
 0x5a0   :  { %9908 = vmatpush1.bf16.msra.mxu0 %v12236_v9  ;;  %v12314_v9 = vld [vmem:[#allocation11 + $0x400] ss:$16 sps:$4 sm:$0xff]  }
 0x5a1   :  { %10072 = vmatpush1.bf16.msra.mxu1 %v12239_v12  ;;  %9909 = vmatprep.subr.bf16.mxu0 %v12244_v26  ;;  %v8296_v12 = vpack.c.bf16 %v12577_v5, %v12577_v5  ;;  %v12317_v26 = vld [vmem:[#allocation11 + $0x408] ss:$16 sps:$4 sm:$0xff]   ;;  %v12392_v5 = vld [vmem:[#allocation11 + $0x5a0] ss:$16 sps:$4 sm:$0xff]  }
 0x5a2   :  { %10073 = vmatprep.subr.bf16.mxu1 %v12247_v51  ;;  %v12322_v51 = vld [vmem:[#allocation11 + $0x424] ss:$16 sps:$4 sm:$0xff]  }
 0x5a4   :  { %9910 = vmatpush1.bf16.msra.mxu0 %v12242_v10  ;;  %v12325_v10 = vld [vmem:[#allocation11 + $0x42c] ss:$16 sps:$4 sm:$0xff]  }
 0x5a5   :  { %10074 = vmatpush1.bf16.msra.mxu1 %v12245_v11  ;;  %9911 = vmatprep.subr.bf16.mxu0 %v12250_v35  ;;  %v12320_v11 = vld [vmem:[#allocation11 + $0x420] ss:$16 sps:$4 sm:$0xff]   ;;  %v12323_v35 = vld [vmem:[#allocation11 + $0x428] ss:$16 sps:$4 sm:$0xff]  }
 0x5a6   :  { %10075 = vmatprep.subr.bf16.mxu1 %v12253_v18  ;;  %v12328_v18 = vld [vmem:[#allocation11 + $0x444] ss:$16 sps:$4 sm:$0xff]  }
 0x5a8   :  { %9912 = vmatpush1.bf16.msra.mxu0 %v12248_v7  ;;  %v12331_v7 = vld [vmem:[#allocation11 + $0x44c] ss:$16 sps:$4 sm:$0xff]  }
 0x5a9   :  { %10076 = vmatpush1.bf16.msra.mxu1 %v12251_v25  ;;  %9913 = vmatprep.subr.bf16.mxu0 %v12256_v61  ;;  %v12326_v25 = vld [vmem:[#allocation11 + $0x440] ss:$16 sps:$4 sm:$0xff]   ;;  %v12329_v61 = vld [vmem:[#allocation11 + $0x448] ss:$16 sps:$4 sm:$0xff]  }
 0x5aa   :  { %10077 = vmatprep.subr.bf16.mxu1 %v12259_v38  ;;  %v12334_v38 = vld [vmem:[#allocation11 + $0x464] ss:$16 sps:$4 sm:$0xff]  }
 0x5ac   :  { %9914 = vmatpush1.bf16.msra.mxu0 %v12254_v32  ;;  %v12337_v32 = vld [vmem:[#allocation11 + $0x46c] ss:$16 sps:$4 sm:$0xff]  }
 0x5ad   :  { %10078 = vmatpush1.bf16.msra.mxu1 %v12257_v0  ;;  %9915 = vmatprep.subr.bf16.mxu0 %v12262_v22  ;;  %v12332_v0 = vld [vmem:[#allocation11 + $0x460] ss:$16 sps:$4 sm:$0xff]   ;;  %v12335_v22 = vld [vmem:[#allocation11 + $0x468] ss:$16 sps:$4 sm:$0xff]  }
 0x5ae   :  { %10079 = vmatprep.subr.bf16.mxu1 %v12265_v27  ;;  %v12340_v27 = vld [vmem:[#allocation11 + $0x484] ss:$16 sps:$4 sm:$0xff]  }
 0x5b0   :  { %9916 = vmatpush1.bf16.msra.mxu0 %v12260_v53  ;;  %v12343_v53 = vld [vmem:[#allocation11 + $0x48c] ss:$16 sps:$4 sm:$0xff]  }
 0x5b1   :  { %10080 = vmatpush1.bf16.msra.mxu1 %v12263_v49  ;;  %9917 = vmatprep.subr.bf16.mxu0 %v12268_v28  ;;  %v12338_v49 = vld [vmem:[#allocation11 + $0x480] ss:$16 sps:$4 sm:$0xff]   ;;  %v12341_v28 = vld [vmem:[#allocation11 + $0x488] ss:$16 sps:$4 sm:$0xff]  }
 0x5b2   :  { %10081 = vmatprep.subr.bf16.mxu1 %v12271_v62  ;;  %v12346_v62 = vld [vmem:[#allocation11 + $0x4a4] ss:$16 sps:$4 sm:$0xff]  }
 0x5b4   :  { %9918 = vmatpush1.bf16.msra.mxu0 %v12266_v8  ;;  %v12349_v8 = vld [vmem:[#allocation11 + $0x4ac] ss:$16 sps:$4 sm:$0xff]  }
 0x5b5   :  { %10082 = vmatpush1.bf16.msra.mxu1 %v12269_v57  ;;  %9919 = vmatprep.subr.bf16.mxu0 %v12274_v43  ;;  %v12344_v57 = vld [vmem:[#allocation11 + $0x4a0] ss:$16 sps:$4 sm:$0xff]   ;;  %v12347_v43 = vld [vmem:[#allocation11 + $0x4a8] ss:$16 sps:$4 sm:$0xff]  }
 0x5b6   :  { %10083 = vmatprep.subr.bf16.mxu1 %v12277_v30  ;;  %v12352_v30 = vld [vmem:[#allocation11 + $0x4c4] ss:$16 sps:$4 sm:$0xff]  }
 0x5b8   :  { %9920 = vmatpush1.bf16.msra.mxu0 %v12272_v58  ;;  %v12355_v58 = vld [vmem:[#allocation11 + $0x4cc] ss:$16 sps:$4 sm:$0xff]  }
 0x5b9   :  { %10084 = vmatpush1.bf16.msra.mxu1 %v12275_v59  ;;  %9921 = vmatprep.subr.bf16.mxu0 %v12280_v41  ;;  %v12350_v59 = vld [vmem:[#allocation11 + $0x4c0] ss:$16 sps:$4 sm:$0xff]   ;;  %v12353_v41 = vld [vmem:[#allocation11 + $0x4c8] ss:$16 sps:$4 sm:$0xff]  }
 0x5ba   :  { %10085 = vmatprep.subr.bf16.mxu1 %v12283_v31  ;;  %v12358_v31 = vld [vmem:[#allocation11 + $0x4e4] ss:$16 sps:$4 sm:$0xff]  }
 0x5bc   :  { %9922 = vmatpush1.bf16.msra.mxu0 %v12278_v24  ;;  %v12361_v24 = vld [vmem:[#allocation11 + $0x4ec] ss:$16 sps:$4 sm:$0xff]  }
 0x5bd   :  { %10086 = vmatpush1.bf16.msra.mxu1 %v12281_v52  ;;  %9923 = vmatprep.subr.bf16.mxu0 %v12286_v34  ;;  %v12356_v52 = vld [vmem:[#allocation11 + $0x4e0] ss:$16 sps:$4 sm:$0xff]   ;;  %v12359_v34 = vld [vmem:[#allocation11 + $0x4e8] ss:$16 sps:$4 sm:$0xff]  }
 0x5be   :  { %10087 = vmatprep.subr.bf16.mxu1 %v12289_v56  ;;  %v12364_v56 = vld [vmem:[#allocation11 + $0x504] ss:$16 sps:$4 sm:$0xff]  }
 0x5c0   :  { %9924 = vmatpush1.bf16.msra.mxu0 %v12284_v20  ;;  %v12362_v20 = vld [vmem:[#allocation11 + $0x500] ss:$16 sps:$4 sm:$0xff]  }
 0x5c1   :  { %10088 = vmatpush1.bf16.msra.mxu1 %v12287_v40  ;;  %9925 = vmatprep.subr.bf16.mxu0 %v12292_v42  ;;  %v12365_v40 = vld [vmem:[#allocation11 + $0x508] ss:$16 sps:$4 sm:$0xff]   ;;  %v12370_v42 = vld [vmem:[#allocation11 + $0x524] ss:$16 sps:$4 sm:$0xff]  }
 0x5c2   :  { %10089 = vmatprep.subr.bf16.mxu1 %v12295_v63  ;;  %v12373_v63 = vld [vmem:[#allocation11 + $0x52c] ss:$16 sps:$4 sm:$0xff]  }
 0x5c4   :  { %9926 = vmatpush1.bf16.msra.mxu0 %v12290_v1  ;;  %v12371_v1 = vld [vmem:[#allocation11 + $0x528] ss:$16 sps:$4 sm:$0xff]  }
 0x5c5   :  { %10090 = vmatpush1.bf16.msra.mxu1 %v12293_v48  ;;  %9927 = vmatprep.subr.bf16.mxu0 %v12298_v33  ;;  %v12376_v48 = vld [vmem:[#allocation11 + $0x544] ss:$16 sps:$4 sm:$0xff]   ;;  %v12379_v33 = vld [vmem:[#allocation11 + $0x54c] ss:$16 sps:$4 sm:$0xff]  }
 0x5c6   :  { %10091 = vmatprep.subr.bf16.mxu1 %v12301_v54  ;;  %v12374_v54 = vld [vmem:[#allocation11 + $0x540] ss:$16 sps:$4 sm:$0xff]  }
 0x5c8   :  { %9928 = vmatpush1.bf16.msra.mxu0 %v12296_v13  ;;  %v12377_v13 = vld [vmem:[#allocation11 + $0x548] ss:$16 sps:$4 sm:$0xff]  }
 0x5c9   :  { %10092 = vmatpush1.bf16.msra.mxu1 %v12299_v55  ;;  %9929 = vmatprep.subr.bf16.mxu0 %v12304_v60  ;;  %v12382_v55 = vld [vmem:[#allocation11 + $0x564] ss:$16 sps:$4 sm:$0xff]   ;;  %v12385_v60 = vld [vmem:[#allocation11 + $0x56c] ss:$16 sps:$4 sm:$0xff]  }
 0x5ca   :  { %10093 = vmatprep.subr.bf16.mxu1 %v12307_v23  ;;  %v12380_v23 = vld [vmem:[#allocation11 + $0x560] ss:$16 sps:$4 sm:$0xff]  }
 0x5cc   :  { %9930 = vmatpush1.bf16.msra.mxu0 %v12302_v2  ;;  %v12383_v2 = vld [vmem:[#allocation11 + $0x568] ss:$16 sps:$4 sm:$0xff]  }
 0x5cd   :  { %10094 = vmatpush1.bf16.msra.mxu1 %v12305_v15  ;;  %9931 = vmatprep.subr.bf16.mxu0 %v12310_v45  ;;  %v12388_v15 = vld [vmem:[#allocation11 + $0x584] ss:$16 sps:$4 sm:$0xff]   ;;  %v12391_v45 = vld [vmem:[#allocation11 + $0x58c] ss:$16 sps:$4 sm:$0xff]  }
 0x5ce   :  { %10095 = vmatprep.subr.bf16.mxu1 %v12313_v3  ;;  %v12386_v3 = vld [vmem:[#allocation11 + $0x580] ss:$16 sps:$4 sm:$0xff]  }
 0x5d0   :  { %9932 = vmatpush1.bf16.msra.mxu0 %v12308_v44  ;;  %v12389_v44 = vld [vmem:[#allocation11 + $0x588] ss:$16 sps:$4 sm:$0xff]  }
 0x5d1   :  { %10096 = vmatpush1.bf16.msra.mxu1 %v12311_v19  ;;  %9942 = vmatprep.subr.bf16.mxu0 %v12316_v4  ;;  %v12394_v19 = vld [vmem:[#allocation11 + $0x5a4] ss:$16 sps:$4 sm:$0xff]   ;;  %v12397_v4 = vld [vmem:[#allocation11 + $0x5ac] ss:$16 sps:$4 sm:$0xff]  }
 0x5d2   :  { %10106 = vmatprep.subr.bf16.mxu1 %v12319_v6  ;;  %v12395_v6 = vld [vmem:[#allocation11 + $0x5a8] ss:$16 sps:$4 sm:$0xff]  }
 0x5d3   :  { %9934 = vmatmul.mubr.bf16.vlgmr.msra.gmra.mrb[24].mxu0 %v8296_v12 }
 0x5d4   :  { %10098 = vmatmul.mubr.bf16.vlgmr.msra.gmra.mrb[24].mxu1 %v8296_v12  ;;  %9943 = vmatpush1.bf16.msra.mxu0 %v12314_v9  ;;  %v12400_v9 = vld [vmem:[#allocation11 + $0x5c4] ss:$16 sps:$4 sm:$0xff]   ;;  %v12403_v12 = vld [vmem:[#allocation11 + $0x5cc] ss:$16 sps:$4 sm:$0xff]  }
 0x5d5   :  { %10107 = vmatpush1.bf16.msra.mxu1 %v12317_v26  ;;  %9944 = vmatprep.subr.bf16.mxu0 %v12322_v51  ;;  %v12398_v26 = vld [vmem:[#allocation11 + $0x5c0] ss:$16 sps:$4 sm:$0xff]   ;;  %v12401_v51 = vld [vmem:[#allocation11 + $0x5c8] ss:$16 sps:$4 sm:$0xff]  }
 0x5d6   :  { %10108 = vmatprep.subr.bf16.mxu1 %v12325_v10  ;;  %v12406_v10 = vld [vmem:[#allocation11 + $0x5e4] ss:$16 sps:$4 sm:$0xff]  }
 0x5d8   :  { %9945 = vmatpush1.bf16.msra.mxu0 %v12320_v11  ;;  %v12409_v11 = vld [vmem:[#allocation11 + $0x5ec] ss:$16 sps:$4 sm:$0xff]  }
 0x5d9   :  { %10109 = vmatpush1.bf16.msra.mxu1 %v12323_v35  ;;  %9946 = vmatprep.subr.bf16.mxu0 %v12328_v18  ;;  %v12404_v35 = vld [vmem:[#allocation11 + $0x5e0] ss:$16 sps:$4 sm:$0xff]   ;;  %v12407_v18 = vld [vmem:[#allocation11 + $0x5e8] ss:$16 sps:$4 sm:$0xff]  }
 0x5da   :  { %10110 = vmatprep.subr.bf16.mxu1 %v12331_v7  ;;  %v12412_v7 = vld [vmem:[#allocation11 + $0x604] ss:$16 sps:$4 sm:$0xff]  }
 0x5dc   :  { %9947 = vmatpush1.bf16.msra.mxu0 %v12326_v25  ;;  %v12415_v25 = vld [vmem:[#allocation11 + $0x60c] ss:$16 sps:$4 sm:$0xff]  }
 0x5dd   :  { %10111 = vmatpush1.bf16.msra.mxu1 %v12329_v61  ;;  %9948 = vmatprep.subr.bf16.mxu0 %v12334_v38  ;;  %v1833_v61 = vrot.slane %v13238_v47, %v13076_v21  ;;  %v1837_v38 = vrot.slane %v13238_v47, %v13083_v36 }
 0x5de   :  { %10112 = vmatprep.subr.bf16.mxu1 %v12337_v32  ;;  %v1845_v32 = vrot.slane %v13238_v47, %v13116_v39  ;;  %v12410_v39 = vld [vmem:[#allocation11 + $0x600] ss:$16 sps:$4 sm:$0xff]   ;;  %v12413_v47 = vld [vmem:[#allocation11 + $0x608] ss:$16 sps:$4 sm:$0xff]  }
 0x5e0   :  { %9949 = vmatpush1.bf16.msra.mxu0 %v12332_v0 }
 0x5e1   :  { %10113 = vmatpush1.bf16.msra.mxu1 %v12335_v22  ;;  %9950 = vmatprep.subr.bf16.mxu0 %v12340_v27 }
 0x5e2   :  { %10114 = vmatprep.subr.bf16.mxu1 %v12343_v53 }
 0x5e4   :  { %9951 = vmatpush1.bf16.msra.mxu0 %v12338_v49 }
 0x5e5   :  { %10115 = vmatpush1.bf16.msra.mxu1 %v12341_v28  ;;  %9952 = vmatprep.subr.bf16.mxu0 %v12346_v62 }
 0x5e6   :  { %10116 = vmatprep.subr.bf16.mxu1 %v12349_v8 }
 0x5e8   :  { %9953 = vmatpush1.bf16.msra.mxu0 %v12344_v57 }
 0x5e9   :  { %10117 = vmatpush1.bf16.msra.mxu1 %v12347_v43  ;;  %9954 = vmatprep.subr.bf16.mxu0 %v12352_v30 }
 0x5ea   :  { %10118 = vmatprep.subr.bf16.mxu1 %v12355_v58 }
 0x5ec   :  { %9955 = vmatpush1.bf16.msra.mxu0 %v12350_v59 }
 0x5ed   :  { %10119 = vmatpush1.bf16.msra.mxu1 %v12353_v41  ;;  %9956 = vmatprep.subr.bf16.mxu0 %v12358_v31  ;;  %v12418_v31 = vld [vmem:[#allocation11 + $0x624] ss:$16 sps:$4 sm:$0xff]  }
 0x5ee   :  { %10120 = vmatprep.subr.bf16.mxu1 %v12361_v24  ;;  %v12421_v24 = vld [vmem:[#allocation11 + $0x62c] ss:$16 sps:$4 sm:$0xff]  }
 0x5f0   :  { %9957 = vmatpush1.bf16.msra.mxu0 %v12356_v52 }
 0x5f1   :  { %10121 = vmatpush1.bf16.msra.mxu1 %v12359_v34  ;;  %9958 = vmatprep.subr.bf16.mxu0 %v12364_v56  ;;  %v12416_v34 = vld [vmem:[#allocation11 + $0x620] ss:$16 sps:$4 sm:$0xff]   ;;  %v12419_v56 = vld [vmem:[#allocation11 + $0x628] ss:$16 sps:$4 sm:$0xff]  }
 0x5f2   :  { %10122 = vmatprep.subr.bf16.mxu1 %v12367_v50  ;;  %v12424_v50 = vld [vmem:[#allocation11 + $0x644] ss:$16 sps:$4 sm:$0xff]  }
 0x5f4   :  { %9959 = vmatpush1.bf16.msra.mxu0 %v12362_v20  ;;  %v12427_v20 = vld [vmem:[#allocation11 + $0x64c] ss:$16 sps:$4 sm:$0xff]  }
 0x5f5   :  { %10123 = vmatpush1.bf16.msra.mxu1 %v12365_v40  ;;  %9960 = vmatprep.subr.bf16.mxu0 %v12370_v42  ;;  %v12422_v40 = vld [vmem:[#allocation11 + $0x640] ss:$16 sps:$4 sm:$0xff]   ;;  %v12425_v42 = vld [vmem:[#allocation11 + $0x648] ss:$16 sps:$4 sm:$0xff]  }
 0x5f6   :  { %10124 = vmatprep.subr.bf16.mxu1 %v12373_v63  ;;  %v12430_v63 = vld [vmem:[#allocation11 + $0x664] ss:$16 sps:$4 sm:$0xff]  }
 0x5f8   :  { %9961 = vmatpush1.bf16.msra.mxu0 %v12368_v46  ;;  %v12433_v46 = vld [vmem:[#allocation11 + $0x66c] ss:$16 sps:$4 sm:$0xff]  }
 0x5f9   :  { %10125 = vmatpush1.bf16.msra.mxu1 %v12371_v1  ;;  %9962 = vmatprep.subr.bf16.mxu0 %v12376_v48  ;;  %v12428_v1 = vld [vmem:[#allocation11 + $0x660] ss:$16 sps:$4 sm:$0xff]   ;;  %v12431_v48 = vld [vmem:[#allocation11 + $0x668] ss:$16 sps:$4 sm:$0xff]  }
 0x5fa   :  { %10126 = vmatprep.subr.bf16.mxu1 %v12379_v33  ;;  %v12436_v33 = vld [vmem:[#allocation11 + $0x684] ss:$16 sps:$4 sm:$0xff]  }
 0x5fc   :  { %9963 = vmatpush1.bf16.msra.mxu0 %v12374_v54  ;;  %v12439_v54 = vld [vmem:[#allocation11 + $0x68c] ss:$16 sps:$4 sm:$0xff]  }
 0x5fd   :  { %10127 = vmatpush1.bf16.msra.mxu1 %v12377_v13  ;;  %9964 = vmatprep.subr.bf16.mxu0 %v12382_v55  ;;  %v12434_v13 = vld [vmem:[#allocation11 + $0x680] ss:$16 sps:$4 sm:$0xff]   ;;  %v12437_v55 = vld [vmem:[#allocation11 + $0x688] ss:$16 sps:$4 sm:$0xff]  }
 0x5fe   :  { %10128 = vmatprep.subr.bf16.mxu1 %v12385_v60  ;;  %v12442_v60 = vld [vmem:[#allocation11 + $0x6a4] ss:$16 sps:$4 sm:$0xff]  }
 0x600   :  { %9965 = vmatpush1.bf16.msra.mxu0 %v12380_v23  ;;  %v12445_v23 = vld [vmem:[#allocation11 + $0x6ac] ss:$16 sps:$4 sm:$0xff]  }
 0x601   :  { %10129 = vmatpush1.bf16.msra.mxu1 %v12383_v2  ;;  %9966 = vmatprep.subr.bf16.mxu0 %v12388_v15  ;;  %v12440_v2 = vld [vmem:[#allocation11 + $0x6a0] ss:$16 sps:$4 sm:$0xff]   ;;  %v12443_v15 = vld [vmem:[#allocation11 + $0x6a8] ss:$16 sps:$4 sm:$0xff]  }
 0x602   :  { %10130 = vmatprep.subr.bf16.mxu1 %v12391_v45  ;;  %v12448_v45 = vld [vmem:[#allocation11 + $0x6c4] ss:$16 sps:$4 sm:$0xff]  }
 0x604   :  { %9967 = vmatpush1.bf16.msra.mxu0 %v12386_v3  ;;  %v12451_v3 = vld [vmem:[#allocation11 + $0x6cc] ss:$16 sps:$4 sm:$0xff]  }
 0x605   :  { %10131 = vmatpush1.bf16.msra.mxu1 %v12389_v44  ;;  %9968 = vmatprep.subr.bf16.mxu0 %v12394_v19  ;;  %v12446_v44 = vld [vmem:[#allocation11 + $0x6c0] ss:$16 sps:$4 sm:$0xff]   ;;  %v12449_v19 = vld [vmem:[#allocation11 + $0x6c8] ss:$16 sps:$4 sm:$0xff]  }
 0x606   :  { %10132 = vmatprep.subr.bf16.mxu1 %v12397_v4  ;;  %v12454_v4 = vld [vmem:[#allocation11 + $0x6e4] ss:$16 sps:$4 sm:$0xff]  }
 0x608   :  { %9969 = vmatpush1.bf16.msra.mxu0 %v12392_v5  ;;  %v12457_v5 = vld [vmem:[#allocation11 + $0x6ec] ss:$16 sps:$4 sm:$0xff]  }
 0x609   :  { %10133 = vmatpush1.bf16.msra.mxu1 %v12395_v6  ;;  %9970 = vmatprep.subr.bf16.mxu0 %v12400_v9  ;;  %v12452_v6 = vld [vmem:[#allocation11 + $0x6e0] ss:$16 sps:$4 sm:$0xff]   ;;  %v12455_v9 = vld [vmem:[#allocation11 + $0x6e8] ss:$16 sps:$4 sm:$0xff]  }
 0x60a   :  { %10134 = vmatprep.subr.bf16.mxu1 %v12403_v12  ;;  %v12460_v12 = vld [vmem:[#allocation11 + $0x704] ss:$16 sps:$4 sm:$0xff]  }
 0x60c   :  { %9971 = vmatpush1.bf16.msra.mxu0 %v12398_v26  ;;  %v12463_v26 = vld [vmem:[#allocation11 + $0x70c] ss:$16 sps:$4 sm:$0xff]  }
 0x60d   :  { %10135 = vmatpush1.bf16.msra.mxu1 %v12401_v51  ;;  %9972 = vmatprep.subr.bf16.mxu0 %v12406_v10  ;;  %v12458_v51 = vld [vmem:[#allocation11 + $0x700] ss:$16 sps:$4 sm:$0xff]   ;;  %v12461_v10 = vld [vmem:[#allocation11 + $0x708] ss:$16 sps:$4 sm:$0xff]  }
 0x60e   :  { %10136 = vmatprep.subr.bf16.mxu1 %v12409_v11  ;;  %v12466_v11 = vld [vmem:[#allocation11 + $0x724] ss:$16 sps:$4 sm:$0xff]  }
 0x610   :  { %9973 = vmatpush1.bf16.msra.mxu0 %v12404_v35  ;;  %v12469_v35 = vld [vmem:[#allocation11 + $0x72c] ss:$16 sps:$4 sm:$0xff]  }
 0x611   :  { %10137 = vmatpush1.bf16.msra.mxu1 %v12407_v18  ;;  %9983 = vmatprep.subr.bf16.mxu0 %v12412_v7  ;;  %v12464_v18 = vld [vmem:[#allocation11 + $0x720] ss:$16 sps:$4 sm:$0xff]   ;;  %v12467_v7 = vld [vmem:[#allocation11 + $0x728] ss:$16 sps:$4 sm:$0xff]  }
 0x612   :  { %10147 = vmatprep.subr.bf16.mxu1 %v12415_v25  ;;  %v12472_v25 = vld [vmem:[#allocation11 + $0x744] ss:$16 sps:$4 sm:$0xff]  }
 0x626   :  { %v7951_v0 = vpop.f32.mrb[20].mxu0 }
 0x627   :  { %v11960_v22 = vadd.f32 %v7951_v0, %v1833_v61  ;;  %v13260_v27 = vpop.f32.mrb[20].mxu1  ;;  %v7953_v53 = vpop.f32.mrb[21].mxu0  ;;  %v12475_v61 = vld [vmem:[#allocation11 + $0x74c] ss:$16 sps:$4 sm:$0xff]   ;;  %v12478_v0 = vld [vmem:[#allocation11 + $0x764] ss:$16 sps:$4 sm:$0xff]  }
 0x628   :  { %v11961_v49 = vadd.f32 %v7953_v53, %v1837_v38  ;;  %v8281_v28 = vpop.f32.mrb[21].mxu1  ;;  %v7955_v62 = vpop.f32.mrb[22].mxu0  ;;  %v12470_v38 = vld [vmem:[#allocation11 + $0x740] ss:$16 sps:$4 sm:$0xff]   ;;  %v12596_v53 = vld [vmem:[#allocation10] sm:$0xff] }
 0x629   :  { %v11963_v8 = vadd.f32 %v8281_v28, %v1845_v32  ;;  %v8283_v57 = vpop.f32.mrb[22].mxu1  ;;  %v7956_v43 = vpop.f32.mrb[23].mxu0  ;;  %12578 = vtanh.f32 %v11960_v22  ;;  %v12473_v32 = vld [vmem:[#allocation11 + $0x748] ss:$16 sps:$4 sm:$0xff]   ;;  %v12481_v22 = vld [vmem:[#allocation11 + $0x76c] ss:$16 sps:$4 sm:$0xff]  }
 0x62a   :  { %v8284_v30 = vpop.f32.mrb[23].mxu1  ;;  %12580 = vtanh.f32 %v11961_v49  ;;  %v1841_v49 = vrot.slane %v12596_v53, %v13113_v37  ;;  %v12476_v28 = vld [vmem:[#allocation11 + $0x760] ss:$16 sps:$4 sm:$0xff]   ;;  %v12479_v62 = vld [vmem:[#allocation11 + $0x768] ss:$16 sps:$4 sm:$0xff]  }
 0x62b   :  { %12582 = vtanh.f32 %v11963_v8  ;;  %v12484_v8 = vld [vmem:[#allocation11 + $0x784] ss:$16 sps:$4 sm:$0xff]   ;;  %v12487_v57 = vld [vmem:[#allocation11 + $0x78c] ss:$16 sps:$4 sm:$0xff]   ;;  %v12482_v30 = vld [vmem:[#allocation11 + $0x780] ss:$16 sps:$4 sm:$0xff]  }
 0x62c   :  { %v11962_v43 = vadd.f32 %v13260_v27, %v1841_v49  ;;  %v12488_v37 = vld [vmem:[#allocation11 + $0x7a0] ss:$16 sps:$4 sm:$0xff]  }
 0x62d   :  { %v12494_v27 = vld [vmem:[#allocation11 + $0x7c0] ss:$16 sps:$4 sm:$0xff]  }
 0x62e   :  { %12584 = vtanh.f32 %v11962_v43 }
 0x633   :  { %v12579_v21 = vpop.eup %12578 }
 0x634   :  { %v12581_v36 = vpop.eup %12580  ;;  %v8298_v41 = vpack.c.bf16 %v12579_v21, %v12579_v21  ;;  %v12485_v21 = vld [vmem:[#allocation11 + $0x788] ss:$16 sps:$4 sm:$0xff]  }
 0x635   :  { %v12583_v58 = vpop.eup %12582  ;;  %v8299_v59 = vpack.c.bf16 %v12581_v36, %v12581_v36  ;;  %v12490_v36 = vld [vmem:[#allocation11 + $0x7a4] ss:$16 sps:$4 sm:$0xff]  }
 0x636   :  { %v8301_v52 = vpack.c.bf16 %v12583_v58, %v12583_v58  ;;  %v12493_v58 = vld [vmem:[#allocation11 + $0x7ac] ss:$16 sps:$4 sm:$0xff]  }
 0x637   :  { %9974 = vmatprep.mubr.bf16.mxu0 %v8299_v59  ;;  %10138 = vmatprep.mubr.bf16.mxu1 %v8299_v59  ;;  %v12491_v59 = vld [vmem:[#allocation11 + $0x7a8] ss:$16 sps:$4 sm:$0xff]  }
 0x638   :  { %9975 = vmatmul.mubr.bf16.vlgmr.msra.gmra.mrb[24].mxu0 %v8298_v41  ;;  %10139 = vmatmul.mubr.bf16.vlgmr.msra.gmra.mrb[24].mxu1 %v8298_v41  ;;  %v12497_v41 = vld [vmem:[#allocation11 + $0x7c8] ss:$16 sps:$4 sm:$0xff]  }
 0x639   :  { %9984 = vmatpush1.bf16.msra.mxu0 %v12410_v39  ;;  %10148 = vmatpush1.bf16.msra.mxu1 %v12413_v47  ;;  %v12496_v39 = vld [vmem:[#allocation11 + $0x7c4] ss:$16 sps:$4 sm:$0xff]   ;;  %v12499_v47 = vld [vmem:[#allocation11 + $0x7cc] ss:$16 sps:$4 sm:$0xff]  }
 0x63a   :  { %10015 = vmatprep.mubr.bf16.mxu0 %v8301_v52  ;;  %10179 = vmatprep.mubr.bf16.mxu1 %v8301_v52  ;;  %v12500_v52 = vld [vmem:[#allocation11 + $0x7e0] ss:$16 sps:$4 sm:$0xff]  }
 0x63b   :  { %9985 = vmatprep.subr.bf16.mxu0 %v12418_v31  ;;  %10149 = vmatprep.subr.bf16.mxu1 %v12421_v24  ;;  %v12502_v31 = vld [vmem:[#allocation11 + $0x7e4] ss:$16 sps:$4 sm:$0xff]   ;;  %v12505_v24 = vld [vmem:[#allocation11 + $0x7ec] ss:$16 sps:$4 sm:$0xff]  }
 0x63d   :  { %9986 = vmatpush1.bf16.msra.mxu0 %v12416_v34  ;;  %10150 = vmatpush1.bf16.msra.mxu1 %v12419_v56  ;;  %v12503_v34 = vld [vmem:[#allocation11 + $0x7e8] ss:$16 sps:$4 sm:$0xff]  }
 0x63e   :  { %9987 = vmatprep.subr.bf16.mxu0 %v12424_v50  ;;  %10151 = vmatprep.subr.bf16.mxu1 %v12427_v20  ;;  %v12506_v56 = vld [vmem:[#allocation14 + $0x40] sm:$0xff]   ;;  %v12585_v20 = vpop.eup %12584 }
 0x63f   :  { %v12507_v50 = vld [vmem:[#allocation14 + $0xc0] sm:$0xff]  }
 0x641   :  { %9988 = vmatpush1.bf16.msra.mxu0 %v12422_v40  ;;  %10152 = vmatpush1.bf16.msra.mxu1 %v12425_v42  ;;  %v12508_v40 = vld [vmem:[#allocation14] sm:$0xff]  }
 0x642   :  { %9989 = vmatprep.subr.bf16.mxu0 %v12430_v63  ;;  %10153 = vmatprep.subr.bf16.mxu1 %v12433_v46  ;;  %v12509_v42 = vld [vmem:[#allocation14 + $0x80] sm:$0xff]   ;;  %v8300_v63 = vpack.c.bf16 %v12585_v20, %v12585_v20  ;;  %v12510_v46 = vld [vmem:[#allocation14 + $0x48] sm:$0xff]  }
 0x645   :  { %9990 = vmatpush1.bf16.msra.mxu0 %v12428_v1  ;;  %10154 = vmatpush1.bf16.msra.mxu1 %v12431_v48  ;;  %v12511_v1 = vld [vmem:[#allocation14 + $0xc8] sm:$0xff]  }
 0x646   :  { %9991 = vmatprep.subr.bf16.mxu0 %v12436_v33  ;;  %10155 = vmatprep.subr.bf16.mxu1 %v12439_v54  ;;  %v12512_v48 = vld [vmem:[#allocation14 + $0x8] sm:$0xff]   ;;  %v12514_v54 = vld [vmem:[#allocation14 + $0x50] sm:$0xff]  }
 0x647   :  { %v12513_v33 = vld [vmem:[#allocation14 + $0x88] sm:$0xff]  }
 0x649   :  { %9992 = vmatpush1.bf16.msra.mxu0 %v12434_v13  ;;  %10156 = vmatpush1.bf16.msra.mxu1 %v12437_v55  ;;  %v12515_v13 = vld [vmem:[#allocation14 + $0xd0] sm:$0xff]  }
 0x64a   :  { %9993 = vmatprep.subr.bf16.mxu0 %v12442_v60  ;;  %10157 = vmatprep.subr.bf16.mxu1 %v12445_v23  ;;  %v12516_v55 = vld [vmem:[#allocation14 + $0x10] sm:$0xff]   ;;  %v12518_v23 = vld [vmem:[#allocation14 + $0x58] sm:$0xff]  }
 0x64b   :  { %v12517_v60 = vld [vmem:[#allocation14 + $0x90] sm:$0xff]  }
 0x64d   :  { %9994 = vmatpush1.bf16.msra.mxu0 %v12440_v2  ;;  %10158 = vmatpush1.bf16.msra.mxu1 %v12443_v15  ;;  %v12519_v2 = vld [vmem:[#allocation14 + $0xd8] sm:$0xff]  }
 0x64e   :  { %9995 = vmatprep.subr.bf16.mxu0 %v12448_v45  ;;  %10159 = vmatprep.subr.bf16.mxu1 %v12451_v3  ;;  %v12520_v15 = vld [vmem:[#allocation14 + $0x18] sm:$0xff]   ;;  %v12522_v3 = vld [vmem:[#allocation14 + $0x60] sm:$0xff]  }
 0x64f   :  { %v12521_v45 = vld [vmem:[#allocation14 + $0x98] sm:$0xff]  }
 0x651   :  { %9996 = vmatpush1.bf16.msra.mxu0 %v12446_v44  ;;  %10160 = vmatpush1.bf16.msra.mxu1 %v12449_v19  ;;  %v12523_v44 = vld [vmem:[#allocation14 + $0xe0] sm:$0xff]  }
 0x652   :  { %9997 = vmatprep.subr.bf16.mxu0 %v12454_v4  ;;  %10161 = vmatprep.subr.bf16.mxu1 %v12457_v5  ;;  %v12524_v19 = vld [vmem:[#allocation14 + $0x20] sm:$0xff]   ;;  %v12526_v5 = vld [vmem:[#allocation14 + $0x68] sm:$0xff]  }
 0x653   :  { %v12525_v4 = vld [vmem:[#allocation14 + $0xa0] sm:$0xff]  }
 0x655   :  { %9998 = vmatpush1.bf16.msra.mxu0 %v12452_v6  ;;  %10162 = vmatpush1.bf16.msra.mxu1 %v12455_v9  ;;  %v12527_v6 = vld [vmem:[#allocation14 + $0xe8] sm:$0xff]  }
 0x656   :  { %9999 = vmatprep.subr.bf16.mxu0 %v12460_v12  ;;  %10163 = vmatprep.subr.bf16.mxu1 %v12463_v26  ;;  %v12528_v9 = vld [vmem:[#allocation14 + $0x28] sm:$0xff]   ;;  %v12530_v26 = vld [vmem:[#allocation14 + $0x70] sm:$0xff]  }
 0x657   :  { %v12529_v12 = vld [vmem:[#allocation14 + $0xa8] sm:$0xff]  }
 0x659   :  { %10000 = vmatpush1.bf16.msra.mxu0 %v12458_v51  ;;  %10164 = vmatpush1.bf16.msra.mxu1 %v12461_v10  ;;  %v12531_v51 = vld [vmem:[#allocation14 + $0xf0] sm:$0xff]  }
 0x65a   :  { %10001 = vmatprep.subr.bf16.mxu0 %v12466_v11  ;;  %10165 = vmatprep.subr.bf16.mxu1 %v12469_v35  ;;  %v12532_v10 = vld [vmem:[#allocation14 + $0x30] sm:$0xff]   ;;  %v12534_v35 = vld [vmem:[#allocation14 + $0x78] sm:$0xff]  }
 0x65b   :  { %v12533_v11 = vld [vmem:[#allocation14 + $0xb0] sm:$0xff]  }
 0x65d   :  { %10002 = vmatpush1.bf16.msra.mxu0 %v12464_v18  ;;  %10166 = vmatpush1.bf16.msra.mxu1 %v12467_v7  ;;  %v12535_v18 = vld [vmem:[#allocation14 + $0xf8] sm:$0xff]  }
 0x65e   :  { %10003 = vmatprep.subr.bf16.mxu0 %v12472_v25  ;;  %10167 = vmatprep.subr.bf16.mxu1 %v12475_v61  ;;  %v12536_v7 = vld [vmem:[#allocation14 + $0x38] sm:$0xff]  }
 0x65f   :  { %v12537_v25 = vld [vmem:[#allocation14 + $0xb8] sm:$0xff]  }
 0x660   :  { %v8558_v61 = vld [vmem:[#allocation13] sm:$0xf] }
 0x661   :  { %10004 = vmatpush1.bf16.msra.mxu0 %v12470_v38  ;;  %10168 = vmatpush1.bf16.msra.mxu1 %v12473_v32  ;;  %v8563_v38 = vrot.slane %v8558_v61, %v13037_v14  ;;  %v8571_v32 = vrot.slane %v8558_v61, %v13092_v29 }
 0x662   :  { %10005 = vmatprep.subr.bf16.mxu0 %v12478_v0  ;;  %10169 = vmatprep.subr.bf16.mxu1 %v12481_v22  ;;  %v8567_v0 = vrot.slane %v8558_v61, %v13042_v16  ;;  %v8575_v22 = vrot.slane %v8558_v61, %v13045_v17 }
 0x665   :  { %10006 = vmatpush1.bf16.msra.mxu0 %v12476_v28  ;;  %10170 = vmatpush1.bf16.msra.mxu1 %v12479_v62 }
 0x666   :  { %10007 = vmatprep.subr.bf16.mxu0 %v12484_v8  ;;  %10171 = vmatprep.subr.bf16.mxu1 %v12487_v57 }
 0x669   :  { %10008 = vmatpush1.bf16.msra.mxu0 %v12482_v30  ;;  %10172 = vmatpush1.bf16.msra.mxu1 %v12485_v21 }
 0x66a   :  { %10009 = vmatprep.subr.bf16.mxu0 %v12490_v36  ;;  %10173 = vmatprep.subr.bf16.mxu1 %v12493_v58 }
 0x66d   :  { %10010 = vmatpush1.bf16.msra.mxu0 %v12488_v37  ;;  %10174 = vmatpush1.bf16.msra.mxu1 %v12491_v59 }
 0x66e   :  { %10011 = vmatprep.subr.bf16.mxu0 %v12496_v39  ;;  %10175 = vmatprep.subr.bf16.mxu1 %v12499_v47 }
 0x671   :  { %10012 = vmatpush1.bf16.msra.mxu0 %v12494_v27  ;;  %10176 = vmatpush1.bf16.msra.mxu1 %v12497_v41 }
 0x672   :  { %10013 = vmatprep.subr.bf16.mxu0 %v12502_v31  ;;  %10177 = vmatprep.subr.bf16.mxu1 %v12505_v24  ;;  %v11879_v24 = vld [vmem:[#allocation16] ss:$0 sm:$0xff] }
 0x675   :  { %10014 = vmatpush1.bf16.msra.mxu0 %v12500_v52  ;;  %10178 = vmatpush1.bf16.msra.mxu1 %v12503_v34 }
 0x676   :  { %11912 = vmatprep.subr.bf16.mxu0 %v12506_v56  ;;  %11934 = vmatprep.subr.bf16.mxu1 %v12507_v50 }
 0x678   :  { %10016 = vmatmul.mubr.bf16.vlgmr.msra.gmra.mrb[24].mxu0 %v8300_v63  ;;  %10180 = vmatmul.mubr.bf16.vlgmr.msra.gmra.mrb[24].mxu1 %v8300_v63 }
 0x679   :  { %11913 = vmatpush3.bf16.msra.mxu0 %v12508_v40  ;;  %11935 = vmatpush3.bf16.msra.mxu1 %v12509_v42 }
 0x67a   :  { %11914 = vmatprep.subr.bf16.mxu0 %v12510_v46  ;;  %11936 = vmatprep.subr.bf16.mxu1 %v12511_v1 }
 0x67d   :  { %11915 = vmatpush3.bf16.msra.mxu0 %v12512_v48  ;;  %11937 = vmatpush3.bf16.msra.mxu1 %v12513_v33 }
 0x67e   :  { %11916 = vmatprep.subr.bf16.mxu0 %v12514_v54  ;;  %11938 = vmatprep.subr.bf16.mxu1 %v12515_v13 }
 0x681   :  { %11917 = vmatpush3.bf16.msra.mxu0 %v12516_v55  ;;  %11939 = vmatpush3.bf16.msra.mxu1 %v12517_v60 }
 0x682   :  { %11918 = vmatprep.subr.bf16.mxu0 %v12518_v23  ;;  %11940 = vmatprep.subr.bf16.mxu1 %v12519_v2 }
 0x685   :  { %11919 = vmatpush3.bf16.msra.mxu0 %v12520_v15  ;;  %11941 = vmatpush3.bf16.msra.mxu1 %v12521_v45 }
 0x686   :  { %11920 = vmatprep.subr.bf16.mxu0 %v12522_v3  ;;  %11942 = vmatprep.subr.bf16.mxu1 %v12523_v44 }
 0x689   :  { %11921 = vmatpush3.bf16.msra.mxu0 %v12524_v19  ;;  %11943 = vmatpush3.bf16.msra.mxu1 %v12525_v4 }
 0x68a   :  { %11922 = vmatprep.subr.bf16.mxu0 %v12526_v5  ;;  %11944 = vmatprep.subr.bf16.mxu1 %v12527_v6 }
 0x68d   :  { %11923 = vmatpush3.bf16.msra.mxu0 %v12528_v9  ;;  %11945 = vmatpush3.bf16.msra.mxu1 %v12529_v12 }
 0x68e   :  { %11924 = vmatprep.subr.bf16.mxu0 %v12530_v26  ;;  %11946 = vmatprep.subr.bf16.mxu1 %v12531_v51 }
 0x691   :  { %11925 = vmatpush3.bf16.msra.mxu0 %v12532_v10  ;;  %11947 = vmatpush3.bf16.msra.mxu1 %v12533_v11 }
 0x692   :  { %11926 = vmatprep.subr.bf16.mxu0 %v12534_v35  ;;  %11948 = vmatprep.subr.bf16.mxu1 %v12535_v18 }
 0x695   :  { %11927 = vmatpush3.bf16.msra.mxu0 %v12536_v7  ;;  %11949 = vmatpush3.bf16.msra.mxu1 %v12537_v25 }
 0x74b   :  { %v10017_v53 = vpop.f32.mrb[24].mxu0  ;;  %v10181_v49 = vpop.f32.mrb[24].mxu1 }
 0x74c   :  { %v11964_v28 = vadd.f32 %v10017_v53, %v8563_v38  ;;  %v11966_v62 = vadd.f32 %v10181_v49, %v8571_v32  ;;  %v10019_v8 = vpop.f32.mrb[25].mxu0  ;;  %v10183_v57 = vpop.f32.mrb[25].mxu1 }
 0x74d   :  { %v11965_v43 = vadd.f32 %v10019_v8, %v8567_v0  ;;  %v11967_v30 = vadd.f32 %v10183_v57, %v8575_v22  ;;  %v10021_v21 = vpop.f32.mrb[26].mxu0  ;;  %v10185_v36 = vpop.f32.mrb[26].mxu1 }
 0x74e   :  { %12586 = vtanh.f32 %v11964_v28  ;;  %v10022_v58 = vpop.f32.mrb[27].mxu0  ;;  %v10186_v37 = vpop.f32.mrb[27].mxu1 }
 0x74f   :  { %12588 = vtanh.f32 %v11966_v62 }
 0x750   :  { %12590 = vtanh.f32 %v11965_v43 }
 0x751   :  { %12592 = vtanh.f32 %v11967_v30 }
 0x758   :  { %v12587_v14 = vpop.eup %12586 }
 0x759   :  { %v12589_v16 = vpop.eup %12588  ;;  %v10192_v39 = vpack.c.bf16 %v12587_v14, %v12587_v14 }
 0x75a   :  { %v12591_v29 = vpop.eup %12590  ;;  %v10194_v27 = vpack.c.bf16 %v12589_v16, %v12589_v16 }
 0x75b   :  { %v12593_v17 = vpop.eup %12592  ;;  %v10193_v59 = vpack.c.bf16 %v12591_v29, %v12591_v29 }
 0x75c   :  { %v10195_v47 = vpack.c.bf16 %v12593_v17, %v12593_v17 }
 0x75d   :  { %10491 = vmatprep.mubr.bf16.mxu0 %v10193_v59 }
 0x75e   :  { %10531 = vmatprep.mubr.bf16.mxu1 %v10195_v47  ;;  %10492 = vmatmul.mubr.bf16.vlgmr.msra.gmra.mrb[28].mxu0 %v10192_v39 }
 0x75f   :  { %10532 = vmatmul.mubr.bf16.vlgmr.msra.gmra.mrb[28].mxu1 %v10194_v27 }
 0x831   :  { %v11928_v41 = vpop.f32.mrb[28].mxu0 }
 0x832   :  { %v11950_v31 = vpop.f32.mrb[28].mxu1  ;;  %v11929_v52 = vpop.f32.mrb[29].mxu0 }
 0x833   :  { %v11930_v34 = vadd.f32 %v11929_v52, %v11928_v41  ;;  %v11951_v56 = vpop.f32.mrb[29].mxu1  ;;  %v11931_v50 = vpop.f32.mrb[30].mxu0 }
 0x834   :  { %v11952_v20 = vadd.f32 %v11951_v56, %v11950_v31  ;;  %v11953_v40 = vpop.f32.mrb[30].mxu1  ;;  %v11932_v42 = vpop.f32.mrb[31].mxu0 }
 0x835   :  { %v10494_v63 = vadd.f32 %v11930_v34, %v11879_v24  ;;  %v11954_v46 = vpop.f32.mrb[31].mxu1 }
 0x837   :  { %v10534_v1 = vadd.f32 %v11952_v20, %v10494_v63 }
 0x839   :  { %10539 = vst [vmem:[#allocation17] sm:$0xff] %v10534_v1 }
 0x83a   :  { %12806 = shalt.err (!%p12803_p6)
}
 0x83b   :  { %s12807_s23 = scalar_lea.hbm %s13289_s9, 128 }
 0x83c   :  { %p12808_p7 = scmp.ne.s32.totalorder %s13289_s9, %s12807_s23  ;;  %p12811_p8 = scmp.lt.u32.totalorder %s12807_s23, %s13289_s9 }
 0x83e   :  { %p12813_p9 = pnand %p12811_p8, %p12808_p7 }
 0x840   :  { %12816 = shalt.err (!%p12813_p9)
}
 0x841   :  { %10549 = dma.vmem_to_hbm [thread:$0]  %s10547_s24, 128, %s13289_s9, [#allocation4]  }
 0x842   :  { %12827 = dma.done.wait [#allocation4], 128  }
 0x843   :  { %12828 = vsyncadd [#allocation4], 4294967168 }
 0x844   :  { %10553 = vsyncpa [#allocation3], 1 }
 0x845   :  { %10554 = vsyncpa [#allocation6], 1 }
 0x846   :  { %10555 = vsyncpa [#allocation9], 1 }
 0x847   :  { %10556 = vsyncpa [#allocation12], 1 }
 0x848   :  { %10557 = vsyncpa [#allocation15], 1 }
 0x849   :  { %10558 = vsyncpa [#allocation4], 1 }

</bundles_post_ra>
